<compile_context>
chip_gen: v5e
topology: v5e:2x2
jax: 0.10.0
libtpu: 0.0.40
codegen_flags: <defaults>
</compile_context>

<pallas_src>
from functools import partial

import jax
import jax.numpy as jnp
from jax.experimental import pallas as pl
from jax.experimental.pallas import tpu as pltpu


def _eitp_patch_embed_kernel(x_ref, w_ref, b_ref, o_ref, xp_ref, *,
                             H, W, Cin, Cout, P):
    # x_ref : (H, W, Cin)        one batch element, NHWC
    # w_ref : (9*Cin, Cout)      conv weight rows ordered (dh, dw, cin)
    # b_ref : (1, Cout)          conv bias
    # o_ref : (Hout*Wout, Cout)  pooled + flattened output (lane-dense)
    # xp_ref: (H+2, W+2, Cin)    VMEM scratch: zero-padded input
    Hout, Wout = H // P, W // P

    # ---- in-kernel zero padding of the 3x3 halo (no HBM round trip) ----
    xp_ref[...] = jnp.zeros(xp_ref.shape, xp_ref.dtype)
    xp_ref[1:H + 1, 1:W + 1, :] = x_ref[...].astype(xp_ref.dtype)

    # ---- weights hoisted: loaded into vregs once ----
    wv = w_ref[...].astype(jnp.float32)                      # (9*Cin, Cout)

    # ---- 3x3 conv as 9 shifted windows x Cin broadcast-FMAs (VPU) ----
    acc = jnp.zeros((H, W, Cout), jnp.float32)
    for dh in range(3):
        for dw in range(3):
            win = xp_ref[dh:dh + H, dw:dw + W, :].astype(jnp.float32)  # (H, W, Cin)
            for c in range(Cin):
                tap = wv[(dh * 3 + dw) * Cin + c, :]                    # (Cout,)
                acc = acc + win[:, :, c:c + 1] * tap                    # (H, W, Cout)

    # ---- PxP max pool fused with the '(H W) C' flatten ----
    pooled = jnp.max(jnp.max(acc.reshape(Hout, P, Wout, P, Cout), axis=3), axis=1)
    # bias commutes with max-pool: add it to the much smaller pooled tensor
    pooled = pooled + b_ref[...].astype(jnp.float32).reshape(1, 1, Cout)
    o_ref[...] = pooled.reshape(Hout * Wout, Cout).astype(o_ref.dtype)


def patch_embed_forward(x_nchw, conv_weight, conv_bias, pool_size=4):
    """
    x_nchw      : (B, Cin, H, W)     float32 image batch (PyTorch layout)
    conv_weight : (Cout, Cin, 3, 3)  PyTorch Conv2d weight
    conv_bias   : (Cout,)            PyTorch Conv2d bias
    returns     : (B, (H//pool)*(W//pool), Cout)  == PatchEmbed.forward output
    """
    B, Cin, H, W = x_nchw.shape
    Cout = conv_weight.shape[0]
    P = pool_size
    Hout, Wout = H // P, W // P

    # Layout glue only: NCHW -> NHWC so embed_dim sits on the 128-lane axis.
    x_nhwc = jnp.transpose(x_nchw, (0, 2, 3, 1))                   # (B, H, W, Cin)
    # (Cout, Cin, 3, 3) -> (3, 3, Cin, Cout) -> (9*Cin, Cout), rows = (dh, dw, cin)
    w_flat = jnp.transpose(conv_weight, (2, 3, 1, 0)).reshape(9 * Cin, Cout)
    b_2d = conv_bias.reshape(1, Cout)

    kernel = partial(_eitp_patch_embed_kernel, H=H, W=W, Cin=Cin, Cout=Cout, P=P)
    out = pl.pallas_call(
        kernel,
        out_shape=jax.ShapeDtypeStruct((B, Hout * Wout, Cout), x_nchw.dtype),
        grid_spec=pltpu.PrefetchScalarGridSpec(
            num_scalar_prefetch=0,
            grid=(B,),
            in_specs=[
                # one full image per grid step; batch dim squeezed out
                pl.BlockSpec((None, H, W, Cin), lambda b: (b, 0, 0, 0)),
                # weights / bias resident across the whole grid
                pl.BlockSpec((9 * Cin, Cout), lambda b: (0, 0)),
                pl.BlockSpec((1, Cout), lambda b: (0, 0)),
            ],
            out_specs=pl.BlockSpec((None, Hout * Wout, Cout), lambda b: (b, 0, 0)),
            scratch_shapes=[pltpu.VMEM((H + 2, W + 2, Cin), jnp.float32)],
        ),
        compiler_params=pltpu.CompilerParams(
            # v7x: the two TensorCores split the batch; on v5e/v6e this is a no-op.
            dimension_semantics=("parallel",)),
        # TODO(synk): at real ViT scale (224x224, embed_dim=768) set
        # vmem_limit_bytes explicitly and tile along H.
    )(x_nhwc, w_flat, b_2d)
    return out


if __name__ == "__main__":
    # Small shapes consistent with the module: in_c=3, pool=4; embed_dim=128
    # keeps the lane axis dense; img_size=16 -> 4x4 = 16 patches.
    B, Cin, H, W = 2, 3, 16, 16
    Cout, P = 128, 4
    S = (H // P) * (W // P)

    key = jax.random.PRNGKey(0)
    kx, kw, kb = jax.random.split(key, 3)
    x = jax.random.normal(kx, (B, Cin, H, W), dtype=jnp.float32)
    conv_w = jax.random.normal(kw, (Cout, Cin, 3, 3), dtype=jnp.float32) * 0.1
    conv_b = jax.random.normal(kb, (Cout,), dtype=jnp.float32) * 0.1

    out = patch_embed_forward(x, conv_w, conv_b, pool_size=P)
    out = jax.block_until_ready(out)

    # Reference: lax conv (SAME, stride 1) + bias, 4x4/4 max pool, flatten.
    x_nhwc = jnp.transpose(x, (0, 2, 3, 1))
    w_hwio = jnp.transpose(conv_w, (2, 3, 1, 0))
    conv_ref = jax.lax.conv_general_dilated(
        x_nhwc, w_hwio, window_strides=(1, 1), padding="SAME",
        dimension_numbers=("NHWC", "HWIO", "NHWC"),
        precision=jax.lax.Precision.HIGHEST) + conv_b[None, None, None, :]
    pool_ref = jax.lax.reduce_window(
        conv_ref, -jnp.inf, jax.lax.max,
        window_dimensions=(1, P, P, 1), window_strides=(1, P, P, 1),
        padding="VALID")
    ref = pool_ref.reshape(B, S, Cout)

    assert out.shape == (B, S, Cout)
    assert jnp.allclose(out, ref, atol=1e-4, rtol=1e-4)

    print("KERNEL_OK")
</pallas_src>

<mosaic_0001>
module attributes {stable_mosaic.version = 11 : i64} {
  func.func @_eitp_patch_embed_kernel(%arg0: i32, %arg1: memref<1x16x16x3xf32, #tpu.memory_space<vmem>>, %arg2: memref<27x128xf32, #tpu.memory_space<vmem>>, %arg3: memref<1x128xf32, #tpu.memory_space<vmem>>, %arg4: memref<1x16x128xf32, #tpu.memory_space<vmem>>, %arg5: memref<18x18x3xf32, #tpu.memory_space<vmem>>) attributes {dimension_semantics = [#tpu.dimension_semantics<parallel>], iteration_bounds = array<i64: 2>, scalar_prefetch = 0 : i64, scratch_operands = 1 : i64, tpu.core_type = #tpu.core_type<tc>, window_params = [{transform_indices = @transform_0, window_bounds = array<i64: 1, 16, 16, 3>}, {pipeline_mode = #tpu.pipeline_mode<synchronous>, transform_indices = @transform_1, window_bounds = array<i64: 27, 128>}, {pipeline_mode = #tpu.pipeline_mode<synchronous>, transform_indices = @transform_2, window_bounds = array<i64: 1, 128>}, {transform_indices = @transform_3, window_bounds = array<i64: 1, 16, 128>}]} {
    %cst = arith.constant 0.000000e+00 : f32
    %0 = vector.broadcast %cst : f32 to vector<18x18x3xf32>
    %c0 = arith.constant 0 : index
    %c0_0 = arith.constant 0 : index
    %c0_1 = arith.constant 0 : index
    %1 = vector.load %arg5[%c0, %c0_0, %c0_1] : memref<18x18x3xf32, #tpu.memory_space<vmem>>, vector<18x18x3xf32>
    tpu.vector_store %arg5[%c0, %c0_0, %c0_1], %0 {strides = array<i32>} : memref<18x18x3xf32, #tpu.memory_space<vmem>>, vector<18x18x3xf32>,
    %c0_2 = arith.constant 0 : index
    %c0_3 = arith.constant 0 : index
    %c0_4 = arith.constant 0 : index
    %c0_5 = arith.constant 0 : index
    %2 = vector.load %arg1[%c0_2, %c0_3, %c0_4, %c0_5] : memref<1x16x16x3xf32, #tpu.memory_space<vmem>>, vector<1x16x16x3xf32>
    %3 = vector.shape_cast %2 : vector<1x16x16x3xf32> to vector<16x16x3xf32>
    %c1 = arith.constant 1 : index
    %c1_6 = arith.constant 1 : index
    %c0_7 = arith.constant 0 : index
    %4 = vector.load %arg5[%c1, %c1_6, %c0_7] : memref<18x18x3xf32, #tpu.memory_space<vmem>>, vector<16x16x3xf32>
    tpu.vector_store %arg5[%c1, %c1_6, %c0_7], %3 {strides = array<i32>} : memref<18x18x3xf32, #tpu.memory_space<vmem>>, vector<16x16x3xf32>,
    %c0_8 = arith.constant 0 : index
    %c0_9 = arith.constant 0 : index
    %5 = vector.load %arg2[%c0_8, %c0_9] : memref<27x128xf32, #tpu.memory_space<vmem>>, vector<27x128xf32>
    %cst_10 = arith.constant 0.000000e+00 : f32
    %6 = vector.broadcast %cst_10 : f32 to vector<16x16x128xf32>
    %c0_11 = arith.constant 0 : index
    %c0_12 = arith.constant 0 : index
    %c0_13 = arith.constant 0 : index
    %7 = vector.load %arg5[%c0_11, %c0_12, %c0_13] : memref<18x18x3xf32, #tpu.memory_space<vmem>>, vector<16x16x3xf32>
    %8 = vector.extract_strided_slice %5 {offsets = [0, 0], sizes = [1, 128], strides = [1, 1]} : vector<27x128xf32> to vector<1x128xf32>
    %9 = vector.shape_cast %8 : vector<1x128xf32> to vector<128xf32>
    %10 = vector.extract_strided_slice %7 {offsets = [0, 0, 0], sizes = [16, 16, 1], strides = [1, 1, 1]} : vector<16x16x3xf32> to vector<16x16x1xf32>
    %11 = vector.shape_cast %9 : vector<128xf32> to vector<1x1x128xf32>
    %12 = vector.broadcast %10 : vector<16x16x1xf32> to vector<16x16x128xf32>
    %13 = vector.broadcast %11 : vector<1x1x128xf32> to vector<16x16x128xf32>
    %14 = arith.mulf %12, %13 : vector<16x16x128xf32>
    %15 = arith.addf %6, %14 : vector<16x16x128xf32>
    %16 = vector.extract_strided_slice %5 {offsets = [1, 0], sizes = [1, 128], strides = [1, 1]} : vector<27x128xf32> to vector<1x128xf32>
    %17 = vector.shape_cast %16 : vector<1x128xf32> to vector<128xf32>
    %18 = vector.extract_strided_slice %7 {offsets = [0, 0, 1], sizes = [16, 16, 1], strides = [1, 1, 1]} : vector<16x16x3xf32> to vector<16x16x1xf32>
    %19 = vector.shape_cast %17 : vector<128xf32> to vector<1x1x128xf32>
    %20 = vector.broadcast %18 : vector<16x16x1xf32> to vector<16x16x128xf32>
    %21 = vector.broadcast %19 : vector<1x1x128xf32> to vector<16x16x128xf32>
    %22 = arith.mulf %20, %21 : vector<16x16x128xf32>
    %23 = arith.addf %15, %22 : vector<16x16x128xf32>
    %24 = vector.extract_strided_slice %5 {offsets = [2, 0], sizes = [1, 128], strides = [1, 1]} : vector<27x128xf32> to vector<1x128xf32>
    %25 = vector.shape_cast %24 : vector<1x128xf32> to vector<128xf32>
    %26 = vector.extract_strided_slice %7 {offsets = [0, 0, 2], sizes = [16, 16, 1], strides = [1, 1, 1]} : vector<16x16x3xf32> to vector<16x16x1xf32>
    %27 = vector.shape_cast %25 : vector<128xf32> to vector<1x1x128xf32>
    %28 = vector.broadcast %26 : vector<16x16x1xf32> to vector<16x16x128xf32>
    %29 = vector.broadcast %27 : vector<1x1x128xf32> to vector<16x16x128xf32>
    %30 = arith.mulf %28, %29 : vector<16x16x128xf32>
    %31 = arith.addf %23, %30 : vector<16x16x128xf32>
    %c0_14 = arith.constant 0 : index
    %c1_15 = arith.constant 1 : index
    %c0_16 = arith.constant 0 : index
    %32 = vector.load %arg5[%c0_14, %c1_15, %c0_16] : memref<18x18x3xf32, #tpu.memory_space<vmem>>, vector<16x16x3xf32>
    %33 = vector.extract_strided_slice %5 {offsets = [3, 0], sizes = [1, 128], strides = [1, 1]} : vector<27x128xf32> to vector<1x128xf32>
    %34 = vector.shape_cast %33 : vector<1x128xf32> to vector<128xf32>
    %35 = vector.extract_strided_slice %32 {offsets = [0, 0, 0], sizes = [16, 16, 1], strides = [1, 1, 1]} : vector<16x16x3xf32> to vector<16x16x1xf32>
    %36 = vector.shape_cast %34 : vector<128xf32> to vector<1x1x128xf32>
    %37 = vector.broadcast %35 : vector<16x16x1xf32> to vector<16x16x128xf32>
    %38 = vector.broadcast %36 : vector<1x1x128xf32> to vector<16x16x128xf32>
    %39 = arith.mulf %37, %38 : vector<16x16x128xf32>
    %40 = arith.addf %31, %39 : vector<16x16x128xf32>
    %41 = vector.extract_strided_slice %5 {offsets = [4, 0], sizes = [1, 128], strides = [1, 1]} : vector<27x128xf32> to vector<1x128xf32>
    %42 = vector.shape_cast %41 : vector<1x128xf32> to vector<128xf32>
    %43 = vector.extract_strided_slice %32 {offsets = [0, 0, 1], sizes = [16, 16, 1], strides = [1, 1, 1]} : vector<16x16x3xf32> to vector<16x16x1xf32>
    %44 = vector.shape_cast %42 : vector<128xf32> to vector<1x1x128xf32>
    %45 = vector.broadcast %43 : vector<16x16x1xf32> to vector<16x16x128xf32>
    %46 = vector.broadcast %44 : vector<1x1x128xf32> to vector<16x16x128xf32>
    %47 = arith.mulf %45, %46 : vector<16x16x128xf32>
    %48 = arith.addf %40, %47 : vector<16x16x128xf32>
    %49 = vector.extract_strided_slice %5 {offsets = [5, 0], sizes = [1, 128], strides = [1, 1]} : vector<27x128xf32> to vector<1x128xf32>
    %50 = vector.shape_cast %49 : vector<1x128xf32> to vector<128xf32>
    %51 = vector.extract_strided_slice %32 {offsets = [0, 0, 2], sizes = [16, 16, 1], strides = [1, 1, 1]} : vector<16x16x3xf32> to vector<16x16x1xf32>
    %52 = vector.shape_cast %50 : vector<128xf32> to vector<1x1x128xf32>
    %53 = vector.broadcast %51 : vector<16x16x1xf32> to vector<16x16x128xf32>
    %54 = vector.broadcast %52 : vector<1x1x128xf32> to vector<16x16x128xf32>
    %55 = arith.mulf %53, %54 : vector<16x16x128xf32>
    %56 = arith.addf %48, %55 : vector<16x16x128xf32>
    %c0_17 = arith.constant 0 : index
    %c2 = arith.constant 2 : index
    %c0_18 = arith.constant 0 : index
    %57 = vector.load %arg5[%c0_17, %c2, %c0_18] : memref<18x18x3xf32, #tpu.memory_space<vmem>>, vector<16x16x3xf32>
    %58 = vector.extract_strided_slice %5 {offsets = [6, 0], sizes = [1, 128], strides = [1, 1]} : vector<27x128xf32> to vector<1x128xf32>
    %59 = vector.shape_cast %58 : vector<1x128xf32> to vector<128xf32>
    %60 = vector.extract_strided_slice %57 {offsets = [0, 0, 0], sizes = [16, 16, 1], strides = [1, 1, 1]} : vector<16x16x3xf32> to vector<16x16x1xf32>
    %61 = vector.shape_cast %59 : vector<128xf32> to vector<1x1x128xf32>
    %62 = vector.broadcast %60 : vector<16x16x1xf32> to vector<16x16x128xf32>
    %63 = vector.broadcast %61 : vector<1x1x128xf32> to vector<16x16x128xf32>
    %64 = arith.mulf %62, %63 : vector<16x16x128xf32>
    %65 = arith.addf %56, %64 : vector<16x16x128xf32>
    %66 = vector.extract_strided_slice %5 {offsets = [7, 0], sizes = [1, 128], strides = [1, 1]} : vector<27x128xf32> to vector<1x128xf32>
    %67 = vector.shape_cast %66 : vector<1x128xf32> to vector<128xf32>
    %68 = vector.extract_strided_slice %57 {offsets = [0, 0, 1], sizes = [16, 16, 1], strides = [1, 1, 1]} : vector<16x16x3xf32> to vector<16x16x1xf32>
    %69 = vector.shape_cast %67 : vector<128xf32> to vector<1x1x128xf32>
    %70 = vector.broadcast %68 : vector<16x16x1xf32> to vector<16x16x128xf32>
    %71 = vector.broadcast %69 : vector<1x1x128xf32> to vector<16x16x128xf32>
    %72 = arith.mulf %70, %71 : vector<16x16x128xf32>
    %73 = arith.addf %65, %72 : vector<16x16x128xf32>
    %74 = vector.extract_strided_slice %5 {offsets = [8, 0], sizes = [1, 128], strides = [1, 1]} : vector<27x128xf32> to vector<1x128xf32>
    %75 = vector.shape_cast %74 : vector<1x128xf32> to vector<128xf32>
    %76 = vector.extract_strided_slice %57 {offsets = [0, 0, 2], sizes = [16, 16, 1], strides = [1, 1, 1]} : vector<16x16x3xf32> to vector<16x16x1xf32>
    %77 = vector.shape_cast %75 : vector<128xf32> to vector<1x1x128xf32>
    %78 = vector.broadcast %76 : vector<16x16x1xf32> to vector<16x16x128xf32>
    %79 = vector.broadcast %77 : vector<1x1x128xf32> to vector<16x16x128xf32>
    %80 = arith.mulf %78, %79 : vector<16x16x128xf32>
    %81 = arith.addf %73, %80 : vector<16x16x128xf32>
    %c1_19 = arith.constant 1 : index
    %c0_20 = arith.constant 0 : index
    %c0_21 = arith.constant 0 : index
    %82 = vector.load %arg5[%c1_19, %c0_20, %c0_21] : memref<18x18x3xf32, #tpu.memory_space<vmem>>, vector<16x16x3xf32>
    %83 = vector.extract_strided_slice %5 {offsets = [9, 0], sizes = [1, 128], strides = [1, 1]} : vector<27x128xf32> to vector<1x128xf32>
    %84 = vector.shape_cast %83 : vector<1x128xf32> to vector<128xf32>
    %85 = vector.extract_strided_slice %82 {offsets = [0, 0, 0], sizes = [16, 16, 1], strides = [1, 1, 1]} : vector<16x16x3xf32> to vector<16x16x1xf32>
    %86 = vector.shape_cast %84 : vector<128xf32> to vector<1x1x128xf32>
    %87 = vector.broadcast %85 : vector<16x16x1xf32> to vector<16x16x128xf32>
    %88 = vector.broadcast %86 : vector<1x1x128xf32> to vector<16x16x128xf32>
    %89 = arith.mulf %87, %88 : vector<16x16x128xf32>
    %90 = arith.addf %81, %89 : vector<16x16x128xf32>
    %91 = vector.extract_strided_slice %5 {offsets = [10, 0], sizes = [1, 128], strides = [1, 1]} : vector<27x128xf32> to vector<1x128xf32>
    %92 = vector.shape_cast %91 : vector<1x128xf32> to vector<128xf32>
    %93 = vector.extract_strided_slice %82 {offsets = [0, 0, 1], sizes = [16, 16, 1], strides = [1, 1, 1]} : vector<16x16x3xf32> to vector<16x16x1xf32>
    %94 = vector.shape_cast %92 : vector<128xf32> to vector<1x1x128xf32>
    %95 = vector.broadcast %93 : vector<16x16x1xf32> to vector<16x16x128xf32>
    %96 = vector.broadcast %94 : vector<1x1x128xf32> to vector<16x16x128xf32>
    %97 = arith.mulf %95, %96 : vector<16x16x128xf32>
    %98 = arith.addf %90, %97 : vector<16x16x128xf32>
    %99 = vector.extract_strided_slice %5 {offsets = [11, 0], sizes = [1, 128], strides = [1, 1]} : vector<27x128xf32> to vector<1x128xf32>
    %100 = vector.shape_cast %99 : vector<1x128xf32> to vector<128xf32>
    %101 = vector.extract_strided_slice %82 {offsets = [0, 0, 2], sizes = [16, 16, 1], strides = [1, 1, 1]} : vector<16x16x3xf32> to vector<16x16x1xf32>
    %102 = vector.shape_cast %100 : vector<128xf32> to vector<1x1x128xf32>
    %103 = vector.broadcast %101 : vector<16x16x1xf32> to vector<16x16x128xf32>
    %104 = vector.broadcast %102 : vector<1x1x128xf32> to vector<16x16x128xf32>
    %105 = arith.mulf %103, %104 : vector<16x16x128xf32>
    %106 = arith.addf %98, %105 : vector<16x16x128xf32>
    %c1_22 = arith.constant 1 : index
    %c1_23 = arith.constant 1 : index
    %c0_24 = arith.constant 0 : index
    %107 = vector.load %arg5[%c1_22, %c1_23, %c0_24] : memref<18x18x3xf32, #tpu.memory_space<vmem>>, vector<16x16x3xf32>
    %108 = vector.extract_strided_slice %5 {offsets = [12, 0], sizes = [1, 128], strides = [1, 1]} : vector<27x128xf32> to vector<1x128xf32>
    %109 = vector.shape_cast %108 : vector<1x128xf32> to vector<128xf32>
    %110 = vector.extract_strided_slice %107 {offsets = [0, 0, 0], sizes = [16, 16, 1], strides = [1, 1, 1]} : vector<16x16x3xf32> to vector<16x16x1xf32>
    %111 = vector.shape_cast %109 : vector<128xf32> to vector<1x1x128xf32>
    %112 = vector.broadcast %110 : vector<16x16x1xf32> to vector<16x16x128xf32>
    %113 = vector.broadcast %111 : vector<1x1x128xf32> to vector<16x16x128xf32>
    %114 = arith.mulf %112, %113 : vector<16x16x128xf32>
    %115 = arith.addf %106, %114 : vector<16x16x128xf32>
    %116 = vector.extract_strided_slice %5 {offsets = [13, 0], sizes = [1, 128], strides = [1, 1]} : vector<27x128xf32> to vector<1x128xf32>
    %117 = vector.shape_cast %116 : vector<1x128xf32> to vector<128xf32>
    %118 = vector.extract_strided_slice %107 {offsets = [0, 0, 1], sizes = [16, 16, 1], strides = [1, 1, 1]} : vector<16x16x3xf32> to vector<16x16x1xf32>
    %119 = vector.shape_cast %117 : vector<128xf32> to vector<1x1x128xf32>
    %120 = vector.broadcast %118 : vector<16x16x1xf32> to vector<16x16x128xf32>
    %121 = vector.broadcast %119 : vector<1x1x128xf32> to vector<16x16x128xf32>
    %122 = arith.mulf %120, %121 : vector<16x16x128xf32>
    %123 = arith.addf %115, %122 : vector<16x16x128xf32>
    %124 = vector.extract_strided_slice %5 {offsets = [14, 0], sizes = [1, 128], strides = [1, 1]} : vector<27x128xf32> to vector<1x128xf32>
    %125 = vector.shape_cast %124 : vector<1x128xf32> to vector<128xf32>
    %126 = vector.extract_strided_slice %107 {offsets = [0, 0, 2], sizes = [16, 16, 1], strides = [1, 1, 1]} : vector<16x16x3xf32> to vector<16x16x1xf32>
    %127 = vector.shape_cast %125 : vector<128xf32> to vector<1x1x128xf32>
    %128 = vector.broadcast %126 : vector<16x16x1xf32> to vector<16x16x128xf32>
    %129 = vector.broadcast %127 : vector<1x1x128xf32> to vector<16x16x128xf32>
    %130 = arith.mulf %128, %129 : vector<16x16x128xf32>
    %131 = arith.addf %123, %130 : vector<16x16x128xf32>
    %c1_25 = arith.constant 1 : index
    %c2_26 = arith.constant 2 : index
    %c0_27 = arith.constant 0 : index
    %132 = vector.load %arg5[%c1_25, %c2_26, %c0_27] : memref<18x18x3xf32, #tpu.memory_space<vmem>>, vector<16x16x3xf32>
    %133 = vector.extract_strided_slice %5 {offsets = [15, 0], sizes = [1, 128], strides = [1, 1]} : vector<27x128xf32> to vector<1x128xf32>
    %134 = vector.shape_cast %133 : vector<1x128xf32> to vector<128xf32>
    %135 = vector.extract_strided_slice %132 {offsets = [0, 0, 0], sizes = [16, 16, 1], strides = [1, 1, 1]} : vector<16x16x3xf32> to vector<16x16x1xf32>
    %136 = vector.shape_cast %134 : vector<128xf32> to vector<1x1x128xf32>
    %137 = vector.broadcast %135 : vector<16x16x1xf32> to vector<16x16x128xf32>
    %138 = vector.broadcast %136 : vector<1x1x128xf32> to vector<16x16x128xf32>
    %139 = arith.mulf %137, %138 : vector<16x16x128xf32>
    %140 = arith.addf %131, %139 : vector<16x16x128xf32>
    %141 = vector.extract_strided_slice %5 {offsets = [16, 0], sizes = [1, 128], strides = [1, 1]} : vector<27x128xf32> to vector<1x128xf32>
    %142 = vector.shape_cast %141 : vector<1x128xf32> to vector<128xf32>
    %143 = vector.extract_strided_slice %132 {offsets = [0, 0, 1], sizes = [16, 16, 1], strides = [1, 1, 1]} : vector<16x16x3xf32> to vector<16x16x1xf32>
    %144 = vector.shape_cast %142 : vector<128xf32> to vector<1x1x128xf32>
    %145 = vector.broadcast %143 : vector<16x16x1xf32> to vector<16x16x128xf32>
    %146 = vector.broadcast %144 : vector<1x1x128xf32> to vector<16x16x128xf32>
    %147 = arith.mulf %145, %146 : vector<16x16x128xf32>
    %148 = arith.addf %140, %147 : vector<16x16x128xf32>
    %149 = vector.extract_strided_slice %5 {offsets = [17, 0], sizes = [1, 128], strides = [1, 1]} : vector<27x128xf32> to vector<1x128xf32>
    %150 = vector.shape_cast %149 : vector<1x128xf32> to vector<128xf32>
    %151 = vector.extract_strided_slice %132 {offsets = [0, 0, 2], sizes = [16, 16, 1], strides = [1, 1, 1]} : vector<16x16x3xf32> to vector<16x16x1xf32>
    %152 = vector.shape_cast %150 : vector<128xf32> to vector<1x1x128xf32>
    %153 = vector.broadcast %151 : vector<16x16x1xf32> to vector<16x16x128xf32>
    %154 = vector.broadcast %152 : vector<1x1x128xf32> to vector<16x16x128xf32>
    %155 = arith.mulf %153, %154 : vector<16x16x128xf32>
    %156 = arith.addf %148, %155 : vector<16x16x128xf32>
    %c2_28 = arith.constant 2 : index
    %c0_29 = arith.constant 0 : index
    %c0_30 = arith.constant 0 : index
    %157 = vector.load %arg5[%c2_28, %c0_29, %c0_30] : memref<18x18x3xf32, #tpu.memory_space<vmem>>, vector<16x16x3xf32>
    %158 = vector.extract_strided_slice %5 {offsets = [18, 0], sizes = [1, 128], strides = [1, 1]} : vector<27x128xf32> to vector<1x128xf32>
    %159 = vector.shape_cast %158 : vector<1x128xf32> to vector<128xf32>
    %160 = vector.extract_strided_slice %157 {offsets = [0, 0, 0], sizes = [16, 16, 1], strides = [1, 1, 1]} : vector<16x16x3xf32> to vector<16x16x1xf32>
    %161 = vector.shape_cast %159 : vector<128xf32> to vector<1x1x128xf32>
    %162 = vector.broadcast %160 : vector<16x16x1xf32> to vector<16x16x128xf32>
    %163 = vector.broadcast %161 : vector<1x1x128xf32> to vector<16x16x128xf32>
    %164 = arith.mulf %162, %163 : vector<16x16x128xf32>
    %165 = arith.addf %156, %164 : vector<16x16x128xf32>
    %166 = vector.extract_strided_slice %5 {offsets = [19, 0], sizes = [1, 128], strides = [1, 1]} : vector<27x128xf32> to vector<1x128xf32>
    %167 = vector.shape_cast %166 : vector<1x128xf32> to vector<128xf32>
    %168 = vector.extract_strided_slice %157 {offsets = [0, 0, 1], sizes = [16, 16, 1], strides = [1, 1, 1]} : vector<16x16x3xf32> to vector<16x16x1xf32>
    %169 = vector.shape_cast %167 : vector<128xf32> to vector<1x1x128xf32>
    %170 = vector.broadcast %168 : vector<16x16x1xf32> to vector<16x16x128xf32>
    %171 = vector.broadcast %169 : vector<1x1x128xf32> to vector<16x16x128xf32>
    %172 = arith.mulf %170, %171 : vector<16x16x128xf32>
    %173 = arith.addf %165, %172 : vector<16x16x128xf32>
    %174 = vector.extract_strided_slice %5 {offsets = [20, 0], sizes = [1, 128], strides = [1, 1]} : vector<27x128xf32> to vector<1x128xf32>
    %175 = vector.shape_cast %174 : vector<1x128xf32> to vector<128xf32>
    %176 = vector.extract_strided_slice %157 {offsets = [0, 0, 2], sizes = [16, 16, 1], strides = [1, 1, 1]} : vector<16x16x3xf32> to vector<16x16x1xf32>
    %177 = vector.shape_cast %175 : vector<128xf32> to vector<1x1x128xf32>
    %178 = vector.broadcast %176 : vector<16x16x1xf32> to vector<16x16x128xf32>
    %179 = vector.broadcast %177 : vector<1x1x128xf32> to vector<16x16x128xf32>
    %180 = arith.mulf %178, %179 : vector<16x16x128xf32>
    %181 = arith.addf %173, %180 : vector<16x16x128xf32>
    %c2_31 = arith.constant 2 : index
    %c1_32 = arith.constant 1 : index
    %c0_33 = arith.constant 0 : index
    %182 = vector.load %arg5[%c2_31, %c1_32, %c0_33] : memref<18x18x3xf32, #tpu.memory_space<vmem>>, vector<16x16x3xf32>
    %183 = vector.extract_strided_slice %5 {offsets = [21, 0], sizes = [1, 128], strides = [1, 1]} : vector<27x128xf32> to vector<1x128xf32>
    %184 = vector.shape_cast %183 : vector<1x128xf32> to vector<128xf32>
    %185 = vector.extract_strided_slice %182 {offsets = [0, 0, 0], sizes = [16, 16, 1], strides = [1, 1, 1]} : vector<16x16x3xf32> to vector<16x16x1xf32>
    %186 = vector.shape_cast %184 : vector<128xf32> to vector<1x1x128xf32>
    %187 = vector.broadcast %185 : vector<16x16x1xf32> to vector<16x16x128xf32>
    %188 = vector.broadcast %186 : vector<1x1x128xf32> to vector<16x16x128xf32>
    %189 = arith.mulf %187, %188 : vector<16x16x128xf32>
    %190 = arith.addf %181, %189 : vector<16x16x128xf32>
    %191 = vector.extract_strided_slice %5 {offsets = [22, 0], sizes = [1, 128], strides = [1, 1]} : vector<27x128xf32> to vector<1x128xf32>
    %192 = vector.shape_cast %191 : vector<1x128xf32> to vector<128xf32>
    %193 = vector.extract_strided_slice %182 {offsets = [0, 0, 1], sizes = [16, 16, 1], strides = [1, 1, 1]} : vector<16x16x3xf32> to vector<16x16x1xf32>
    %194 = vector.shape_cast %192 : vector<128xf32> to vector<1x1x128xf32>
    %195 = vector.broadcast %193 : vector<16x16x1xf32> to vector<16x16x128xf32>
    %196 = vector.broadcast %194 : vector<1x1x128xf32> to vector<16x16x128xf32>
    %197 = arith.mulf %195, %196 : vector<16x16x128xf32>
    %198 = arith.addf %190, %197 : vector<16x16x128xf32>
    %199 = vector.extract_strided_slice %5 {offsets = [23, 0], sizes = [1, 128], strides = [1, 1]} : vector<27x128xf32> to vector<1x128xf32>
    %200 = vector.shape_cast %199 : vector<1x128xf32> to vector<128xf32>
    %201 = vector.extract_strided_slice %182 {offsets = [0, 0, 2], sizes = [16, 16, 1], strides = [1, 1, 1]} : vector<16x16x3xf32> to vector<16x16x1xf32>
    %202 = vector.shape_cast %200 : vector<128xf32> to vector<1x1x128xf32>
    %203 = vector.broadcast %201 : vector<16x16x1xf32> to vector<16x16x128xf32>
    %204 = vector.broadcast %202 : vector<1x1x128xf32> to vector<16x16x128xf32>
    %205 = arith.mulf %203, %204 : vector<16x16x128xf32>
    %206 = arith.addf %198, %205 : vector<16x16x128xf32>
    %c2_34 = arith.constant 2 : index
    %c2_35 = arith.constant 2 : index
    %c0_36 = arith.constant 0 : index
    %207 = vector.load %arg5[%c2_34, %c2_35, %c0_36] : memref<18x18x3xf32, #tpu.memory_space<vmem>>, vector<16x16x3xf32>
    %208 = vector.extract_strided_slice %5 {offsets = [24, 0], sizes = [1, 128], strides = [1, 1]} : vector<27x128xf32> to vector<1x128xf32>
    %209 = vector.shape_cast %208 : vector<1x128xf32> to vector<128xf32>
    %210 = vector.extract_strided_slice %207 {offsets = [0, 0, 0], sizes = [16, 16, 1], strides = [1, 1, 1]} : vector<16x16x3xf32> to vector<16x16x1xf32>
    %211 = vector.shape_cast %209 : vector<128xf32> to vector<1x1x128xf32>
    %212 = vector.broadcast %210 : vector<16x16x1xf32> to vector<16x16x128xf32>
    %213 = vector.broadcast %211 : vector<1x1x128xf32> to vector<16x16x128xf32>
    %214 = arith.mulf %212, %213 : vector<16x16x128xf32>
    %215 = arith.addf %206, %214 : vector<16x16x128xf32>
    %216 = vector.extract_strided_slice %5 {offsets = [25, 0], sizes = [1, 128], strides = [1, 1]} : vector<27x128xf32> to vector<1x128xf32>
    %217 = vector.shape_cast %216 : vector<1x128xf32> to vector<128xf32>
    %218 = vector.extract_strided_slice %207 {offsets = [0, 0, 1], sizes = [16, 16, 1], strides = [1, 1, 1]} : vector<16x16x3xf32> to vector<16x16x1xf32>
    %219 = vector.shape_cast %217 : vector<128xf32> to vector<1x1x128xf32>
    %220 = vector.broadcast %218 : vector<16x16x1xf32> to vector<16x16x128xf32>
    %221 = vector.broadcast %219 : vector<1x1x128xf32> to vector<16x16x128xf32>
    %222 = arith.mulf %220, %221 : vector<16x16x128xf32>
    %223 = arith.addf %215, %222 : vector<16x16x128xf32>
    %224 = vector.extract_strided_slice %5 {offsets = [26, 0], sizes = [1, 128], strides = [1, 1]} : vector<27x128xf32> to vector<1x128xf32>
    %225 = vector.shape_cast %224 : vector<1x128xf32> to vector<128xf32>
    %226 = vector.extract_strided_slice %207 {offsets = [0, 0, 2], sizes = [16, 16, 1], strides = [1, 1, 1]} : vector<16x16x3xf32> to vector<16x16x1xf32>
    %227 = vector.shape_cast %225 : vector<128xf32> to vector<1x1x128xf32>
    %228 = vector.broadcast %226 : vector<16x16x1xf32> to vector<16x16x128xf32>
    %229 = vector.broadcast %227 : vector<1x1x128xf32> to vector<16x16x128xf32>
    %230 = arith.mulf %228, %229 : vector<16x16x128xf32>
    %231 = arith.addf %223, %230 : vector<16x16x128xf32>
    %232 = vector.shape_cast %231 : vector<16x16x128xf32> to vector<4x4x4x4x128xf32>
    %cst_37 = arith.constant dense<0xFF800000> : vector<4x4x4x128xf32>
    %233 = vector.multi_reduction <maximumf>, %232, %cst_37 [3] : vector<4x4x4x4x128xf32> to vector<4x4x4x128xf32>
    %cst_38 = arith.constant dense<0xFF800000> : vector<4x4x128xf32>
    %234 = vector.multi_reduction <maximumf>, %233, %cst_38 [1] : vector<4x4x4x128xf32> to vector<4x4x128xf32>
    %c0_39 = arith.constant 0 : index
    %c0_40 = arith.constant 0 : index
    %235 = vector.load %arg3[%c0_39, %c0_40] : memref<1x128xf32, #tpu.memory_space<vmem>>, vector<1x128xf32>
    %236 = vector.shape_cast %235 : vector<1x128xf32> to vector<1x1x128xf32>
    %237 = vector.broadcast %236 : vector<1x1x128xf32> to vector<4x4x128xf32>
    %238 = arith.addf %234, %237 : vector<4x4x128xf32>
    %239 = vector.shape_cast %238 : vector<4x4x128xf32> to vector<16x128xf32>
    %c0_41 = arith.constant 0 : index
    %c0_42 = arith.constant 0 : index
    %c0_43 = arith.constant 0 : index
    %240 = vector.load %arg4[%c0_41, %c0_42, %c0_43] : memref<1x16x128xf32, #tpu.memory_space<vmem>>, vector<1x16x128xf32>
    %241 = vector.shape_cast %240 : vector<1x16x128xf32> to vector<16x128xf32>
    %242 = vector.shape_cast %239 : vector<16x128xf32> to vector<1x16x128xf32>
    tpu.vector_store %arg4[%c0_41, %c0_42, %c0_43], %242 {strides = array<i32>} : memref<1x16x128xf32, #tpu.memory_space<vmem>>, vector<1x16x128xf32>,
    return
  }
  func.func @transform_0(%arg0: i32) -> (i32, i32, i32, i32) {
    %c0_i32 = arith.constant 0 : i32
    %c0_i32_0 = arith.constant 0 : i32
    %c0_i32_1 = arith.constant 0 : i32
    %c0_i32_2 = arith.constant 0 : i32
    return %arg0, %c0_i32, %c0_i32_0, %c0_i32_1 : i32, i32, i32, i32
  }
  func.func @transform_1(%arg0: i32) -> (i32, i32) {
    %c0_i32 = arith.constant 0 : i32
    %c0_i32_0 = arith.constant 0 : i32
    %c0_i32_1 = arith.constant 0 : i32
    return %c0_i32, %c0_i32_0 : i32, i32
  }
  func.func @transform_2(%arg0: i32) -> (i32, i32) {
    %c0_i32 = arith.constant 0 : i32
    %c0_i32_0 = arith.constant 0 : i32
    %c0_i32_1 = arith.constant 0 : i32
    return %c0_i32, %c0_i32_0 : i32, i32
  }
  func.func @transform_3(%arg0: i32) -> (i32, i32, i32) {
    %c0_i32 = arith.constant 0 : i32
    %c0_i32_0 = arith.constant 0 : i32
    %c0_i32_1 = arith.constant 0 : i32
    return %arg0, %c0_i32, %c0_i32_0 : i32, i32, i32
  }
}

</mosaic_0001>

<bundles_post_ra>
// kernel: tpu_custom_call.1
= control target key start
LH: loop header
LB: loop body
LE: loop exit
PB: predicated region body
PF: predicated region fallthrough
CT: control target
= control target key end

     0   :  { %8 = vsyncpa [#allocation4], 0  ;;  %s13255_s0 = inlined_call_operand.vmem [shape: f32[2,16,16,3], index: 0, kind: input, shape index: {}]   ;;  %s13256_s1 = inlined_call_operand.vmem [shape: f32[27,128], index: 1, kind: input, shape index: {}]   ;;  %s13257_s2 = inlined_call_operand.vmem [shape: f32[1,128], index: 2, kind: input, shape index: {}]   ;;  %s13258_s3 = inlined_call_operand.hbm [shape: f32[2,16,128], index: 3, kind: output, shape index: {}]  }
   0x1   :  { %10 = vsyncpa [#allocation4 + $0x1], 0  ;;  %s7261_s12 = smov 0   ;;  %s7263_s13 = smov 0  }
   0x2   :  { %s7265_s14 = smov 0   ;;  %s7267_s15 = smov 0  }
   0x3 LB: > { %s7282_s16 = sadd.s32 4294967295, %s7233_s15   ;;  %s6828_s17 = sadd.s32 4294967294, %s7233_s15   ;;  %s7233_s15 = sphi %s7267_s15, %s15007_s15   ;;  %s7229_s14 = sphi %s7265_s14, %s15006_s14   ;;  %s7225_s13 = sphi %s7263_s13, %s15005_s13   ;;  %s7221_s12 = sphi %s7261_s12, %s15004_s12  }
   0x4   : > { %s7286_s18 = sadd.s32 1, %s7233_s15   ;;  %s91_s19 = sadd.s32 1, %s7229_s14 }
   0x5   : > { %s88_s20 = ssub.s32 %s7233_s15, %s7286_s18  ;;  %p101_p0 = scmp.ne.s32.totalorder %s7229_s14, %s7225_s13 }
   0x6   : > { %p89_p1 = scmp.eq.s32.totalorder %s88_s20, 0  ;;  %p102_p2 = scmp.eq.s32.totalorder %s7282_s16, 1 }
   0x7   : > { %p107_p3 = scmp.ne.s32.totalorder %s7225_s13, %s7221_s12  ;;  %p108_p4 = scmp.eq.s32.totalorder %s6828_s17, 1 }
   0x8   : > { %s7297_s21 = scalar_select %p89_p1, %s7229_s14, %s91_s19  }
   0x9   : > { %p7299_p5 = por %p102_p2, %p101_p0  ;;  %p7303_p6 = por %p108_p4, %p107_p3 }
   0xa   : > { %p6831_p7 = scmp.ge.s32.totalorder %s7233_s15, 1  ;;  %p140_p8 = scmp.lt.s32.totalorder %s7233_s15, 3 }
   0xc   : > { %p141_p9 = pnand %p6831_p7, %p140_p8 }
   0xe   : > { %144 = sbr.rel (%p141_p9) target bundleno = 2636 (0xa4c), region = 32 }
  0x13   : > { %vm169_vm0 = vcmask 23552   ;;  %v13263_v0 = vmov 0   ;;  %v7236_v1 = vmov 0.0   ;;  %p164_p10 = scmp.lt.s32.totalorder %s7282_s16, 1  ;;  %vm172_vm1 = vcmask 17408   ;;  %s7191_s11 = scalar_lea.hbm %s13258_s3, 32 }
  0x14   : > { %6887 = vset.pattern.permute.xlu0 %v13263_v0  ;;  %170 = vst.msk [vmem:[#allocation2] sm:$0xff] %vm169_vm0, %v7236_v1  ;;  %6889 = vset.pattern.permute.xlu2 %v13263_v0  ;;  %v13261_v63 = vmov 1   ;;  %vm6178_vm2 = vcmask 1043456   ;;  %vm6712_vm3 = vcmask 1041409   ;;  %vm6715_vm4 = vcmask 1042434  }
  0x15   : > { %171 = vst.msk [vmem:[#allocation2 + $0x8] sm:$0xff] %vm169_vm0, %v7236_v1  ;;  %6888 = vset.pattern.permute.xlu1 %v13263_v0  ;;  %s165_s24 = scalar_select %p164_p10, %s7282_s16, 1  ;;  %vm6718_vm5 = vcmask 1043459   ;;  %vm6721_vm6 = vcmask 1044484   ;;  %vm6724_vm7 = vcmask 1045509   ;;  %vm6727_vm8 = vcmask 1046534  }
  0x16   : > { %174 = vst.msk [vmem:[#allocation2 + $0x18] sm:$0xff] %vm169_vm0, %v7236_v1  ;;  %vm6730_vm9 = vcmask 1047559  }
  0x17   : > { %175 = vst.msk [vmem:[#allocation2 + $0x20] sm:$0xff] %vm169_vm0, %v7236_v1  ;;  %s6840_s25 = sshll.u32 %s165_s24, 8 }
  0x18   : > { %177 = vst.msk [vmem:[#allocation2 + $0x30] sm:$0xff] %vm169_vm0, %v7236_v1  ;;  %s7382_s28 = scalar_lea.vmem %s13255_s0, %s6840_s25  ;;  %s161_s25 = sand.u32 1, %s7225_s13  }
  0x19   : > { %178 = vst.msk [vmem:[#allocation2 + $0x38] sm:$0xff] %vm169_vm0, %v7236_v1  ;;  %v227_v4 = vld [vmem:[%s7382_s28 + $0x10] sm:$0xff]  ;;  %v225_v5 = vld [vmem:[%s7382_s28] sm:$0xff]  ;;  %v228_v6 = vld [vmem:[%s7382_s28 + $0x18] sm:$0xff]  ;;  %s6832_s26 = sshll.u32 %s161_s25, 4  ;;  %s6751_s6 = scalar_lea.sflag [#allocation4], %s161_s25 }
  0x1a   : > { %180 = vst.msk [vmem:[#allocation2 + $0x48] sm:$0xff] %vm169_vm0, %v7236_v1  ;;  %v226_v10 = vld [vmem:[%s7382_s28 + $0x8] sm:$0xff]  ;;  %v229_v11 = vld [vmem:[%s7382_s28 + $0x20] sm:$0xff]  ;;  %v231_v12 = vld [vmem:[%s7382_s28 + $0x30] sm:$0xff]  ;;  %s13200_s27 = scalar_lea.vmem [#allocation3], %s6832_s26 }
  0x1b   : > { %v7326_v2 = vld [vmem:[#allocation2] sm:$0xff]  ;;  %181 = vst.msk [vmem:[#allocation2 + $0x50] sm:$0xff] %vm169_vm0, %v7236_v1  ;;  %v230_v13 = vld [vmem:[%s7382_s28 + $0x28] sm:$0xff]  ;;  %v232_v14 = vld [vmem:[%s7382_s28 + $0x38] sm:$0xff] }
  0x1c   : > { %328 = vperm.xlu0 %6887, %v7326_v2   ;;  %183 = vst.msk [vmem:[#allocation2 + $0x60] sm:$0xff] %vm169_vm0, %v7236_v1  ;;  %v295_v3 = vld [vmem:[#allocation2 + $0x8] sm:$0xff]  ;;  %v233_v15 = vld [vmem:[%s7382_s28 + $0x40] sm:$0xff]  ;;  %v235_v17 = vld [vmem:[%s7382_s28 + $0x50] sm:$0xff] }
  0x1d   : > { %184 = vst.msk [vmem:[#allocation2 + $0x68] sm:$0xff] %vm169_vm0, %v7236_v1  ;;  %v234_v16 = vld [vmem:[%s7382_s28 + $0x48] sm:$0xff]  ;;  %v237_v18 = vld [vmem:[%s7382_s28 + $0x60] sm:$0xff]  ;;  %v236_v19 = vld [vmem:[%s7382_s28 + $0x58] sm:$0xff] }
  0x1e   : > { %186 = vst.msk [vmem:[#allocation2 + $0x78] sm:$0xff] %vm169_vm0, %v7236_v1  ;;  %v238_v21 = vld [vmem:[%s7382_s28 + $0x68] sm:$0xff]  ;;  %v239_v23 = vld [vmem:[%s7382_s28 + $0x70] sm:$0xff]  ;;  %v240_v25 = vld [vmem:[%s7382_s28 + $0x78] sm:$0xff] }
  0x1f   : > { %187 = vst.msk [vmem:[#allocation2 + $0x80] sm:$0xff] %vm169_vm0, %v7236_v1  ;;  %v241_v26 = vld [vmem:[%s7382_s28 + $0x80] sm:$0xff]  ;;  %v243_v27 = vld [vmem:[%s7382_s28 + $0x90] sm:$0xff]  ;;  %v242_v28 = vld [vmem:[%s7382_s28 + $0x88] sm:$0xff] }
  0x20   : > { %189 = vst.msk [vmem:[#allocation2 + $0x90] sm:$0xff] %vm169_vm0, %v7236_v1  ;;  %v244_v30 = vld [vmem:[%s7382_s28 + $0x98] sm:$0xff]  ;;  %v245_v33 = vld [vmem:[%s7382_s28 + $0xa0] sm:$0xff]  ;;  %v246_v34 = vld [vmem:[%s7382_s28 + $0xa8] sm:$0xff] }
  0x21   : > { %190 = vst.msk [vmem:[#allocation2 + $0x98] sm:$0xff] %vm169_vm0, %v7236_v1  ;;  %v247_v35 = vld [vmem:[%s7382_s28 + $0xb0] sm:$0xff]  ;;  %v249_v39 = vld [vmem:[%s7382_s28 + $0xc0] sm:$0xff]  ;;  %v248_v40 = vld [vmem:[%s7382_s28 + $0xb8] sm:$0xff] }
  0x22   : > { %192 = vst.msk [vmem:[#allocation2 + $0xa8] sm:$0xff] %vm169_vm0, %v7236_v1  ;;  %v250_v41 = vld [vmem:[%s7382_s28 + $0xc8] sm:$0xff]  ;;  %v251_v45 = vld [vmem:[%s7382_s28 + $0xd0] sm:$0xff]  ;;  %v252_v46 = vld [vmem:[%s7382_s28 + $0xd8] sm:$0xff] }
  0x23   : > { %193 = vst.msk [vmem:[#allocation2 + $0xb0] sm:$0xff] %vm169_vm0, %v7236_v1  ;;  %v253_v47 = vld [vmem:[%s7382_s28 + $0xe0] sm:$0xff]  ;;  %v254_v51 = vld [vmem:[%s7382_s28 + $0xe8] sm:$0xff] }
  0x24   : > { %195 = vst.msk [vmem:[#allocation2 + $0xc0] sm:$0xff] %vm169_vm0, %v7236_v1  ;;  %333 = vperm.xlu0 %6887, %v295_v3  }
  0x25   : > { %196 = vst.msk [vmem:[#allocation2 + $0xc8] sm:$0xff] %vm169_vm0, %v7236_v1 }
  0x26   : > { %198 = vst.msk [vmem:[#allocation2 + $0xd8] sm:$0xff] %vm169_vm0, %v7236_v1 }
  0x27   : > { %199 = vst.msk [vmem:[#allocation2 + $0xe0] sm:$0xff] %vm169_vm0, %v7236_v1 }
  0x28   : > { %201 = vst.msk [vmem:[#allocation2 + $0xf0] sm:$0xff] %vm169_vm0, %v7236_v1 }
  0x29   : > { %202 = vst.msk [vmem:[#allocation2 + $0xf8] sm:$0xff] %vm169_vm0, %v7236_v1 }
  0x2a   : > { %204 = vst.msk [vmem:[#allocation2 + $0x108] sm:$0xff] %vm169_vm0, %v7236_v1 }
  0x2b   : > { %205 = vst.msk [vmem:[#allocation2 + $0x110] sm:$0xff] %vm169_vm0, %v7236_v1 }
  0x2c   : > { %207 = vst.msk [vmem:[#allocation2 + $0x120] sm:$0xff] %vm169_vm0, %v7236_v1 }
  0x2d   : > { %208 = vst.msk [vmem:[#allocation2 + $0x128] sm:$0xff] %vm169_vm0, %v7236_v1 }
  0x2e   : > { %210 = vst.msk [vmem:[#allocation2 + $0x138] sm:$0xff] %vm169_vm0, %v7236_v1 }
  0x2f   : > { %211 = vst.msk [vmem:[#allocation2 + $0x140] sm:$0xff] %vm169_vm0, %v7236_v1 }
  0x30   : > { %213 = vst.msk [vmem:[#allocation2 + $0x150] sm:$0xff] %vm169_vm0, %v7236_v1 }
  0x31   : > { %214 = vst.msk [vmem:[#allocation2 + $0x158] sm:$0xff] %vm169_vm0, %v7236_v1 }
  0x32   : > { %216 = vst.msk [vmem:[#allocation2 + $0x168] sm:$0xff] %vm169_vm0, %v7236_v1 }
  0x33   : > { %217 = vst.msk [vmem:[#allocation2 + $0x170] sm:$0xff] %vm169_vm0, %v7236_v1 }
  0x34   : > { %219 = vst.msk [vmem:[#allocation2 + $0x180] sm:$0xff] %vm169_vm0, %v7236_v1 }
  0x35   : > { %220 = vst.msk [vmem:[#allocation2 + $0x188] sm:$0xff] %vm169_vm0, %v7236_v1 }
  0x36   : > { %222 = vst.msk [vmem:[#allocation2 + $0x198] sm:$0xff] %vm169_vm0, %v7236_v1 }
  0x37   : > { %223 = vst.msk [vmem:[#allocation2 + $0x1a0] sm:$0xff] %vm169_vm0, %v7236_v1 }
  0x38   : > { %260 = vst.msk [vmem:[#allocation2 + $0x31] sm:$0xff] %vm169_vm0, %v227_v4 }
  0x39   : > { %258 = vst.msk [vmem:[#allocation2 + $0x19] sm:$0xff] %vm169_vm0, %v225_v5 }
  0x3a   : > { %179 = vst.msk [vmem:[#allocation2 + $0x40] sm:$0x3] %vm172_vm1, %v7236_v1 }
  0x3b   : > { %261 = vst.msk [vmem:[#allocation2 + $0x39] sm:$0xff] %vm169_vm0, %v228_v6 }
  0x3c   : > { %173 = vst.msk [vmem:[#allocation2 + $0x10] sm:$0x3] %vm172_vm1, %v7236_v1 }
  0x3d   : > { %176 = vst.msk [vmem:[#allocation2 + $0x28] sm:$0x3] %vm172_vm1, %v7236_v1 }
  0x3e   : > { %182 = vst.msk [vmem:[#allocation2 + $0x58] sm:$0x3] %vm172_vm1, %v7236_v1 }
  0x3f   : > { %v7408_v7 = vld [vmem:[#allocation2 + $0x30] sm:$0xff]  ;;  %185 = vst.msk [vmem:[#allocation2 + $0x70] sm:$0x3] %vm172_vm1, %v7236_v1 }
  0x40   : > { %348 = vperm.xlu2 %6889, %v7408_v7   ;;  %v7413_v8 = vld [vmem:[#allocation2 + $0x18] sm:$0xff]  ;;  %188 = vst.msk [vmem:[#allocation2 + $0x88] sm:$0x3] %vm172_vm1, %v7236_v1 }
  0x41   : > { %338 = vperm.xlu1 %6888, %v7413_v8   ;;  %191 = vst.msk [vmem:[#allocation2 + $0xa0] sm:$0x3] %vm172_vm1, %v7236_v1 }
  0x42   : > { %194 = vst.msk [vmem:[#allocation2 + $0xb8] sm:$0x3] %vm172_vm1, %v7236_v1  ;;  %v7426_v9 = vld [vmem:[#allocation2 + $0x38] sm:$0xff] }
  0x43   : > { %197 = vst.msk [vmem:[#allocation2 + $0xd0] sm:$0x3] %vm172_vm1, %v7236_v1  ;;  %v938_v3 = vld [vmem:[#allocation2 + $0x9] sm:$0xff] }
  0x44   : > { %200 = vst.msk [vmem:[#allocation2 + $0xe8] sm:$0x3] %vm172_vm1, %v7236_v1 }
  0x45   : > { %203 = vst.msk [vmem:[#allocation2 + $0x100] sm:$0x3] %vm172_vm1, %v7236_v1 }
  0x46   : > { %206 = vst.msk [vmem:[#allocation2 + $0x118] sm:$0x3] %vm172_vm1, %v7236_v1 }
  0x47   : > { %209 = vst.msk [vmem:[#allocation2 + $0x130] sm:$0x3] %vm172_vm1, %v7236_v1 }
  0x48   : > { %353 = vperm.xlu2 %6889, %v7426_v9   ;;  %212 = vst.msk [vmem:[#allocation2 + $0x148] sm:$0x3] %vm172_vm1, %v7236_v1 }
  0x49   : > { %215 = vst.msk [vmem:[#allocation2 + $0x160] sm:$0x3] %vm172_vm1, %v7236_v1 }
  0x4a   : > { %218 = vst.msk [vmem:[#allocation2 + $0x178] sm:$0x3] %vm172_vm1, %v7236_v1 }
  0x4b   : > { %221 = vst.msk [vmem:[#allocation2 + $0x190] sm:$0x3] %vm172_vm1, %v7236_v1 }
  0x4c   : > { %224 = vst.msk [vmem:[#allocation2 + $0x1a8] sm:$0x3] %vm172_vm1, %v7236_v1 }
  0x4d   : > { %259 = vst.msk [vmem:[#allocation2 + $0x21] sm:$0xff] %vm169_vm0, %v226_v10 }
  0x4e   : > { %262 = vst.msk [vmem:[#allocation2 + $0x49] sm:$0xff] %vm169_vm0, %v229_v11 }
  0x4f   : > { %264 = vst.msk [vmem:[#allocation2 + $0x61] sm:$0xff] %vm169_vm0, %v231_v12 }
  0x50   : > { %263 = vst.msk [vmem:[#allocation2 + $0x51] sm:$0xff] %vm169_vm0, %v230_v13 }
  0x51   : > { %265 = vst.msk [vmem:[#allocation2 + $0x69] sm:$0xff] %vm169_vm0, %v232_v14 }
  0x52   : > { %266 = vst.msk [vmem:[#allocation2 + $0x79] sm:$0xff] %vm169_vm0, %v233_v15 }
  0x53   : > { %267 = vst.msk [vmem:[#allocation2 + $0x81] sm:$0xff] %vm169_vm0, %v234_v16 }
  0x54   : > { %v7462_v20 = vld [vmem:[#allocation2 + $0x20] sm:$0xff]  ;;  %268 = vst.msk [vmem:[#allocation2 + $0x91] sm:$0xff] %vm169_vm0, %v235_v17 }
  0x55   : > { %343 = vperm.xlu1 %6888, %v7462_v20   ;;  %v300_v22 = vld [vmem:[#allocation2 + $0x48] sm:$0xff]  ;;  %270 = vst.msk [vmem:[#allocation2 + $0xa9] sm:$0xff] %vm169_vm0, %v237_v18 }
  0x56   : > { %358 = vperm.xlu0 %6887, %v300_v22   ;;  %v7469_v24 = vld [vmem:[#allocation2 + $0x60] sm:$0xff]  ;;  %269 = vst.msk [vmem:[#allocation2 + $0x99] sm:$0xff] %vm169_vm0, %v236_v19  ;;  %v943_v5 = vld [vmem:[#allocation2 + $0x49] sm:$0xff] }
  0x57   : > { %368 = vperm.xlu2 %6889, %v7469_v24   ;;  %271 = vst.msk [vmem:[#allocation2 + $0xb1] sm:$0xff] %vm169_vm0, %v238_v21  ;;  %v7480_v29 = vld [vmem:[#allocation2 + $0x50] sm:$0xff] }
  0x58   : > { %272 = vst.msk [vmem:[#allocation2 + $0xc1] sm:$0xff] %vm169_vm0, %v239_v23  ;;  %v303_v31 = vld [vmem:[#allocation2 + $0x68] sm:$0xff] }
  0x59   : > { %273 = vst.msk [vmem:[#allocation2 + $0xc9] sm:$0xff] %vm169_vm0, %v240_v25  ;;  %v7497_v36 = vld [vmem:[#allocation2 + $0x78] sm:$0xff]  ;;  %v946_v10 = vld [vmem:[#allocation2 + $0x69] sm:$0xff] }
  0x5a   : > { %274 = vst.msk [vmem:[#allocation2 + $0xd9] sm:$0xff] %vm169_vm0, %v241_v26  ;;  %v7485_v32 = vld [vmem:[#allocation2 + $0x80] sm:$0xff] }
  0x5b   : > { %276 = vst.msk [vmem:[#allocation2 + $0xf1] sm:$0xff] %vm169_vm0, %v243_v27  ;;  %v306_v37 = vld [vmem:[#allocation2 + $0x90] sm:$0xff] }
  0x5c   : > { %275 = vst.msk [vmem:[#allocation2 + $0xe1] sm:$0xff] %vm169_vm0, %v242_v28  ;;  %v7499_v38 = vld [vmem:[#allocation2 + $0xa8] sm:$0xff]  ;;  %v949_v12 = vld [vmem:[#allocation2 + $0x91] sm:$0xff] }
  0x5d   : > { %363 = vperm.xlu1 %6888, %v7480_v29   ;;  %277 = vst.msk [vmem:[#allocation2 + $0xf9] sm:$0xff] %vm169_vm0, %v244_v30  ;;  %v7509_v42 = vld [vmem:[#allocation2 + $0x98] sm:$0xff] }
  0x5e   : > { %373 = vperm.xlu0 %6887, %v303_v31   ;;  %278 = vst.msk [vmem:[#allocation2 + $0x109] sm:$0xff] %vm169_vm0, %v245_v33  ;;  %v309_v43 = vld [vmem:[#allocation2 + $0xb0] sm:$0xff] }
  0x5f   : > { %383 = vperm.xlu2 %6889, %v7485_v32   ;;  %279 = vst.msk [vmem:[#allocation2 + $0x111] sm:$0xff] %vm169_vm0, %v246_v34  ;;  %v7521_v48 = vld [vmem:[#allocation2 + $0xc0] sm:$0xff]  ;;  %v952_v15 = vld [vmem:[#allocation2 + $0xb1] sm:$0xff] }
  0x60   : > { %280 = vst.msk [vmem:[#allocation2 + $0x121] sm:$0xff] %vm169_vm0, %v247_v35  ;;  %v7511_v44 = vld [vmem:[#allocation2 + $0xc8] sm:$0xff] }
  0x61   : > { %282 = vst.msk [vmem:[#allocation2 + $0x139] sm:$0xff] %vm169_vm0, %v249_v39  ;;  %v312_v49 = vld [vmem:[#allocation2 + $0xd8] sm:$0xff] }
  0x62   : > { %281 = vst.msk [vmem:[#allocation2 + $0x129] sm:$0xff] %vm169_vm0, %v248_v40  ;;  %v7523_v50 = vld [vmem:[#allocation2 + $0xf0] sm:$0xff]  ;;  %v955_v19 = vld [vmem:[#allocation2 + $0xd9] sm:$0xff] }
  0x63   : > { %283 = vst.msk [vmem:[#allocation2 + $0x141] sm:$0xff] %vm169_vm0, %v250_v41  ;;  %v7529_v52 = vld [vmem:[#allocation2 + $0xe0] sm:$0xff] }
  0x64   : > { %284 = vst.msk [vmem:[#allocation2 + $0x151] sm:$0xff] %vm169_vm0, %v251_v45  ;;  %v315_v53 = vld [vmem:[#allocation2 + $0xf8] sm:$0xff] }
  0x65   : > { %378 = vperm.xlu1 %6888, %v7497_v36   ;;  %285 = vst.msk [vmem:[#allocation2 + $0x159] sm:$0xff] %vm169_vm0, %v252_v46  ;;  %v7535_v55 = vld [vmem:[#allocation2 + $0x108] sm:$0xff]  ;;  %v958_v25 = vld [vmem:[#allocation2 + $0xf9] sm:$0xff] }
  0x66   : > { %388 = vperm.xlu0 %6887, %v306_v37   ;;  %286 = vst.msk [vmem:[#allocation2 + $0x169] sm:$0xff] %vm169_vm0, %v253_v47  ;;  %v7531_v54 = vld [vmem:[#allocation2 + $0x110] sm:$0xff] }
  0x67   : > { %398 = vperm.xlu2 %6889, %v7499_v38   ;;  %287 = vst.msk [vmem:[#allocation2 + $0x171] sm:$0xff] %vm169_vm0, %v254_v51  ;;  %v318_v56 = vld [vmem:[#allocation2 + $0x120] sm:$0xff]  ;;  %v1581_v47 = vld [vmem:[#allocation2 + $0xa] sm:$0xff] }
  0x68   : > { %v7537_v57 = vld [vmem:[#allocation2 + $0x138] sm:$0xff]  ;;  %v961_v30 = vld [vmem:[#allocation2 + $0x121] sm:$0xff] }
  0x69   : > { %v7541_v58 = vld [vmem:[#allocation2 + $0x128] sm:$0xff] }
  0x6a   : > { %v321_v59 = vld [vmem:[#allocation2 + $0x140] sm:$0xff] }
  0x6b   : > { %v7547_v61 = vld [vmem:[#allocation2 + $0x150] sm:$0xff]  ;;  %v964_v35 = vld [vmem:[#allocation2 + $0x141] sm:$0xff] }
  0x6c   : > { %v7543_v60 = vld [vmem:[#allocation2 + $0x158] sm:$0xff] }
  0x6d   : > { %393 = vperm.xlu1 %6888, %v7509_v42   ;;  %v324_v62 = vld [vmem:[#allocation2 + $0x168] sm:$0xff] }
  0x6e   : > { %403 = vperm.xlu0 %6887, %v309_v43   ;;  %v7552_v1 = vld [vmem:[#allocation2 + $0x170] sm:$0xff] }
  0x6f   : > { %413 = vperm.xlu2 %6889, %v7511_v44   ;;  %v967_v41 = vld [vmem:[#allocation2 + $0x169] sm:$0xff] }
  0x75   : > { %408 = vperm.xlu1 %6888, %v7521_v48  }
  0x76   : > { %418 = vperm.xlu0 %6887, %v312_v49  }
  0x77   : > { %428 = vperm.xlu2 %6889, %v7523_v50  }
  0x7d   : > { %423 = vperm.xlu1 %6888, %v7529_v52  }
  0x7e   : > { %433 = vperm.xlu0 %6887, %v315_v53   ;;  %v13259_v53 = vmov 2  }
  0x7f   : > { %443 = vperm.xlu2 %6889, %v7531_v54  }
  0x85   : > { %438 = vperm.xlu1 %6888, %v7535_v55  }
  0x86   : > { %448 = vperm.xlu0 %6887, %v318_v56  }
  0x87   : > { %458 = vperm.xlu2 %6889, %v7537_v57  }
  0x8d   : > { %453 = vperm.xlu1 %6888, %v7541_v58  }
  0x8e   : > { %463 = vperm.xlu0 %6887, %v321_v59   ;;  %v7567_v13 = vpop.permute.xlu0 %328  ;;  %v1586_v59 = vld [vmem:[#allocation2 + $0x4a] sm:$0xff] }
  0x8f   : > { %473 = vperm.xlu2 %6889, %v7543_v60  }
  0x95   : > { %468 = vperm.xlu1 %6888, %v7547_v61  }
  0x96   : > { %478 = vperm.xlu0 %6887, %v324_v62   ;;  %v7576_v17 = vpop.permute.xlu0 %333 }
  0x97   : > { %6890 = vset.pattern.permute.xlu2 %v13261_v63 }
  0x98   : > { %552 = vperm.xlu2 %6890, %v7326_v2  }
  0x9a   : > { %v7555_v4 = vpop.permute.xlu2 %348 }
  0x9d   : > { %483 = vperm.xlu1 %6888, %v7552_v1  }
  0x9e   : > { %976 = vperm.xlu0 %6887, %v938_v3  }
  0xa0   : > { %564 = vperm.xlu2 %6890, %v7462_v20  }
  0xa2   : > { %v7560_v6 = vpop.permute.xlu2 %353 }
  0xa5   : > { %6891 = vset.pattern.permute.xlu1 %v13261_v63 }
  0xa6   : > { %560 = vperm.xlu1 %6891, %v7413_v8   ;;  %1001 = vperm.xlu0 %6887, %v943_v5  }
  0xa8   : > { %572 = vperm.xlu2 %6890, %v7426_v9  }
  0xae   : > { %568 = vperm.xlu1 %6891, %v7408_v7   ;;  %1016 = vperm.xlu0 %6887, %v946_v10   ;;  %v1589_v10 = vld [vmem:[#allocation2 + $0x6a] sm:$0xff] }
  0xb0   : > { %584 = vperm.xlu2 %6890, %v7469_v24  }
  0xb1   : > { %v7565_v11 = vpop.permute.xlu2 %368 }
  0xb3   : > { %v7573_v16 = vpop.permute.xlu1 %338 }
  0xb6   : > { %580 = vperm.xlu1 %6891, %v7480_v29   ;;  %1031 = vperm.xlu0 %6887, %v949_v12  }
  0xb8   : > { %596 = vperm.xlu2 %6890, %v7485_v32  }
  0xb9   : > { %v7571_v14 = vpop.permute.xlu2 %383 }
  0xbe   : > { %592 = vperm.xlu1 %6891, %v7497_v36   ;;  %1046 = vperm.xlu0 %6887, %v952_v15  }
  0xc0   : > { %608 = vperm.xlu2 %6890, %v7499_v38  }
  0xc1   : > { %v7579_v18 = vpop.permute.xlu2 %398 }
  0xc6   : > { %604 = vperm.xlu1 %6891, %v7509_v42   ;;  %1061 = vperm.xlu0 %6887, %v955_v19   ;;  %v1592_v19 = vld [vmem:[#allocation2 + $0x92] sm:$0xff] }
  0xc7   : > { %v7582_v21 = vpop.permute.xlu1 %343 }
  0xc8   : > { %v7584_v22 = vpop.permute.xlu0 %358  ;;  %620 = vperm.xlu2 %6890, %v7511_v44  }
  0xc9   : > { %v7587_v23 = vpop.permute.xlu2 %413 }
  0xce   : > { %616 = vperm.xlu1 %6891, %v7521_v48   ;;  %1076 = vperm.xlu0 %6887, %v958_v25  }
  0xcf   : > { %v7590_v26 = vpop.permute.xlu1 %363 }
  0xd0   : > { %v7592_v27 = vpop.permute.xlu0 %373  ;;  %632 = vperm.xlu2 %6890, %v7523_v50  }
  0xd1   : > { %v7595_v28 = vpop.permute.xlu2 %428 }
  0xd6   : > { %628 = vperm.xlu1 %6891, %v7529_v52   ;;  %1091 = vperm.xlu0 %6887, %v961_v30  }
  0xd7   : > { %v7598_v31 = vpop.permute.xlu1 %378 }
  0xd8   : > { %v7600_v33 = vpop.permute.xlu0 %388  ;;  %644 = vperm.xlu2 %6890, %v7531_v54  }
  0xd9   : > { %v7603_v34 = vpop.permute.xlu2 %443 }
  0xde   : > { %640 = vperm.xlu1 %6891, %v7535_v55   ;;  %1106 = vperm.xlu0 %6887, %v964_v35  }
  0xdf   : > { %v7606_v37 = vpop.permute.xlu1 %393 }
  0xe0   : > { %v7608_v39 = vpop.permute.xlu0 %403  ;;  %656 = vperm.xlu2 %6890, %v7537_v57  }
  0xe1   : > { %v7611_v40 = vpop.permute.xlu2 %458 }
  0xe6   : > { %652 = vperm.xlu1 %6891, %v7541_v58   ;;  %1121 = vperm.xlu0 %6887, %v967_v41  }
  0xe7   : > { %v7614_v43 = vpop.permute.xlu1 %408 }
  0xe8   : > { %v7616_v45 = vpop.permute.xlu0 %418  ;;  %668 = vperm.xlu2 %6890, %v7543_v60  }
  0xe9   : > { %v7619_v46 = vpop.permute.xlu2 %473 }
  0xee   : > { %664 = vperm.xlu1 %6891, %v7547_v61   ;;  %1619 = vperm.xlu0 %6887, %v1581_v47  }
  0xef   : > { %v7622_v49 = vpop.permute.xlu1 %423 }
  0xf0   : > { %v7624_v51 = vpop.permute.xlu0 %433  ;;  %6892 = vset.pattern.permute.xlu2 %v13259_v53 }
  0xf1   : > { %13332 = vst [vmem:[#allocation6_spill] sm:$0xff] %v7624_v51  ;;  %745 = vperm.xlu2 %6892, %v7326_v2  }
  0xf2   : > { %v7628_v56 = vpop.permute.xlu2 %552 }
  0xf6   : > { %676 = vperm.xlu1 %6891, %v7552_v1   ;;  %1644 = vperm.xlu0 %6887, %v1586_v59  }
  0xf7   : > { %v7631_v62 = vpop.permute.xlu1 %438 }
  0xf8   : > { %13333 = vst [vmem:[#allocation7_spill] sm:$0xff] %v7631_v62  ;;  %v7633_v3 = vpop.permute.xlu0 %448  ;;  %v256_v62 = vld [vmem:[%s7382_s28 + $0xf8] sm:$0xff] }
  0xf9   : > { %13334 = vst [vmem:[#allocation8_spill] sm:$0xff] %v7633_v3  ;;  %757 = vperm.xlu2 %6892, %v7462_v20   ;;  %v7972_v3 = vld [vmem:[#allocation2 + $0xca] sm:$0xff] }
  0xfa   : > { %v7636_v5 = vpop.permute.xlu2 %564  ;;  %289 = vst.msk [vmem:[#allocation2 + $0x189] sm:$0xff] %vm169_vm0, %v256_v62 }
  0xfe   : > { %6893 = vset.pattern.permute.xlu1 %v13259_v53  ;;  %1659 = vperm.xlu0 %6887, %v1589_v10  }
  0xff   : > { %753 = vperm.xlu1 %6893, %v7413_v8   ;;  %v7640_v2 = vpop.permute.xlu1 %453  ;;  %v1595_v8 = vld [vmem:[#allocation2 + $0xb2] sm:$0xff] }
 0x100   : > { %13335 = vst [vmem:[#allocation9_spill] sm:$0xff] %v7640_v2  ;;  %v7642_v12 = vpop.permute.xlu0 %463  ;;  %v7950_v2 = vld [vmem:[#allocation2 + $0x82] sm:$0xff] }
 0x101   : > { %13336 = vst [vmem:[#allocation10_spill] sm:$0xff] %v7642_v12  ;;  %765 = vperm.xlu2 %6892, %v7426_v9  }
 0x102   : > { %v7645_v15 = vpop.permute.xlu2 %572 }
 0x106   : > { %1674 = vperm.xlu0 %6887, %v1592_v19  }
 0x107   : > { %761 = vperm.xlu1 %6893, %v7408_v7   ;;  %v7648_v25 = vpop.permute.xlu1 %468  ;;  %v1598_v7 = vld [vmem:[#allocation2 + $0xda] sm:$0xff] }
 0x108   : > { %13337 = vst [vmem:[#allocation11_spill] sm:$0xff] %v7648_v25  ;;  %v7650_v30 = vpop.permute.xlu0 %478 }
 0x109   : > { %13338 = vst [vmem:[#allocation12_spill] sm:$0xff] %v7650_v30  ;;  %777 = vperm.xlu2 %6892, %v7469_v24   ;;  %v13396_v30 = vmov 1  }
 0x10a   : > { %v7653_v35 = vpop.permute.xlu2 %584 }
 0x10e   : > { %1689 = vperm.xlu0 %6887, %v1595_v8  }
 0x10f   : > { %773 = vperm.xlu1 %6893, %v7480_v29   ;;  %v7656_v41 = vpop.permute.xlu1 %483  ;;  %v1601_v29 = vld [vmem:[#allocation2 + $0xfa] sm:$0xff] }
 0x110   : > { %13339 = vst [vmem:[#allocation13_spill] sm:$0xff] %v7656_v41  ;;  %v7658_v9 = vpop.permute.xlu0 %976 }
 0x111   : > { %13340 = vst [vmem:[#allocation14_spill] sm:$0xff] %v7658_v9  ;;  %789 = vperm.xlu2 %6892, %v7485_v32  }
 0x112   : > { %v7661_v47 = vpop.permute.xlu2 %596 }
 0x113   : > { %13341 = vst [vmem:[#allocation15_spill] sm:$0xff] %v7661_v47 }
 0x116   : > { %1704 = vperm.xlu0 %6887, %v1598_v7  }
 0x117   : > { %785 = vperm.xlu1 %6893, %v7497_v36   ;;  %v1604_v36 = vld [vmem:[#allocation2 + $0x122] sm:$0xff] }
 0x118   : > { %v7664_v59 = vpop.permute.xlu1 %560  ;;  %v7666_v10 = vpop.permute.xlu0 %1001 }
 0x119   : > { %13342 = vst [vmem:[#allocation16_spill] sm:$0xff] %v7664_v59  ;;  %801 = vperm.xlu2 %6892, %v7499_v38  }
 0x11a   : > { %13343 = vst [vmem:[#allocation17_spill] sm:$0xff] %v7666_v10  ;;  %v7669_v19 = vpop.permute.xlu2 %608 }
 0x11b   : > { %13344 = vst [vmem:[#allocation18_spill] sm:$0xff] %v7669_v19 }
 0x11e   : > { %1719 = vperm.xlu0 %6887, %v1601_v29  }
 0x11f   : > { %797 = vperm.xlu1 %6893, %v7509_v42   ;;  %v1607_v42 = vld [vmem:[#allocation2 + $0x142] sm:$0xff] }
 0x120   : > { %v7672_v8 = vpop.permute.xlu1 %568  ;;  %v7674_v53 = vpop.permute.xlu0 %1016 }
 0x121   : > { %13345 = vst [vmem:[#allocation19_spill] sm:$0xff] %v7672_v8  ;;  %813 = vperm.xlu2 %6892, %v7511_v44  }
 0x122   : > { %13346 = vst [vmem:[#allocation20_spill] sm:$0xff] %v7674_v53  ;;  %v7677_v7 = vpop.permute.xlu2 %620 }
 0x123   : > { %13347 = vst [vmem:[#allocation21_spill] sm:$0xff] %v7677_v7 }
 0x126   : > { %1734 = vperm.xlu0 %6887, %v1604_v36  }
 0x127   : > { %809 = vperm.xlu1 %6893, %v7521_v48   ;;  %v1610_v48 = vld [vmem:[#allocation2 + $0x16a] sm:$0xff] }
 0x128   : > { %v7680_v63 = vpop.permute.xlu1 %580  ;;  %v7682_v0 = vpop.permute.xlu0 %1031 }
 0x129   : > { %13348 = vst [vmem:[#allocation22_spill] sm:$0xff] %v7680_v63  ;;  %825 = vperm.xlu2 %6892, %v7523_v50  }
 0x12a   : > { %13349 = vst [vmem:[#allocation23_spill] sm:$0xff] %v7682_v0  ;;  %v7685_v29 = vpop.permute.xlu2 %632 }
 0x12b   : > { %13350 = vst [vmem:[#allocation24_spill] sm:$0xff] %v7685_v29  ;;  %v7816_v29 = vld [vmem:[#allocation2 + $0xe1] sm:$0xff] }
 0x12e   : > { %1749 = vperm.xlu0 %6887, %v1607_v42  }
 0x12f   : > { %821 = vperm.xlu1 %6893, %v7529_v52  }
 0x130   : > { %v7688_v53 = vpop.permute.xlu1 %592  ;;  %v7690_v10 = vpop.permute.xlu0 %1046 }
 0x131   : > { %13351 = vst [vmem:[#allocation25_spill] sm:$0xff] %v7688_v53  ;;  %837 = vperm.xlu2 %6892, %v7531_v54  }
 0x132   : > { %13352 = vst [vmem:[#allocation26_spill] sm:$0xff] %v7690_v10  ;;  %v7693_v36 = vpop.permute.xlu2 %644 }
 0x133   : > { %13353 = vst [vmem:[#allocation27_spill] sm:$0xff] %v7693_v36 }
 0x136   : > { %1764 = vperm.xlu0 %6887, %v1610_v48  }
 0x137   : > { %833 = vperm.xlu1 %6893, %v7535_v55   ;;  %v7714_v55 = vld [vmem:[#allocation2 + $0x1] sm:$0xff] }
 0x138   : > { %v7696_v0 = vpop.permute.xlu1 %604  ;;  %v7698_v63 = vpop.permute.xlu0 %1061 }
 0x139   : > { %13354 = vst [vmem:[#allocation28_spill] sm:$0xff] %v7696_v0  ;;  %849 = vperm.xlu2 %6892, %v7537_v57  }
 0x13a   : > { %13355 = vst [vmem:[#allocation29_spill] sm:$0xff] %v7698_v63  ;;  %v7701_v42 = vpop.permute.xlu2 %656 }
 0x13b   : > { %13356 = vst [vmem:[#allocation30_spill] sm:$0xff] %v7701_v42 }
 0x13e   : > { %2262 = vperm.xlu0 %6887, %v7462_v20   ;;  %v13362_v20 = vmov 0  }
 0x13f   : > { %845 = vperm.xlu1 %6893, %v7541_v58  }
 0x140   : > { %v7705_v52 = vpop.permute.xlu1 %616  ;;  %v7707_v10 = vpop.permute.xlu0 %1076 }
 0x141   : > { %13357 = vst [vmem:[#allocation31_spill] sm:$0xff] %v7705_v52  ;;  %861 = vperm.xlu2 %6892, %v7543_v60  }
 0x142   : > { %13358 = vst [vmem:[#allocation32_spill] sm:$0xff] %v7707_v10  ;;  %v7710_v48 = vpop.permute.xlu2 %668  ;;  %v7726_v10 = vld [vmem:[#allocation2 + $0x21] sm:$0xff] }
 0x143   : > { %13359 = vst [vmem:[#allocation33_spill] sm:$0xff] %v7710_v48 }
 0x146   : > { %2287 = vperm.xlu0 %6887, %v7469_v24  }
 0x147   : > { %857 = vperm.xlu1 %6893, %v7547_v61  }
 0x148   : > { %v7716_v63 = vpop.permute.xlu1 %628  ;;  %v7718_v42 = vpop.permute.xlu0 %1091 }
 0x149   : > { %13360 = vst [vmem:[#allocation34_spill] sm:$0xff] %v7716_v63  ;;  %6894 = vset.pattern.permute.xlu2 %v13362_v20  ;;  %v7735_v63 = vld [vmem:[#allocation2 + $0x19] sm:$0xff] }
 0x14a   : > { %13361 = vst [vmem:[#allocation35_spill] sm:$0xff] %v7718_v42  ;;  %971 = vperm.xlu2 %6894, %v7714_v55  }
 0x14b   : > { %v7722_v58 = vpop.permute.xlu2 %745 }
 0x14c   : > { %13363 = vst [vmem:[#allocation36_spill] sm:$0xff] %v7722_v58 }
 0x14e   : > { %2302 = vperm.xlu0 %6887, %v7485_v32   ;;  %v7739_v32 = vld [vmem:[#allocation2 + $0x39] sm:$0xff] }
 0x14f   : > { %869 = vperm.xlu1 %6893, %v7552_v1  }
 0x150   : > { %v7728_v24 = vpop.permute.xlu1 %640  ;;  %v7730_v61 = vpop.permute.xlu0 %1106 }
 0x151   : > { %13364 = vst [vmem:[#allocation37_spill] sm:$0xff] %v7728_v24  ;;  %v7749_v24 = vld [vmem:[#allocation2 + $0x31] sm:$0xff] }
 0x152   : > { %13365 = vst [vmem:[#allocation38_spill] sm:$0xff] %v7730_v61  ;;  %986 = vperm.xlu2 %6894, %v7726_v10  }
 0x153   : > { %v7733_v42 = vpop.permute.xlu2 %757 }
 0x154   : > { %13366 = vst [vmem:[#allocation39_spill] sm:$0xff] %v7733_v42  ;;  %v255_v42 = vld [vmem:[%s7382_s28 + $0xf0] sm:$0xff]  ;;  %s6841_s28 = sshll.u32 %s7282_s16, 4  ;;  %s6763_s16 = sshll.u32 %s13200_s27, 4  ;;  %s6764_s16 = int_to_ptr.vmem [resolvable:$true] %s6763_s16 }
 0x155   : > { %288 = vst.msk [vmem:[#allocation2 + $0x181] sm:$0xff] %vm169_vm0, %v255_v42  ;;  %s6762_s4 = scalar_lea.hbm %s13258_s3, %s6841_s28 }
 0x156   : > { %2317 = vperm.xlu0 %6887, %v7499_v38   ;;  %v7753_v38 = vld [vmem:[#allocation2 + $0x61] sm:$0xff]  ;;  %s6765_s5 = sshll.u32 %s6762_s4, 4  ;;  %s6766_s5 = int_to_ptr.hbm [resolvable:$true] %s6765_s5 }
 0x157   : > { %6895 = vset.pattern.permute.xlu1 %v13362_v20  ;;  %s7185_s7 = sshra.s32 %s6766_s5, 4  ;;  %s7186_s7 = int_to_ptr.hbm [resolvable:$true] %s7185_s7 }
 0x158   : > { %981 = vperm.xlu1 %6895, %v7735_v63   ;;  %v7742_v1 = vpop.permute.xlu1 %652  ;;  %v7744_v58 = vpop.permute.xlu0 %1121  ;;  %s7187_s8 = scalar_lea.hbm %s7186_s7, 16  ;;  %p7192_p0 = scmp.lt.s32.totalorder %s7186_s7, %s13258_s3 }
 0x159   : > { %13367 = vst [vmem:[#allocation40_spill] sm:$0xff] %v7742_v1  ;;  %p7188_p11 = scmp.ne.s32.totalorder %s7186_s7, %s7187_s8  ;;  %p7193_p1 = scmp.lt.s32.totalorder %s7191_s11, %s7187_s8 }
 0x15a   : > { %13368 = vst [vmem:[#allocation41_spill] sm:$0xff] %v7744_v58  ;;  %996 = vperm.xlu2 %6894, %v7739_v32  }
 0x15b   : > { %v7747_v61 = vpop.permute.xlu2 %765  ;;  %p7189_p12 = pnand %p7188_p11, %p7299_p5  ;;  %p7194_p2 = por %p7193_p1, %p7192_p0 }
 0x15c   : > { %13369 = vst [vmem:[#allocation42_spill] sm:$0xff] %v7747_v61  ;;  %v7764_v61 = vld [vmem:[#allocation2 + $0x51] sm:$0xff] }
 0x15d   : > { %p7190_p13 = pneg %p7189_p12 }
 0x15e   : > { %2332 = vperm.xlu0 %6887, %v7511_v44   ;;  %v7767_v44 = vld [vmem:[#allocation2 + $0x81] sm:$0xff] }
 0x15f   : > { %p7195_p3 = pnand %p7194_p2, %p7190_p13 }
 0x160   : > { %991 = vperm.xlu1 %6895, %v7749_v24   ;;  %v7757_v48 = vpop.permute.xlu1 %664  ;;  %v7759_v1 = vpop.permute.xlu0 %1619 }
 0x161   : > { %13370 = vst [vmem:[#allocation43_spill] sm:$0xff] %v7757_v48 }
 0x162   : > { %13371 = vst [vmem:[#allocation44_spill] sm:$0xff] %v7759_v1  ;;  %1011 = vperm.xlu2 %6894, %v7753_v38   ;;  %v7777_v1 = vld [vmem:[#allocation2 + $0x79] sm:$0xff] }
 0x163   : > { %v7762_v58 = vpop.permute.xlu2 %777 }
 0x164   : > { %13372 = vst [vmem:[#allocation45_spill] sm:$0xff] %v7762_v58  ;;  %v7780_v58 = vld [vmem:[#allocation2 + $0xa9] sm:$0xff] }
 0x166   : > { %2347 = vperm.xlu0 %6887, %v7523_v50  }
 0x168   : > { %1006 = vperm.xlu1 %6895, %v7764_v61   ;;  %v7770_v52 = vpop.permute.xlu1 %676  ;;  %v7772_v42 = vpop.permute.xlu0 %1644 }
 0x169   : > { %13373 = vst [vmem:[#allocation46_spill] sm:$0xff] %v7770_v52 }
 0x16a   : > { %13374 = vst [vmem:[#allocation47_spill] sm:$0xff] %v7772_v42  ;;  %1026 = vperm.xlu2 %6894, %v7767_v44   ;;  %v7790_v42 = vld [vmem:[#allocation2 + $0x99] sm:$0xff] }
 0x16b   : > { %v7775_v48 = vpop.permute.xlu2 %789 }
 0x16c   : > { %13375 = vst [vmem:[#allocation48_spill] sm:$0xff] %v7775_v48  ;;  %v7793_v48 = vld [vmem:[#allocation2 + $0xc9] sm:$0xff] }
 0x16e   : > { %2362 = vperm.xlu0 %6887, %v7531_v54  }
 0x170   : > { %1021 = vperm.xlu1 %6895, %v7777_v1   ;;  %v7783_v50 = vpop.permute.xlu0 %1659 }
 0x171   : > { %13376 = vst [vmem:[#allocation49_spill] sm:$0xff] %v7783_v50  ;;  %v7785_v0 = vpop.permute.xlu1 %753 }
 0x172   : > { %13377 = vst [vmem:[#allocation50_spill] sm:$0xff] %v7785_v0  ;;  %1041 = vperm.xlu2 %6894, %v7780_v58   ;;  %v7803_v0 = vld [vmem:[#allocation2 + $0xc1] sm:$0xff] }
 0x173   : > { %v7788_v52 = vpop.permute.xlu2 %801 }
 0x174   : > { %13378 = vst [vmem:[#allocation51_spill] sm:$0xff] %v7788_v52  ;;  %v7806_v52 = vld [vmem:[#allocation2 + $0xf1] sm:$0xff] }
 0x176   : > { %2377 = vperm.xlu0 %6887, %v7537_v57  }
 0x178   : > { %1036 = vperm.xlu1 %6895, %v7790_v42   ;;  %v7796_v54 = vpop.permute.xlu0 %1674 }
 0x179   : > { %13379 = vst [vmem:[#allocation52_spill] sm:$0xff] %v7796_v54  ;;  %v7798_v36 = vpop.permute.xlu1 %761  ;;  %v2253_v54 = vld [vmem:[#allocation2 + $0x180] sm:$0xff] }
 0x17a   : > { %13380 = vst [vmem:[#allocation53_spill] sm:$0xff] %v7798_v36  ;;  %1056 = vperm.xlu2 %6894, %v7793_v48  }
 0x17b   : > { %v7801_v50 = vpop.permute.xlu2 %813 }
 0x17c   : > { %13381 = vst [vmem:[#allocation54_spill] sm:$0xff] %v7801_v50  ;;  %v7818_v50 = vld [vmem:[#allocation2 + $0x111] sm:$0xff] }
 0x17e   : > { %2392 = vperm.xlu0 %6887, %v7543_v60  }
 0x180   : > { %1051 = vperm.xlu1 %6895, %v7803_v0   ;;  %v7809_v57 = vpop.permute.xlu0 %1689 }
 0x181   : > { %13382 = vst [vmem:[#allocation55_spill] sm:$0xff] %v7809_v57  ;;  %v7811_v53 = vpop.permute.xlu1 %773 }
 0x182   : > { %13383 = vst [vmem:[#allocation56_spill] sm:$0xff] %v7811_v53  ;;  %1071 = vperm.xlu2 %6894, %v7806_v52   ;;  %v7828_v53 = vld [vmem:[#allocation2 + $0x109] sm:$0xff] }
 0x183   : > { %v7814_v36 = vpop.permute.xlu2 %825 }
 0x184   : > { %13384 = vst [vmem:[#allocation57_spill] sm:$0xff] %v7814_v36  ;;  %v7831_v36 = vld [vmem:[#allocation2 + $0x139] sm:$0xff] }
 0x186   : > { %2407 = vperm.xlu0 %6887, %v2253_v54  }
 0x188   : > { %1066 = vperm.xlu1 %6895, %v7816_v29   ;;  %v7821_v60 = vpop.permute.xlu0 %1704 }
 0x189   : > { %13385 = vst [vmem:[#allocation58_spill] sm:$0xff] %v7821_v60  ;;  %v7823_v7 = vpop.permute.xlu1 %785 }
 0x18a   : > { %13386 = vst [vmem:[#allocation59_spill] sm:$0xff] %v7823_v7  ;;  %1086 = vperm.xlu2 %6894, %v7818_v50   ;;  %v7841_v7 = vld [vmem:[#allocation2 + $0x129] sm:$0xff] }
 0x18b   : > { %v7826_v57 = vpop.permute.xlu2 %837 }
 0x18c   : > { %13387 = vst [vmem:[#allocation60_spill] sm:$0xff] %v7826_v57  ;;  %v7844_v57 = vld [vmem:[#allocation2 + $0x159] sm:$0xff] }
 0x18e   : > { %2905 = vperm.xlu0 %6887, %v7726_v10  }
 0x190   : > { %1081 = vperm.xlu1 %6895, %v7828_v53   ;;  %v7834_v54 = vpop.permute.xlu0 %1719 }
 0x191   : > { %13388 = vst [vmem:[#allocation61_spill] sm:$0xff] %v7834_v54  ;;  %v7836_v8 = vpop.permute.xlu1 %797 }
 0x192   : > { %13389 = vst [vmem:[#allocation62_spill] sm:$0xff] %v7836_v8  ;;  %1101 = vperm.xlu2 %6894, %v7831_v36   ;;  %v7854_v8 = vld [vmem:[#allocation2 + $0x151] sm:$0xff] }
 0x193   : > { %v7839_v60 = vpop.permute.xlu2 %849 }
 0x194   : > { %13390 = vst [vmem:[#allocation63_spill] sm:$0xff] %v7839_v60 }
 0x196   : > { %2930 = vperm.xlu0 %6887, %v7753_v38  }
 0x198   : > { %1096 = vperm.xlu1 %6895, %v7841_v7   ;;  %v7847_v9 = vpop.permute.xlu0 %1734 }
 0x199   : > { %13391 = vst [vmem:[#allocation64_spill] sm:$0xff] %v7847_v9  ;;  %v7849_v41 = vpop.permute.xlu1 %809 }
 0x19a   : > { %13392 = vst [vmem:[#allocation65_spill] sm:$0xff] %v7849_v41  ;;  %1116 = vperm.xlu2 %6894, %v7844_v57   ;;  %v7866_v41 = vld [vmem:[#allocation2 + $0x171] sm:$0xff] }
 0x19b   : > { %v7852_v54 = vpop.permute.xlu2 %861 }
 0x19c   : > { %13393 = vst [vmem:[#allocation66_spill] sm:$0xff] %v7852_v54 }
 0x19e   : > { %2945 = vperm.xlu0 %6887, %v7767_v44  }
 0x1a0   : > { %1111 = vperm.xlu1 %6895, %v7854_v8   ;;  %v7858_v60 = vpop.permute.xlu0 %1749 }
 0x1a1   : > { %13394 = vst [vmem:[#allocation67_spill] sm:$0xff] %v7858_v60  ;;  %v7860_v19 = vpop.permute.xlu1 %821 }
 0x1a2   : > { %13395 = vst [vmem:[#allocation68_spill] sm:$0xff] %v7860_v19  ;;  %6896 = vset.pattern.permute.xlu2 %v13396_v30 }
 0x1a3   : > { %1195 = vperm.xlu2 %6896, %v7714_v55  }
 0x1a4   : > { %v7864_v9 = vpop.permute.xlu2 %971 }
 0x1a5   : > { %13397 = vst [vmem:[#allocation69_spill] sm:$0xff] %v7864_v9 }
 0x1a6   : > { %2960 = vperm.xlu0 %6887, %v7780_v58  }
 0x1a8   : > { %1126 = vperm.xlu1 %6895, %v7866_v41   ;;  %v7870_v54 = vpop.permute.xlu0 %1764 }
 0x1a9   : > { %13398 = vst [vmem:[#allocation70_spill] sm:$0xff] %v7870_v54  ;;  %v7872_v25 = vpop.permute.xlu1 %833 }
 0x1aa   : > { %13399 = vst [vmem:[#allocation71_spill] sm:$0xff] %v7872_v25 }
 0x1ab   : > { %1207 = vperm.xlu2 %6896, %v7726_v10  }
 0x1ac   : > { %v7875_v60 = vpop.permute.xlu2 %986 }
 0x1ad   : > { %13400 = vst [vmem:[#allocation72_spill] sm:$0xff] %v7875_v60 }
 0x1ae   : > { %2975 = vperm.xlu0 %6887, %v7793_v48  }
 0x1b0   : > { %6897 = vset.pattern.permute.xlu1 %v13396_v30  ;;  %v7879_v19 = vpop.permute.xlu0 %2262 }
 0x1b1   : > { %13401 = vst [vmem:[#allocation73_spill] sm:$0xff] %v7879_v19  ;;  %1203 = vperm.xlu1 %6897, %v7735_v63   ;;  %v7882_v9 = vpop.permute.xlu1 %845 }
 0x1b2   : > { %13402 = vst [vmem:[#allocation74_spill] sm:$0xff] %v7882_v9 }
 0x1b3   : > { %1215 = vperm.xlu2 %6896, %v7739_v32  }
 0x1b4   : > { %v7885_v59 = vpop.permute.xlu2 %996 }
 0x1b5   : > { %13403 = vst [vmem:[#allocation75_spill] sm:$0xff] %v7885_v59 }
 0x1b6   : > { %2990 = vperm.xlu0 %6887, %v7806_v52  }
 0x1b8   : > { %v7888_v54 = vpop.permute.xlu0 %2287 }
 0x1b9   : > { %13404 = vst [vmem:[#allocation76_spill] sm:$0xff] %v7888_v54  ;;  %1211 = vperm.xlu1 %6897, %v7749_v24   ;;  %v7891_v60 = vpop.permute.xlu1 %857 }
 0x1ba   : > { %13405 = vst [vmem:[#allocation77_spill] sm:$0xff] %v7891_v60 }
 0x1bb   : > { %1227 = vperm.xlu2 %6896, %v7753_v38  }
 0x1bc   : > { %v7894_v25 = vpop.permute.xlu2 %1011 }
 0x1bd   : > { %13406 = vst [vmem:[#allocation78_spill] sm:$0xff] %v7894_v25 }
 0x1be   : > { %3005 = vperm.xlu0 %6887, %v7818_v50  }
 0x1c0   : > { %v7897_v19 = vpop.permute.xlu0 %2302 }
 0x1c1   : > { %13407 = vst [vmem:[#allocation79_spill] sm:$0xff] %v7897_v19  ;;  %1223 = vperm.xlu1 %6897, %v7764_v61   ;;  %v7900_v9 = vpop.permute.xlu1 %869 }
 0x1c2   : > { %13408 = vst [vmem:[#allocation80_spill] sm:$0xff] %v7900_v9 }
 0x1c3   : > { %1239 = vperm.xlu2 %6896, %v7767_v44  }
 0x1c4   : > { %v7903_v59 = vpop.permute.xlu2 %1026 }
 0x1c5   : > { %13409 = vst [vmem:[#allocation81_spill] sm:$0xff] %v7903_v59  ;;  %v2896_v59 = vld [vmem:[#allocation2 + $0x181] sm:$0xff] }
 0x1c6   : > { %3020 = vperm.xlu0 %6887, %v7831_v36  }
 0x1c8   : > { %v7906_v54 = vpop.permute.xlu0 %2317 }
 0x1c9   : > { %13410 = vst [vmem:[#allocation82_spill] sm:$0xff] %v7906_v54  ;;  %1235 = vperm.xlu1 %6897, %v7777_v1  }
 0x1ca   : > { %v7909_v60 = vpop.permute.xlu1 %981 }
 0x1cb   : > { %13411 = vst [vmem:[#allocation83_spill] sm:$0xff] %v7909_v60  ;;  %1251 = vperm.xlu2 %6896, %v7780_v58  }
 0x1cc   : > { %v7912_v25 = vpop.permute.xlu2 %1041 }
 0x1cd   : > { %13412 = vst [vmem:[#allocation84_spill] sm:$0xff] %v7912_v25  ;;  %v7928_v25 = vld [vmem:[#allocation2 + $0x22] sm:$0xff] }
 0x1ce   : > { %3035 = vperm.xlu0 %6887, %v7844_v57  }
 0x1d0   : > { %v7915_v19 = vpop.permute.xlu0 %2332 }
 0x1d1   : > { %13413 = vst [vmem:[#allocation85_spill] sm:$0xff] %v7915_v19  ;;  %1247 = vperm.xlu1 %6897, %v7790_v42  }
 0x1d2   : > { %v7918_v9 = vpop.permute.xlu1 %991 }
 0x1d3   : > { %13414 = vst [vmem:[#allocation86_spill] sm:$0xff] %v7918_v9  ;;  %1263 = vperm.xlu2 %6896, %v7793_v48  }
 0x1d4   : > { %v7921_v54 = vpop.permute.xlu2 %1056 }
 0x1d5   : > { %13415 = vst [vmem:[#allocation87_spill] sm:$0xff] %v7921_v54 }
 0x1d6   : > { %3050 = vperm.xlu0 %6887, %v2896_v59   ;;  %v7939_v59 = vld [vmem:[#allocation2 + $0x62] sm:$0xff] }
 0x1d8   : > { %v7923_v12 = vpop.permute.xlu0 %2347 }
 0x1d9   : > { %13416 = vst [vmem:[#allocation88_spill] sm:$0xff] %v7923_v12  ;;  %1259 = vperm.xlu1 %6897, %v7803_v0  }
 0x1da   : > { %v7926_v60 = vpop.permute.xlu1 %1006 }
 0x1db   : > { %13417 = vst [vmem:[#allocation89_spill] sm:$0xff] %v7926_v60  ;;  %1275 = vperm.xlu2 %6896, %v7806_v52  }
 0x1dc   : > { %v7931_v19 = vpop.permute.xlu2 %1071 }
 0x1dd   : > { %13418 = vst [vmem:[#allocation90_spill] sm:$0xff] %v7931_v19 }
 0x1de   : > { %3548 = vperm.xlu0 %6887, %v7928_v25  }
 0x1e0   : > { %v7934_v9 = vpop.permute.xlu0 %2362 }
 0x1e1   : > { %13419 = vst [vmem:[#allocation91_spill] sm:$0xff] %v7934_v9  ;;  %1271 = vperm.xlu1 %6897, %v7816_v29  }
 0x1e2   : > { %v7937_v54 = vpop.permute.xlu1 %1021 }
 0x1e3   : > { %13420 = vst [vmem:[#allocation92_spill] sm:$0xff] %v7937_v54  ;;  %1287 = vperm.xlu2 %6896, %v7818_v50  }
 0x1e4   : > { %v7942_v12 = vpop.permute.xlu2 %1086 }
 0x1e5   : > { %13421 = vst [vmem:[#allocation93_spill] sm:$0xff] %v7942_v12 }
 0x1e6   : > { %3573 = vperm.xlu0 %6887, %v7939_v59  }
 0x1e8   : > { %v7945_v60 = vpop.permute.xlu0 %2377 }
 0x1e9   : > { %13422 = vst [vmem:[#allocation94_spill] sm:$0xff] %v7945_v60  ;;  %1283 = vperm.xlu1 %6897, %v7828_v53   ;;  %v7961_v60 = vld [vmem:[#allocation2 + $0xaa] sm:$0xff] }
 0x1ea   : > { %v7948_v19 = vpop.permute.xlu1 %1036 }
 0x1eb   : > { %13423 = vst [vmem:[#allocation95_spill] sm:$0xff] %v7948_v19  ;;  %1299 = vperm.xlu2 %6896, %v7831_v36  }
 0x1ec   : > { %v7953_v9 = vpop.permute.xlu2 %1101 }
 0x1ed   : > { %13424 = vst [vmem:[#allocation96_spill] sm:$0xff] %v7953_v9 }
 0x1ee   : > { %3588 = vperm.xlu0 %6887, %v7950_v2  }
 0x1f0   : > { %v7956_v54 = vpop.permute.xlu0 %2392 }
 0x1f1   : > { %13425 = vst [vmem:[#allocation97_spill] sm:$0xff] %v7956_v54  ;;  %1295 = vperm.xlu1 %6897, %v7841_v7   ;;  %v13430_v54 = vmov 2  }
 0x1f2   : > { %v7959_v12 = vpop.permute.xlu1 %1051 }
 0x1f3   : > { %13426 = vst [vmem:[#allocation98_spill] sm:$0xff] %v7959_v12  ;;  %1311 = vperm.xlu2 %6896, %v7844_v57  }
 0x1f4   : > { %v7964_v19 = vpop.permute.xlu2 %1116 }
 0x1f5   : > { %13427 = vst [vmem:[#allocation99_spill] sm:$0xff] %v7964_v19 }
 0x1f6   : > { %3603 = vperm.xlu0 %6887, %v7961_v60  }
 0x1f8   : > { %v7967_v47 = vpop.permute.xlu0 %2407 }
 0x1f9   : > { %13428 = vst [vmem:[#allocation100_spill] sm:$0xff] %v7967_v47  ;;  %1307 = vperm.xlu1 %6897, %v7854_v8  }
 0x1fa   : > { %v7970_v9 = vpop.permute.xlu1 %1066 }
 0x1fb   : > { %13429 = vst [vmem:[#allocation101_spill] sm:$0xff] %v7970_v9  ;;  %6898 = vset.pattern.permute.xlu2 %v13430_v54  ;;  %v7986_v9 = vld [vmem:[#allocation2 + $0xf2] sm:$0xff] }
 0x1fc   : > { %1388 = vperm.xlu2 %6898, %v7714_v55  }
 0x1fd   : > { %v7976_v12 = vpop.permute.xlu2 %1195 }
 0x1fe   : > { %13431 = vst [vmem:[#allocation102_spill] sm:$0xff] %v7976_v12  ;;  %3618 = vperm.xlu0 %6887, %v7972_v3   ;;  %v8009_v12 = vld [vmem:[#allocation2 + $0x13a] sm:$0xff] }
 0x200   : > { %v7981_v19 = vpop.permute.xlu0 %2905 }
 0x201   : > { %13432 = vst [vmem:[#allocation103_spill] sm:$0xff] %v7981_v19  ;;  %1319 = vperm.xlu1 %6897, %v7866_v41   ;;  %v7998_v19 = vld [vmem:[#allocation2 + $0x112] sm:$0xff] }
 0x202   : > { %v7984_v47 = vpop.permute.xlu1 %1081 }
 0x203   : > { %13433 = vst [vmem:[#allocation104_spill] sm:$0xff] %v7984_v47 }
 0x204   : > { %1400 = vperm.xlu2 %6898, %v7726_v10  }
 0x205   : > { %v7989_v51 = vpop.permute.xlu2 %1207 }
 0x206   : > { %13434 = vst [vmem:[#allocation105_spill] sm:$0xff] %v7989_v51  ;;  %3633 = vperm.xlu0 %6887, %v7986_v9  }
 0x208   : > { %v7992_v55 = vpop.permute.xlu0 %2930 }
 0x209   : > { %13435 = vst [vmem:[#allocation106_spill] sm:$0xff] %v7992_v55  ;;  %6899 = vset.pattern.permute.xlu1 %v13430_v54  ;;  %v8020_v55 = vld [vmem:[#allocation2 + $0x15a] sm:$0xff] }
 0x20a   : > { %1396 = vperm.xlu1 %6899, %v7735_v63   ;;  %v7996_v62 = vpop.permute.xlu1 %1096 }
 0x20b   : > { %13436 = vst [vmem:[#allocation107_spill] sm:$0xff] %v7996_v62 }
 0x20c   : > { %1408 = vperm.xlu2 %6898, %v7739_v32  }
 0x20d   : > { %v8001_v47 = vpop.permute.xlu2 %1215 }
 0x20e   : > { %13437 = vst [vmem:[#allocation108_spill] sm:$0xff] %v8001_v47  ;;  %3648 = vperm.xlu0 %6887, %v7998_v19  }
 0x210   : > { %v8004_v10 = vpop.permute.xlu0 %2945 }
 0x211   : > { %13438 = vst [vmem:[#allocation109_spill] sm:$0xff] %v8004_v10 }
 0x212   : > { %1404 = vperm.xlu1 %6899, %v7749_v24   ;;  %v8007_v51 = vpop.permute.xlu1 %1111 }
 0x213   : > { %13439 = vst [vmem:[#allocation110_spill] sm:$0xff] %v8007_v51 }
 0x214   : > { %1420 = vperm.xlu2 %6898, %v7753_v38  }
 0x215   : > { %v8012_v63 = vpop.permute.xlu2 %1227 }
 0x216   : > { %13440 = vst [vmem:[#allocation111_spill] sm:$0xff] %v8012_v63  ;;  %3663 = vperm.xlu0 %6887, %v8009_v12   ;;  %v3539_v63 = vld [vmem:[#allocation2 + $0x182] sm:$0xff] }
 0x218   : > { %v8015_v62 = vpop.permute.xlu0 %2960 }
 0x219   : > { %13441 = vst [vmem:[#allocation112_spill] sm:$0xff] %v8015_v62  ;;  %v8131_v62 = vld [vmem:[#allocation2 + $0x7a] sm:$0xff] }
 0x21a   : > { %1416 = vperm.xlu1 %6899, %v7764_v61   ;;  %v8018_v47 = vpop.permute.xlu1 %1126 }
 0x21b   : > { %13442 = vst [vmem:[#allocation113_spill] sm:$0xff] %v8018_v47 }
 0x21c   : > { %1432 = vperm.xlu2 %6898, %v7767_v44  }
 0x21d   : > { %v8023_v24 = vpop.permute.xlu2 %1239 }
 0x21e   : > { %13443 = vst [vmem:[#allocation114_spill] sm:$0xff] %v8023_v24  ;;  %3678 = vperm.xlu0 %6887, %v8020_v55   ;;  %v8039_v24 = vld [vmem:[#allocation2 + $0x38] sm:$0xff] }
 0x220   : > { %v8026_v51 = vpop.permute.xlu0 %2975 }
 0x221   : > { %13444 = vst [vmem:[#allocation115_spill] sm:$0xff] %v8026_v51 }
 0x222   : > { %1428 = vperm.xlu1 %6899, %v7777_v1  }
 0x223   : > { %v8029_v38 = vpop.permute.xlu1 %1203 }
 0x224   : > { %13445 = vst [vmem:[#allocation116_spill] sm:$0xff] %v8029_v38  ;;  %1444 = vperm.xlu2 %6898, %v7780_v58  }
 0x225   : > { %v8032_v61 = vpop.permute.xlu2 %1251 }
 0x226   : > { %13446 = vst [vmem:[#allocation117_spill] sm:$0xff] %v8032_v61  ;;  %3693 = vperm.xlu0 %6887, %v3539_v63   ;;  %v4159_v63 = vld [vmem:[#allocation2 + $0x78] sm:$0xff] }
 0x228   : > { %v8034_v47 = vpop.permute.xlu0 %2990 }
 0x229   : > { %13447 = vst [vmem:[#allocation118_spill] sm:$0xff] %v8034_v47 }
 0x22a   : > { %1440 = vperm.xlu1 %6899, %v7790_v42  }
 0x22b   : > { %v8037_v44 = vpop.permute.xlu1 %1211 }
 0x22c   : > { %13448 = vst [vmem:[#allocation119_spill] sm:$0xff] %v8037_v44  ;;  %1456 = vperm.xlu2 %6898, %v7793_v48  }
 0x22d   : > { %v8042_v51 = vpop.permute.xlu2 %1263 }
 0x22e   : > { %13449 = vst [vmem:[#allocation120_spill] sm:$0xff] %v8042_v51  ;;  %4192 = vperm.xlu0 %6887, %v8039_v24   ;;  %v4162_v51 = vld [vmem:[#allocation2 + $0x98] sm:$0xff] }
 0x230   : > { %v8045_v38 = vpop.permute.xlu0 %3005 }
 0x231   : > { %13450 = vst [vmem:[#allocation121_spill] sm:$0xff] %v8045_v38 }
 0x232   : > { %1452 = vperm.xlu1 %6899, %v7803_v0  }
 0x233   : > { %v8048_v58 = vpop.permute.xlu1 %1223 }
 0x234   : > { %13451 = vst [vmem:[#allocation122_spill] sm:$0xff] %v8048_v58  ;;  %1468 = vperm.xlu2 %6898, %v7806_v52  }
 0x235   : > { %v8051_v61 = vpop.permute.xlu2 %1275 }
 0x236   : > { %13452 = vst [vmem:[#allocation123_spill] sm:$0xff] %v8051_v61  ;;  %4217 = vperm.xlu0 %6887, %v4159_v63   ;;  %v4165_v61 = vld [vmem:[#allocation2 + $0xc0] sm:$0xff] }
 0x238   : > { %v8053_v44 = vpop.permute.xlu0 %3020 }
 0x239   : > { %13453 = vst [vmem:[#allocation124_spill] sm:$0xff] %v8053_v44  ;;  %v4180_v44 = vld [vmem:[#allocation2 + $0x170] sm:$0xff] }
 0x23a   : > { %1464 = vperm.xlu1 %6899, %v7816_v29  }
 0x23b   : > { %v8056_v48 = vpop.permute.xlu1 %1235 }
 0x23c   : > { %13454 = vst [vmem:[#allocation125_spill] sm:$0xff] %v8056_v48  ;;  %1480 = vperm.xlu2 %6898, %v7818_v50  }
 0x23d   : > { %v8059_v38 = vpop.permute.xlu2 %1287 }
 0x23e   : > { %13455 = vst [vmem:[#allocation126_spill] sm:$0xff] %v8059_v38  ;;  %4232 = vperm.xlu0 %6887, %v4162_v51   ;;  %v4168_v38 = vld [vmem:[#allocation2 + $0xe0] sm:$0xff] }
 0x240   : > { %v8061_v47 = vpop.permute.xlu0 %3035 }
 0x241   : > { %13456 = vst [vmem:[#allocation127_spill] sm:$0xff] %v8061_v47 }
 0x242   : > { %1476 = vperm.xlu1 %6899, %v7828_v53  }
 0x243   : > { %v8064_v52 = vpop.permute.xlu1 %1247 }
 0x244   : > { %13457 = vst [vmem:[#allocation128_spill] sm:$0xff] %v8064_v52  ;;  %1492 = vperm.xlu2 %6898, %v7831_v36   ;;  %v8080_v36 = vld [vmem:[#allocation2 + $0x2] sm:$0xff] }
 0x245   : > { %v8067_v63 = vpop.permute.xlu2 %1299 }
 0x246   : > { %13458 = vst [vmem:[#allocation129_spill] sm:$0xff] %v8067_v63  ;;  %4247 = vperm.xlu0 %6887, %v4165_v61   ;;  %v4171_v61 = vld [vmem:[#allocation2 + $0x108] sm:$0xff] }
 0x248   : > { %v8069_v58 = vpop.permute.xlu0 %3050 }
 0x249   : > { %13459 = vst [vmem:[#allocation130_spill] sm:$0xff] %v8069_v58  ;;  %v4177_v58 = vld [vmem:[#allocation2 + $0x150] sm:$0xff] }
 0x24a   : > { %1488 = vperm.xlu1 %6899, %v7841_v7  }
 0x24b   : > { %v8072_v50 = vpop.permute.xlu1 %1259 }
 0x24c   : > { %13460 = vst [vmem:[#allocation131_spill] sm:$0xff] %v8072_v50  ;;  %1504 = vperm.xlu2 %6898, %v7844_v57  }
 0x24d   : > { %v8075_v51 = vpop.permute.xlu2 %1311 }
 0x24e   : > { %13461 = vst [vmem:[#allocation132_spill] sm:$0xff] %v8075_v51  ;;  %4262 = vperm.xlu0 %6887, %v4168_v38   ;;  %v4174_v51 = vld [vmem:[#allocation2 + $0x128] sm:$0xff] }
 0x250   : > { %v8077_v48 = vpop.permute.xlu0 %3548 }
 0x251   : > { %13462 = vst [vmem:[#allocation133_spill] sm:$0xff] %v8077_v48  ;;  %v8098_v48 = vld [vmem:[#allocation2 + $0x1a] sm:$0xff] }
 0x252   : > { %1500 = vperm.xlu1 %6899, %v7854_v8  }
 0x253   : > { %v8082_v63 = vpop.permute.xlu1 %1271 }
 0x254   : > { %13463 = vst [vmem:[#allocation134_spill] sm:$0xff] %v8082_v63  ;;  %6900 = vset.pattern.permute.xlu2 %v13362_v20 }
 0x255   : > { %1614 = vperm.xlu2 %6900, %v8080_v36  }
 0x256   : > { %4277 = vperm.xlu0 %6887, %v4171_v61   ;;  %v8086_v50 = vpop.permute.xlu2 %1388  ;;  %v8101_v61 = vld [vmem:[#allocation2 + $0x3a] sm:$0xff] }
 0x257   : > { %13464 = vst [vmem:[#allocation135_spill] sm:$0xff] %v8086_v50 }
 0x258   : > { %v8088_v57 = vpop.permute.xlu0 %3573 }
 0x259   : > { %13465 = vst [vmem:[#allocation136_spill] sm:$0xff] %v8088_v57  ;;  %v8121_v57 = vld [vmem:[#allocation2 + $0x52] sm:$0xff] }
 0x25a   : > { %1512 = vperm.xlu1 %6899, %v7866_v41  }
 0x25b   : > { %v8091_v38 = vpop.permute.xlu1 %1283 }
 0x25c   : > { %13466 = vst [vmem:[#allocation137_spill] sm:$0xff] %v8091_v38 }
 0x25d   : > { %1629 = vperm.xlu2 %6900, %v7928_v25  }
 0x25e   : > { %4292 = vperm.xlu0 %6887, %v4174_v51   ;;  %v8094_v52 = vpop.permute.xlu2 %1400 }
 0x25f   : > { %13467 = vst [vmem:[#allocation138_spill] sm:$0xff] %v8094_v52  ;;  %v8111_v52 = vld [vmem:[#allocation2 + $0x32] sm:$0xff] }
 0x260   : > { %v8096_v63 = vpop.permute.xlu0 %3588 }
 0x261   : > { %13468 = vst [vmem:[#allocation139_spill] sm:$0xff] %v8096_v63 }
 0x262   : > { %6901 = vset.pattern.permute.xlu1 %v13362_v20 }
 0x263   : > { %1624 = vperm.xlu1 %6901, %v8098_v48   ;;  %v8104_v50 = vpop.permute.xlu1 %1295 }
 0x264   : > { %13469 = vst [vmem:[#allocation140_spill] sm:$0xff] %v8104_v50 }
 0x265   : > { %1639 = vperm.xlu2 %6900, %v8101_v61  }
 0x266   : > { %4307 = vperm.xlu0 %6887, %v4177_v58   ;;  %v8107_v38 = vpop.permute.xlu2 %1408 }
 0x267   : > { %13470 = vst [vmem:[#allocation141_spill] sm:$0xff] %v8107_v38  ;;  %v4183_v38 = vld [vmem:[#allocation2 + $0x198] sm:$0xff] }
 0x268   : > { %v8109_v51 = vpop.permute.xlu0 %3603 }
 0x269   : > { %13471 = vst [vmem:[#allocation142_spill] sm:$0xff] %v8109_v51 }
 0x26b   : > { %1634 = vperm.xlu1 %6901, %v8111_v52   ;;  %v8114_v47 = vpop.permute.xlu1 %1307 }
 0x26c   : > { %13472 = vst [vmem:[#allocation143_spill] sm:$0xff] %v8114_v47 }
 0x26d   : > { %1654 = vperm.xlu2 %6900, %v7939_v59  }
 0x26e   : > { %4322 = vperm.xlu0 %6887, %v4180_v44   ;;  %v8117_v63 = vpop.permute.xlu2 %1420 }
 0x26f   : > { %13473 = vst [vmem:[#allocation144_spill] sm:$0xff] %v8117_v63 }
 0x270   : > { %v8119_v50 = vpop.permute.xlu0 %3618 }
 0x271   : > { %13474 = vst [vmem:[#allocation145_spill] sm:$0xff] %v8119_v50  ;;  %v8142_v50 = vld [vmem:[#allocation2 + $0x9a] sm:$0xff] }
 0x273   : > { %1649 = vperm.xlu1 %6901, %v8121_v57   ;;  %v8124_v58 = vpop.permute.xlu1 %1319 }
 0x274   : > { %13475 = vst [vmem:[#allocation146_spill] sm:$0xff] %v8124_v58 }
 0x275   : > { %1669 = vperm.xlu2 %6900, %v7950_v2  }
 0x276   : > { %4337 = vperm.xlu0 %6887, %v4183_v38   ;;  %v8127_v51 = vpop.permute.xlu2 %1432 }
 0x277   : > { %13476 = vst [vmem:[#allocation147_spill] sm:$0xff] %v8127_v51 }
 0x278   : > { %v8129_v47 = vpop.permute.xlu0 %3633 }
 0x279   : > { %13477 = vst [vmem:[#allocation148_spill] sm:$0xff] %v8129_v47  ;;  %v8153_v47 = vld [vmem:[#allocation2 + $0xc2] sm:$0xff] }
 0x27b   : > { %1664 = vperm.xlu1 %6901, %v8131_v62  }
 0x27c   : > { %v8134_v44 = vpop.permute.xlu1 %1396 }
 0x27d   : > { %13478 = vst [vmem:[#allocation149_spill] sm:$0xff] %v8134_v44  ;;  %1684 = vperm.xlu2 %6900, %v7961_v60  }
 0x27e   : > { %4835 = vperm.xlu0 %6887, %v7739_v32   ;;  %v8138_v63 = vpop.permute.xlu2 %1444 }
 0x27f   : > { %13479 = vst [vmem:[#allocation150_spill] sm:$0xff] %v8138_v63 }
 0x280   : > { %v8140_v58 = vpop.permute.xlu0 %3648 }
 0x281   : > { %13480 = vst [vmem:[#allocation151_spill] sm:$0xff] %v8140_v58  ;;  %v8164_v58 = vld [vmem:[#allocation2 + $0xe2] sm:$0xff] }
 0x283   : > { %1679 = vperm.xlu1 %6901, %v8142_v50  }
 0x284   : > { %v8145_v38 = vpop.permute.xlu1 %1404 }
 0x285   : > { %13481 = vst [vmem:[#allocation152_spill] sm:$0xff] %v8145_v38  ;;  %1699 = vperm.xlu2 %6900, %v7972_v3  }
 0x286   : > { %4860 = vperm.xlu0 %6887, %v7777_v1   ;;  %v8149_v51 = vpop.permute.xlu2 %1456 }
 0x287   : > { %13482 = vst [vmem:[#allocation153_spill] sm:$0xff] %v8149_v51 }
 0x288   : > { %v8151_v44 = vpop.permute.xlu0 %3663 }
 0x289   : > { %13483 = vst [vmem:[#allocation154_spill] sm:$0xff] %v8151_v44  ;;  %v8175_v44 = vld [vmem:[#allocation2 + $0x10a] sm:$0xff] }
 0x28b   : > { %1694 = vperm.xlu1 %6901, %v8153_v47  }
 0x28c   : > { %v8156_v32 = vpop.permute.xlu1 %1416 }
 0x28d   : > { %13484 = vst [vmem:[#allocation155_spill] sm:$0xff] %v8156_v32  ;;  %1714 = vperm.xlu2 %6900, %v7986_v9  }
 0x28e   : > { %4875 = vperm.xlu0 %6887, %v7790_v42   ;;  %v8160_v63 = vpop.permute.xlu2 %1468 }
 0x28f   : > { %13485 = vst [vmem:[#allocation156_spill] sm:$0xff] %v8160_v63 }
 0x290   : > { %v8162_v38 = vpop.permute.xlu0 %3678 }
 0x291   : > { %13486 = vst [vmem:[#allocation157_spill] sm:$0xff] %v8162_v38  ;;  %v8186_v38 = vld [vmem:[#allocation2 + $0x12a] sm:$0xff] }
 0x293   : > { %1709 = vperm.xlu1 %6901, %v8164_v58  }
 0x294   : > { %v8167_v1 = vpop.permute.xlu1 %1428 }
 0x295   : > { %13487 = vst [vmem:[#allocation158_spill] sm:$0xff] %v8167_v1  ;;  %1729 = vperm.xlu2 %6900, %v7998_v19  }
 0x296   : > { %4890 = vperm.xlu0 %6887, %v7803_v0   ;;  %v8171_v51 = vpop.permute.xlu2 %1480 }
 0x297   : > { %13488 = vst [vmem:[#allocation159_spill] sm:$0xff] %v8171_v51 }
 0x298   : > { %v8173_v32 = vpop.permute.xlu0 %3693 }
 0x299   : > { %13489 = vst [vmem:[#allocation160_spill] sm:$0xff] %v8173_v32  ;;  %v8197_v32 = vld [vmem:[#allocation2 + $0x152] sm:$0xff] }
 0x29b   : > { %1724 = vperm.xlu1 %6901, %v8175_v44  }
 0x29c   : > { %v8178_v42 = vpop.permute.xlu1 %1440 }
 0x29d   : > { %13490 = vst [vmem:[#allocation161_spill] sm:$0xff] %v8178_v42  ;;  %1744 = vperm.xlu2 %6900, %v8009_v12  }
 0x29e   : > { %4905 = vperm.xlu0 %6887, %v7816_v29   ;;  %v8182_v63 = vpop.permute.xlu2 %1492 }
 0x29f   : > { %13491 = vst [vmem:[#allocation162_spill] sm:$0xff] %v8182_v63 }
 0x2a0   : > { %v8184_v1 = vpop.permute.xlu0 %4192 }
 0x2a1   : > { %13492 = vst [vmem:[#allocation163_spill] sm:$0xff] %v8184_v1 }
 0x2a3   : > { %1739 = vperm.xlu1 %6901, %v8186_v38  }
 0x2a4   : > { %v8189_v0 = vpop.permute.xlu1 %1452 }
 0x2a5   : > { %13493 = vst [vmem:[#allocation164_spill] sm:$0xff] %v8189_v0  ;;  %1759 = vperm.xlu2 %6900, %v8020_v55  }
 0x2a6   : > { %4920 = vperm.xlu0 %6887, %v7828_v53   ;;  %v8193_v51 = vpop.permute.xlu2 %1504  ;;  %v8209_v53 = vld [vmem:[#allocation2 + $0x172] sm:$0xff] }
 0x2a7   : > { %13494 = vst [vmem:[#allocation165_spill] sm:$0xff] %v8193_v51 }
 0x2a8   : > { %v8195_v42 = vpop.permute.xlu0 %4217 }
 0x2a9   : > { %13495 = vst [vmem:[#allocation166_spill] sm:$0xff] %v8195_v42 }
 0x2ab   : > { %1754 = vperm.xlu1 %6901, %v8197_v32  }
 0x2ac   : > { %v8200_v29 = vpop.permute.xlu1 %1464 }
 0x2ad   : > { %13496 = vst [vmem:[#allocation167_spill] sm:$0xff] %v8200_v29  ;;  %6902 = vset.pattern.permute.xlu2 %v13396_v30 }
 0x2ae   : > { %4935 = vperm.xlu0 %6887, %v7841_v7   ;;  %1838 = vperm.xlu2 %6902, %v8080_v36  }
 0x2af   : > { %v8205_v0 = vpop.permute.xlu2 %1614 }
 0x2b0   : > { %13497 = vst [vmem:[#allocation168_spill] sm:$0xff] %v8205_v0  ;;  %v8207_v63 = vpop.permute.xlu0 %4232 }
 0x2b1   : > { %13498 = vst [vmem:[#allocation169_spill] sm:$0xff] %v8207_v63 }
 0x2b3   : > { %1769 = vperm.xlu1 %6901, %v8209_v53  }
 0x2b4   : > { %v8212_v51 = vpop.permute.xlu1 %1476 }
 0x2b5   : > { %13499 = vst [vmem:[#allocation170_spill] sm:$0xff] %v8212_v51 }
 0x2b6   : > { %4950 = vperm.xlu0 %6887, %v7854_v8   ;;  %1850 = vperm.xlu2 %6902, %v7928_v25   ;;  %v4826_v8 = vld [vmem:[#allocation2 + $0x199] sm:$0xff] }
 0x2b7   : > { %v8216_v29 = vpop.permute.xlu2 %1629 }
 0x2b8   : > { %13500 = vst [vmem:[#allocation171_spill] sm:$0xff] %v8216_v29  ;;  %v8218_v42 = vpop.permute.xlu0 %4247 }
 0x2b9   : > { %13501 = vst [vmem:[#allocation172_spill] sm:$0xff] %v8218_v42 }
 0x2bb   : > { %6903 = vset.pattern.permute.xlu1 %v13396_v30 }
 0x2bc   : > { %1846 = vperm.xlu1 %6903, %v8098_v48   ;;  %v8222_v7 = vpop.permute.xlu1 %1488 }
 0x2bd   : > { %13502 = vst [vmem:[#allocation173_spill] sm:$0xff] %v8222_v7  ;;  %v6964_v7 = vld [vmem:[#allocation2 + $0x169] sm:$0xff] }
 0x2be   : > { %4965 = vperm.xlu0 %6887, %v7866_v41   ;;  %1858 = vperm.xlu2 %6902, %v8101_v61  }
 0x2bf   : > { %v8226_v63 = vpop.permute.xlu2 %1639 }
 0x2c0   : > { %13503 = vst [vmem:[#allocation174_spill] sm:$0xff] %v8226_v63  ;;  %v8228_v0 = vpop.permute.xlu0 %4262 }
 0x2c1   : > { %13504 = vst [vmem:[#allocation175_spill] sm:$0xff] %v8228_v0 }
 0x2c4   : > { %1854 = vperm.xlu1 %6903, %v8111_v52   ;;  %v8231_v29 = vpop.permute.xlu1 %1500 }
 0x2c5   : > { %13505 = vst [vmem:[#allocation176_spill] sm:$0xff] %v8231_v29  ;;  %v8522_v29 = vld [vmem:[#allocation2 + $0x168] sm:$0xff] }
 0x2c6   : > { %4980 = vperm.xlu0 %6887, %v4826_v8   ;;  %1870 = vperm.xlu2 %6902, %v7939_v59  }
 0x2c7   : > { %v8234_v42 = vpop.permute.xlu2 %1654 }
 0x2c8   : > { %13506 = vst [vmem:[#allocation177_spill] sm:$0xff] %v8234_v42  ;;  %v8236_v51 = vpop.permute.xlu0 %4277 }
 0x2c9   : > { %13507 = vst [vmem:[#allocation178_spill] sm:$0xff] %v8236_v51 }
 0x2cc   : > { %1866 = vperm.xlu1 %6903, %v8121_v57   ;;  %v8239_v41 = vpop.permute.xlu1 %1512 }
 0x2cd   : > { %13508 = vst [vmem:[#allocation179_spill] sm:$0xff] %v8239_v41 }
 0x2ce   : > { %5478 = vperm.xlu0 %6887, %v8101_v61   ;;  %1882 = vperm.xlu2 %6902, %v7950_v2  }
 0x2cf   : > { %v8243_v0 = vpop.permute.xlu2 %1669 }
 0x2d0   : > { %13509 = vst [vmem:[#allocation180_spill] sm:$0xff] %v8243_v0  ;;  %v8245_v63 = vpop.permute.xlu0 %4292 }
 0x2d1   : > { %13510 = vst [vmem:[#allocation181_spill] sm:$0xff] %v8245_v63 }
 0x2d4   : > { %1878 = vperm.xlu1 %6903, %v8131_v62  }
 0x2d5   : > { %v8248_v8 = vpop.permute.xlu1 %1624 }
 0x2d6   : > { %13511 = vst [vmem:[#allocation182_spill] sm:$0xff] %v8248_v8  ;;  %5503 = vperm.xlu0 %6887, %v8131_v62   ;;  %1894 = vperm.xlu2 %6902, %v7961_v60  }
 0x2d7   : > { %v8252_v51 = vpop.permute.xlu2 %1684 }
 0x2d8   : > { %13512 = vst [vmem:[#allocation183_spill] sm:$0xff] %v8252_v51  ;;  %v8254_v42 = vpop.permute.xlu0 %4307 }
 0x2d9   : > { %13513 = vst [vmem:[#allocation184_spill] sm:$0xff] %v8254_v42 }
 0x2dc   : > { %1890 = vperm.xlu1 %6903, %v8142_v50  }
 0x2dd   : > { %v8257_v41 = vpop.permute.xlu1 %1634 }
 0x2de   : > { %13514 = vst [vmem:[#allocation185_spill] sm:$0xff] %v8257_v41  ;;  %5518 = vperm.xlu0 %6887, %v8142_v50   ;;  %1906 = vperm.xlu2 %6902, %v7972_v3  }
 0x2df   : > { %v8261_v63 = vpop.permute.xlu2 %1699 }
 0x2e0   : > { %13515 = vst [vmem:[#allocation186_spill] sm:$0xff] %v8261_v63  ;;  %v8263_v0 = vpop.permute.xlu0 %4322 }
 0x2e1   : > { %13516 = vst [vmem:[#allocation187_spill] sm:$0xff] %v8263_v0 }
 0x2e4   : > { %1902 = vperm.xlu1 %6903, %v8153_v47  }
 0x2e5   : > { %v8266_v8 = vpop.permute.xlu1 %1649 }
 0x2e6   : > { %13517 = vst [vmem:[#allocation188_spill] sm:$0xff] %v8266_v8  ;;  %5533 = vperm.xlu0 %6887, %v8153_v47   ;;  %1918 = vperm.xlu2 %6902, %v7986_v9  }
 0x2e7   : > { %v8270_v42 = vpop.permute.xlu2 %1714 }
 0x2e8   : > { %13518 = vst [vmem:[#allocation189_spill] sm:$0xff] %v8270_v42  ;;  %v8272_v51 = vpop.permute.xlu0 %4337 }
 0x2e9   : > { %13519 = vst [vmem:[#allocation190_spill] sm:$0xff] %v8272_v51 }
 0x2ec   : > { %1914 = vperm.xlu1 %6903, %v8164_v58  }
 0x2ed   : > { %v8275_v41 = vpop.permute.xlu1 %1664 }
 0x2ee   : > { %13520 = vst [vmem:[#allocation191_spill] sm:$0xff] %v8275_v41  ;;  %5548 = vperm.xlu0 %6887, %v8164_v58   ;;  %1930 = vperm.xlu2 %6902, %v7998_v19  }
 0x2ef   : > { %v8279_v0 = vpop.permute.xlu2 %1729 }
 0x2f0   : > { %13521 = vst [vmem:[#allocation192_spill] sm:$0xff] %v8279_v0  ;;  %v8281_v63 = vpop.permute.xlu0 %4835 }
 0x2f1   : > { %13522 = vst [vmem:[#allocation193_spill] sm:$0xff] %v8281_v63 }
 0x2f4   : > { %1926 = vperm.xlu1 %6903, %v8175_v44  }
 0x2f5   : > { %v8284_v8 = vpop.permute.xlu1 %1679 }
 0x2f6   : > { %13523 = vst [vmem:[#allocation194_spill] sm:$0xff] %v8284_v8  ;;  %5563 = vperm.xlu0 %6887, %v8175_v44   ;;  %1942 = vperm.xlu2 %6902, %v8009_v12  }
 0x2f7   : > { %v8288_v51 = vpop.permute.xlu2 %1744 }
 0x2f8   : > { %13524 = vst [vmem:[#allocation195_spill] sm:$0xff] %v8288_v51  ;;  %v8290_v42 = vpop.permute.xlu0 %4860 }
 0x2f9   : > { %13525 = vst [vmem:[#allocation196_spill] sm:$0xff] %v8290_v42 }
 0x2fc   : > { %1938 = vperm.xlu1 %6903, %v8186_v38  }
 0x2fd   : > { %v8293_v41 = vpop.permute.xlu1 %1694 }
 0x2fe   : > { %13526 = vst [vmem:[#allocation197_spill] sm:$0xff] %v8293_v41  ;;  %5578 = vperm.xlu0 %6887, %v8186_v38   ;;  %1954 = vperm.xlu2 %6902, %v8020_v55  }
 0x2ff   : > { %v8297_v63 = vpop.permute.xlu2 %1759 }
 0x300   : > { %13527 = vst [vmem:[#allocation198_spill] sm:$0xff] %v8297_v63  ;;  %v8299_v0 = vpop.permute.xlu0 %4875  ;;  %v5469_v63 = vld [vmem:[#allocation2 + $0x19a] sm:$0xff] }
 0x301   : > { %13528 = vst [vmem:[#allocation199_spill] sm:$0xff] %v8299_v0 }
 0x304   : > { %1950 = vperm.xlu1 %6903, %v8197_v32  }
 0x305   : > { %v8302_v8 = vpop.permute.xlu1 %1709 }
 0x306   : > { %13529 = vst [vmem:[#allocation200_spill] sm:$0xff] %v8302_v8  ;;  %5593 = vperm.xlu0 %6887, %v8197_v32   ;;  %6904 = vset.pattern.permute.xlu2 %v13430_v54 }
 0x307   : > { %2031 = vperm.xlu2 %6904, %v8080_v36  }
 0x308   : > { %v8307_v42 = vpop.permute.xlu0 %4890  ;;  %v8309_v41 = vpop.permute.xlu2 %1838 }
 0x309   : > { %13530 = vst [vmem:[#allocation201_spill] sm:$0xff] %v8307_v42 }
 0x30a   : > { %13531 = vst [vmem:[#allocation202_spill] sm:$0xff] %v8309_v41 }
 0x30c   : > { %1962 = vperm.xlu1 %6903, %v8209_v53  }
 0x30d   : > { %v8312_v51 = vpop.permute.xlu1 %1724 }
 0x30e   : > { %13532 = vst [vmem:[#allocation203_spill] sm:$0xff] %v8312_v51  ;;  %5608 = vperm.xlu0 %6887, %v8209_v53   ;;  %v6963_v51 = vld [vmem:[#allocation2 + $0x141] sm:$0xff] }
 0x30f   : > { %2043 = vperm.xlu2 %6904, %v7928_v25  }
 0x310   : > { %v8316_v0 = vpop.permute.xlu0 %4905  ;;  %v8318_v8 = vpop.permute.xlu2 %1850 }
 0x311   : > { %13533 = vst [vmem:[#allocation204_spill] sm:$0xff] %v8316_v0  ;;  %v6945_v0 = vld [vmem:[#allocation2 + $0x8] sm:$0xff] }
 0x312   : > { %13534 = vst [vmem:[#allocation205_spill] sm:$0xff] %v8318_v8 }
 0x314   : > { %6905 = vset.pattern.permute.xlu1 %v13430_v54 }
 0x315   : > { %2039 = vperm.xlu1 %6905, %v8098_v48   ;;  %v8322_v36 = vpop.permute.xlu1 %1739 }
 0x316   : > { %13535 = vst [vmem:[#allocation206_spill] sm:$0xff] %v8322_v36  ;;  %5623 = vperm.xlu0 %6887, %v5469_v63   ;;  %v8512_v36 = vld [vmem:[#allocation2 + $0x170] sm:$0xff] }
 0x317   : > { %2051 = vperm.xlu2 %6904, %v8101_v61   ;;  %v6946_v61 = vld [vmem:[#allocation2 + $0x48] sm:$0xff] }
 0x318   : > { %v8325_v42 = vpop.permute.xlu0 %4920  ;;  %v8327_v41 = vpop.permute.xlu2 %1858 }
 0x319   : > { %13536 = vst [vmem:[#allocation207_spill] sm:$0xff] %v8325_v42 }
 0x31a   : > { %13537 = vst [vmem:[#allocation208_spill] sm:$0xff] %v8327_v41  ;;  %v6962_v41 = vld [vmem:[#allocation2 + $0x121] sm:$0xff] }
 0x31d   : > { %2047 = vperm.xlu1 %6905, %v8111_v52   ;;  %v8330_v25 = vpop.permute.xlu1 %1754 }
 0x31e   : > { %13538 = vst [vmem:[#allocation209_spill] sm:$0xff] %v8330_v25  ;;  %6938 = vset.pattern.permute.xlu0 %v13396_v30  ;;  %v8510_v25 = vld [vmem:[#allocation2 + $0x140] sm:$0xff] }
 0x31f   : > { %556 = vperm.xlu0 %6938, %v6945_v0   ;;  %2063 = vperm.xlu2 %6904, %v7939_v59   ;;  %v6947_v59 = vld [vmem:[#allocation2 + $0x68] sm:$0xff] }
 0x320   : > { %v8334_v48 = vpop.permute.xlu0 %4935  ;;  %v8336_v8 = vpop.permute.xlu2 %1870 }
 0x321   : > { %13539 = vst [vmem:[#allocation210_spill] sm:$0xff] %v8334_v48 }
 0x322   : > { %13540 = vst [vmem:[#allocation211_spill] sm:$0xff] %v8336_v8  ;;  %v8500_v8 = vld [vmem:[#allocation2 + $0x150] sm:$0xff] }
 0x325   : > { %2059 = vperm.xlu1 %6905, %v8121_v57   ;;  %v8339_v63 = vpop.permute.xlu1 %1769 }
 0x326   : > { %13541 = vst [vmem:[#allocation212_spill] sm:$0xff] %v8339_v63  ;;  %v8498_v63 = vld [vmem:[#allocation2 + $0x120] sm:$0xff] }
 0x327   : > { %576 = vperm.xlu0 %6938, %v6946_v61   ;;  %2075 = vperm.xlu2 %6904, %v7950_v2   ;;  %v6948_v2 = vld [vmem:[#allocation2 + $0x90] sm:$0xff] }
 0x328   : > { %v8342_v52 = vpop.permute.xlu0 %4950  ;;  %v8344_v42 = vpop.permute.xlu2 %1882 }
 0x329   : > { %13542 = vst [vmem:[#allocation213_spill] sm:$0xff] %v8342_v52 }
 0x32a   : > { %13543 = vst [vmem:[#allocation214_spill] sm:$0xff] %v8344_v42  ;;  %v6961_v42 = vld [vmem:[#allocation2 + $0xf9] sm:$0xff] }
 0x32d   : > { %2071 = vperm.xlu1 %6905, %v8131_v62  }
 0x32e   : > { %v8347_v0 = vpop.permute.xlu1 %1846 }
 0x32f   : > { %13544 = vst [vmem:[#allocation215_spill] sm:$0xff] %v8347_v0  ;;  %588 = vperm.xlu0 %6938, %v6947_v59   ;;  %2087 = vperm.xlu2 %6904, %v7961_v60   ;;  %v6949_v60 = vld [vmem:[#allocation2 + $0xb0] sm:$0xff]  ;;  %v8488_v0 = vld [vmem:[#allocation2 + $0x128] sm:$0xff] }
 0x330   : > { %v8350_v48 = vpop.permute.xlu0 %4965  ;;  %v8352_v57 = vpop.permute.xlu2 %1894 }
 0x331   : > { %13545 = vst [vmem:[#allocation216_spill] sm:$0xff] %v8350_v48 }
 0x332   : > { %13546 = vst [vmem:[#allocation217_spill] sm:$0xff] %v8352_v57  ;;  %v8486_v57 = vld [vmem:[#allocation2 + $0xf8] sm:$0xff] }
 0x335   : > { %2083 = vperm.xlu1 %6905, %v8142_v50  }
 0x336   : > { %v8355_v61 = vpop.permute.xlu1 %1854 }
 0x337   : > { %13547 = vst [vmem:[#allocation218_spill] sm:$0xff] %v8355_v61  ;;  %600 = vperm.xlu0 %6938, %v6948_v2   ;;  %2099 = vperm.xlu2 %6904, %v7972_v3   ;;  %v6950_v3 = vld [vmem:[#allocation2 + $0xd8] sm:$0xff] }
 0x338   : > { %v8358_v52 = vpop.permute.xlu0 %4980  ;;  %v8360_v62 = vpop.permute.xlu2 %1906  ;;  %v6960_v61 = vld [vmem:[#allocation2 + $0xd9] sm:$0xff] }
 0x339   : > { %13548 = vst [vmem:[#allocation219_spill] sm:$0xff] %v8358_v52 }
 0x33a   : > { %13549 = vst [vmem:[#allocation220_spill] sm:$0xff] %v8360_v62  ;;  %v8476_v62 = vld [vmem:[#allocation2 + $0x108] sm:$0xff] }
 0x33d   : > { %2095 = vperm.xlu1 %6905, %v8153_v47  }
 0x33e   : > { %v8363_v59 = vpop.permute.xlu1 %1866 }
 0x33f   : > { %13550 = vst [vmem:[#allocation221_spill] sm:$0xff] %v8363_v59  ;;  %612 = vperm.xlu0 %6938, %v6949_v60   ;;  %2111 = vperm.xlu2 %6904, %v7986_v9   ;;  %v6951_v9 = vld [vmem:[#allocation2 + $0xf8] sm:$0xff] }
 0x340   : > { %v8366_v48 = vpop.permute.xlu0 %5478  ;;  %v8368_v50 = vpop.permute.xlu2 %1918  ;;  %v6959_v59 = vld [vmem:[#allocation2 + $0xb1] sm:$0xff] }
 0x341   : > { %13551 = vst [vmem:[#allocation222_spill] sm:$0xff] %v8366_v48 }
 0x342   : > { %13552 = vst [vmem:[#allocation223_spill] sm:$0xff] %v8368_v50 }
 0x345   : > { %2107 = vperm.xlu1 %6905, %v8164_v58  }
 0x346   : > { %v8371_v2 = vpop.permute.xlu1 %1878 }
 0x347   : > { %13553 = vst [vmem:[#allocation224_spill] sm:$0xff] %v8371_v2  ;;  %624 = vperm.xlu0 %6938, %v6950_v3   ;;  %2123 = vperm.xlu2 %6904, %v7998_v19   ;;  %v6952_v19 = vld [vmem:[#allocation2 + $0x120] sm:$0xff]  ;;  %v6958_v2 = vld [vmem:[#allocation2 + $0x91] sm:$0xff] }
 0x348   : > { %v8374_v52 = vpop.permute.xlu0 %5503  ;;  %v8376_v47 = vpop.permute.xlu2 %1930 }
 0x349   : > { %13554 = vst [vmem:[#allocation225_spill] sm:$0xff] %v8374_v52 }
 0x34a   : > { %13555 = vst [vmem:[#allocation226_spill] sm:$0xff] %v8376_v47 }
 0x34d   : > { %2119 = vperm.xlu1 %6905, %v8175_v44  }
 0x34e   : > { %v8379_v60 = vpop.permute.xlu1 %1890 }
 0x34f   : > { %13556 = vst [vmem:[#allocation227_spill] sm:$0xff] %v8379_v60  ;;  %636 = vperm.xlu0 %6938, %v6951_v9   ;;  %2135 = vperm.xlu2 %6904, %v8009_v12   ;;  %v8395_v9 = vld [vmem:[#allocation2 + $0x18] sm:$0xff]  ;;  %v6957_v60 = vld [vmem:[#allocation2 + $0x69] sm:$0xff] }
 0x350   : > { %v8382_v48 = vpop.permute.xlu0 %5518  ;;  %v8384_v58 = vpop.permute.xlu2 %1942 }
 0x351   : > { %13557 = vst [vmem:[#allocation228_spill] sm:$0xff] %v8382_v48  ;;  %v6953_v48 = vld [vmem:[#allocation2 + $0x140] sm:$0xff] }
 0x352   : > { %13558 = vst [vmem:[#allocation229_spill] sm:$0xff] %v8384_v58 }
 0x355   : > { %2131 = vperm.xlu1 %6905, %v8186_v38  }
 0x356   : > { %v8387_v3 = vpop.permute.xlu1 %1902 }
 0x357   : > { %13559 = vst [vmem:[#allocation230_spill] sm:$0xff] %v8387_v3  ;;  %648 = vperm.xlu0 %6938, %v6952_v19   ;;  %2147 = vperm.xlu2 %6904, %v8020_v55   ;;  %v6956_v3 = vld [vmem:[#allocation2 + $0x49] sm:$0xff] }
 0x358   : > { %v8390_v52 = vpop.permute.xlu0 %5533  ;;  %v8392_v44 = vpop.permute.xlu2 %1954 }
 0x359   : > { %13560 = vst [vmem:[#allocation231_spill] sm:$0xff] %v8390_v52  ;;  %v6954_v52 = vld [vmem:[#allocation2 + $0x168] sm:$0xff] }
 0x35a   : > { %13561 = vst [vmem:[#allocation232_spill] sm:$0xff] %v8392_v44 }
 0x35d   : > { %2143 = vperm.xlu1 %6905, %v8197_v32  }
 0x35e   : > { %v8397_v12 = vpop.permute.xlu1 %1914 }
 0x35f   : > { %13562 = vst [vmem:[#allocation233_spill] sm:$0xff] %v8397_v12  ;;  %660 = vperm.xlu0 %6938, %v6953_v48   ;;  %6906 = vset.pattern.permute.xlu2 %v13362_v20  ;;  %v8413_v48 = vld [vmem:[#allocation2 + $0x30] sm:$0xff] }
 0x360   : > { %v8400_v38 = vpop.permute.xlu0 %5548  ;;  %2257 = vperm.xlu2 %6906, %v8395_v9  }
 0x361   : > { %13563 = vst [vmem:[#allocation234_spill] sm:$0xff] %v8400_v38  ;;  %v8403_v19 = vpop.permute.xlu2 %2031  ;;  %v8416_v38 = vld [vmem:[#allocation2 + $0x50] sm:$0xff] }
 0x362   : > { %13564 = vst [vmem:[#allocation235_spill] sm:$0xff] %v8403_v19 }
 0x365   : > { %2155 = vperm.xlu1 %6905, %v8209_v53   ;;  %v6955_v53 = vld [vmem:[#allocation2 + $0x9] sm:$0xff] }
 0x366   : > { %v8406_v55 = vpop.permute.xlu1 %1926 }
 0x367   : > { %13565 = vst [vmem:[#allocation236_spill] sm:$0xff] %v8406_v55  ;;  %672 = vperm.xlu0 %6938, %v6954_v52  }
 0x368   : > { %v8408_v32 = vpop.permute.xlu0 %5563  ;;  %2272 = vperm.xlu2 %6906, %v8039_v24  }
 0x369   : > { %13566 = vst [vmem:[#allocation237_spill] sm:$0xff] %v8408_v32  ;;  %v8411_v12 = vpop.permute.xlu2 %2043  ;;  %v8426_v32 = vld [vmem:[#allocation2 + $0x48] sm:$0xff] }
 0x36a   : > { %13567 = vst [vmem:[#allocation238_spill] sm:$0xff] %v8411_v12  ;;  %v8428_v12 = vld [vmem:[#allocation2 + $0x78] sm:$0xff] }
 0x36d   : > { %6907 = vset.pattern.permute.xlu1 %v13362_v20 }
 0x36e   : > { %2267 = vperm.xlu1 %6907, %v8413_v48   ;;  %v8419_v19 = vpop.permute.xlu1 %1938 }
 0x36f   : > { %13568 = vst [vmem:[#allocation239_spill] sm:$0xff] %v8419_v19  ;;  %1199 = vperm.xlu0 %6938, %v6955_v53   ;;  %v8440_v19 = vld [vmem:[#allocation2 + $0x98] sm:$0xff] }
 0x370   : > { %v8421_v55 = vpop.permute.xlu0 %5578  ;;  %2282 = vperm.xlu2 %6906, %v8416_v38  }
 0x371   : > { %13569 = vst [vmem:[#allocation240_spill] sm:$0xff] %v8421_v55  ;;  %v8424_v52 = vpop.permute.xlu2 %2051  ;;  %v8438_v55 = vld [vmem:[#allocation2 + $0x68] sm:$0xff] }
 0x372   : > { %13570 = vst [vmem:[#allocation241_spill] sm:$0xff] %v8424_v52 }
 0x376   : > { %2277 = vperm.xlu1 %6907, %v8426_v32   ;;  %v8431_v44 = vpop.permute.xlu1 %1950 }
 0x377   : > { %13571 = vst [vmem:[#allocation242_spill] sm:$0xff] %v8431_v44  ;;  %1219 = vperm.xlu0 %6938, %v6956_v3   ;;  %v8452_v44 = vld [vmem:[#allocation2 + $0xc0] sm:$0xff] }
 0x378   : > { %v8433_v58 = vpop.permute.xlu0 %5593  ;;  %2297 = vperm.xlu2 %6906, %v8428_v12  }
 0x379   : > { %13572 = vst [vmem:[#allocation243_spill] sm:$0xff] %v8433_v58  ;;  %v8436_v53 = vpop.permute.xlu2 %2063  ;;  %v8450_v58 = vld [vmem:[#allocation2 + $0x90] sm:$0xff] }
 0x37a   : > { %13573 = vst [vmem:[#allocation244_spill] sm:$0xff] %v8436_v53 }
 0x37e   : > { %2292 = vperm.xlu1 %6907, %v8438_v55   ;;  %v8443_v52 = vpop.permute.xlu1 %1962 }
 0x37f   : > { %13574 = vst [vmem:[#allocation245_spill] sm:$0xff] %v8443_v52  ;;  %1231 = vperm.xlu0 %6938, %v6957_v60   ;;  %v8464_v52 = vld [vmem:[#allocation2 + $0xe0] sm:$0xff] }
 0x380   : > { %v8445_v47 = vpop.permute.xlu0 %5608  ;;  %2312 = vperm.xlu2 %6906, %v8440_v19  }
 0x381   : > { %13575 = vst [vmem:[#allocation246_spill] sm:$0xff] %v8445_v47  ;;  %v8448_v3 = vpop.permute.xlu2 %2075  ;;  %v8462_v47 = vld [vmem:[#allocation2 + $0xb0] sm:$0xff] }
 0x382   : > { %13576 = vst [vmem:[#allocation247_spill] sm:$0xff] %v8448_v3 }
 0x386   : > { %2307 = vperm.xlu1 %6907, %v8450_v58  }
 0x387   : > { %v8455_v53 = vpop.permute.xlu1 %2039  ;;  %1243 = vperm.xlu0 %6938, %v6958_v2  }
 0x388   : > { %13577 = vst [vmem:[#allocation248_spill] sm:$0xff] %v8455_v53  ;;  %v8457_v50 = vpop.permute.xlu0 %5623  ;;  %2327 = vperm.xlu2 %6906, %v8452_v44  }
 0x389   : > { %13578 = vst [vmem:[#allocation249_spill] sm:$0xff] %v8457_v50  ;;  %v8460_v60 = vpop.permute.xlu2 %2087  ;;  %v8474_v50 = vld [vmem:[#allocation2 + $0xd8] sm:$0xff] }
 0x38a   : > { %13579 = vst [vmem:[#allocation250_spill] sm:$0xff] %v8460_v60 }
 0x38e   : > { %2322 = vperm.xlu1 %6907, %v8462_v47  }
 0x38f   : > { %v8467_v3 = vpop.permute.xlu1 %2047  ;;  %1255 = vperm.xlu0 %6938, %v6959_v59  }
 0x390   : > { %13580 = vst [vmem:[#allocation251_spill] sm:$0xff] %v8467_v3  ;;  %2342 = vperm.xlu2 %6906, %v8464_v52  }
 0x391   : > { %v8470_v53 = vpop.permute.xlu0 %556  ;;  %v8472_v2 = vpop.permute.xlu2 %2099 }
 0x392   : > { %13581 = vst [vmem:[#allocation252_spill] sm:$0xff] %v8470_v53  ;;  %v6965_v53 = vld [vmem:[#allocation2 + $0xa] sm:$0xff] }
 0x393   : > { %13582 = vst [vmem:[#allocation253_spill] sm:$0xff] %v8472_v2 }
 0x396   : > { %2337 = vperm.xlu1 %6907, %v8474_v50  }
 0x397   : > { %v8479_v60 = vpop.permute.xlu1 %2059  ;;  %1267 = vperm.xlu0 %6938, %v6960_v61  }
 0x398   : > { %13583 = vst [vmem:[#allocation254_spill] sm:$0xff] %v8479_v60  ;;  %2357 = vperm.xlu2 %6906, %v8476_v62  }
 0x399   : > { %v8482_v3 = vpop.permute.xlu0 %576  ;;  %v8484_v59 = vpop.permute.xlu2 %2111 }
 0x39a   : > { %13584 = vst [vmem:[#allocation255_spill] sm:$0xff] %v8484_v59 }
 0x39e   : > { %2352 = vperm.xlu1 %6907, %v8486_v57  }
 0x39f   : > { %v8491_v2 = vpop.permute.xlu1 %2071  ;;  %1279 = vperm.xlu0 %6938, %v6961_v42  }
 0x3a0   : > { %13585 = vst [vmem:[#allocation256_spill] sm:$0xff] %v8491_v2  ;;  %2372 = vperm.xlu2 %6906, %v8488_v0  }
 0x3a1   : > { %v8494_v60 = vpop.permute.xlu0 %588  ;;  %v8496_v61 = vpop.permute.xlu2 %2123 }
 0x3a2   : > { %13586 = vst [vmem:[#allocation257_spill] sm:$0xff] %v8496_v61 }
 0x3a6   : > { %2367 = vperm.xlu1 %6907, %v8498_v63  }
 0x3a7   : > { %v8503_v59 = vpop.permute.xlu1 %2083  ;;  %1291 = vperm.xlu0 %6938, %v6962_v41  }
 0x3a8   : > { %13587 = vst [vmem:[#allocation258_spill] sm:$0xff] %v8503_v59  ;;  %2387 = vperm.xlu2 %6906, %v8500_v8  }
 0x3a9   : > { %v8506_v2 = vpop.permute.xlu0 %600  ;;  %v8508_v42 = vpop.permute.xlu2 %2135 }
 0x3aa   : > { %13588 = vst [vmem:[#allocation259_spill] sm:$0xff] %v8506_v2 }
 0x3ab   : > { %13589 = vst [vmem:[#allocation260_spill] sm:$0xff] %v8508_v42 }
 0x3ae   : > { %2382 = vperm.xlu1 %6907, %v8510_v25  }
 0x3af   : > { %v8515_v61 = vpop.permute.xlu1 %2095  ;;  %1303 = vperm.xlu0 %6938, %v6963_v51  }
 0x3b0   : > { %13590 = vst [vmem:[#allocation261_spill] sm:$0xff] %v8515_v61  ;;  %2402 = vperm.xlu2 %6906, %v8512_v36   ;;  %v8533_v61 = vld [vmem:[#allocation2 + $0x188] sm:$0xff] }
 0x3b1   : > { %v8518_v59 = vpop.permute.xlu0 %612  ;;  %v8520_v41 = vpop.permute.xlu2 %2147 }
 0x3b2   : > { %13591 = vst [vmem:[#allocation262_spill] sm:$0xff] %v8518_v59 }
 0x3b3   : > { %13592 = vst [vmem:[#allocation263_spill] sm:$0xff] %v8520_v41 }
 0x3b6   : > { %2397 = vperm.xlu1 %6907, %v8522_v29  }
 0x3b7   : > { %v8525_v42 = vpop.permute.xlu1 %2107  ;;  %1315 = vperm.xlu0 %6938, %v6964_v7  }
 0x3b8   : > { %13593 = vst [vmem:[#allocation264_spill] sm:$0xff] %v8525_v42  ;;  %6908 = vset.pattern.permute.xlu2 %v13396_v30 }
 0x3b9   : > { %v8528_v1 = vpop.permute.xlu0 %624  ;;  %2481 = vperm.xlu2 %6908, %v8395_v9  }
 0x3ba   : > { %13594 = vst [vmem:[#allocation265_spill] sm:$0xff] %v8528_v1  ;;  %v8531_v51 = vpop.permute.xlu2 %2257 }
 0x3bb   : > { %13595 = vst [vmem:[#allocation266_spill] sm:$0xff] %v8531_v51  ;;  %v6966_v51 = vld [vmem:[#allocation2 + $0x4a] sm:$0xff] }
 0x3be   : > { %2412 = vperm.xlu1 %6907, %v8533_v61  }
 0x3bf   : > { %v8536_v41 = vpop.permute.xlu1 %2119  ;;  %1842 = vperm.xlu0 %6938, %v6965_v53  }
 0x3c0   : > { %13596 = vst [vmem:[#allocation267_spill] sm:$0xff] %v8536_v41 }
 0x3c1   : > { %v8538_v10 = vpop.permute.xlu0 %636  ;;  %2493 = vperm.xlu2 %6908, %v8039_v24  }
 0x3c2   : > { %13597 = vst [vmem:[#allocation268_spill] sm:$0xff] %v8538_v10  ;;  %v8541_v7 = vpop.permute.xlu2 %2272  ;;  %v6967_v10 = vld [vmem:[#allocation2 + $0x6a] sm:$0xff] }
 0x3c3   : > { %13598 = vst [vmem:[#allocation269_spill] sm:$0xff] %v8541_v7 }
 0x3c6   : > { %6909 = vset.pattern.permute.xlu1 %v13396_v30 }
 0x3c7   : > { %2489 = vperm.xlu1 %6909, %v8413_v48   ;;  %v8545_v42 = vpop.permute.xlu1 %2131  ;;  %1862 = vperm.xlu0 %6938, %v6966_v51  }
 0x3c8   : > { %13599 = vst [vmem:[#allocation270_spill] sm:$0xff] %v8545_v42  ;;  %v6968_v42 = vld [vmem:[#allocation2 + $0x92] sm:$0xff] }
 0x3c9   : > { %v8547_v1 = vpop.permute.xlu0 %648  ;;  %2501 = vperm.xlu2 %6908, %v8416_v38  }
 0x3ca   : > { %13600 = vst [vmem:[#allocation271_spill] sm:$0xff] %v8547_v1  ;;  %v8550_v41 = vpop.permute.xlu2 %2282 }
 0x3cb   : > { %13601 = vst [vmem:[#allocation272_spill] sm:$0xff] %v8550_v41 }
 0x3cf   : > { %2497 = vperm.xlu1 %6909, %v8426_v32   ;;  %v8553_v53 = vpop.permute.xlu1 %2143  ;;  %1874 = vperm.xlu0 %6938, %v6967_v10   ;;  %v6969_v10 = vld [vmem:[#allocation2 + $0xb2] sm:$0xff] }
 0x3d0   : > { %13602 = vst [vmem:[#allocation273_spill] sm:$0xff] %v8553_v53 }
 0x3d1   : > { %v8555_v7 = vpop.permute.xlu0 %660  ;;  %2513 = vperm.xlu2 %6908, %v8428_v12  }
 0x3d2   : > { %13603 = vst [vmem:[#allocation274_spill] sm:$0xff] %v8555_v7  ;;  %v8558_v59 = vpop.permute.xlu2 %2297 }
 0x3d3   : > { %13604 = vst [vmem:[#allocation275_spill] sm:$0xff] %v8558_v59 }
 0x3d7   : > { %2509 = vperm.xlu1 %6909, %v8438_v55   ;;  %v8561_v51 = vpop.permute.xlu1 %2155  ;;  %1886 = vperm.xlu0 %6938, %v6968_v42   ;;  %v6970_v42 = vld [vmem:[#allocation2 + $0xda] sm:$0xff] }
 0x3d8   : > { %13605 = vst [vmem:[#allocation276_spill] sm:$0xff] %v8561_v51 }
 0x3d9   : > { %v8563_v1 = vpop.permute.xlu0 %672  ;;  %2525 = vperm.xlu2 %6908, %v8440_v19  }
 0x3da   : > { %13606 = vst [vmem:[#allocation277_spill] sm:$0xff] %v8563_v1  ;;  %v8566_v41 = vpop.permute.xlu2 %2312 }
 0x3db   : > { %13607 = vst [vmem:[#allocation278_spill] sm:$0xff] %v8566_v41 }
 0x3df   : > { %2521 = vperm.xlu1 %6909, %v8450_v58   ;;  %1898 = vperm.xlu0 %6938, %v6969_v10   ;;  %v6971_v10 = vld [vmem:[#allocation2 + $0xfa] sm:$0xff] }
 0x3e0   : > { %v8569_v53 = vpop.permute.xlu1 %2267 }
 0x3e1   : > { %13608 = vst [vmem:[#allocation279_spill] sm:$0xff] %v8569_v53  ;;  %v8571_v7 = vpop.permute.xlu0 %1199  ;;  %2537 = vperm.xlu2 %6908, %v8452_v44  }
 0x3e2   : > { %13609 = vst [vmem:[#allocation280_spill] sm:$0xff] %v8571_v7  ;;  %v8574_v59 = vpop.permute.xlu2 %2327 }
 0x3e3   : > { %13610 = vst [vmem:[#allocation281_spill] sm:$0xff] %v8574_v59 }
 0x3e7   : > { %2533 = vperm.xlu1 %6909, %v8462_v47   ;;  %1910 = vperm.xlu0 %6938, %v6970_v42   ;;  %v6972_v42 = vld [vmem:[#allocation2 + $0x122] sm:$0xff] }
 0x3e8   : > { %v8577_v51 = vpop.permute.xlu1 %2277 }
 0x3e9   : > { %13611 = vst [vmem:[#allocation282_spill] sm:$0xff] %v8577_v51  ;;  %v8579_v1 = vpop.permute.xlu0 %1219  ;;  %2549 = vperm.xlu2 %6908, %v8464_v52  }
 0x3ea   : > { %13612 = vst [vmem:[#allocation283_spill] sm:$0xff] %v8579_v1  ;;  %v8582_v41 = vpop.permute.xlu2 %2342 }
 0x3eb   : > { %13613 = vst [vmem:[#allocation284_spill] sm:$0xff] %v8582_v41 }
 0x3ef   : > { %2545 = vperm.xlu1 %6909, %v8474_v50   ;;  %1922 = vperm.xlu0 %6938, %v6971_v10   ;;  %v6973_v10 = vld [vmem:[#allocation2 + $0x142] sm:$0xff] }
 0x3f0   : > { %v8585_v53 = vpop.permute.xlu1 %2292 }
 0x3f1   : > { %13614 = vst [vmem:[#allocation285_spill] sm:$0xff] %v8585_v53  ;;  %v8587_v7 = vpop.permute.xlu0 %1231  ;;  %2561 = vperm.xlu2 %6908, %v8476_v62  }
 0x3f2   : > { %13615 = vst [vmem:[#allocation286_spill] sm:$0xff] %v8587_v7  ;;  %v8590_v59 = vpop.permute.xlu2 %2357 }
 0x3f3   : > { %13616 = vst [vmem:[#allocation287_spill] sm:$0xff] %v8590_v59 }
 0x3f7   : > { %2557 = vperm.xlu1 %6909, %v8486_v57   ;;  %1934 = vperm.xlu0 %6938, %v6972_v42   ;;  %v6974_v42 = vld [vmem:[#allocation2 + $0x16a] sm:$0xff] }
 0x3f8   : > { %v8593_v51 = vpop.permute.xlu1 %2307 }
 0x3f9   : > { %13617 = vst [vmem:[#allocation288_spill] sm:$0xff] %v8593_v51  ;;  %v8595_v2 = vpop.permute.xlu0 %1243  ;;  %2573 = vperm.xlu2 %6908, %v8488_v0  }
 0x3fa   : > { %13618 = vst [vmem:[#allocation289_spill] sm:$0xff] %v8595_v2  ;;  %v8598_v41 = vpop.permute.xlu2 %2372 }
 0x3fb   : > { %13619 = vst [vmem:[#allocation290_spill] sm:$0xff] %v8598_v41 }
 0x3ff   : > { %2569 = vperm.xlu1 %6909, %v8498_v63   ;;  %1946 = vperm.xlu0 %6938, %v6973_v10   ;;  %v6975_v10 = vld [vmem:[#allocation2 + $0x20] sm:$0xff] }
 0x400   : > { %v8601_v53 = vpop.permute.xlu1 %2322 }
 0x401   : > { %13620 = vst [vmem:[#allocation291_spill] sm:$0xff] %v8601_v53  ;;  %v8603_v7 = vpop.permute.xlu0 %1255  ;;  %2585 = vperm.xlu2 %6908, %v8500_v8  }
 0x402   : > { %13621 = vst [vmem:[#allocation292_spill] sm:$0xff] %v8603_v7  ;;  %v8606_v59 = vpop.permute.xlu2 %2387 }
 0x403   : > { %13622 = vst [vmem:[#allocation293_spill] sm:$0xff] %v8606_v59 }
 0x407   : > { %2581 = vperm.xlu1 %6909, %v8510_v25   ;;  %1958 = vperm.xlu0 %6938, %v6974_v42  }
 0x408   : > { %v8609_v51 = vpop.permute.xlu1 %2337 }
 0x409   : > { %13623 = vst [vmem:[#allocation294_spill] sm:$0xff] %v8609_v51  ;;  %v8611_v2 = vpop.permute.xlu0 %1267  ;;  %2597 = vperm.xlu2 %6908, %v8512_v36   ;;  %v6976_v51 = vld [vmem:[#allocation2 + $0x60] sm:$0xff] }
 0x40a   : > { %13624 = vst [vmem:[#allocation295_spill] sm:$0xff] %v8611_v2  ;;  %v8614_v41 = vpop.permute.xlu2 %2402  ;;  %v6996_v2 = vld [vmem:[#allocation2 + $0x62] sm:$0xff] }
 0x40b   : > { %13625 = vst [vmem:[#allocation296_spill] sm:$0xff] %v8614_v41 }
 0x40f   : > { %2593 = vperm.xlu1 %6909, %v8522_v29   ;;  %2485 = vperm.xlu0 %6938, %v6975_v10  }
 0x410   : > { %v8617_v53 = vpop.permute.xlu1 %2352 }
 0x411   : > { %13626 = vst [vmem:[#allocation297_spill] sm:$0xff] %v8617_v53  ;;  %v8619_v7 = vpop.permute.xlu0 %1279  ;;  %6910 = vset.pattern.permute.xlu2 %v13430_v54  ;;  %v6977_v53 = vld [vmem:[#allocation2 + $0x80] sm:$0xff] }
 0x412   : > { %13627 = vst [vmem:[#allocation298_spill] sm:$0xff] %v8619_v7  ;;  %2674 = vperm.xlu2 %6910, %v8395_v9  }
 0x413   : > { %v8623_v42 = vpop.permute.xlu2 %2481 }
 0x414   : > { %13628 = vst [vmem:[#allocation299_spill] sm:$0xff] %v8623_v42 }
 0x417   : > { %2605 = vperm.xlu1 %6909, %v8533_v61   ;;  %2505 = vperm.xlu0 %6938, %v6976_v51  }
 0x418   : > { %v8626_v59 = vpop.permute.xlu1 %2367 }
 0x419   : > { %13629 = vst [vmem:[#allocation300_spill] sm:$0xff] %v8626_v59  ;;  %v8628_v41 = vpop.permute.xlu0 %1291  ;;  %v6978_v59 = vld [vmem:[#allocation2 + $0xa8] sm:$0xff] }
 0x41a   : > { %13630 = vst [vmem:[#allocation301_spill] sm:$0xff] %v8628_v41  ;;  %2686 = vperm.xlu2 %6910, %v8039_v24  }
 0x41b   : > { %v8631_v10 = vpop.permute.xlu2 %2493 }
 0x41c   : > { %13631 = vst [vmem:[#allocation302_spill] sm:$0xff] %v8631_v10 }
 0x41f   : > { %6911 = vset.pattern.permute.xlu1 %v13430_v54  ;;  %2517 = vperm.xlu0 %6938, %v6977_v53  }
 0x420   : > { %2682 = vperm.xlu1 %6911, %v8413_v48   ;;  %v8635_v9 = vpop.permute.xlu1 %2382  ;;  %v6979_v48 = vld [vmem:[#allocation2 + $0xc8] sm:$0xff] }
 0x421   : > { %13632 = vst [vmem:[#allocation303_spill] sm:$0xff] %v8635_v9  ;;  %v8637_v42 = vpop.permute.xlu0 %1303 }
 0x422   : > { %13633 = vst [vmem:[#allocation304_spill] sm:$0xff] %v8637_v42  ;;  %2694 = vperm.xlu2 %6910, %v8416_v38   ;;  %v6993_v42 = vld [vmem:[#allocation2 + $0x159] sm:$0xff] }
 0x423   : > { %v8640_v51 = vpop.permute.xlu2 %2501 }
 0x424   : > { %13634 = vst [vmem:[#allocation305_spill] sm:$0xff] %v8640_v51  ;;  %v8764_v51 = vld [vmem:[#allocation2 + $0x91] sm:$0xff] }
 0x427   : > { %2529 = vperm.xlu0 %6938, %v6978_v59  }
 0x428   : > { %2690 = vperm.xlu1 %6911, %v8426_v32   ;;  %v8643_v24 = vpop.permute.xlu1 %2397  ;;  %v6980_v32 = vld [vmem:[#allocation2 + $0xf0] sm:$0xff] }
 0x429   : > { %13635 = vst [vmem:[#allocation306_spill] sm:$0xff] %v8643_v24  ;;  %v8645_v10 = vpop.permute.xlu0 %1315 }
 0x42a   : > { %13636 = vst [vmem:[#allocation307_spill] sm:$0xff] %v8645_v10  ;;  %2706 = vperm.xlu2 %6910, %v8428_v12  }
 0x42b   : > { %v8648_v53 = vpop.permute.xlu2 %2513 }
 0x42c   : > { %13637 = vst [vmem:[#allocation308_spill] sm:$0xff] %v8648_v53 }
 0x42f   : > { %2541 = vperm.xlu0 %6938, %v6979_v48  }
 0x430   : > { %2702 = vperm.xlu1 %6911, %v8438_v55   ;;  %v8651_v9 = vpop.permute.xlu1 %2412  ;;  %v6981_v55 = vld [vmem:[#allocation2 + $0x110] sm:$0xff] }
 0x431   : > { %13638 = vst [vmem:[#allocation309_spill] sm:$0xff] %v8651_v9  ;;  %v8653_v38 = vpop.permute.xlu0 %1842 }
 0x432   : > { %13639 = vst [vmem:[#allocation310_spill] sm:$0xff] %v8653_v38  ;;  %2718 = vperm.xlu2 %6910, %v8440_v19   ;;  %v8776_v38 = vld [vmem:[#allocation2 + $0xb1] sm:$0xff] }
 0x433   : > { %v8656_v59 = vpop.permute.xlu2 %2525 }
 0x434   : > { %13640 = vst [vmem:[#allocation311_spill] sm:$0xff] %v8656_v59  ;;  %v6990_v59 = vld [vmem:[#allocation2 + $0xf1] sm:$0xff] }
 0x437   : > { %2553 = vperm.xlu0 %6938, %v6980_v32  }
 0x438   : > { %2714 = vperm.xlu1 %6911, %v8450_v58   ;;  %v6982_v58 = vld [vmem:[#allocation2 + $0x138] sm:$0xff] }
 0x439   : > { %v8659_v24 = vpop.permute.xlu1 %2489  ;;  %v8661_v12 = vpop.permute.xlu0 %1862 }
 0x43a   : > { %13641 = vst [vmem:[#allocation312_spill] sm:$0xff] %v8659_v24  ;;  %2730 = vperm.xlu2 %6910, %v8452_v44  }
 0x43b   : > { %13642 = vst [vmem:[#allocation313_spill] sm:$0xff] %v8661_v12  ;;  %v8664_v48 = vpop.permute.xlu2 %2537 }
 0x43c   : > { %13643 = vst [vmem:[#allocation314_spill] sm:$0xff] %v8664_v48  ;;  %v8752_v48 = vld [vmem:[#allocation2 + $0x69] sm:$0xff] }
 0x43f   : > { %2565 = vperm.xlu0 %6938, %v6981_v55  }
 0x440   : > { %2726 = vperm.xlu1 %6911, %v8462_v47   ;;  %v6983_v47 = vld [vmem:[#allocation2 + $0x158] sm:$0xff] }
 0x441   : > { %v8667_v9 = vpop.permute.xlu1 %2497  ;;  %v8669_v19 = vpop.permute.xlu0 %1874 }
 0x442   : > { %13644 = vst [vmem:[#allocation315_spill] sm:$0xff] %v8667_v9  ;;  %2742 = vperm.xlu2 %6910, %v8464_v52  }
 0x443   : > { %13645 = vst [vmem:[#allocation316_spill] sm:$0xff] %v8669_v19  ;;  %v8672_v32 = vpop.permute.xlu2 %2549 }
 0x444   : > { %13646 = vst [vmem:[#allocation317_spill] sm:$0xff] %v8672_v32 }
 0x447   : > { %2577 = vperm.xlu0 %6938, %v6982_v58  }
 0x448   : > { %2738 = vperm.xlu1 %6911, %v8474_v50   ;;  %v6984_v50 = vld [vmem:[#allocation2 + $0x180] sm:$0xff] }
 0x449   : > { %v8675_v24 = vpop.permute.xlu1 %2509  ;;  %v8677_v44 = vpop.permute.xlu0 %1886 }
 0x44a   : > { %13647 = vst [vmem:[#allocation318_spill] sm:$0xff] %v8675_v24  ;;  %2754 = vperm.xlu2 %6910, %v8476_v62  }
 0x44b   : > { %13648 = vst [vmem:[#allocation319_spill] sm:$0xff] %v8677_v44  ;;  %v8680_v55 = vpop.permute.xlu2 %2561  ;;  %v6997_v44 = vld [vmem:[#allocation2 + $0x82] sm:$0xff] }
 0x44c   : > { %13649 = vst [vmem:[#allocation320_spill] sm:$0xff] %v8680_v55  ;;  %v8742_v55 = vld [vmem:[#allocation2 + $0x79] sm:$0xff] }
 0x44f   : > { %2589 = vperm.xlu0 %6938, %v6983_v47  }
 0x450   : > { %2750 = vperm.xlu1 %6911, %v8486_v57   ;;  %v6985_v57 = vld [vmem:[#allocation2 + $0x21] sm:$0xff] }
 0x451   : > { %v8683_v9 = vpop.permute.xlu1 %2521  ;;  %v8685_v52 = vpop.permute.xlu0 %1898 }
 0x452   : > { %13650 = vst [vmem:[#allocation321_spill] sm:$0xff] %v8683_v9  ;;  %2766 = vperm.xlu2 %6910, %v8488_v0  }
 0x453   : > { %13651 = vst [vmem:[#allocation322_spill] sm:$0xff] %v8685_v52  ;;  %v8688_v58 = vpop.permute.xlu2 %2573 }
 0x454   : > { %13652 = vst [vmem:[#allocation323_spill] sm:$0xff] %v8688_v58  ;;  %v8740_v58 = vld [vmem:[#allocation2 + $0x49] sm:$0xff] }
 0x457   : > { %2601 = vperm.xlu0 %6938, %v6984_v50  }
 0x458   : > { %2762 = vperm.xlu1 %6911, %v8498_v63   ;;  %v6986_v63 = vld [vmem:[#allocation2 + $0x61] sm:$0xff] }
 0x459   : > { %v8691_v24 = vpop.permute.xlu1 %2533  ;;  %v8693_v62 = vpop.permute.xlu0 %1910 }
 0x45a   : > { %13653 = vst [vmem:[#allocation324_spill] sm:$0xff] %v8691_v24  ;;  %2778 = vperm.xlu2 %6910, %v8500_v8   ;;  %v8707_v24 = vld [vmem:[#allocation2 + $0x19] sm:$0xff] }
 0x45b   : > { %13654 = vst [vmem:[#allocation325_spill] sm:$0xff] %v8693_v62  ;;  %v8696_v47 = vpop.permute.xlu2 %2585  ;;  %v6994_v62 = vld [vmem:[#allocation2 + $0x181] sm:$0xff] }
 0x45c   : > { %13655 = vst [vmem:[#allocation326_spill] sm:$0xff] %v8696_v47 }
 0x45f   : > { %3128 = vperm.xlu0 %6938, %v6985_v57   ;;  %v6987_v57 = vld [vmem:[#allocation2 + $0x81] sm:$0xff] }
 0x460   : > { %2774 = vperm.xlu1 %6911, %v8510_v25  }
 0x461   : > { %v8699_v9 = vpop.permute.xlu1 %2545  ;;  %v8701_v0 = vpop.permute.xlu0 %1922 }
 0x462   : > { %13656 = vst [vmem:[#allocation327_spill] sm:$0xff] %v8699_v9  ;;  %2790 = vperm.xlu2 %6910, %v8512_v36   ;;  %v8718_v36 = vld [vmem:[#allocation2 + $0x39] sm:$0xff] }
 0x463   : > { %13657 = vst [vmem:[#allocation328_spill] sm:$0xff] %v8701_v0  ;;  %v8704_v50 = vpop.permute.xlu2 %2597 }
 0x464   : > { %13658 = vst [vmem:[#allocation329_spill] sm:$0xff] %v8704_v50  ;;  %v6988_v50 = vld [vmem:[#allocation2 + $0xa9] sm:$0xff] }
 0x467   : > { %3148 = vperm.xlu0 %6938, %v6986_v63  }
 0x468   : > { %2786 = vperm.xlu1 %6911, %v8522_v29  }
 0x469   : > { %v8709_v8 = vpop.permute.xlu1 %2557  ;;  %v8711_v47 = vpop.permute.xlu0 %1934 }
 0x46a   : > { %13659 = vst [vmem:[#allocation330_spill] sm:$0xff] %v8709_v8  ;;  %6912 = vset.pattern.permute.xlu2 %v13362_v20  ;;  %v8727_v8 = vld [vmem:[#allocation2 + $0x31] sm:$0xff] }
 0x46b   : > { %13660 = vst [vmem:[#allocation331_spill] sm:$0xff] %v8711_v47  ;;  %2900 = vperm.xlu2 %6912, %v8707_v24  }
 0x46c   : > { %v8715_v25 = vpop.permute.xlu2 %2674 }
 0x46d   : > { %13661 = vst [vmem:[#allocation332_spill] sm:$0xff] %v8715_v25  ;;  %v8730_v25 = vld [vmem:[#allocation2 + $0x51] sm:$0xff] }
 0x46f   : > { %3160 = vperm.xlu0 %6938, %v6987_v57  }
 0x470   : > { %2798 = vperm.xlu1 %6911, %v8533_v61  }
 0x471   : > { %v8720_v63 = vpop.permute.xlu1 %2569  ;;  %v8722_v29 = vpop.permute.xlu0 %1946 }
 0x472   : > { %13662 = vst [vmem:[#allocation333_spill] sm:$0xff] %v8720_v63 }
 0x473   : > { %13663 = vst [vmem:[#allocation334_spill] sm:$0xff] %v8722_v29  ;;  %2915 = vperm.xlu2 %6912, %v8718_v36   ;;  %v6992_v29 = vld [vmem:[#allocation2 + $0x139] sm:$0xff] }
 0x474   : > { %v8725_v9 = vpop.permute.xlu2 %2686 }
 0x475   : > { %13664 = vst [vmem:[#allocation335_spill] sm:$0xff] %v8725_v9  ;;  %v6989_v9 = vld [vmem:[#allocation2 + $0xc9] sm:$0xff] }
 0x477   : > { %3172 = vperm.xlu0 %6938, %v6988_v50  }
 0x478   : > { %6913 = vset.pattern.permute.xlu1 %v13362_v20 }
 0x479   : > { %2910 = vperm.xlu1 %6913, %v8727_v8   ;;  %v8733_v61 = vpop.permute.xlu1 %2581  ;;  %v8735_v57 = vpop.permute.xlu0 %1958 }
 0x47a   : > { %13665 = vst [vmem:[#allocation336_spill] sm:$0xff] %v8733_v61 }
 0x47b   : > { %13666 = vst [vmem:[#allocation337_spill] sm:$0xff] %v8735_v57  ;;  %2925 = vperm.xlu2 %6912, %v8730_v25  }
 0x47c   : > { %v8738_v63 = vpop.permute.xlu2 %2694 }
 0x47d   : > { %13667 = vst [vmem:[#allocation338_spill] sm:$0xff] %v8738_v63  ;;  %v8754_v63 = vld [vmem:[#allocation2 + $0x99] sm:$0xff] }
 0x47f   : > { %3184 = vperm.xlu0 %6938, %v6989_v9  }
 0x481   : > { %2920 = vperm.xlu1 %6913, %v8740_v58   ;;  %v8745_v50 = vpop.permute.xlu1 %2593  ;;  %v8747_v32 = vpop.permute.xlu0 %2485 }
 0x482   : > { %13668 = vst [vmem:[#allocation339_spill] sm:$0xff] %v8745_v50 }
 0x483   : > { %13669 = vst [vmem:[#allocation340_spill] sm:$0xff] %v8747_v32  ;;  %2940 = vperm.xlu2 %6912, %v8742_v55   ;;  %v6991_v32 = vld [vmem:[#allocation2 + $0x111] sm:$0xff] }
 0x484   : > { %v8750_v61 = vpop.permute.xlu2 %2706 }
 0x485   : > { %13670 = vst [vmem:[#allocation341_spill] sm:$0xff] %v8750_v61  ;;  %v8766_v61 = vld [vmem:[#allocation2 + $0xc1] sm:$0xff] }
 0x487   : > { %3196 = vperm.xlu0 %6938, %v6990_v59  }
 0x489   : > { %2935 = vperm.xlu1 %6913, %v8752_v48   ;;  %v8757_v9 = vpop.permute.xlu1 %2605  ;;  %v8759_v53 = vpop.permute.xlu0 %2505 }
 0x48a   : > { %13671 = vst [vmem:[#allocation342_spill] sm:$0xff] %v8757_v9 }
 0x48b   : > { %13672 = vst [vmem:[#allocation343_spill] sm:$0xff] %v8759_v53  ;;  %2955 = vperm.xlu2 %6912, %v8754_v63   ;;  %v6998_v53 = vld [vmem:[#allocation2 + $0xaa] sm:$0xff] }
 0x48c   : > { %v8762_v50 = vpop.permute.xlu2 %2718 }
 0x48d   : > { %13673 = vst [vmem:[#allocation344_spill] sm:$0xff] %v8762_v50  ;;  %v8778_v50 = vld [vmem:[#allocation2 + $0xe1] sm:$0xff] }
 0x48f   : > { %3208 = vperm.xlu0 %6938, %v6991_v32  }
 0x491   : > { %2950 = vperm.xlu1 %6913, %v8764_v51   ;;  %v8769_v59 = vpop.permute.xlu0 %2517 }
 0x492   : > { %13674 = vst [vmem:[#allocation345_spill] sm:$0xff] %v8769_v59  ;;  %v8771_v57 = vpop.permute.xlu1 %2682 }
 0x493   : > { %13675 = vst [vmem:[#allocation346_spill] sm:$0xff] %v8771_v57  ;;  %2970 = vperm.xlu2 %6912, %v8766_v61   ;;  %v8788_v57 = vld [vmem:[#allocation2 + $0xd9] sm:$0xff] }
 0x494   : > { %v8774_v9 = vpop.permute.xlu2 %2730 }
 0x495   : > { %13676 = vst [vmem:[#allocation347_spill] sm:$0xff] %v8774_v9  ;;  %v8790_v9 = vld [vmem:[#allocation2 + $0x109] sm:$0xff] }
 0x497   : > { %3220 = vperm.xlu0 %6938, %v6992_v29  }
 0x499   : > { %2965 = vperm.xlu1 %6913, %v8776_v38   ;;  %v8781_v32 = vpop.permute.xlu0 %2529 }
 0x49a   : > { %13677 = vst [vmem:[#allocation348_spill] sm:$0xff] %v8781_v32  ;;  %v8783_v10 = vpop.permute.xlu1 %2690  ;;  %v6995_v32 = vld [vmem:[#allocation2 + $0x22] sm:$0xff] }
 0x49b   : > { %13678 = vst [vmem:[#allocation349_spill] sm:$0xff] %v8783_v10  ;;  %2985 = vperm.xlu2 %6912, %v8778_v50   ;;  %v8800_v10 = vld [vmem:[#allocation2 + $0xf9] sm:$0xff] }
 0x49c   : > { %v8786_v47 = vpop.permute.xlu2 %2742 }
 0x49d   : > { %13679 = vst [vmem:[#allocation350_spill] sm:$0xff] %v8786_v47  ;;  %v8802_v47 = vld [vmem:[#allocation2 + $0x129] sm:$0xff] }
 0x49f   : > { %3232 = vperm.xlu0 %6938, %v6993_v42  }
 0x4a1   : > { %2980 = vperm.xlu1 %6913, %v8788_v57   ;;  %v8793_v29 = vpop.permute.xlu0 %2541 }
 0x4a2   : > { %13680 = vst [vmem:[#allocation351_spill] sm:$0xff] %v8793_v29  ;;  %v8795_v0 = vpop.permute.xlu1 %2702 }
 0x4a3   : > { %13681 = vst [vmem:[#allocation352_spill] sm:$0xff] %v8795_v0  ;;  %3000 = vperm.xlu2 %6912, %v8790_v9   ;;  %v8812_v0 = vld [vmem:[#allocation2 + $0x121] sm:$0xff] }
 0x4a4   : > { %v8798_v41 = vpop.permute.xlu2 %2754 }
 0x4a5   : > { %13682 = vst [vmem:[#allocation353_spill] sm:$0xff] %v8798_v41  ;;  %v8814_v41 = vld [vmem:[#allocation2 + $0x151] sm:$0xff] }
 0x4a7   : > { %3244 = vperm.xlu0 %6938, %v6994_v62  }
 0x4a9   : > { %2995 = vperm.xlu1 %6913, %v8800_v10   ;;  %v8805_v42 = vpop.permute.xlu0 %2553 }
 0x4aa   : > { %13683 = vst [vmem:[#allocation354_spill] sm:$0xff] %v8805_v42  ;;  %v8807_v7 = vpop.permute.xlu1 %2714 }
 0x4ab   : > { %13684 = vst [vmem:[#allocation355_spill] sm:$0xff] %v8807_v7  ;;  %3015 = vperm.xlu2 %6912, %v8802_v47   ;;  %v8824_v7 = vld [vmem:[#allocation2 + $0x141] sm:$0xff] }
 0x4ac   : > { %v8810_v29 = vpop.permute.xlu2 %2766 }
 0x4ad   : > { %13685 = vst [vmem:[#allocation356_spill] sm:$0xff] %v8810_v29  ;;  %v8826_v29 = vld [vmem:[#allocation2 + $0x171] sm:$0xff] }
 0x4af   : > { %3771 = vperm.xlu0 %6938, %v6995_v32  }
 0x4b1   : > { %3010 = vperm.xlu1 %6913, %v8812_v0   ;;  %v8817_v62 = vpop.permute.xlu0 %2565 }
 0x4b2   : > { %13686 = vst [vmem:[#allocation357_spill] sm:$0xff] %v8817_v62  ;;  %v8819_v52 = vpop.permute.xlu1 %2726 }
 0x4b3   : > { %13687 = vst [vmem:[#allocation358_spill] sm:$0xff] %v8819_v52  ;;  %3030 = vperm.xlu2 %6912, %v8814_v41   ;;  %v8836_v52 = vld [vmem:[#allocation2 + $0x169] sm:$0xff] }
 0x4b4   : > { %v8822_v42 = vpop.permute.xlu2 %2778 }
 0x4b5   : > { %13688 = vst [vmem:[#allocation359_spill] sm:$0xff] %v8822_v42 }
 0x4b7   : > { %3791 = vperm.xlu0 %6938, %v6996_v2  }
 0x4b9   : > { %3025 = vperm.xlu1 %6913, %v8824_v7   ;;  %v8829_v32 = vpop.permute.xlu0 %2577 }
 0x4ba   : > { %13689 = vst [vmem:[#allocation360_spill] sm:$0xff] %v8829_v32  ;;  %v8831_v59 = vpop.permute.xlu1 %2738 }
 0x4bb   : > { %13690 = vst [vmem:[#allocation361_spill] sm:$0xff] %v8831_v59  ;;  %3045 = vperm.xlu2 %6912, %v8826_v29   ;;  %v8847_v59 = vld [vmem:[#allocation2 + $0x189] sm:$0xff] }
 0x4bc   : > { %v8834_v62 = vpop.permute.xlu2 %2790 }
 0x4bd   : > { %13691 = vst [vmem:[#allocation362_spill] sm:$0xff] %v8834_v62 }
 0x4bf   : > { %3803 = vperm.xlu0 %6938, %v6997_v44  }
 0x4c1   : > { %3040 = vperm.xlu1 %6913, %v8836_v52   ;;  %v8839_v42 = vpop.permute.xlu0 %2589 }
 0x4c2   : > { %13692 = vst [vmem:[#allocation363_spill] sm:$0xff] %v8839_v42  ;;  %v8841_v2 = vpop.permute.xlu1 %2750 }
 0x4c3   : > { %13693 = vst [vmem:[#allocation364_spill] sm:$0xff] %v8841_v2  ;;  %6914 = vset.pattern.permute.xlu2 %v13396_v30  ;;  %v6999_v2 = vld [vmem:[#allocation2 + $0xca] sm:$0xff] }
 0x4c4   : > { %3124 = vperm.xlu2 %6914, %v8707_v24  }
 0x4c5   : > { %v8845_v32 = vpop.permute.xlu2 %2900 }
 0x4c6   : > { %13694 = vst [vmem:[#allocation365_spill] sm:$0xff] %v8845_v32 }
 0x4c7   : > { %3815 = vperm.xlu0 %6938, %v6998_v53  }
 0x4c9   : > { %3055 = vperm.xlu1 %6913, %v8847_v59   ;;  %v8850_v62 = vpop.permute.xlu0 %2601 }
 0x4ca   : > { %13695 = vst [vmem:[#allocation366_spill] sm:$0xff] %v8850_v62  ;;  %v8852_v44 = vpop.permute.xlu1 %2762  ;;  %v7000_v62 = vld [vmem:[#allocation2 + $0xf2] sm:$0xff] }
 0x4cb   : > { %13696 = vst [vmem:[#allocation367_spill] sm:$0xff] %v8852_v44 }
 0x4cc   : > { %3136 = vperm.xlu2 %6914, %v8718_v36  }
 0x4cd   : > { %v8855_v42 = vpop.permute.xlu2 %2915 }
 0x4ce   : > { %13697 = vst [vmem:[#allocation368_spill] sm:$0xff] %v8855_v42 }
 0x4cf   : > { %3827 = vperm.xlu0 %6938, %v6999_v2  }
 0x4d1   : > { %6915 = vset.pattern.permute.xlu1 %v13396_v30  ;;  %v8858_v19 = vpop.permute.xlu0 %3128 }
 0x4d2   : > { %13698 = vst [vmem:[#allocation369_spill] sm:$0xff] %v8858_v19  ;;  %3132 = vperm.xlu1 %6915, %v8727_v8   ;;  %v8861_v32 = vpop.permute.xlu1 %2774  ;;  %v7001_v19 = vld [vmem:[#allocation2 + $0x112] sm:$0xff] }
 0x4d3   : > { %13699 = vst [vmem:[#allocation370_spill] sm:$0xff] %v8861_v32 }
 0x4d4   : > { %3144 = vperm.xlu2 %6914, %v8730_v25  }
 0x4d5   : > { %v8864_v53 = vpop.permute.xlu2 %2925 }
 0x4d6   : > { %13700 = vst [vmem:[#allocation371_spill] sm:$0xff] %v8864_v53  ;;  %v7002_v53 = vld [vmem:[#allocation2 + $0x13a] sm:$0xff] }
 0x4d7   : > { %3839 = vperm.xlu0 %6938, %v7000_v62  }
 0x4d9   : > { %v8866_v44 = vpop.permute.xlu0 %3148 }
 0x4da   : > { %13701 = vst [vmem:[#allocation372_spill] sm:$0xff] %v8866_v44  ;;  %3140 = vperm.xlu1 %6915, %v8740_v58   ;;  %v8869_v42 = vpop.permute.xlu1 %2786 }
 0x4db   : > { %13702 = vst [vmem:[#allocation373_spill] sm:$0xff] %v8869_v42 }
 0x4dc   : > { %3156 = vperm.xlu2 %6914, %v8742_v55  }
 0x4dd   : > { %v8872_v2 = vpop.permute.xlu2 %2940 }
 0x4de   : > { %13703 = vst [vmem:[#allocation374_spill] sm:$0xff] %v8872_v2  ;;  %v7003_v2 = vld [vmem:[#allocation2 + $0x15a] sm:$0xff] }
 0x4df   : > { %3851 = vperm.xlu0 %6938, %v7001_v19  }
 0x4e1   : > { %v8874_v12 = vpop.permute.xlu0 %3160 }
 0x4e2   : > { %13704 = vst [vmem:[#allocation375_spill] sm:$0xff] %v8874_v12  ;;  %3152 = vperm.xlu1 %6915, %v8752_v48   ;;  %v8877_v32 = vpop.permute.xlu1 %2798 }
 0x4e3   : > { %13705 = vst [vmem:[#allocation376_spill] sm:$0xff] %v8877_v32 }
 0x4e4   : > { %3168 = vperm.xlu2 %6914, %v8754_v63  }
 0x4e5   : > { %v8880_v62 = vpop.permute.xlu2 %2955 }
 0x4e6   : > { %13706 = vst [vmem:[#allocation377_spill] sm:$0xff] %v8880_v62  ;;  %v7004_v62 = vld [vmem:[#allocation2 + $0x182] sm:$0xff] }
 0x4e7   : > { %3863 = vperm.xlu0 %6938, %v7002_v53  }
 0x4e9   : > { %v8882_v44 = vpop.permute.xlu0 %3172 }
 0x4ea   : > { %13707 = vst [vmem:[#allocation378_spill] sm:$0xff] %v8882_v44  ;;  %3164 = vperm.xlu1 %6915, %v8764_v51  }
 0x4eb   : > { %v8885_v42 = vpop.permute.xlu1 %2910 }
 0x4ec   : > { %13708 = vst [vmem:[#allocation379_spill] sm:$0xff] %v8885_v42  ;;  %3180 = vperm.xlu2 %6914, %v8766_v61  }
 0x4ed   : > { %v8888_v19 = vpop.permute.xlu2 %2970 }
 0x4ee   : > { %13709 = vst [vmem:[#allocation380_spill] sm:$0xff] %v8888_v19  ;;  %v7005_v19 = vld [vmem:[#allocation2 + $0x38] sm:$0xff] }
 0x4ef   : > { %3875 = vperm.xlu0 %6938, %v7003_v2  }
 0x4f1   : > { %v8890_v12 = vpop.permute.xlu0 %3184 }
 0x4f2   : > { %13710 = vst [vmem:[#allocation381_spill] sm:$0xff] %v8890_v12  ;;  %3176 = vperm.xlu1 %6915, %v8776_v38  }
 0x4f3   : > { %v8893_v32 = vpop.permute.xlu1 %2920 }
 0x4f4   : > { %13711 = vst [vmem:[#allocation382_spill] sm:$0xff] %v8893_v32  ;;  %3192 = vperm.xlu2 %6914, %v8778_v50  }
 0x4f5   : > { %v8896_v53 = vpop.permute.xlu2 %2985 }
 0x4f6   : > { %13712 = vst [vmem:[#allocation383_spill] sm:$0xff] %v8896_v53  ;;  %v7006_v53 = vld [vmem:[#allocation2 + $0x78] sm:$0xff] }
 0x4f7   : > { %3887 = vperm.xlu0 %6938, %v7004_v62  }
 0x4f9   : > { %v8898_v44 = vpop.permute.xlu0 %3196 }
 0x4fa   : > { %13713 = vst [vmem:[#allocation384_spill] sm:$0xff] %v8898_v44  ;;  %3188 = vperm.xlu1 %6915, %v8788_v57  }
 0x4fb   : > { %v8901_v42 = vpop.permute.xlu1 %2935 }
 0x4fc   : > { %13714 = vst [vmem:[#allocation385_spill] sm:$0xff] %v8901_v42  ;;  %3204 = vperm.xlu2 %6914, %v8790_v9  }
 0x4fd   : > { %v8904_v2 = vpop.permute.xlu2 %3000 }
 0x4fe   : > { %13715 = vst [vmem:[#allocation386_spill] sm:$0xff] %v8904_v2  ;;  %v7007_v2 = vld [vmem:[#allocation2 + $0x98] sm:$0xff] }
 0x4ff   : > { %4415 = vperm.xlu0 %6938, %v7005_v19  }
 0x501   : > { %v8906_v12 = vpop.permute.xlu0 %3208 }
 0x502   : > { %13716 = vst [vmem:[#allocation387_spill] sm:$0xff] %v8906_v12  ;;  %3200 = vperm.xlu1 %6915, %v8800_v10  }
 0x503   : > { %v8909_v32 = vpop.permute.xlu1 %2950 }
 0x504   : > { %13717 = vst [vmem:[#allocation388_spill] sm:$0xff] %v8909_v32  ;;  %3216 = vperm.xlu2 %6914, %v8802_v47  }
 0x505   : > { %v8912_v62 = vpop.permute.xlu2 %3015 }
 0x506   : > { %13718 = vst [vmem:[#allocation389_spill] sm:$0xff] %v8912_v62  ;;  %v7008_v62 = vld [vmem:[#allocation2 + $0xc0] sm:$0xff] }
 0x507   : > { %4435 = vperm.xlu0 %6938, %v7006_v53  }
 0x509   : > { %v8914_v44 = vpop.permute.xlu0 %3220 }
 0x50a   : > { %13719 = vst [vmem:[#allocation390_spill] sm:$0xff] %v8914_v44  ;;  %3212 = vperm.xlu1 %6915, %v8812_v0  }
 0x50b   : > { %v8917_v42 = vpop.permute.xlu1 %2965 }
 0x50c   : > { %13720 = vst [vmem:[#allocation391_spill] sm:$0xff] %v8917_v42  ;;  %3228 = vperm.xlu2 %6914, %v8814_v41  }
 0x50d   : > { %v8920_v19 = vpop.permute.xlu2 %3030 }
 0x50e   : > { %13721 = vst [vmem:[#allocation392_spill] sm:$0xff] %v8920_v19  ;;  %v7009_v19 = vld [vmem:[#allocation2 + $0xe0] sm:$0xff] }
 0x50f   : > { %4447 = vperm.xlu0 %6938, %v7007_v2  }
 0x511   : > { %v8922_v12 = vpop.permute.xlu0 %3232 }
 0x512   : > { %13722 = vst [vmem:[#allocation393_spill] sm:$0xff] %v8922_v12  ;;  %3224 = vperm.xlu1 %6915, %v8824_v7   ;;  %v7029_v12 = vld [vmem:[#allocation2 + $0xe2] sm:$0xff] }
 0x513   : > { %v8925_v32 = vpop.permute.xlu1 %2980 }
 0x514   : > { %13723 = vst [vmem:[#allocation394_spill] sm:$0xff] %v8925_v32  ;;  %3240 = vperm.xlu2 %6914, %v8826_v29  }
 0x515   : > { %v8928_v53 = vpop.permute.xlu2 %3045 }
 0x516   : > { %13724 = vst [vmem:[#allocation395_spill] sm:$0xff] %v8928_v53 }
 0x517   : > { %4459 = vperm.xlu0 %6938, %v7008_v62  }
 0x519   : > { %v8930_v44 = vpop.permute.xlu0 %3244 }
 0x51a   : > { %13725 = vst [vmem:[#allocation396_spill] sm:$0xff] %v8930_v44  ;;  %3236 = vperm.xlu1 %6915, %v8836_v52   ;;  %v7010_v44 = vld [vmem:[#allocation2 + $0x108] sm:$0xff] }
 0x51b   : > { %v8933_v42 = vpop.permute.xlu1 %2995 }
 0x51c   : > { %13726 = vst [vmem:[#allocation397_spill] sm:$0xff] %v8933_v42  ;;  %6916 = vset.pattern.permute.xlu2 %v13430_v54 }
 0x51d   : > { %3317 = vperm.xlu2 %6916, %v8707_v24  }
 0x51e   : > { %v8937_v2 = vpop.permute.xlu2 %3124 }
 0x51f   : > { %13727 = vst [vmem:[#allocation398_spill] sm:$0xff] %v8937_v2  ;;  %4471 = vperm.xlu0 %6938, %v7009_v19   ;;  %v7011_v2 = vld [vmem:[#allocation2 + $0x128] sm:$0xff] }
 0x521   : > { %v8939_v32 = vpop.permute.xlu0 %3771 }
 0x522   : > { %13728 = vst [vmem:[#allocation399_spill] sm:$0xff] %v8939_v32  ;;  %3248 = vperm.xlu1 %6915, %v8847_v59  }
 0x523   : > { %v8942_v53 = vpop.permute.xlu1 %3010 }
 0x524   : > { %13729 = vst [vmem:[#allocation400_spill] sm:$0xff] %v8942_v53 }
 0x525   : > { %3329 = vperm.xlu2 %6916, %v8718_v36  }
 0x526   : > { %v8945_v62 = vpop.permute.xlu2 %3136 }
 0x527   : > { %13730 = vst [vmem:[#allocation401_spill] sm:$0xff] %v8945_v62  ;;  %4483 = vperm.xlu0 %6938, %v7010_v44   ;;  %v7012_v62 = vld [vmem:[#allocation2 + $0x150] sm:$0xff] }
 0x529   : > { %v8947_v42 = vpop.permute.xlu0 %3791 }
 0x52a   : > { %13731 = vst [vmem:[#allocation402_spill] sm:$0xff] %v8947_v42  ;;  %6917 = vset.pattern.permute.xlu1 %v13430_v54 }
 0x52b   : > { %3325 = vperm.xlu1 %6917, %v8727_v8   ;;  %v8951_v24 = vpop.permute.xlu1 %3025 }
 0x52c   : > { %13732 = vst [vmem:[#allocation403_spill] sm:$0xff] %v8951_v24 }
 0x52d   : > { %3337 = vperm.xlu2 %6916, %v8730_v25  }
 0x52e   : > { %v8954_v19 = vpop.permute.xlu2 %3144 }
 0x52f   : > { %13733 = vst [vmem:[#allocation404_spill] sm:$0xff] %v8954_v19  ;;  %4495 = vperm.xlu0 %6938, %v7011_v2   ;;  %v7013_v19 = vld [vmem:[#allocation2 + $0x170] sm:$0xff] }
 0x531   : > { %v8956_v53 = vpop.permute.xlu0 %3803 }
 0x532   : > { %13734 = vst [vmem:[#allocation405_spill] sm:$0xff] %v8956_v53 }
 0x533   : > { %3333 = vperm.xlu1 %6917, %v8740_v58   ;;  %v8959_v36 = vpop.permute.xlu1 %3040 }
 0x534   : > { %13735 = vst [vmem:[#allocation406_spill] sm:$0xff] %v8959_v36  ;;  %v7024_v36 = vld [vmem:[#allocation2 + $0x199] sm:$0xff] }
 0x535   : > { %3349 = vperm.xlu2 %6916, %v8742_v55  }
 0x536   : > { %v8962_v44 = vpop.permute.xlu2 %3156 }
 0x537   : > { %13736 = vst [vmem:[#allocation407_spill] sm:$0xff] %v8962_v44  ;;  %4507 = vperm.xlu0 %6938, %v7012_v62   ;;  %v7014_v44 = vld [vmem:[#allocation2 + $0x198] sm:$0xff] }
 0x539   : > { %v8964_v8 = vpop.permute.xlu0 %3815 }
 0x53a   : > { %13737 = vst [vmem:[#allocation408_spill] sm:$0xff] %v8964_v8 }
 0x53b   : > { %3345 = vperm.xlu1 %6917, %v8752_v48   ;;  %v8967_v25 = vpop.permute.xlu1 %3055 }
 0x53c   : > { %13738 = vst [vmem:[#allocation409_spill] sm:$0xff] %v8967_v25 }
 0x53d   : > { %3361 = vperm.xlu2 %6916, %v8754_v63  }
 0x53e   : > { %v8970_v2 = vpop.permute.xlu2 %3168 }
 0x53f   : > { %13739 = vst [vmem:[#allocation410_spill] sm:$0xff] %v8970_v2  ;;  %4519 = vperm.xlu0 %6938, %v7013_v19   ;;  %v7015_v2 = vld [vmem:[#allocation2 + $0x39] sm:$0xff] }
 0x541   : > { %v8972_v58 = vpop.permute.xlu0 %3827 }
 0x542   : > { %13740 = vst [vmem:[#allocation411_spill] sm:$0xff] %v8972_v58 }
 0x543   : > { %3357 = vperm.xlu1 %6917, %v8764_v51  }
 0x544   : > { %v8975_v55 = vpop.permute.xlu1 %3132 }
 0x545   : > { %13741 = vst [vmem:[#allocation412_spill] sm:$0xff] %v8975_v55  ;;  %3373 = vperm.xlu2 %6916, %v8766_v61  }
 0x546   : > { %v8978_v62 = vpop.permute.xlu2 %3180 }
 0x547   : > { %13742 = vst [vmem:[#allocation413_spill] sm:$0xff] %v8978_v62  ;;  %4531 = vperm.xlu0 %6938, %v7014_v44   ;;  %v7016_v62 = vld [vmem:[#allocation2 + $0x79] sm:$0xff] }
 0x549   : > { %v8980_v48 = vpop.permute.xlu0 %3839 }
 0x54a   : > { %13743 = vst [vmem:[#allocation414_spill] sm:$0xff] %v8980_v48  ;;  %v7030_v48 = vld [vmem:[#allocation2 + $0x10a] sm:$0xff] }
 0x54b   : > { %3369 = vperm.xlu1 %6917, %v8776_v38  }
 0x54c   : > { %v8983_v63 = vpop.permute.xlu1 %3140 }
 0x54d   : > { %13744 = vst [vmem:[#allocation415_spill] sm:$0xff] %v8983_v63  ;;  %3385 = vperm.xlu2 %6916, %v8778_v50   ;;  %v7023_v63 = vld [vmem:[#allocation2 + $0x171] sm:$0xff] }
 0x54e   : > { %v8986_v19 = vpop.permute.xlu2 %3192 }
 0x54f   : > { %13745 = vst [vmem:[#allocation416_spill] sm:$0xff] %v8986_v19  ;;  %5058 = vperm.xlu0 %6938, %v7015_v2   ;;  %v7017_v19 = vld [vmem:[#allocation2 + $0x99] sm:$0xff] }
 0x551   : > { %v8988_v51 = vpop.permute.xlu0 %3851 }
 0x552   : > { %13746 = vst [vmem:[#allocation417_spill] sm:$0xff] %v8988_v51 }
 0x553   : > { %3381 = vperm.xlu1 %6917, %v8788_v57  }
 0x554   : > { %v8991_v61 = vpop.permute.xlu1 %3152 }
 0x555   : > { %13747 = vst [vmem:[#allocation418_spill] sm:$0xff] %v8991_v61  ;;  %3397 = vperm.xlu2 %6916, %v8790_v9  }
 0x556   : > { %v8994_v44 = vpop.permute.xlu2 %3204 }
 0x557   : > { %13748 = vst [vmem:[#allocation419_spill] sm:$0xff] %v8994_v44  ;;  %5078 = vperm.xlu0 %6938, %v7016_v62   ;;  %v7018_v44 = vld [vmem:[#allocation2 + $0xc1] sm:$0xff] }
 0x559   : > { %v8996_v38 = vpop.permute.xlu0 %3863 }
 0x55a   : > { %13749 = vst [vmem:[#allocation420_spill] sm:$0xff] %v8996_v38 }
 0x55b   : > { %3393 = vperm.xlu1 %6917, %v8800_v10  }
 0x55c   : > { %v8999_v50 = vpop.permute.xlu1 %3164 }
 0x55d   : > { %13750 = vst [vmem:[#allocation421_spill] sm:$0xff] %v8999_v50  ;;  %3409 = vperm.xlu2 %6916, %v8802_v47   ;;  %v7019_v50 = vld [vmem:[#allocation2 + $0xe1] sm:$0xff] }
 0x55e   : > { %v9002_v2 = vpop.permute.xlu2 %3216 }
 0x55f   : > { %13751 = vst [vmem:[#allocation422_spill] sm:$0xff] %v9002_v2  ;;  %5090 = vperm.xlu0 %6938, %v7017_v19   ;;  %v9058_v2 = vld [vmem:[#allocation2 + $0x7a] sm:$0xff] }
 0x561   : > { %v9004_v57 = vpop.permute.xlu0 %3875 }
 0x562   : > { %13752 = vst [vmem:[#allocation423_spill] sm:$0xff] %v9004_v57  ;;  %v7028_v57 = vld [vmem:[#allocation2 + $0xc2] sm:$0xff] }
 0x563   : > { %3405 = vperm.xlu1 %6917, %v8812_v0  }
 0x564   : > { %v9007_v9 = vpop.permute.xlu1 %3176 }
 0x565   : > { %13753 = vst [vmem:[#allocation424_spill] sm:$0xff] %v9007_v9  ;;  %3421 = vperm.xlu2 %6916, %v8814_v41   ;;  %v9023_v41 = vld [vmem:[#allocation2 + $0x1a] sm:$0xff] }
 0x566   : > { %v9010_v62 = vpop.permute.xlu2 %3228 }
 0x567   : > { %13754 = vst [vmem:[#allocation425_spill] sm:$0xff] %v9010_v62  ;;  %5102 = vperm.xlu0 %6938, %v7018_v44   ;;  %v9043_v62 = vld [vmem:[#allocation2 + $0x32] sm:$0xff] }
 0x569   : > { %v9012_v10 = vpop.permute.xlu0 %3887 }
 0x56a   : > { %13755 = vst [vmem:[#allocation426_spill] sm:$0xff] %v9012_v10  ;;  %v7027_v10 = vld [vmem:[#allocation2 + $0x9a] sm:$0xff] }
 0x56b   : > { %3417 = vperm.xlu1 %6917, %v8824_v7   ;;  %v7020_v7 = vld [vmem:[#allocation2 + $0x109] sm:$0xff] }
 0x56c   : > { %v9015_v47 = vpop.permute.xlu1 %3188 }
 0x56d   : > { %13756 = vst [vmem:[#allocation427_spill] sm:$0xff] %v9015_v47  ;;  %3433 = vperm.xlu2 %6916, %v8826_v29  }
 0x56e   : > { %v9018_v19 = vpop.permute.xlu2 %3240 }
 0x56f   : > { %13757 = vst [vmem:[#allocation428_spill] sm:$0xff] %v9018_v19  ;;  %5114 = vperm.xlu0 %6938, %v7019_v50   ;;  %v9034_v50 = vld [vmem:[#allocation2 + $0x3a] sm:$0xff] }
 0x571   : > { %v9020_v0 = vpop.permute.xlu0 %4415 }
 0x572   : > { %13758 = vst [vmem:[#allocation429_spill] sm:$0xff] %v9020_v0 }
 0x573   : > { %3429 = vperm.xlu1 %6917, %v8836_v52   ;;  %v7021_v52 = vld [vmem:[#allocation2 + $0x129] sm:$0xff] }
 0x574   : > { %v9025_v9 = vpop.permute.xlu1 %3200 }
 0x575   : > { %13759 = vst [vmem:[#allocation430_spill] sm:$0xff] %v9025_v9  ;;  %6918 = vset.pattern.permute.xlu2 %v13362_v20 }
 0x576   : > { %3543 = vperm.xlu2 %6918, %v9023_v41  }
 0x577   : > { %5126 = vperm.xlu0 %6938, %v7020_v7   ;;  %v9029_v44 = vpop.permute.xlu2 %3317  ;;  %v9046_v7 = vld [vmem:[#allocation2 + $0x52] sm:$0xff] }
 0x578   : > { %13760 = vst [vmem:[#allocation431_spill] sm:$0xff] %v9029_v44  ;;  %v7022_v44 = vld [vmem:[#allocation2 + $0x151] sm:$0xff] }
 0x579   : > { %v9031_v29 = vpop.permute.xlu0 %4435 }
 0x57a   : > { %13761 = vst [vmem:[#allocation432_spill] sm:$0xff] %v9031_v29  ;;  %v7026_v29 = vld [vmem:[#allocation2 + $0x7a] sm:$0xff] }
 0x57b   : > { %3441 = vperm.xlu1 %6917, %v8847_v59  }
 0x57c   : > { %v9036_v47 = vpop.permute.xlu1 %3212 }
 0x57d   : > { %13762 = vst [vmem:[#allocation433_spill] sm:$0xff] %v9036_v47 }
 0x57e   : > { %3558 = vperm.xlu2 %6918, %v9034_v50  }
 0x57f   : > { %5138 = vperm.xlu0 %6938, %v7021_v52   ;;  %v9039_v9 = vpop.permute.xlu2 %3329 }
 0x580   : > { %13763 = vst [vmem:[#allocation434_spill] sm:$0xff] %v9039_v9  ;;  %v9056_v9 = vld [vmem:[#allocation2 + $0x4a] sm:$0xff] }
 0x581   : > { %v9041_v19 = vpop.permute.xlu0 %4447 }
 0x582   : > { %13764 = vst [vmem:[#allocation435_spill] sm:$0xff] %v9041_v19 }
 0x583   : > { %6919 = vset.pattern.permute.xlu1 %v13362_v20 }
 0x584   : > { %3553 = vperm.xlu1 %6919, %v9043_v62   ;;  %v9049_v59 = vpop.permute.xlu1 %3224 }
 0x585   : > { %13765 = vst [vmem:[#allocation436_spill] sm:$0xff] %v9049_v59 }
 0x586   : > { %3568 = vperm.xlu2 %6918, %v9046_v7  }
 0x587   : > { %5150 = vperm.xlu0 %6938, %v7022_v44   ;;  %v9052_v47 = vpop.permute.xlu2 %3337  ;;  %v9068_v44 = vld [vmem:[#allocation2 + $0x6a] sm:$0xff] }
 0x588   : > { %13766 = vst [vmem:[#allocation437_spill] sm:$0xff] %v9052_v47  ;;  %v9070_v47 = vld [vmem:[#allocation2 + $0x9a] sm:$0xff] }
 0x589   : > { %v9054_v52 = vpop.permute.xlu0 %4459 }
 0x58a   : > { %13767 = vst [vmem:[#allocation438_spill] sm:$0xff] %v9054_v52  ;;  %v7025_v52 = vld [vmem:[#allocation2 + $0x3a] sm:$0xff] }
 0x58c   : > { %3563 = vperm.xlu1 %6919, %v9056_v9   ;;  %v9061_v61 = vpop.permute.xlu1 %3236 }
 0x58d   : > { %13768 = vst [vmem:[#allocation439_spill] sm:$0xff] %v9061_v61 }
 0x58e   : > { %3583 = vperm.xlu2 %6918, %v9058_v2  }
 0x58f   : > { %5162 = vperm.xlu0 %6938, %v7023_v63   ;;  %v9064_v59 = vpop.permute.xlu2 %3349  ;;  %v9080_v63 = vld [vmem:[#allocation2 + $0x92] sm:$0xff] }
 0x590   : > { %13769 = vst [vmem:[#allocation440_spill] sm:$0xff] %v9064_v59  ;;  %v9082_v59 = vld [vmem:[#allocation2 + $0xc2] sm:$0xff] }
 0x591   : > { %v9066_v55 = vpop.permute.xlu0 %4471 }
 0x592   : > { %13770 = vst [vmem:[#allocation441_spill] sm:$0xff] %v9066_v55 }
 0x594   : > { %3578 = vperm.xlu1 %6919, %v9068_v44   ;;  %v9073_v25 = vpop.permute.xlu1 %3248 }
 0x595   : > { %13771 = vst [vmem:[#allocation442_spill] sm:$0xff] %v9073_v25 }
 0x596   : > { %3598 = vperm.xlu2 %6918, %v9070_v47  }
 0x597   : > { %5174 = vperm.xlu0 %6938, %v7024_v36   ;;  %v9076_v61 = vpop.permute.xlu2 %3361  ;;  %v9092_v36 = vld [vmem:[#allocation2 + $0xb2] sm:$0xff] }
 0x598   : > { %13772 = vst [vmem:[#allocation443_spill] sm:$0xff] %v9076_v61  ;;  %v9094_v61 = vld [vmem:[#allocation2 + $0xe2] sm:$0xff] }
 0x599   : > { %v9078_v24 = vpop.permute.xlu0 %4483 }
 0x59a   : > { %13773 = vst [vmem:[#allocation444_spill] sm:$0xff] %v9078_v24 }
 0x59c   : > { %3593 = vperm.xlu1 %6919, %v9080_v63  }
 0x59d   : > { %v9085_v55 = vpop.permute.xlu1 %3325 }
 0x59e   : > { %13774 = vst [vmem:[#allocation445_spill] sm:$0xff] %v9085_v55  ;;  %3613 = vperm.xlu2 %6918, %v9082_v59  }
 0x59f   : > { %5701 = vperm.xlu0 %6938, %v7025_v52   ;;  %v9088_v25 = vpop.permute.xlu2 %3373  ;;  %v9104_v52 = vld [vmem:[#allocation2 + $0xda] sm:$0xff] }
 0x5a0   : > { %13775 = vst [vmem:[#allocation446_spill] sm:$0xff] %v9088_v25  ;;  %v9106_v25 = vld [vmem:[#allocation2 + $0x10a] sm:$0xff] }
 0x5a1   : > { %v9090_v19 = vpop.permute.xlu0 %4495 }
 0x5a2   : > { %13776 = vst [vmem:[#allocation447_spill] sm:$0xff] %v9090_v19 }
 0x5a4   : > { %3608 = vperm.xlu1 %6919, %v9092_v36  }
 0x5a5   : > { %v9097_v24 = vpop.permute.xlu1 %3333 }
 0x5a6   : > { %13777 = vst [vmem:[#allocation448_spill] sm:$0xff] %v9097_v24  ;;  %3628 = vperm.xlu2 %6918, %v9094_v61  }
 0x5a7   : > { %5721 = vperm.xlu0 %6938, %v7026_v29   ;;  %v9100_v55 = vpop.permute.xlu2 %3385  ;;  %v9116_v29 = vld [vmem:[#allocation2 + $0xfa] sm:$0xff] }
 0x5a8   : > { %13778 = vst [vmem:[#allocation449_spill] sm:$0xff] %v9100_v55  ;;  %v9118_v55 = vld [vmem:[#allocation2 + $0x12a] sm:$0xff] }
 0x5a9   : > { %v9102_v0 = vpop.permute.xlu0 %4507 }
 0x5aa   : > { %13779 = vst [vmem:[#allocation450_spill] sm:$0xff] %v9102_v0 }
 0x5ac   : > { %3623 = vperm.xlu1 %6919, %v9104_v52  }
 0x5ad   : > { %v9109_v19 = vpop.permute.xlu1 %3345 }
 0x5ae   : > { %13780 = vst [vmem:[#allocation451_spill] sm:$0xff] %v9109_v19  ;;  %3643 = vperm.xlu2 %6918, %v9106_v25  }
 0x5af   : > { %5733 = vperm.xlu0 %6938, %v7027_v10   ;;  %v9112_v24 = vpop.permute.xlu2 %3397  ;;  %v9128_v10 = vld [vmem:[#allocation2 + $0x122] sm:$0xff] }
 0x5b0   : > { %13781 = vst [vmem:[#allocation452_spill] sm:$0xff] %v9112_v24  ;;  %v9130_v24 = vld [vmem:[#allocation2 + $0x152] sm:$0xff] }
 0x5b1   : > { %v9114_v32 = vpop.permute.xlu0 %4519 }
 0x5b2   : > { %13782 = vst [vmem:[#allocation453_spill] sm:$0xff] %v9114_v32 }
 0x5b4   : > { %3638 = vperm.xlu1 %6919, %v9116_v29  }
 0x5b5   : > { %v9121_v0 = vpop.permute.xlu1 %3357 }
 0x5b6   : > { %13783 = vst [vmem:[#allocation454_spill] sm:$0xff] %v9121_v0  ;;  %3658 = vperm.xlu2 %6918, %v9118_v55  }
 0x5b7   : > { %5745 = vperm.xlu0 %6938, %v7028_v57   ;;  %v9124_v19 = vpop.permute.xlu2 %3409  ;;  %v9140_v57 = vld [vmem:[#allocation2 + $0x142] sm:$0xff] }
 0x5b8   : > { %13784 = vst [vmem:[#allocation455_spill] sm:$0xff] %v9124_v19  ;;  %v9142_v19 = vld [vmem:[#allocation2 + $0x172] sm:$0xff] }
 0x5b9   : > { %v9126_v38 = vpop.permute.xlu0 %4531 }
 0x5ba   : > { %13785 = vst [vmem:[#allocation456_spill] sm:$0xff] %v9126_v38 }
 0x5bc   : > { %3653 = vperm.xlu1 %6919, %v9128_v10  }
 0x5bd   : > { %v9133_v32 = vpop.permute.xlu1 %3369 }
 0x5be   : > { %13786 = vst [vmem:[#allocation457_spill] sm:$0xff] %v9133_v32  ;;  %3673 = vperm.xlu2 %6918, %v9130_v24  }
 0x5bf   : > { %5757 = vperm.xlu0 %6938, %v7029_v12   ;;  %v9136_v0 = vpop.permute.xlu2 %3421  ;;  %v9152_v12 = vld [vmem:[#allocation2 + $0x16a] sm:$0xff] }
 0x5c0   : > { %13787 = vst [vmem:[#allocation458_spill] sm:$0xff] %v9136_v0 }
 0x5c1   : > { %v9138_v51 = vpop.permute.xlu0 %5058 }
 0x5c2   : > { %13788 = vst [vmem:[#allocation459_spill] sm:$0xff] %v9138_v51  ;;  %v7031_v51 = vld [vmem:[#allocation2 + $0x12a] sm:$0xff] }
 0x5c4   : > { %3668 = vperm.xlu1 %6919, %v9140_v57  }
 0x5c5   : > { %v9145_v38 = vpop.permute.xlu1 %3381 }
 0x5c6   : > { %13789 = vst [vmem:[#allocation460_spill] sm:$0xff] %v9145_v38  ;;  %3688 = vperm.xlu2 %6918, %v9142_v19  }
 0x5c7   : > { %5769 = vperm.xlu0 %6938, %v7030_v48   ;;  %v9148_v32 = vpop.permute.xlu2 %3433  ;;  %v9163_v48 = vld [vmem:[#allocation2 + $0x18a] sm:$0xff] }
 0x5c8   : > { %13790 = vst [vmem:[#allocation461_spill] sm:$0xff] %v9148_v32 }
 0x5c9   : > { %v9150_v58 = vpop.permute.xlu0 %5078 }
 0x5ca   : > { %13791 = vst [vmem:[#allocation462_spill] sm:$0xff] %v9150_v58  ;;  %v7032_v58 = vld [vmem:[#allocation2 + $0x152] sm:$0xff] }
 0x5cc   : > { %3683 = vperm.xlu1 %6919, %v9152_v12  }
 0x5cd   : > { %v9155_v0 = vpop.permute.xlu1 %3393 }
 0x5ce   : > { %13792 = vst [vmem:[#allocation463_spill] sm:$0xff] %v9155_v0  ;;  %6920 = vset.pattern.permute.xlu2 %v13396_v30 }
 0x5cf   : > { %5781 = vperm.xlu0 %6938, %v7031_v51   ;;  %3767 = vperm.xlu2 %6920, %v9023_v41  }
 0x5d0   : > { %v9159_v38 = vpop.permute.xlu2 %3543 }
 0x5d1   : > { %13793 = vst [vmem:[#allocation464_spill] sm:$0xff] %v9159_v38  ;;  %v9161_v8 = vpop.permute.xlu0 %5090  ;;  %v7033_v38 = vld [vmem:[#allocation2 + $0x172] sm:$0xff] }
 0x5d2   : > { %13794 = vst [vmem:[#allocation465_spill] sm:$0xff] %v9161_v8 }
 0x5d4   : > { %3698 = vperm.xlu1 %6919, %v9163_v48  }
 0x5d5   : > { %v9166_v32 = vpop.permute.xlu1 %3405 }
 0x5d6   : > { %13795 = vst [vmem:[#allocation466_spill] sm:$0xff] %v9166_v32 }
 0x5d7   : > { %5793 = vperm.xlu0 %6938, %v7032_v58   ;;  %3779 = vperm.xlu2 %6920, %v9034_v50  }
 0x5d8   : > { %v9169_v0 = vpop.permute.xlu2 %3558 }
 0x5d9   : > { %13796 = vst [vmem:[#allocation467_spill] sm:$0xff] %v9169_v0  ;;  %v9171_v53 = vpop.permute.xlu0 %5102  ;;  %v7034_v0 = vld [vmem:[#allocation2 + $0x19a] sm:$0xff] }
 0x5da   : > { %13797 = vst [vmem:[#allocation468_spill] sm:$0xff] %v9171_v53 }
 0x5dc   : > { %6921 = vset.pattern.permute.xlu1 %v13396_v30 }
 0x5dd   : > { %3775 = vperm.xlu1 %6921, %v9043_v62   ;;  %v9175_v51 = vpop.permute.xlu1 %3417 }
 0x5de   : > { %13798 = vst [vmem:[#allocation469_spill] sm:$0xff] %v9175_v51 }
 0x5df   : > { %5805 = vperm.xlu0 %6938, %v7033_v38   ;;  %3787 = vperm.xlu2 %6920, %v9046_v7  }
 0x5e0   : > { %v9178_v8 = vpop.permute.xlu2 %3568 }
 0x5e1   : > { %13799 = vst [vmem:[#allocation470_spill] sm:$0xff] %v9178_v8  ;;  %v9180_v32 = vpop.permute.xlu0 %5114  ;;  %v7035_v8 = vld [vmem:[#allocation2 + $0x8] sm:$0xff] }
 0x5e2   : > { %13800 = vst [vmem:[#allocation471_spill] sm:$0xff] %v9180_v32 }
 0x5e5   : > { %3783 = vperm.xlu1 %6921, %v9056_v9   ;;  %v9183_v58 = vpop.permute.xlu1 %3429 }
 0x5e6   : > { %13801 = vst [vmem:[#allocation472_spill] sm:$0xff] %v9183_v58 }
 0x5e7   : > { %5817 = vperm.xlu0 %6938, %v7034_v0   ;;  %3799 = vperm.xlu2 %6920, %v9058_v2  }
 0x5e8   : > { %v9186_v53 = vpop.permute.xlu2 %3583 }
 0x5e9   : > { %13802 = vst [vmem:[#allocation473_spill] sm:$0xff] %v9186_v53  ;;  %v9188_v42 = vpop.permute.xlu0 %5126  ;;  %v7036_v53 = vld [vmem:[#allocation2 + $0x48] sm:$0xff] }
 0x5ea   : > { %13803 = vst [vmem:[#allocation474_spill] sm:$0xff] %v9188_v42 }
 0x5ed   : > { %3795 = vperm.xlu1 %6921, %v9068_v44   ;;  %v9191_v38 = vpop.permute.xlu1 %3441 }
 0x5ee   : > { %13804 = vst [vmem:[#allocation475_spill] sm:$0xff] %v9191_v38 }
 0x5ef   : > { %6941 = vset.pattern.permute.xlu0 %v13430_v54  ;;  %3811 = vperm.xlu2 %6920, %v9070_v47  }
 0x5f0   : > { %749 = vperm.xlu0 %6941, %v7035_v8   ;;  %v9195_v51 = vpop.permute.xlu2 %3598  ;;  %v7037_v8 = vld [vmem:[#allocation2 + $0x68] sm:$0xff] }
 0x5f1   : > { %13805 = vst [vmem:[#allocation476_spill] sm:$0xff] %v9195_v51  ;;  %v9197_v58 = vpop.permute.xlu0 %5138 }
 0x5f2   : > { %13806 = vst [vmem:[#allocation477_spill] sm:$0xff] %v9197_v58 }
 0x5f5   : > { %3807 = vperm.xlu1 %6921, %v9080_v63  }
 0x5f6   : > { %v9200_v0 = vpop.permute.xlu1 %3553 }
 0x5f7   : > { %13807 = vst [vmem:[#allocation478_spill] sm:$0xff] %v9200_v0  ;;  %3823 = vperm.xlu2 %6920, %v9082_v59  }
 0x5f8   : > { %769 = vperm.xlu0 %6941, %v7036_v53   ;;  %v9203_v42 = vpop.permute.xlu2 %3613  ;;  %v7038_v53 = vld [vmem:[#allocation2 + $0x90] sm:$0xff] }
 0x5f9   : > { %13808 = vst [vmem:[#allocation479_spill] sm:$0xff] %v9203_v42  ;;  %v9205_v38 = vpop.permute.xlu0 %5150 }
 0x5fa   : > { %13809 = vst [vmem:[#allocation480_spill] sm:$0xff] %v9205_v38 }
 0x5fd   : > { %3819 = vperm.xlu1 %6921, %v9092_v36  }
 0x5fe   : > { %v9208_v32 = vpop.permute.xlu1 %3563 }
 0x5ff   : > { %13810 = vst [vmem:[#allocation481_spill] sm:$0xff] %v9208_v32  ;;  %3835 = vperm.xlu2 %6920, %v9094_v61  }
 0x600   : > { %781 = vperm.xlu0 %6941, %v7037_v8   ;;  %v9211_v51 = vpop.permute.xlu2 %3628  ;;  %v7039_v8 = vld [vmem:[#allocation2 + $0xb0] sm:$0xff] }
 0x601   : > { %13811 = vst [vmem:[#allocation482_spill] sm:$0xff] %v9211_v51  ;;  %v9213_v58 = vpop.permute.xlu0 %5162 }
 0x602   : > { %13812 = vst [vmem:[#allocation483_spill] sm:$0xff] %v9213_v58 }
 0x605   : > { %3831 = vperm.xlu1 %6921, %v9104_v52  }
 0x606   : > { %v9216_v0 = vpop.permute.xlu1 %3578 }
 0x607   : > { %13813 = vst [vmem:[#allocation484_spill] sm:$0xff] %v9216_v0  ;;  %3847 = vperm.xlu2 %6920, %v9106_v25  }
 0x608   : > { %793 = vperm.xlu0 %6941, %v7038_v53   ;;  %v9219_v42 = vpop.permute.xlu2 %3643  ;;  %v7040_v53 = vld [vmem:[#allocation2 + $0xd8] sm:$0xff] }
 0x609   : > { %13814 = vst [vmem:[#allocation485_spill] sm:$0xff] %v9219_v42  ;;  %v9221_v38 = vpop.permute.xlu0 %5174 }
 0x60a   : > { %13815 = vst [vmem:[#allocation486_spill] sm:$0xff] %v9221_v38 }
 0x60d   : > { %3843 = vperm.xlu1 %6921, %v9116_v29  }
 0x60e   : > { %v9224_v32 = vpop.permute.xlu1 %3593 }
 0x60f   : > { %13816 = vst [vmem:[#allocation487_spill] sm:$0xff] %v9224_v32  ;;  %3859 = vperm.xlu2 %6920, %v9118_v55  }
 0x610   : > { %805 = vperm.xlu0 %6941, %v7039_v8   ;;  %v9227_v58 = vpop.permute.xlu2 %3658  ;;  %v7041_v8 = vld [vmem:[#allocation2 + $0xf8] sm:$0xff] }
 0x611   : > { %13817 = vst [vmem:[#allocation488_spill] sm:$0xff] %v9227_v58  ;;  %v9229_v51 = vpop.permute.xlu0 %5701 }
 0x612   : > { %13818 = vst [vmem:[#allocation489_spill] sm:$0xff] %v9229_v51 }
 0x615   : > { %3855 = vperm.xlu1 %6921, %v9128_v10  }
 0x616   : > { %v9232_v0 = vpop.permute.xlu1 %3608 }
 0x617   : > { %13819 = vst [vmem:[#allocation490_spill] sm:$0xff] %v9232_v0  ;;  %3871 = vperm.xlu2 %6920, %v9130_v24  }
 0x618   : > { %817 = vperm.xlu0 %6941, %v7040_v53   ;;  %v9235_v38 = vpop.permute.xlu2 %3673  ;;  %v7042_v53 = vld [vmem:[#allocation2 + $0x120] sm:$0xff] }
 0x619   : > { %13820 = vst [vmem:[#allocation491_spill] sm:$0xff] %v9235_v38  ;;  %v9237_v42 = vpop.permute.xlu0 %5721  ;;  %v7059_v38 = vld [vmem:[#allocation2 + $0xb2] sm:$0xff] }
 0x61a   : > { %13821 = vst [vmem:[#allocation492_spill] sm:$0xff] %v9237_v42 }
 0x61d   : > { %3867 = vperm.xlu1 %6921, %v9140_v57  }
 0x61e   : > { %v9240_v32 = vpop.permute.xlu1 %3623 }
 0x61f   : > { %13822 = vst [vmem:[#allocation493_spill] sm:$0xff] %v9240_v32  ;;  %3883 = vperm.xlu2 %6920, %v9142_v19  }
 0x620   : > { %829 = vperm.xlu0 %6941, %v7041_v8   ;;  %v9243_v51 = vpop.permute.xlu2 %3688 }
 0x621   : > { %13823 = vst [vmem:[#allocation494_spill] sm:$0xff] %v9243_v51  ;;  %v9245_v58 = vpop.permute.xlu0 %5733  ;;  %v7043_v51 = vld [vmem:[#allocation2 + $0x140] sm:$0xff] }
 0x622   : > { %13824 = vst [vmem:[#allocation495_spill] sm:$0xff] %v9245_v58 }
 0x625   : > { %3879 = vperm.xlu1 %6921, %v9152_v12  }
 0x626   : > { %v9248_v0 = vpop.permute.xlu1 %3638 }
 0x627   : > { %13825 = vst [vmem:[#allocation496_spill] sm:$0xff] %v9248_v0  ;;  %6922 = vset.pattern.permute.xlu2 %v13430_v54 }
 0x628   : > { %841 = vperm.xlu0 %6941, %v7042_v53   ;;  %3960 = vperm.xlu2 %6922, %v9023_v41   ;;  %v7044_v53 = vld [vmem:[#allocation2 + $0x168] sm:$0xff] }
 0x629   : > { %v9252_v42 = vpop.permute.xlu0 %5745  ;;  %v9254_v32 = vpop.permute.xlu2 %3767 }
 0x62a   : > { %13826 = vst [vmem:[#allocation497_spill] sm:$0xff] %v9252_v42 }
 0x62b   : > { %13827 = vst [vmem:[#allocation498_spill] sm:$0xff] %v9254_v32  ;;  %v9407_v32 = vld [vmem:[#allocation2 + $0xc8] sm:$0xff] }
 0x62d   : > { %3891 = vperm.xlu1 %6921, %v9163_v48  }
 0x62e   : > { %v9257_v8 = vpop.permute.xlu1 %3653 }
 0x62f   : > { %13828 = vst [vmem:[#allocation499_spill] sm:$0xff] %v9257_v8 }
 0x630   : > { %853 = vperm.xlu0 %6941, %v7043_v51   ;;  %3972 = vperm.xlu2 %6922, %v9034_v50   ;;  %v7045_v51 = vld [vmem:[#allocation2 + $0x9] sm:$0xff] }
 0x631   : > { %v9260_v58 = vpop.permute.xlu0 %5757  ;;  %v9262_v0 = vpop.permute.xlu2 %3779 }
 0x632   : > { %13829 = vst [vmem:[#allocation500_spill] sm:$0xff] %v9260_v58 }
 0x633   : > { %13830 = vst [vmem:[#allocation501_spill] sm:$0xff] %v9262_v0  ;;  %v9395_v0 = vld [vmem:[#allocation2 + $0xa8] sm:$0xff] }
 0x635   : > { %6923 = vset.pattern.permute.xlu1 %v13430_v54 }
 0x636   : > { %3968 = vperm.xlu1 %6923, %v9043_v62   ;;  %v9266_v41 = vpop.permute.xlu1 %3668 }
 0x637   : > { %13831 = vst [vmem:[#allocation502_spill] sm:$0xff] %v9266_v41  ;;  %v9397_v41 = vld [vmem:[#allocation2 + $0xd8] sm:$0xff] }
 0x638   : > { %865 = vperm.xlu0 %6941, %v7044_v53   ;;  %3980 = vperm.xlu2 %6922, %v9046_v7   ;;  %v7046_v7 = vld [vmem:[#allocation2 + $0x49] sm:$0xff] }
 0x639   : > { %v9269_v42 = vpop.permute.xlu0 %5769  ;;  %v9271_v8 = vpop.permute.xlu2 %3787 }
 0x63a   : > { %13832 = vst [vmem:[#allocation503_spill] sm:$0xff] %v9269_v42 }
 0x63b   : > { %13833 = vst [vmem:[#allocation504_spill] sm:$0xff] %v9271_v8  ;;  %v9383_v8 = vld [vmem:[#allocation2 + $0x80] sm:$0xff] }
 0x63e   : > { %3976 = vperm.xlu1 %6923, %v9056_v9   ;;  %v9274_v50 = vpop.permute.xlu1 %3683 }
 0x63f   : > { %13834 = vst [vmem:[#allocation505_spill] sm:$0xff] %v9274_v50  ;;  %v9385_v50 = vld [vmem:[#allocation2 + $0xb0] sm:$0xff] }
 0x640   : > { %1392 = vperm.xlu0 %6941, %v7045_v51   ;;  %3992 = vperm.xlu2 %6922, %v9058_v2   ;;  %v7047_v2 = vld [vmem:[#allocation2 + $0x69] sm:$0xff] }
 0x641   : > { %v9277_v58 = vpop.permute.xlu0 %5781  ;;  %v9279_v62 = vpop.permute.xlu2 %3799 }
 0x642   : > { %13835 = vst [vmem:[#allocation506_spill] sm:$0xff] %v9277_v58 }
 0x643   : > { %13836 = vst [vmem:[#allocation507_spill] sm:$0xff] %v9279_v62  ;;  %v7056_v62 = vld [vmem:[#allocation2 + $0x4a] sm:$0xff] }
 0x646   : > { %3988 = vperm.xlu1 %6923, %v9068_v44   ;;  %v9282_v53 = vpop.permute.xlu1 %3698 }
 0x647   : > { %13837 = vst [vmem:[#allocation508_spill] sm:$0xff] %v9282_v53 }
 0x648   : > { %1412 = vperm.xlu0 %6941, %v7046_v7   ;;  %4004 = vperm.xlu2 %6922, %v9070_v47   ;;  %v7048_v47 = vld [vmem:[#allocation2 + $0x91] sm:$0xff] }
 0x649   : > { %v9285_v42 = vpop.permute.xlu0 %5793  ;;  %v9287_v9 = vpop.permute.xlu2 %3811 }
 0x64a   : > { %13838 = vst [vmem:[#allocation509_spill] sm:$0xff] %v9285_v42 }
 0x64b   : > { %13839 = vst [vmem:[#allocation510_spill] sm:$0xff] %v9287_v9  ;;  %v7055_v9 = vld [vmem:[#allocation2 + $0xa] sm:$0xff] }
 0x64e   : > { %4000 = vperm.xlu1 %6923, %v9080_v63  }
 0x64f   : > { %v9290_v51 = vpop.permute.xlu1 %3775 }
 0x650   : > { %13840 = vst [vmem:[#allocation511_spill] sm:$0xff] %v9290_v51  ;;  %1424 = vperm.xlu0 %6941, %v7047_v2   ;;  %4016 = vperm.xlu2 %6922, %v9082_v59   ;;  %v7049_v59 = vld [vmem:[#allocation2 + $0xb1] sm:$0xff]  ;;  %v9361_v51 = vld [vmem:[#allocation2 + $0x68] sm:$0xff] }
 0x651   : > { %v9293_v58 = vpop.permute.xlu0 %5805  ;;  %v9295_v44 = vpop.permute.xlu2 %3823 }
 0x652   : > { %13841 = vst [vmem:[#allocation512_spill] sm:$0xff] %v9293_v58 }
 0x653   : > { %13842 = vst [vmem:[#allocation513_spill] sm:$0xff] %v9295_v44  ;;  %v9358_v44 = vld [vmem:[#allocation2 + $0x48] sm:$0xff] }
 0x656   : > { %4012 = vperm.xlu1 %6923, %v9092_v36  }
 0x657   : > { %v9298_v7 = vpop.permute.xlu1 %3783 }
 0x658   : > { %13843 = vst [vmem:[#allocation514_spill] sm:$0xff] %v9298_v7  ;;  %1436 = vperm.xlu0 %6941, %v7048_v47   ;;  %4028 = vperm.xlu2 %6922, %v9094_v61   ;;  %v7050_v61 = vld [vmem:[#allocation2 + $0xd9] sm:$0xff] }
 0x659   : > { %v9301_v42 = vpop.permute.xlu0 %5817  ;;  %v9303_v63 = vpop.permute.xlu2 %3835 }
 0x65a   : > { %13844 = vst [vmem:[#allocation515_spill] sm:$0xff] %v9301_v42 }
 0x65b   : > { %13845 = vst [vmem:[#allocation516_spill] sm:$0xff] %v9303_v63  ;;  %v7060_v63 = vld [vmem:[#allocation2 + $0xda] sm:$0xff] }
 0x65e   : > { %4024 = vperm.xlu1 %6923, %v9104_v52  }
 0x65f   : > { %v9306_v2 = vpop.permute.xlu1 %3795 }
 0x660   : > { %13846 = vst [vmem:[#allocation517_spill] sm:$0xff] %v9306_v2  ;;  %1448 = vperm.xlu0 %6941, %v7049_v59   ;;  %4040 = vperm.xlu2 %6922, %v9106_v25   ;;  %v7051_v25 = vld [vmem:[#allocation2 + $0xf9] sm:$0xff] }
 0x661   : > { %v9309_v58 = vpop.permute.xlu2 %3847 }
 0x662   : > { %13847 = vst [vmem:[#allocation518_spill] sm:$0xff] %v9309_v58  ;;  %v9311_v36 = vpop.permute.xlu0 %749  ;;  %v9421_v58 = vld [vmem:[#allocation2 + $0x120] sm:$0xff] }
 0x663   : > { %13848 = vst [vmem:[#allocation519_spill] sm:$0xff] %v9311_v36  ;;  %v7061_v36 = vld [vmem:[#allocation2 + $0xfa] sm:$0xff] }
 0x666   : > { %4036 = vperm.xlu1 %6923, %v9116_v29  }
 0x667   : > { %v9314_v47 = vpop.permute.xlu1 %3807 }
 0x668   : > { %13849 = vst [vmem:[#allocation520_spill] sm:$0xff] %v9314_v47  ;;  %1460 = vperm.xlu0 %6941, %v7050_v61   ;;  %4052 = vperm.xlu2 %6922, %v9118_v55   ;;  %v7052_v55 = vld [vmem:[#allocation2 + $0x121] sm:$0xff] }
 0x669   : > { %v9317_v42 = vpop.permute.xlu2 %3859 }
 0x66a   : > { %13850 = vst [vmem:[#allocation521_spill] sm:$0xff] %v9317_v42  ;;  %v9319_v52 = vpop.permute.xlu0 %769  ;;  %v9419_v42 = vld [vmem:[#allocation2 + $0xf0] sm:$0xff] }
 0x66e   : > { %4048 = vperm.xlu1 %6923, %v9128_v10  }
 0x66f   : > { %v9322_v59 = vpop.permute.xlu1 %3819 }
 0x670   : > { %13851 = vst [vmem:[#allocation522_spill] sm:$0xff] %v9322_v59  ;;  %1472 = vperm.xlu0 %6941, %v7051_v25   ;;  %4064 = vperm.xlu2 %6922, %v9130_v24   ;;  %v9338_v25 = vld [vmem:[#allocation2 + $0x30] sm:$0xff]  ;;  %v7053_v59 = vld [vmem:[#allocation2 + $0x141] sm:$0xff] }
 0x671   : > { %v9325_v2 = vpop.permute.xlu2 %3871 }
 0x672   : > { %13852 = vst [vmem:[#allocation523_spill] sm:$0xff] %v9325_v2  ;;  %v9327_v29 = vpop.permute.xlu0 %781  ;;  %v9409_v2 = vld [vmem:[#allocation2 + $0xf8] sm:$0xff] }
 0x676   : > { %4060 = vperm.xlu1 %6923, %v9140_v57  }
 0x677   : > { %v9330_v61 = vpop.permute.xlu1 %3831 }
 0x678   : > { %13853 = vst [vmem:[#allocation524_spill] sm:$0xff] %v9330_v61  ;;  %1484 = vperm.xlu0 %6941, %v7052_v55   ;;  %4076 = vperm.xlu2 %6922, %v9142_v19   ;;  %v9349_v19 = vld [vmem:[#allocation2 + $0x50] sm:$0xff] }
 0x679   : > { %v9333_v47 = vpop.permute.xlu2 %3883 }
 0x67a   : > { %13854 = vst [vmem:[#allocation525_spill] sm:$0xff] %v9333_v47  ;;  %v9335_v10 = vpop.permute.xlu0 %793  ;;  %v7058_v47 = vld [vmem:[#allocation2 + $0x92] sm:$0xff] }
 0x67b   : > { %13855 = vst [vmem:[#allocation526_spill] sm:$0xff] %v9335_v10  ;;  %v9467_v10 = vld [vmem:[#allocation2 + $0x180] sm:$0xff] }
 0x67e   : > { %4072 = vperm.xlu1 %6923, %v9152_v12   ;;  %v7054_v12 = vld [vmem:[#allocation2 + $0x169] sm:$0xff] }
 0x67f   : > { %v9340_v24 = vpop.permute.xlu1 %3843 }
 0x680   : > { %13856 = vst [vmem:[#allocation527_spill] sm:$0xff] %v9340_v24  ;;  %1496 = vperm.xlu0 %6941, %v7053_v59   ;;  %6924 = vset.pattern.permute.xlu2 %v13362_v20  ;;  %v7057_v24 = vld [vmem:[#allocation2 + $0x6a] sm:$0xff] }
 0x681   : > { %4187 = vperm.xlu2 %6924, %v9338_v25  }
 0x682   : > { %v9344_v57 = vpop.permute.xlu0 %805  ;;  %v9346_v55 = vpop.permute.xlu2 %3960 }
 0x683   : > { %13857 = vst [vmem:[#allocation528_spill] sm:$0xff] %v9344_v57  ;;  %v9457_v57 = vld [vmem:[#allocation2 + $0x188] sm:$0xff] }
 0x684   : > { %13858 = vst [vmem:[#allocation529_spill] sm:$0xff] %v9346_v55  ;;  %v9371_v55 = vld [vmem:[#allocation2 + $0x60] sm:$0xff] }
 0x686   : > { %4084 = vperm.xlu1 %6923, %v9163_v48  }
 0x687   : > { %v9351_v61 = vpop.permute.xlu1 %3855 }
 0x688   : > { %13859 = vst [vmem:[#allocation530_spill] sm:$0xff] %v9351_v61  ;;  %1508 = vperm.xlu0 %6941, %v7054_v12  }
 0x689   : > { %4202 = vperm.xlu2 %6924, %v9349_v19  }
 0x68a   : > { %v9354_v7 = vpop.permute.xlu0 %817  ;;  %v9356_v59 = vpop.permute.xlu2 %3972 }
 0x68b   : > { %13860 = vst [vmem:[#allocation531_spill] sm:$0xff] %v9354_v7  ;;  %v9455_v7 = vld [vmem:[#allocation2 + $0x158] sm:$0xff] }
 0x68c   : > { %13861 = vst [vmem:[#allocation532_spill] sm:$0xff] %v9356_v59  ;;  %v9373_v59 = vld [vmem:[#allocation2 + $0x90] sm:$0xff] }
 0x68e   : > { %6925 = vset.pattern.permute.xlu1 %v13362_v20 }
 0x68f   : > { %4197 = vperm.xlu1 %6925, %v9358_v44   ;;  %v9364_v48 = vpop.permute.xlu1 %3867 }
 0x690   : > { %13862 = vst [vmem:[#allocation533_spill] sm:$0xff] %v9364_v48  ;;  %2035 = vperm.xlu0 %6941, %v7055_v9  }
 0x691   : > { %4212 = vperm.xlu2 %6924, %v9361_v51  }
 0x692   : > { %v9367_v12 = vpop.permute.xlu0 %829  ;;  %v9369_v61 = vpop.permute.xlu2 %3980 }
 0x693   : > { %13863 = vst [vmem:[#allocation534_spill] sm:$0xff] %v9367_v12  ;;  %v7062_v12 = vld [vmem:[#allocation2 + $0x122] sm:$0xff] }
 0x694   : > { %13864 = vst [vmem:[#allocation535_spill] sm:$0xff] %v9369_v61 }
 0x697   : > { %4207 = vperm.xlu1 %6925, %v9371_v55   ;;  %v9376_v53 = vpop.permute.xlu1 %3879 }
 0x698   : > { %13865 = vst [vmem:[#allocation536_spill] sm:$0xff] %v9376_v53  ;;  %2055 = vperm.xlu0 %6941, %v7056_v62  }
 0x699   : > { %4227 = vperm.xlu2 %6924, %v9373_v59  }
 0x69a   : > { %v9379_v48 = vpop.permute.xlu0 %841  ;;  %v9381_v9 = vpop.permute.xlu2 %3992 }
 0x69b   : > { %13866 = vst [vmem:[#allocation537_spill] sm:$0xff] %v9379_v48  ;;  %v9445_v48 = vld [vmem:[#allocation2 + $0x168] sm:$0xff] }
 0x69c   : > { %13867 = vst [vmem:[#allocation538_spill] sm:$0xff] %v9381_v9 }
 0x69f   : > { %4222 = vperm.xlu1 %6925, %v9383_v8   ;;  %v9388_v61 = vpop.permute.xlu1 %3891 }
 0x6a0   : > { %13868 = vst [vmem:[#allocation539_spill] sm:$0xff] %v9388_v61  ;;  %2067 = vperm.xlu0 %6941, %v7057_v24  }
 0x6a1   : > { %4242 = vperm.xlu2 %6924, %v9385_v50  }
 0x6a2   : > { %v9391_v53 = vpop.permute.xlu0 %853  ;;  %v9393_v62 = vpop.permute.xlu2 %4004 }
 0x6a3   : > { %13869 = vst [vmem:[#allocation540_spill] sm:$0xff] %v9391_v53  ;;  %v9443_v53 = vld [vmem:[#allocation2 + $0x138] sm:$0xff] }
 0x6a4   : > { %13870 = vst [vmem:[#allocation541_spill] sm:$0xff] %v9393_v62 }
 0x6a7   : > { %4237 = vperm.xlu1 %6925, %v9395_v0  }
 0x6a8   : > { %v9400_v9 = vpop.permute.xlu1 %3968  ;;  %2079 = vperm.xlu0 %6941, %v7058_v47  }
 0x6a9   : > { %13871 = vst [vmem:[#allocation542_spill] sm:$0xff] %v9400_v9  ;;  %4257 = vperm.xlu2 %6924, %v9397_v41  }
 0x6aa   : > { %v9403_v61 = vpop.permute.xlu0 %865  ;;  %v9405_v24 = vpop.permute.xlu2 %4016 }
 0x6ab   : > { %13872 = vst [vmem:[#allocation543_spill] sm:$0xff] %v9403_v61  ;;  %v9431_v61 = vld [vmem:[#allocation2 + $0x110] sm:$0xff] }
 0x6ac   : > { %13873 = vst [vmem:[#allocation544_spill] sm:$0xff] %v9405_v24 }
 0x6af   : > { %4252 = vperm.xlu1 %6925, %v9407_v32  }
 0x6b0   : > { %v9412_v62 = vpop.permute.xlu1 %3976  ;;  %2091 = vperm.xlu0 %6941, %v7059_v38  }
 0x6b1   : > { %13874 = vst [vmem:[#allocation545_spill] sm:$0xff] %v9412_v62  ;;  %4272 = vperm.xlu2 %6924, %v9409_v2  }
 0x6b2   : > { %v9415_v9 = vpop.permute.xlu0 %1392  ;;  %v9417_v47 = vpop.permute.xlu2 %4028 }
 0x6b3   : > { %13875 = vst [vmem:[#allocation546_spill] sm:$0xff] %v9415_v9  ;;  %v9433_v9 = vld [vmem:[#allocation2 + $0x140] sm:$0xff] }
 0x6b4   : > { %13876 = vst [vmem:[#allocation547_spill] sm:$0xff] %v9417_v47 }
 0x6b7   : > { %4267 = vperm.xlu1 %6925, %v9419_v42  }
 0x6b8   : > { %v9424_v24 = vpop.permute.xlu1 %3988  ;;  %2103 = vperm.xlu0 %6941, %v7060_v63  }
 0x6b9   : > { %13877 = vst [vmem:[#allocation548_spill] sm:$0xff] %v9424_v24  ;;  %4287 = vperm.xlu2 %6924, %v9421_v58  }
 0x6ba   : > { %v9427_v62 = vpop.permute.xlu0 %1412  ;;  %v9429_v38 = vpop.permute.xlu2 %4040 }
 0x6bb   : > { %13878 = vst [vmem:[#allocation549_spill] sm:$0xff] %v9427_v62 }
 0x6bc   : > { %13879 = vst [vmem:[#allocation550_spill] sm:$0xff] %v9429_v38 }
 0x6bf   : > { %4282 = vperm.xlu1 %6925, %v9431_v61  }
 0x6c0   : > { %v9436_v47 = vpop.permute.xlu1 %4000  ;;  %2115 = vperm.xlu0 %6941, %v7061_v36  }
 0x6c1   : > { %13880 = vst [vmem:[#allocation551_spill] sm:$0xff] %v9436_v47  ;;  %4302 = vperm.xlu2 %6924, %v9433_v9  }
 0x6c2   : > { %v9439_v24 = vpop.permute.xlu0 %1424  ;;  %v9441_v63 = vpop.permute.xlu2 %4052 }
 0x6c3   : > { %13881 = vst [vmem:[#allocation552_spill] sm:$0xff] %v9439_v24  ;;  %v7063_v24 = vld [vmem:[#allocation2 + $0x142] sm:$0xff] }
 0x6c4   : > { %13882 = vst [vmem:[#allocation553_spill] sm:$0xff] %v9441_v63 }
 0x6c7   : > { %4297 = vperm.xlu1 %6925, %v9443_v53  }
 0x6c8   : > { %v9448_v38 = vpop.permute.xlu1 %4012  ;;  %2127 = vperm.xlu0 %6941, %v7062_v12  }
 0x6c9   : > { %13883 = vst [vmem:[#allocation554_spill] sm:$0xff] %v9448_v38  ;;  %4317 = vperm.xlu2 %6924, %v9445_v48  }
 0x6ca   : > { %v9451_v47 = vpop.permute.xlu0 %1436  ;;  %v9453_v36 = vpop.permute.xlu2 %4064 }
 0x6cb   : > { %13884 = vst [vmem:[#allocation555_spill] sm:$0xff] %v9451_v47  ;;  %v7064_v47 = vld [vmem:[#allocation2 + $0x16a] sm:$0xff] }
 0x6cc   : > { %13885 = vst [vmem:[#allocation556_spill] sm:$0xff] %v9453_v36 }
 0x6cf   : > { %4312 = vperm.xlu1 %6925, %v9455_v7  }
 0x6d0   : > { %v9460_v63 = vpop.permute.xlu1 %4024  ;;  %2139 = vperm.xlu0 %6941, %v7063_v24  }
 0x6d1   : > { %13886 = vst [vmem:[#allocation557_spill] sm:$0xff] %v9460_v63  ;;  %4332 = vperm.xlu2 %6924, %v9457_v57   ;;  %v9478_v63 = vld [vmem:[#allocation2 + $0x1a0] sm:$0xff] }
 0x6d2   : > { %v9463_v38 = vpop.permute.xlu0 %1448  ;;  %v9465_v12 = vpop.permute.xlu2 %4076 }
 0x6d3   : > { %13887 = vst [vmem:[#allocation558_spill] sm:$0xff] %v9463_v38  ;;  %v7065_v38 = vld [vmem:[#allocation2 + $0x20] sm:$0xff] }
 0x6d4   : > { %13888 = vst [vmem:[#allocation559_spill] sm:$0xff] %v9465_v12 }
 0x6d7   : > { %4327 = vperm.xlu1 %6925, %v9467_v10  }
 0x6d8   : > { %v9470_v36 = vpop.permute.xlu1 %4036  ;;  %2151 = vperm.xlu0 %6941, %v7064_v47  }
 0x6d9   : > { %13889 = vst [vmem:[#allocation560_spill] sm:$0xff] %v9470_v36  ;;  %6926 = vset.pattern.permute.xlu2 %v13396_v30 }
 0x6da   : > { %v9473_v62 = vpop.permute.xlu0 %1460  ;;  %4411 = vperm.xlu2 %6926, %v9338_v25  }
 0x6db   : > { %13890 = vst [vmem:[#allocation561_spill] sm:$0xff] %v9473_v62  ;;  %v9476_v24 = vpop.permute.xlu2 %4187 }
 0x6dc   : > { %13891 = vst [vmem:[#allocation562_spill] sm:$0xff] %v9476_v24  ;;  %v7066_v24 = vld [vmem:[#allocation2 + $0x60] sm:$0xff] }
 0x6df   : > { %4342 = vperm.xlu1 %6925, %v9478_v63  }
 0x6e0   : > { %v9481_v12 = vpop.permute.xlu1 %4048  ;;  %2678 = vperm.xlu0 %6941, %v7065_v38  }
 0x6e1   : > { %13892 = vst [vmem:[#allocation563_spill] sm:$0xff] %v9481_v12 }
 0x6e2   : > { %v9483_v1 = vpop.permute.xlu0 %1472  ;;  %4423 = vperm.xlu2 %6926, %v9349_v19  }
 0x6e3   : > { %13893 = vst [vmem:[#allocation564_spill] sm:$0xff] %v9483_v1  ;;  %v9486_v47 = vpop.permute.xlu2 %4202  ;;  %v7067_v1 = vld [vmem:[#allocation2 + $0x80] sm:$0xff] }
 0x6e4   : > { %13894 = vst [vmem:[#allocation565_spill] sm:$0xff] %v9486_v47 }
 0x6e7   : > { %6927 = vset.pattern.permute.xlu1 %v13396_v30 }
 0x6e8   : > { %4419 = vperm.xlu1 %6927, %v9358_v44   ;;  %v9490_v36 = vpop.permute.xlu1 %4060  ;;  %2698 = vperm.xlu0 %6941, %v7066_v24  }
 0x6e9   : > { %13895 = vst [vmem:[#allocation566_spill] sm:$0xff] %v9490_v36  ;;  %v7068_v36 = vld [vmem:[#allocation2 + $0xa8] sm:$0xff] }
 0x6ea   : > { %v9492_v62 = vpop.permute.xlu0 %1484  ;;  %4431 = vperm.xlu2 %6926, %v9361_v51  }
 0x6eb   : > { %13896 = vst [vmem:[#allocation567_spill] sm:$0xff] %v9492_v62  ;;  %v9495_v12 = vpop.permute.xlu2 %4212 }
 0x6ec   : > { %13897 = vst [vmem:[#allocation568_spill] sm:$0xff] %v9495_v12 }
 0x6f0   : > { %4427 = vperm.xlu1 %6927, %v9371_v55   ;;  %v9498_v38 = vpop.permute.xlu1 %4072  ;;  %2710 = vperm.xlu0 %6941, %v7067_v1   ;;  %v7069_v1 = vld [vmem:[#allocation2 + $0xc8] sm:$0xff] }
 0x6f1   : > { %13898 = vst [vmem:[#allocation569_spill] sm:$0xff] %v9498_v38 }
 0x6f2   : > { %v9500_v47 = vpop.permute.xlu0 %1496  ;;  %4443 = vperm.xlu2 %6926, %v9373_v59  }
 0x6f3   : > { %13899 = vst [vmem:[#allocation570_spill] sm:$0xff] %v9500_v47  ;;  %v9503_v30 = vpop.permute.xlu2 %4227 }
 0x6f4   : > { %13900 = vst [vmem:[#allocation571_spill] sm:$0xff] %v9503_v30 }
 0x6f8   : > { %4439 = vperm.xlu1 %6927, %v9383_v8   ;;  %v9506_v24 = vpop.permute.xlu1 %4084  ;;  %2722 = vperm.xlu0 %6941, %v7068_v36   ;;  %v7070_v36 = vld [vmem:[#allocation2 + $0xf0] sm:$0xff] }
 0x6f9   : > { %13901 = vst [vmem:[#allocation572_spill] sm:$0xff] %v9506_v24 }
 0x6fa   : > { %v9508_v62 = vpop.permute.xlu0 %1508  ;;  %4455 = vperm.xlu2 %6926, %v9385_v50  }
 0x6fb   : > { %13902 = vst [vmem:[#allocation573_spill] sm:$0xff] %v9508_v62  ;;  %v9511_v12 = vpop.permute.xlu2 %4242 }
 0x6fc   : > { %13903 = vst [vmem:[#allocation574_spill] sm:$0xff] %v9511_v12 }
 0x700   : > { %4451 = vperm.xlu1 %6927, %v9395_v0   ;;  %2734 = vperm.xlu0 %6941, %v7069_v1   ;;  %v7071_v1 = vld [vmem:[#allocation2 + $0x110] sm:$0xff] }
 0x701   : > { %v9514_v38 = vpop.permute.xlu1 %4197 }
 0x702   : > { %13904 = vst [vmem:[#allocation575_spill] sm:$0xff] %v9514_v38  ;;  %v9516_v47 = vpop.permute.xlu0 %2035  ;;  %4467 = vperm.xlu2 %6926, %v9397_v41  }
 0x703   : > { %13905 = vst [vmem:[#allocation576_spill] sm:$0xff] %v9516_v47  ;;  %v9519_v30 = vpop.permute.xlu2 %4257 }
 0x704   : > { %13906 = vst [vmem:[#allocation577_spill] sm:$0xff] %v9519_v30 }
 0x708   : > { %4463 = vperm.xlu1 %6927, %v9407_v32   ;;  %2746 = vperm.xlu0 %6941, %v7070_v36   ;;  %v7072_v36 = vld [vmem:[#allocation2 + $0x138] sm:$0xff] }
 0x709   : > { %v9522_v24 = vpop.permute.xlu1 %4207 }
 0x70a   : > { %13907 = vst [vmem:[#allocation578_spill] sm:$0xff] %v9522_v24  ;;  %v9524_v62 = vpop.permute.xlu0 %2055  ;;  %4479 = vperm.xlu2 %6926, %v9409_v2  }
 0x70b   : > { %13908 = vst [vmem:[#allocation579_spill] sm:$0xff] %v9524_v62  ;;  %v9527_v12 = vpop.permute.xlu2 %4272 }
 0x70c   : > { %13909 = vst [vmem:[#allocation580_spill] sm:$0xff] %v9527_v12 }
 0x710   : > { %4475 = vperm.xlu1 %6927, %v9419_v42   ;;  %2758 = vperm.xlu0 %6941, %v7071_v1   ;;  %v7073_v1 = vld [vmem:[#allocation2 + $0x158] sm:$0xff] }
 0x711   : > { %v9530_v38 = vpop.permute.xlu1 %4222 }
 0x712   : > { %13910 = vst [vmem:[#allocation581_spill] sm:$0xff] %v9530_v38  ;;  %v9532_v47 = vpop.permute.xlu0 %2067  ;;  %4491 = vperm.xlu2 %6926, %v9421_v58  }
 0x713   : > { %13911 = vst [vmem:[#allocation582_spill] sm:$0xff] %v9532_v47  ;;  %v9535_v30 = vpop.permute.xlu2 %4287 }
 0x714   : > { %13912 = vst [vmem:[#allocation583_spill] sm:$0xff] %v9535_v30 }
 0x718   : > { %4487 = vperm.xlu1 %6927, %v9431_v61   ;;  %2770 = vperm.xlu0 %6941, %v7072_v36   ;;  %v7074_v36 = vld [vmem:[#allocation2 + $0x180] sm:$0xff] }
 0x719   : > { %v9538_v24 = vpop.permute.xlu1 %4237 }
 0x71a   : > { %13913 = vst [vmem:[#allocation584_spill] sm:$0xff] %v9538_v24  ;;  %v9540_v62 = vpop.permute.xlu0 %2079  ;;  %4503 = vperm.xlu2 %6926, %v9433_v9  }
 0x71b   : > { %13914 = vst [vmem:[#allocation585_spill] sm:$0xff] %v9540_v62  ;;  %v9543_v12 = vpop.permute.xlu2 %4302 }
 0x71c   : > { %13915 = vst [vmem:[#allocation586_spill] sm:$0xff] %v9543_v12 }
 0x720   : > { %4499 = vperm.xlu1 %6927, %v9443_v53   ;;  %2782 = vperm.xlu0 %6941, %v7073_v1   ;;  %v7075_v1 = vld [vmem:[#allocation2 + $0x21] sm:$0xff] }
 0x721   : > { %v9546_v38 = vpop.permute.xlu1 %4252 }
 0x722   : > { %13916 = vst [vmem:[#allocation587_spill] sm:$0xff] %v9546_v38  ;;  %v9548_v47 = vpop.permute.xlu0 %2091  ;;  %4515 = vperm.xlu2 %6926, %v9445_v48  }
 0x723   : > { %13917 = vst [vmem:[#allocation588_spill] sm:$0xff] %v9548_v47  ;;  %v9551_v30 = vpop.permute.xlu2 %4317 }
 0x724   : > { %13918 = vst [vmem:[#allocation589_spill] sm:$0xff] %v9551_v30 }
 0x728   : > { %4511 = vperm.xlu1 %6927, %v9455_v7   ;;  %2794 = vperm.xlu0 %6941, %v7074_v36  }
 0x729   : > { %v9554_v24 = vpop.permute.xlu1 %4267 }
 0x72a   : > { %13919 = vst [vmem:[#allocation590_spill] sm:$0xff] %v9554_v24  ;;  %v9556_v62 = vpop.permute.xlu0 %2103  ;;  %4527 = vperm.xlu2 %6926, %v9457_v57   ;;  %v7076_v24 = vld [vmem:[#allocation2 + $0x61] sm:$0xff] }
 0x72b   : > { %13920 = vst [vmem:[#allocation591_spill] sm:$0xff] %v9556_v62  ;;  %v9559_v12 = vpop.permute.xlu2 %4332  ;;  %v9886_v62 = vld [vmem:[#allocation2 + $0xf1] sm:$0xff] }
 0x72c   : > { %13921 = vst [vmem:[#allocation592_spill] sm:$0xff] %v9559_v12 }
 0x730   : > { %4523 = vperm.xlu1 %6927, %v9467_v10   ;;  %3321 = vperm.xlu0 %6941, %v7075_v1  }
 0x731   : > { %v9562_v38 = vpop.permute.xlu1 %4282 }
 0x732   : > { %13922 = vst [vmem:[#allocation593_spill] sm:$0xff] %v9562_v38  ;;  %v9564_v47 = vpop.permute.xlu0 %2115  ;;  %6928 = vset.pattern.permute.xlu2 %v13430_v54  ;;  %v7077_v38 = vld [vmem:[#allocation2 + $0x81] sm:$0xff] }
 0x733   : > { %13923 = vst [vmem:[#allocation594_spill] sm:$0xff] %v9564_v47  ;;  %4604 = vperm.xlu2 %6928, %v9338_v25  }
 0x734   : > { %v9568_v36 = vpop.permute.xlu2 %4411 }
 0x735   : > { %13924 = vst [vmem:[#allocation595_spill] sm:$0xff] %v9568_v36 }
 0x738   : > { %4535 = vperm.xlu1 %6927, %v9478_v63   ;;  %3341 = vperm.xlu0 %6941, %v7076_v24  }
 0x739   : > { %v9571_v30 = vpop.permute.xlu1 %4297 }
 0x73a   : > { %13925 = vst [vmem:[#allocation596_spill] sm:$0xff] %v9571_v30  ;;  %v9573_v12 = vpop.permute.xlu0 %2127  ;;  %v7078_v30 = vld [vmem:[#allocation2 + $0xa9] sm:$0xff] }
 0x73b   : > { %13926 = vst [vmem:[#allocation597_spill] sm:$0xff] %v9573_v12  ;;  %4616 = vperm.xlu2 %6928, %v9349_v19  }
 0x73c   : > { %v9576_v1 = vpop.permute.xlu2 %4423 }
 0x73d   : > { %13927 = vst [vmem:[#allocation598_spill] sm:$0xff] %v9576_v1 }
 0x740   : > { %6929 = vset.pattern.permute.xlu1 %v13430_v54  ;;  %3353 = vperm.xlu0 %6941, %v7077_v38  }
 0x741   : > { %4612 = vperm.xlu1 %6929, %v9358_v44   ;;  %v9580_v25 = vpop.permute.xlu1 %4312  ;;  %v7079_v44 = vld [vmem:[#allocation2 + $0xc9] sm:$0xff] }
 0x742   : > { %13928 = vst [vmem:[#allocation599_spill] sm:$0xff] %v9580_v25  ;;  %v9582_v36 = vpop.permute.xlu0 %2139 }
 0x743   : > { %13929 = vst [vmem:[#allocation600_spill] sm:$0xff] %v9582_v36  ;;  %4624 = vperm.xlu2 %6928, %v9361_v51  }
 0x744   : > { %v9585_v24 = vpop.permute.xlu2 %4431 }
 0x745   : > { %13930 = vst [vmem:[#allocation601_spill] sm:$0xff] %v9585_v24  ;;  %v9675_v24 = vld [vmem:[#allocation2 + $0x69] sm:$0xff] }
 0x746   : > { %13962 = vst [vmem:[#allocation633_spill] sm:$0xff] %v9675_v24 }
 0x748   : > { %3365 = vperm.xlu0 %6941, %v7078_v30  }
 0x749   : > { %4620 = vperm.xlu1 %6929, %v9371_v55   ;;  %v9588_v19 = vpop.permute.xlu1 %4327  ;;  %v7080_v55 = vld [vmem:[#allocation2 + $0xf1] sm:$0xff] }
 0x74a   : > { %13931 = vst [vmem:[#allocation602_spill] sm:$0xff] %v9588_v19  ;;  %v9590_v1 = vpop.permute.xlu0 %2151 }
 0x74b   : > { %13932 = vst [vmem:[#allocation603_spill] sm:$0xff] %v9590_v1  ;;  %4636 = vperm.xlu2 %6928, %v9373_v59  }
 0x74c   : > { %v9593_v38 = vpop.permute.xlu2 %4443 }
 0x74d   : > { %13933 = vst [vmem:[#allocation604_spill] sm:$0xff] %v9593_v38  ;;  %v7088_v38 = vld [vmem:[#allocation2 + $0xaa] sm:$0xff] }
 0x750   : > { %3377 = vperm.xlu0 %6941, %v7079_v44  }
 0x751   : > { %4632 = vperm.xlu1 %6929, %v9383_v8   ;;  %v9596_v25 = vpop.permute.xlu1 %4342  ;;  %v7081_v8 = vld [vmem:[#allocation2 + $0x111] sm:$0xff] }
 0x752   : > { %13934 = vst [vmem:[#allocation605_spill] sm:$0xff] %v9596_v25  ;;  %v9598_v51 = vpop.permute.xlu0 %2678 }
 0x753   : > { %13935 = vst [vmem:[#allocation606_spill] sm:$0xff] %v9598_v51  ;;  %4648 = vperm.xlu2 %6928, %v9385_v50   ;;  %v9727_v51 = vld [vmem:[#allocation2 + $0xd9] sm:$0xff] }
 0x754   : > { %v9601_v30 = vpop.permute.xlu2 %4455  ;;  %13978 = vst [vmem:[#allocation649_spill] sm:$0xff] %v9727_v51 }
 0x755   : > { %13936 = vst [vmem:[#allocation607_spill] sm:$0xff] %v9601_v30  ;;  %v9672_v30 = vld [vmem:[#allocation2 + $0x49] sm:$0xff] }
 0x756   : > { %13961 = vst [vmem:[#allocation632_spill] sm:$0xff] %v9672_v30 }
 0x758   : > { %3389 = vperm.xlu0 %6941, %v7080_v55  }
 0x759   : > { %4644 = vperm.xlu1 %6929, %v9395_v0   ;;  %v7082_v0 = vld [vmem:[#allocation2 + $0x139] sm:$0xff] }
 0x75a   : > { %v9604_v19 = vpop.permute.xlu1 %4419  ;;  %v9606_v59 = vpop.permute.xlu0 %2698 }
 0x75b   : > { %13937 = vst [vmem:[#allocation608_spill] sm:$0xff] %v9604_v19  ;;  %4660 = vperm.xlu2 %6928, %v9397_v41  }
 0x75c   : > { %v9609_v44 = vpop.permute.xlu2 %4467 }
 0x75d   : > { %13938 = vst [vmem:[#allocation609_spill] sm:$0xff] %v9609_v44 }
 0x760   : > { %3401 = vperm.xlu0 %6941, %v7081_v8  }
 0x761   : > { %4656 = vperm.xlu1 %6929, %v9407_v32   ;;  %v7083_v32 = vld [vmem:[#allocation2 + $0x159] sm:$0xff] }
 0x762   : > { %v9612_v25 = vpop.permute.xlu1 %4427  ;;  %v9614_v50 = vpop.permute.xlu0 %2710 }
 0x763   : > { %13939 = vst [vmem:[#allocation610_spill] sm:$0xff] %v9612_v25  ;;  %4672 = vperm.xlu2 %6928, %v9409_v2  }
 0x764   : > { %13940 = vst [vmem:[#allocation611_spill] sm:$0xff] %v9614_v50  ;;  %v9617_v55 = vpop.permute.xlu2 %4479 }
 0x765   : > { %13941 = vst [vmem:[#allocation612_spill] sm:$0xff] %v9617_v55 }
 0x768   : > { %3413 = vperm.xlu0 %6941, %v7082_v0  }
 0x769   : > { %4668 = vperm.xlu1 %6929, %v9419_v42   ;;  %v7084_v42 = vld [vmem:[#allocation2 + $0x181] sm:$0xff] }
 0x76a   : > { %v9620_v19 = vpop.permute.xlu1 %4439  ;;  %v9622_v41 = vpop.permute.xlu0 %2722 }
 0x76b   : > { %13942 = vst [vmem:[#allocation613_spill] sm:$0xff] %v9620_v19  ;;  %4684 = vperm.xlu2 %6928, %v9421_v58  }
 0x76c   : > { %13943 = vst [vmem:[#allocation614_spill] sm:$0xff] %v9622_v41  ;;  %v9625_v8 = vpop.permute.xlu2 %4491  ;;  %v7094_v41 = vld [vmem:[#allocation2 + $0x182] sm:$0xff] }
 0x76d   : > { %13944 = vst [vmem:[#allocation615_spill] sm:$0xff] %v9625_v8 }
 0x770   : > { %3425 = vperm.xlu0 %6941, %v7083_v32  }
 0x771   : > { %4680 = vperm.xlu1 %6929, %v9431_v61   ;;  %v7085_v61 = vld [vmem:[#allocation2 + $0x22] sm:$0xff] }
 0x772   : > { %v9628_v25 = vpop.permute.xlu1 %4451  ;;  %v9630_v2 = vpop.permute.xlu0 %2734 }
 0x773   : > { %13945 = vst [vmem:[#allocation616_spill] sm:$0xff] %v9628_v25  ;;  %4696 = vperm.xlu2 %6928, %v9433_v9  }
 0x774   : > { %13946 = vst [vmem:[#allocation617_spill] sm:$0xff] %v9630_v2  ;;  %v9633_v0 = vpop.permute.xlu2 %4503  ;;  %v14004_v2 = vld [vmem:[#allocation21_spill] sm:$0xff] }
 0x775   : > { %13947 = vst [vmem:[#allocation618_spill] sm:$0xff] %v9633_v0  ;;  %v7090_v0 = vld [vmem:[#allocation2 + $0xf2] sm:$0xff] }
 0x778   : > { %3437 = vperm.xlu0 %6941, %v7084_v42  }
 0x779   : > { %4692 = vperm.xlu1 %6929, %v9443_v53   ;;  %v7086_v53 = vld [vmem:[#allocation2 + $0x62] sm:$0xff] }
 0x77a   : > { %v9636_v19 = vpop.permute.xlu1 %4463  ;;  %v9638_v58 = vpop.permute.xlu0 %2746 }
 0x77b   : > { %13948 = vst [vmem:[#allocation619_spill] sm:$0xff] %v9636_v19  ;;  %4708 = vperm.xlu2 %6928, %v9445_v48   ;;  %v9652_v19 = vld [vmem:[#allocation2 + $0x31] sm:$0xff] }
 0x77c   : > { %13949 = vst [vmem:[#allocation620_spill] sm:$0xff] %v9638_v58  ;;  %v9641_v32 = vpop.permute.xlu2 %4515 }
 0x77d   : > { %13950 = vst [vmem:[#allocation621_spill] sm:$0xff] %v9641_v32  ;;  %v9697_v32 = vld [vmem:[#allocation2 + $0x81] sm:$0xff] }
 0x77e   : > { %13971 = vst [vmem:[#allocation642_spill] sm:$0xff] %v9697_v32 }
 0x780   : > { %3964 = vperm.xlu0 %6941, %v7085_v61   ;;  %v7087_v61 = vld [vmem:[#allocation2 + $0x82] sm:$0xff] }
 0x781   : > { %4704 = vperm.xlu1 %6929, %v9455_v7  }
 0x782   : > { %v9644_v25 = vpop.permute.xlu1 %4475  ;;  %v9646_v9 = vpop.permute.xlu0 %2758 }
 0x783   : > { %13951 = vst [vmem:[#allocation622_spill] sm:$0xff] %v9644_v25  ;;  %4720 = vperm.xlu2 %6928, %v9457_v57   ;;  %v9663_v57 = vld [vmem:[#allocation2 + $0x51] sm:$0xff] }
 0x784   : > { %13952 = vst [vmem:[#allocation623_spill] sm:$0xff] %v9646_v9  ;;  %v9649_v42 = vpop.permute.xlu2 %4527 }
 0x785   : > { %13953 = vst [vmem:[#allocation624_spill] sm:$0xff] %v9649_v42 }
 0x786   : > { %13957 = vst [vmem:[#allocation628_spill] sm:$0xff] %v9663_v57 }
 0x788   : > { %3984 = vperm.xlu0 %6941, %v7086_v53  }
 0x789   : > { %4716 = vperm.xlu1 %6929, %v9467_v10  }
 0x78a   : > { %v9654_v48 = vpop.permute.xlu1 %4487  ;;  %v9656_v44 = vpop.permute.xlu0 %2770 }
 0x78b   : > { %13954 = vst [vmem:[#allocation625_spill] sm:$0xff] %v9654_v48  ;;  %6930 = vset.pattern.permute.xlu2 %v13362_v20  ;;  %v9687_v48 = vld [vmem:[#allocation2 + $0x91] sm:$0xff] }
 0x78c   : > { %13955 = vst [vmem:[#allocation626_spill] sm:$0xff] %v9656_v44  ;;  %4830 = vperm.xlu2 %6930, %v9652_v19  }
 0x78d   : > { %v9660_v7 = vpop.permute.xlu2 %4604  ;;  %13967 = vst [vmem:[#allocation638_spill] sm:$0xff] %v9687_v48 }
 0x78e   : > { %13956 = vst [vmem:[#allocation627_spill] sm:$0xff] %v9660_v7  ;;  %v9685_v7 = vld [vmem:[#allocation2 + $0x61] sm:$0xff] }
 0x78f   : > { %13966 = vst [vmem:[#allocation637_spill] sm:$0xff] %v9685_v7 }
 0x790   : > { %3996 = vperm.xlu0 %6941, %v7087_v61  }
 0x791   : > { %4728 = vperm.xlu1 %6929, %v9478_v63  }
 0x792   : > { %v9665_v53 = vpop.permute.xlu1 %4499  ;;  %v9667_v10 = vpop.permute.xlu0 %2782 }
 0x793   : > { %13958 = vst [vmem:[#allocation629_spill] sm:$0xff] %v9665_v53 }
 0x794   : > { %13959 = vst [vmem:[#allocation630_spill] sm:$0xff] %v9667_v10  ;;  %4845 = vperm.xlu2 %6930, %v9663_v57   ;;  %v14077_v57 = vld [vmem:[#allocation69_spill] sm:$0xff] }
 0x795   : > { %v9670_v25 = vpop.permute.xlu2 %4616 }
 0x796   : > { %13960 = vst [vmem:[#allocation631_spill] sm:$0xff] %v9670_v25  ;;  %v7089_v25 = vld [vmem:[#allocation2 + $0xca] sm:$0xff] }
 0x798   : > { %4008 = vperm.xlu0 %6941, %v7088_v38  }
 0x799   : > { %6931 = vset.pattern.permute.xlu1 %v13362_v20  ;;  %v7091_v20 = vld [vmem:[#allocation2 + $0x112] sm:$0xff] }
 0x79a   : > { %4840 = vperm.xlu1 %6931, %v9672_v30   ;;  %v9678_v63 = vpop.permute.xlu1 %4511  ;;  %v9680_v61 = vpop.permute.xlu0 %2794 }
 0x79b   : > { %13963 = vst [vmem:[#allocation634_spill] sm:$0xff] %v9678_v63 }
 0x79c   : > { %13964 = vst [vmem:[#allocation635_spill] sm:$0xff] %v9680_v61  ;;  %4855 = vperm.xlu2 %6930, %v9675_v24  }
 0x79d   : > { %v9683_v53 = vpop.permute.xlu2 %4624 }
 0x79e   : > { %13965 = vst [vmem:[#allocation636_spill] sm:$0xff] %v9683_v53  ;;  %v9699_v53 = vld [vmem:[#allocation2 + $0xb1] sm:$0xff] }
 0x79f   : > { %13972 = vst [vmem:[#allocation643_spill] sm:$0xff] %v9699_v53 }
 0x7a0   : > { %4020 = vperm.xlu0 %6941, %v7089_v25  }
 0x7a2   : > { %4850 = vperm.xlu1 %6931, %v9685_v7   ;;  %v9690_v38 = vpop.permute.xlu1 %4523  ;;  %v9692_v42 = vpop.permute.xlu0 %3321  ;;  %v14011_v7 = vld [vmem:[#allocation20_spill] sm:$0xff] }
 0x7a3   : > { %13968 = vst [vmem:[#allocation639_spill] sm:$0xff] %v9690_v38  ;;  %v9709_v38 = vld [vmem:[%s13256_s1] sm:$0xff] }
 0x7a4   : > { %13969 = vst [vmem:[#allocation640_spill] sm:$0xff] %v9692_v42  ;;  %4870 = vperm.xlu2 %6930, %v9687_v48   ;;  %v486_v55 = vperm.slane %v9709_v38, 0  ;;  %v9725_v61 = vperm.slane %v9709_v38, 1  ;;  %v13998_v48 = vld [vmem:[#allocation18_spill] sm:$0xff] }
 0x7a5   : > { %v9695_v63 = vpop.permute.xlu2 %4636  ;;  %14014 = vst [vmem:[#allocation18_spill] sm:$0xff] %v9886_v62 }
 0x7a6   : > { %13970 = vst [vmem:[#allocation641_spill] sm:$0xff] %v9695_v63  ;;  %v9718_v54 = vmul.f32 %v486_v55, %v7555_v4  ;;  %v9722_v42 = vmul.f32 %v486_v55, %v7576_v17  ;;  %v495_v10 = vmul.f32 %v486_v55, %v7565_v11  ;;  %v498_v1 = vmul.f32 %v486_v55, %v7571_v14 }
 0x7a7   : > { %v490_v17 = vmul.f32 %v486_v55, %v7582_v21  ;;  %v9739_v44 = vmul.f32 %v486_v55, %v7584_v22  ;;  %v9742_v36 = vmul.f32 %v486_v55, %v7587_v23  ;;  %v9747_v11 = vmul.f32 %v486_v55, %v7590_v26 }
 0x7a8   : > { %4032 = vperm.xlu0 %6941, %v7090_v0   ;;  %v9715_v0 = vld [vmem:[#allocation2 + $0xa9] sm:$0xff]  ;;  %13977 = vst [vmem:[#allocation648_spill] sm:$0xff] %v9722_v42  ;;  %v9750_v14 = vmul.f32 %v486_v55, %v7592_v27  ;;  %v9759_v21 = vmul.f32 %v486_v55, %v7598_v31  ;;  %v9762_v22 = vmul.f32 %v486_v55, %v7600_v33 }
 0x7a9   : > { %13976 = vst [vmem:[#allocation647_spill] sm:$0xff] %v9715_v0  ;;  %v9765_v23 = vmul.f32 %v486_v55, %v7603_v34  ;;  %v683_v26 = vmul.f32 %v9725_v61, %v7636_v5  ;;  %v9778_v31 = vmul.f32 %v486_v55, %v7611_v40  ;;  %v685_v33 = vmul.f32 %v9725_v61, %v7645_v15 }
 0x7aa   : > { %4865 = vperm.xlu1 %6931, %v9697_v32   ;;  %v9702_v25 = vpop.permute.xlu1 %4535  ;;  %v9704_v8 = vpop.permute.xlu0 %3341  ;;  %v9783_v34 = vmul.f32 %v486_v55, %v7614_v43  ;;  %v9789_v5 = vmul.f32 %v486_v55, %v7619_v46  ;;  %v9796_v40 = vmul.f32 %v486_v55, %v7622_v49  ;;  %v9804_v43 = vperm.slane %v9709_v38, 3  ;;  %v13985_v46 = vld [vmem:[#allocation7_spill] sm:$0xff] }
 0x7ab   : > { %13973 = vst [vmem:[#allocation644_spill] sm:$0xff] %v9702_v25  ;;  %v487_v25 = vmul.f32 %v486_v55, %v7567_v13  ;;  %v501_v13 = vmul.f32 %v486_v55, %v7579_v18  ;;  %v680_v18 = vmul.f32 %v9725_v61, %v7628_v56  ;;  %v9775_v56 = vmul.f32 %v486_v55, %v7608_v39  ;;  %v9793_v39 = vld [vmem:[#allocation2 + $0xc9] sm:$0xff]  ;;  %v13988_v49 = vld [vmem:[#allocation15_spill] sm:$0xff] }
 0x7ac   : > { %13974 = vst [vmem:[#allocation645_spill] sm:$0xff] %v9704_v8  ;;  %4885 = vperm.xlu2 %6930, %v9699_v53   ;;  %v9807_v9 = vmul.f32 %v486_v55, %v13985_v46  ;;  %v9812_v12 = vadd.f32 %v683_v26, %v490_v17  ;;  %v691_v42 = vmul.f32 %v9725_v61, %v13988_v49  ;;  %v13991_v53 = vld [vmem:[#allocation10_spill] sm:$0xff]  ;;  %v13993_v46 = vld [vmem:[#allocation16_spill] sm:$0xff]  ;;  %v13995_v17 = vld [vmem:[#allocation11_spill] sm:$0xff] }
 0x7ad   : > { %v9712_v63 = vpop.permute.xlu2 %4648  ;;  %13982 = vst [vmem:[#allocation653_spill] sm:$0xff] %v9793_v39  ;;  %v9801_v15 = vadd.f32 %v680_v18, %v487_v25  ;;  %v13990_v25 = vld [vmem:[#allocation9_spill] sm:$0xff]  ;;  %v9822_v58 = vmul.f32 %v486_v55, %v13991_v53  ;;  %v682_v32 = vmul.f32 %v9725_v61, %v13993_v46  ;;  %v9832_v26 = vmul.f32 %v486_v55, %v13995_v17  ;;  %v13996_v49 = vld [vmem:[#allocation12_spill] sm:$0xff]  ;;  %v14001_v46 = vld [vmem:[#allocation14_spill] sm:$0xff] }
 0x7ae   : > { %13975 = vst [vmem:[#allocation646_spill] sm:$0xff] %v9712_v63  ;;  %v492_v63 = vmul.f32 %v486_v55, %v7560_v6  ;;  %v9819_v18 = vmul.f32 %v486_v55, %v13990_v25  ;;  %v9835_v47 = vmul.f32 %v486_v55, %v13996_v49  ;;  %v694_v53 = vmul.f32 %v9725_v61, %v13998_v48  ;;  %v14005_v48 = vld [vmem:[#allocation17_spill] sm:$0xff] }
 0x7af   : > { %13992 = vst [vmem:[#allocation15_spill] sm:$0xff] %v9822_v58  ;;  %v697_v49 = vmul.f32 %v9725_v61, %v14004_v2 }
 0x7b0   : > { %4044 = vperm.xlu0 %6941, %v7091_v20   ;;  %v489_v20 = vmul.f32 %v486_v55, %v7573_v16  ;;  %v9753_v16 = vmul.f32 %v486_v55, %v7595_v28  ;;  %v9772_v28 = vmul.f32 %v486_v55, %v7606_v37  ;;  %v688_v37 = vmul.f32 %v9725_v61, %v7653_v35 }
 0x7b1   : > { %13997 = vst [vmem:[#allocation10_spill] sm:$0xff] %v9835_v47  ;;  %v14009_v47 = vld [vmem:[#allocation25_spill] sm:$0xff] }
 0x7b2   : > { %4880 = vperm.xlu1 %6931, %v9715_v0   ;;  %v9734_v4 = vpop.permute.xlu0 %3353  ;;  %v13986_v0 = vld [vmem:[#allocation8_spill] sm:$0xff]  ;;  %v9837_v25 = vadd.f32 %v688_v37, %v495_v10  ;;  %v9855_v10 = vadd.f32 %v691_v42, %v498_v1  ;;  %v9859_v37 = vmul.f32 %v9804_v43, %v14005_v48  ;;  %v690_v2 = vmul.f32 %v9725_v61, %v14009_v47 }
 0x7b3   : > { %13979 = vst [vmem:[#allocation650_spill] sm:$0xff] %v9734_v4  ;;  %v9744_v6 = vpop.permute.xlu1 %4612  ;;  %v9810_v35 = vmul.f32 %v486_v55, %v13986_v0  ;;  %v9874_v42 = vperm.slane %v9709_v38, 2  ;;  %v9876_v48 = vadd.f32 %v694_v53, %v501_v13  ;;  %v14015_v13 = vld [vmem:[#allocation23_spill] sm:$0xff] }
 0x7b4   : > { %13980 = vst [vmem:[#allocation651_spill] sm:$0xff] %v9744_v6  ;;  %4900 = vperm.xlu2 %6930, %v9727_v51   ;;  %v9786_v6 = vmul.f32 %v486_v55, %v7616_v45  ;;  %v7092_v45 = vld [vmem:[#allocation2 + $0x13a] sm:$0xff]  ;;  %v9896_v53 = vmul.f32 %v9804_v43, %v14015_v13  ;;  %v9915_v24 = vadd.f32 %v690_v2, %v9759_v21  ;;  %v14025_v2 = vld [vmem:[#allocation37_spill] sm:$0xff] }
 0x7b5   : > { %v9769_v27 = vpop.permute.xlu2 %4660  ;;  %13987 = vst [vmem:[#allocation7_spill] sm:$0xff] %v9810_v35  ;;  %v7093_v4 = vld [vmem:[#allocation2 + $0x15a] sm:$0xff] }
 0x7b6   : > { %13981 = vst [vmem:[#allocation652_spill] sm:$0xff] %v9769_v27  ;;  %v13983_v27 = vld [vmem:[#allocation6_spill] sm:$0xff]  ;;  %v9912_v13 = vld [vmem:[#allocation2 + $0x121] sm:$0xff] }
 0x7b7   : > { %v9799_v51 = vmul.f32 %v486_v55, %v13983_v27  ;;  %v9816_v27 = vld [vmem:[#allocation2 + $0xf9] sm:$0xff] }
 0x7b8   : > { %4056 = vperm.xlu0 %6941, %v7092_v45   ;;  %13989 = vst [vmem:[#allocation8_spill] sm:$0xff] %v9816_v27  ;;  %v9824_v45 = vadd.f32 %v685_v33, %v492_v63  ;;  %v14000_v33 = vld [vmem:[#allocation13_spill] sm:$0xff] }
 0x7b9   : > { %13984 = vst [vmem:[#allocation6_spill] sm:$0xff] %v9799_v51  ;;  %v9844_v58 = vmul.f32 %v486_v55, %v14000_v33  ;;  %v14006_v55 = vld [vmem:[#allocation22_spill] sm:$0xff]  ;;  %v14046_v51 = vld [vmem:[#allocation51_spill] sm:$0xff] }
 0x7ba   : > { %4895 = vperm.xlu1 %6931, %v9793_v39   ;;  %v9829_v0 = vpop.permute.xlu0 %3365  ;;  %v9848_v39 = vmul.f32 %v9804_v43, %v14001_v46  ;;  %v687_v33 = vmul.f32 %v9725_v61, %v14006_v55  ;;  %v9880_v55 = vmul.f32 %v9804_v43, %v14011_v7  ;;  %v14016_v7 = vld [vmem:[#allocation31_spill] sm:$0xff]  ;;  %14019 = vst [vmem:[#allocation13_spill] sm:$0xff] %v9912_v13 }
 0x7bb   : > { %13994 = vst [vmem:[#allocation9_spill] sm:$0xff] %v9829_v0  ;;  %v9841_v63 = vpop.permute.xlu1 %4620  ;;  %v14003_v0 = vld [vmem:[#allocation19_spill] sm:$0xff]  ;;  %v696_v35 = vmul.f32 %v9725_v61, %v14016_v7 }
 0x7bc   : > { %13999 = vst [vmem:[#allocation16_spill] sm:$0xff] %v9841_v63  ;;  %v684_v17 = vmul.f32 %v9725_v61, %v14003_v0  ;;  %4915 = vperm.xlu2 %6930, %v9816_v27   ;;  %v14007_v63 = vld [vmem:[#allocation24_spill] sm:$0xff]  ;;  %v9867_v0 = vadd.f32 %v682_v32, %v489_v20  ;;  %v14010_v27 = vld [vmem:[#allocation27_spill] sm:$0xff]  ;;  %v14013_v32 = vld [vmem:[#allocation30_spill] sm:$0xff] }
 0x7bd   : > { %14002 = vst [vmem:[#allocation11_spill] sm:$0xff] %v9848_v39  ;;  %v700_v46 = vmul.f32 %v9725_v61, %v14007_v63  ;;  %v9865_v39 = vpop.permute.xlu2 %4672  ;;  %v703_v1 = vmul.f32 %v9725_v61, %v14010_v27  ;;  %v14012_v63 = vld [vmem:[#allocation28_spill] sm:$0xff]  ;;  %v706_v20 = vmul.f32 %v9725_v61, %v14013_v32  ;;  %v9892_v27 = vadd.f32 %v697_v49, %v9742_v36  ;;  %v14018_v36 = vld [vmem:[#allocation33_spill] sm:$0xff] }
 0x7be   : > { %14008 = vst [vmem:[#allocation12_spill] sm:$0xff] %v9865_v39  ;;  %v693_v39 = vmul.f32 %v9725_v61, %v14012_v63  ;;  %v9889_v47 = vadd.f32 %v684_v17, %v9718_v54  ;;  %v9901_v63 = vadd.f32 %v687_v33, %v9747_v11  ;;  %v14017_v54 = vld [vmem:[#allocation26_spill] sm:$0xff]  ;;  %v709_v49 = vmul.f32 %v9725_v61, %v14018_v36  ;;  %v14023_v36 = vld [vmem:[#allocation29_spill] sm:$0xff] }
 0x7bf   : > { %v9904_v32 = vadd.f32 %v700_v46, %v9753_v16  ;;  %v9908_v17 = vmul.f32 %v9804_v43, %v14017_v54  ;;  %v14020_v11 = vld [vmem:[#allocation34_spill] sm:$0xff]  ;;  %v14021_v16 = vld [vmem:[#allocation36_spill] sm:$0xff]  ;;  %v9932_v21 = vmul.f32 %v9804_v43, %v14023_v36  ;;  %v9951_v36 = vperm.slane %v9709_v38, 6 }
 0x7c0   : > { %4068 = vperm.xlu0 %6941, %v7093_v4   ;;  %v9918_v4 = vadd.f32 %v703_v1, %v9765_v23  ;;  %v699_v33 = vmul.f32 %v9725_v61, %v14020_v11  ;;  %v873_v46 = vmul.f32 %v9874_v42, %v14021_v16  ;;  %v9928_v54 = vadd.f32 %v693_v39, %v9772_v28  ;;  %v14029_v28 = vld [vmem:[#allocation39_spill] sm:$0xff] }
 0x7c1   : > { %14024 = vst [vmem:[#allocation19_spill] sm:$0xff] %v9932_v21  ;;  %v9935_v23 = vadd.f32 %v706_v20, %v9778_v31  ;;  %v702_v1 = vmul.f32 %v9725_v61, %v14025_v2  ;;  %v9942_v16 = vadd.f32 %v696_v35, %v9783_v34  ;;  %v876_v39 = vmul.f32 %v9874_v42, %v14029_v28  ;;  %v14031_v20 = vld [vmem:[#allocation35_spill] sm:$0xff]  ;;  %v14033_v34 = vld [vmem:[#allocation40_spill] sm:$0xff]  ;;  %v14075_v21 = vld [vmem:[#allocation66_spill] sm:$0xff] }
 0x7c2   : > { %4910 = vperm.xlu1 %6931, %v9886_v62   ;;  %v9925_v7 = vpop.permute.xlu0 %3377  ;;  %v14027_v62 = vld [vmem:[#allocation32_spill] sm:$0xff]  ;;  %14030 = vst [vmem:[#allocation22_spill] sm:$0xff] %v9951_v36  ;;  %v9955_v31 = vadd.f32 %v709_v49, %v9789_v5  ;;  %v9959_v2 = vmul.f32 %v9804_v43, %v14031_v20  ;;  %v705_v35 = vmul.f32 %v9725_v61, %v14033_v34  ;;  %v14037_v49 = vld [vmem:[#allocation42_spill] sm:$0xff] }
 0x7c3   : > { %14022 = vst [vmem:[#allocation14_spill] sm:$0xff] %v9925_v7  ;;  %v9939_v11 = vpop.permute.xlu1 %4632  ;;  %v9946_v7 = vmul.f32 %v9804_v43, %v14027_v62  ;;  %v686_v62 = vmul.f32 %v9725_v61, %v8482_v3  ;;  %v9968_v28 = vadd.f32 %v699_v33, %v9796_v40  ;;  %v9975_v5 = vadd.f32 %v873_v46, %v9801_v15 }
 0x7c4   : > { %14026 = vst [vmem:[#allocation21_spill] sm:$0xff] %v9939_v11  ;;  %4930 = vperm.xlu2 %6930, %v9912_v13   ;;  %v878_v20 = vmul.f32 %v9874_v42, %v14037_v49  ;;  %v9980_v34 = vadd.f32 %v702_v1, %v9807_v9  ;;  %v879_v33 = vmul.f32 %v9874_v42, %v9319_v52  ;;  %v14043_v9 = vld [vmem:[#allocation46_spill] sm:$0xff]  ;;  %v14044_v49 = vld [vmem:[#allocation48_spill] sm:$0xff] }
 0x7c5   : > { %14028 = vst [vmem:[#allocation17_spill] sm:$0xff] %v9946_v7  ;;  %v9965_v11 = vpop.permute.xlu2 %4684  ;;  %v14035_v7 = vld [vmem:[#allocation38_spill] sm:$0xff]  ;;  %v9995_v46 = vadd.f32 %v876_v39, %v9812_v12  ;;  %v711_v1 = vmul.f32 %v9725_v61, %v14043_v9  ;;  %v718_v12 = vadd.f32 %v686_v62, %v9739_v44  ;;  %v10009_v39 = vld [vmem:[#allocation2 + $0x141] sm:$0xff]  ;;  %v14053_v62 = vld [vmem:[#allocation47_spill] sm:$0xff] }
 0x7c6   : > { %14032 = vst [vmem:[#allocation24_spill] sm:$0xff] %v9959_v2  ;;  %v9972_v13 = vmul.f32 %v9804_v43, %v14035_v7  ;;  %v14038_v2 = vld [vmem:[#allocation43_spill] sm:$0xff]  ;;  %v14045_v52 = vld [vmem:[#allocation50_spill] sm:$0xff] }
 0x7c7   : > { %14034 = vst [vmem:[#allocation25_spill] sm:$0xff] %v9965_v11  ;;  %v708_v3 = vmul.f32 %v9725_v61, %v14038_v2  ;;  %v14039_v11 = vld [vmem:[#allocation45_spill] sm:$0xff]  ;;  %v9988_v7 = vld [vmem:[#allocation2 + $0x111] sm:$0xff]  ;;  %v884_v2 = vmul.f32 %v9874_v42, %v14044_v49  ;;  %v875_v30 = vmul.f32 %v9874_v42, %v14045_v52  ;;  %v10016_v49 = vadd.f32 %v878_v20, %v9824_v45 }
 0x7c8   : > { %14036 = vst [vmem:[#allocation27_spill] sm:$0xff] %v9972_v13  ;;  %v881_v40 = vmul.f32 %v9874_v42, %v14039_v11  ;;  %v14041_v13 = vld [vmem:[#allocation41_spill] sm:$0xff]  ;;  %4080 = vperm.xlu0 %6941, %v7094_v41   ;;  %v10002_v11 = vadd.f32 %v705_v35, %v9819_v18  ;;  %v14051_v35 = vld [vmem:[#allocation54_spill] sm:$0xff]  ;;  %v911_v20 = vadd.f32 %v879_v33, %v718_v12  ;;  %v14059_v12 = vld [vmem:[#allocation55_spill] sm:$0xff] }
 0x7c9   : > { %14040 = vst [vmem:[#allocation20_spill] sm:$0xff] %v9988_v7  ;;  %v9992_v15 = vmul.f32 %v9804_v43, %v14041_v13  ;;  %v887_v13 = vmul.f32 %v9874_v42, %v14046_v51  ;;  %v14050_v41 = vld [vmem:[#allocation53_spill] sm:$0xff]  ;;  %v890_v52 = vmul.f32 %v9874_v42, %v14051_v35  ;;  %v10026_v44 = vadd.f32 %v708_v3, %v9832_v26  ;;  %v14056_v3 = vld [vmem:[#allocation56_spill] sm:$0xff] }
 0x7ca   : > { %14047 = vst [vmem:[#allocation30_spill] sm:$0xff] %v10009_v39  ;;  %v877_v18 = vmul.f32 %v9874_v42, %v14050_v41  ;;  %4925 = vperm.xlu1 %6931, %v9988_v7   ;;  %v10023_v51 = vpop.permute.xlu0 %3389  ;;  %v10033_v45 = vadd.f32 %v881_v40, %v9837_v25  ;;  %v10038_v41 = vadd.f32 %v711_v1, %v9844_v58  ;;  %v14055_v35 = vld [vmem:[#allocation49_spill] sm:$0xff]  ;;  %v14057_v40 = vld [vmem:[#allocation52_spill] sm:$0xff] }
 0x7cb   : > { %14042 = vst [vmem:[#allocation28_spill] sm:$0xff] %v9992_v15  ;;  %v14048_v15 = vld [vmem:[#allocation44_spill] sm:$0xff]  ;;  %v10042_v7 = vmul.f32 %v9951_v36, %v14055_v35  ;;  %v10045_v26 = vadd.f32 %v884_v2, %v9855_v10  ;;  %v10051_v25 = vadd.f32 %v875_v30, %v9867_v0  ;;  %v10055_v33 = vmul.f32 %v9951_v36, %v14057_v40  ;;  %v14061_v0 = vld [vmem:[#allocation57_spill] sm:$0xff] }
 0x7cc   : > { %v10013_v9 = vmul.f32 %v9951_v36, %v14048_v15  ;;  %14052 = vst [vmem:[#allocation31_spill] sm:$0xff] %v10023_v51  ;;  %v10030_v15 = vmul.f32 %v9951_v36, %v14053_v62  ;;  %v880_v62 = vmul.f32 %v9874_v42, %v14056_v3  ;;  %4945 = vperm.xlu2 %6930, %v10009_v39   ;;  %v7095_v39 = vld [vmem:[#allocation2 + $0x38] sm:$0xff]  ;;  %v10108_v51 = vld [vmem:[#allocation2 + $0x169] sm:$0xff] }
 0x7cd   : > { %v10058_v58 = vadd.f32 %v887_v13, %v9876_v48  ;;  %v689_v1 = vmul.f32 %v9725_v61, %v8494_v60  ;;  %v10062_v10 = vpop.permute.xlu2 %4696  ;;  %v10065_v2 = vadd.f32 %v877_v18, %v9889_v47  ;;  %v10069_v35 = vmul.f32 %v9951_v36, %v14059_v12  ;;  %v10085_v18 = vld [vmem:[#allocation2 + $0x139] sm:$0xff]  ;;  %14070 = vst [vmem:[#allocation37_spill] sm:$0xff] %v10108_v51 }
 0x7ce   : > { %14049 = vst [vmem:[#allocation23_spill] sm:$0xff] %v10013_v9  ;;  %v10035_v9 = vpop.permute.xlu1 %4644  ;;  %v10072_v30 = vadd.f32 %v890_v52, %v9892_v27  ;;  %v893_v3 = vmul.f32 %v9874_v42, %v14061_v0  ;;  %v10077_v48 = vperm.slane %v9709_v38, 4  ;;  %v10080_v60 = vperm.slane %v9709_v38, 5  ;;  %v14064_v27 = vld [vmem:[#allocation59_spill] sm:$0xff]  ;;  %v14065_v12 = vld [vmem:[#allocation60_spill] sm:$0xff] }
 0x7cf   : > { %14054 = vst [vmem:[#allocation26_spill] sm:$0xff] %v10035_v9  ;;  %v1168_v13 = vadd.f32 %v9859_v37, %v911_v20  ;;  %v882_v47 = vmul.f32 %v9874_v42, %v9327_v29  ;;  %v10088_v40 = vadd.f32 %v880_v62, %v9901_v63  ;;  %v883_v52 = vmul.f32 %v9874_v42, %v14064_v27  ;;  %v14066_v9 = vld [vmem:[#allocation62_spill] sm:$0xff]  ;;  %v14067_v37 = vld [vmem:[#allocation63_spill] sm:$0xff]  ;;  %v10101_v29 = vld [vmem:[%s13256_s1 + $0x8] sm:$0xff] }
 0x7d0   : > { %14058 = vst [vmem:[#allocation33_spill] sm:$0xff] %v10062_v10  ;;  %v896_v0 = vmul.f32 %v9874_v42, %v14065_v12  ;;  %v886_v10 = vmul.f32 %v9874_v42, %v14066_v9  ;;  %4608 = vperm.xlu0 %6941, %v7095_v39   ;;  %v899_v20 = vmul.f32 %v9874_v42, %v14067_v37  ;;  %v14068_v62 = vld [vmem:[#allocation283_spill] sm:$0xff]  ;;  %v14071_v9 = vld [vmem:[#allocation58_spill] sm:$0xff] }
 0x7d1   : > { %14060 = vst [vmem:[#allocation34_spill] sm:$0xff] %v10069_v35  ;;  %v721_v63 = vadd.f32 %v689_v1, %v9750_v14  ;;  %v1329_v27 = vmul.f32 %v10077_v48, %v14068_v62  ;;  %v10112_v39 = vmul.f32 %v9951_v36, %v14071_v9  ;;  %v10115_v37 = vadd.f32 %v893_v3, %v9904_v32  ;;  %v14074_v35 = vld [vmem:[#allocation65_spill] sm:$0xff] }
 0x7d2   : > { %14062 = vst [vmem:[#allocation36_spill] sm:$0xff] %v10085_v18  ;;  %v889_v8 = vmul.f32 %v9874_v42, %v14074_v35  ;;  %v902_v14 = vmul.f32 %v9874_v42, %v14075_v21  ;;  %4940 = vperm.xlu1 %6931, %v10085_v18   ;;  %v10122_v1 = vpop.permute.xlu0 %3401  ;;  %v1130_v9 = vmul.f32 %v9804_v43, %v14077_v57  ;;  %v14079_v35 = vld [vmem:[#allocation61_spill] sm:$0xff] }
 0x7d3   : > { %14063 = vst [vmem:[#allocation29_spill] sm:$0xff] %v10088_v40  ;;  %v14069_v40 = vld [vmem:[#allocation549_spill] sm:$0xff]  ;;  %v1361_v50 = vadd.f32 %v1329_v27, %v1168_v13  ;;  %v10131_v3 = vadd.f32 %v883_v52, %v9915_v24  ;;  %v10135_v21 = vmul.f32 %v9951_v36, %v14079_v35  ;;  %v10138_v18 = vadd.f32 %v896_v0, %v9918_v4  ;;  %v14080_v24 = vld [vmem:[#allocation259_spill] sm:$0xff]  ;;  %v14082_v27 = vld [vmem:[#allocation64_spill] sm:$0xff] }
 0x7d4   : > { %v1522_v12 = vmul.f32 %v10080_v60, %v14069_v40  ;;  %14072 = vst [vmem:[#allocation32_spill] sm:$0xff] %v10112_v39  ;;  %v14076_v40 = vld [vmem:[#allocation68_spill] sm:$0xff]  ;;  %v914_v39 = vadd.f32 %v882_v47, %v721_v63  ;;  %4960 = vperm.xlu2 %6930, %v10108_v51   ;;  %v10145_v57 = vadd.f32 %v886_v10, %v9928_v54  ;;  %v14097_v51 = vld [vmem:[#allocation75_spill] sm:$0xff] }
 0x7d5   : > { %14073 = vst [vmem:[#allocation39_spill] sm:$0xff] %v10115_v37  ;;  %v892_v62 = vmul.f32 %v9874_v42, %v14076_v40  ;;  %v10141_v37 = vperm.slane %v10101_v29, 1  ;;  %v10148_v13 = vadd.f32 %v899_v20, %v9935_v23  ;;  %v692_v47 = vmul.f32 %v9725_v61, %v14080_v24  ;;  %v10152_v63 = vpop.permute.xlu2 %4708  ;;  %v14084_v40 = vld [vmem:[#allocation67_spill] sm:$0xff] }
 0x7d6   : > { %v10128_v32 = vpop.permute.xlu1 %4656  ;;  %v1554_v52 = vadd.f32 %v1522_v12, %v1361_v50  ;;  %14081 = vst [vmem:[#allocation40_spill] sm:$0xff] %v10152_v63  ;;  %v10156_v4 = vmul.f32 %v9951_v36, %v14082_v27  ;;  %v10159_v0 = vadd.f32 %v889_v8, %v9942_v16  ;;  %v10163_v54 = vmul.f32 %v9951_v36, %v14084_v40  ;;  %v14088_v12 = vld [vmem:[#allocation526_spill] sm:$0xff]  ;;  %v10177_v8 = vld [vmem:[#allocation2 + $0x159] sm:$0xff] }
 0x7d7   : > { %14078 = vst [vmem:[#allocation35_spill] sm:$0xff] %v10128_v32  ;;  %v10166_v23 = vadd.f32 %v902_v14, %v9955_v31  ;;  %v10169_v10 = vadd.f32 %v892_v62, %v9968_v28  ;;  %v10172_v50 = vadd.f32 %v1130_v9, %v9975_v5  ;;  %v1171_v20 = vadd.f32 %v9880_v55, %v914_v39  ;;  %v14090_v16 = vld [vmem:[#allocation71_spill] sm:$0xff]  ;;  %v14091_v27 = vld [vmem:[#allocation72_spill] sm:$0xff]  ;;  %v14092_v39 = vld [vmem:[#allocation286_spill] sm:$0xff] }
 0x7d8   : > { %14083 = vst [vmem:[#allocation38_spill] sm:$0xff] %v10159_v0  ;;  %v885_v35 = vmul.f32 %v9874_v42, %v14088_v12  ;;  %v895_v24 = vmul.f32 %v9874_v42, %v14090_v16  ;;  %v1133_v31 = vmul.f32 %v9804_v43, %v14091_v27  ;;  %v10184_v14 = vperm.slane %v9709_v38, 7  ;;  %v7096_v5 = vld [vmem:[#allocation2 + $0x78] sm:$0xff]  ;;  %v14093_v40 = vld [vmem:[#allocation552_spill] sm:$0xff]  ;;  %v10195_v16 = vld [vmem:[#allocation2 + $0x189] sm:$0xff] }
 0x7d9   : > { %14085 = vst [vmem:[#allocation42_spill] sm:$0xff] %v10166_v23  ;;  %v10187_v28 = vperm.slane %v10101_v29, 0  ;;  %4628 = vperm.xlu0 %6941, %v7096_v5   ;;  %v724_v55 = vadd.f32 %v692_v47, %v9762_v22  ;;  %v1332_v62 = vmul.f32 %v10077_v48, %v14092_v39  ;;  %v1811_v9 = vadd.f32 %v10030_v15, %v1554_v52  ;;  %v14095_v27 = vld [vmem:[#allocation74_spill] sm:$0xff]  ;;  %v14096_v32 = vld [vmem:[#allocation77_spill] sm:$0xff]  ;;  %v14105_v0 = vld [vmem:[#allocation80_spill] sm:$0xff] }
 0x7da   : > { %14086 = vst [vmem:[#allocation43_spill] sm:$0xff] %v10169_v10  ;;  %v1525_v12 = vmul.f32 %v10080_v60, %v14093_v40  ;;  %v898_v38 = vmul.f32 %v9874_v42, %v14095_v27  ;;  %v901_v63 = vmul.f32 %v9874_v42, %v14096_v32  ;;  %v1135_v5 = vmul.f32 %v9804_v43, %v14097_v51  ;;  %v14098_v22 = vld [vmem:[#allocation78_spill] sm:$0xff]  ;;  %v10206_v15 = vpop.permute.xlu0 %3413  ;;  %v14099_v52 = vld [vmem:[#allocation313_spill] sm:$0xff]  ;;  %v14100_v10 = vld [vmem:[#allocation579_spill] sm:$0xff] }
 0x7db   : > { %14087 = vst [vmem:[#allocation45_spill] sm:$0xff] %v10172_v50  ;;  %v1138_v47 = vmul.f32 %v9804_v43, %v14098_v22  ;;  %4955 = vperm.xlu1 %6931, %v10177_v8   ;;  %v1972_v39 = vmul.f32 %v10184_v14, %v14099_v52  ;;  %v917_v40 = vadd.f32 %v885_v35, %v724_v55  ;;  %v14102_v32 = vld [vmem:[#allocation70_spill] sm:$0xff] }
 0x7dc   : > { %14089 = vst [vmem:[#allocation41_spill] sm:$0xff] %v10177_v8  ;;  %v1364_v50 = vadd.f32 %v1332_v62, %v1171_v20  ;;  %v2165_v27 = vmul.f32 %v10187_v28, %v14100_v10  ;;  %v10216_v51 = vmul.f32 %v9951_v36, %v14102_v32  ;;  %v10219_v22 = vadd.f32 %v895_v24, %v9980_v34  ;;  %v14106_v20 = vld [vmem:[#allocation73_spill] sm:$0xff]  ;;  %v14107_v35 = vld [vmem:[#allocation262_spill] sm:$0xff] }
 0x7dd   : > { %14094 = vst [vmem:[#allocation46_spill] sm:$0xff] %v10195_v16  ;;  %v10222_v8 = vadd.f32 %v1133_v31, %v9995_v46  ;;  %v904_v52 = vmul.f32 %v9874_v42, %v14105_v0  ;;  %4975 = vperm.xlu2 %6930, %v10195_v16   ;;  %v10229_v10 = vmul.f32 %v10141_v37, %v14106_v20  ;;  %v14110_v46 = vld [vmem:[#allocation76_spill] sm:$0xff]  ;;  %v14130_v36 = vld [vmem:[#allocation86_spill] sm:$0xff]  ;;  %v14131_v16 = vld [vmem:[#allocation87_spill] sm:$0xff] }
 0x7de   : > { %v10212_v23 = vpop.permute.xlu1 %4668  ;;  %14103 = vst [vmem:[#allocation50_spill] sm:$0xff] %v10219_v22  ;;  %v695_v55 = vmul.f32 %v9725_v61, %v14107_v35  ;;  %v1557_v62 = vadd.f32 %v1525_v12, %v1364_v50  ;;  %v2004_v32 = vadd.f32 %v1972_v39, %v1811_v9  ;;  %v10236_v34 = vadd.f32 %v898_v38, %v10002_v11  ;;  %v14114_v9 = vld [vmem:[#allocation528_spill] sm:$0xff]  ;;  %v14116_v38 = vld [vmem:[#allocation79_spill] sm:$0xff] }
 0x7df   : > { %14101 = vst [vmem:[#allocation48_spill] sm:$0xff] %v10212_v23  ;;  %v10233_v23 = vpop.permute.xlu2 %4720  ;;  %v2422_v24 = vmul.f32 %v10141_v37, %v14110_v46  ;;  %v10241_v0 = vadd.f32 %v901_v63, %v10026_v44  ;;  %v10244_v31 = vadd.f32 %v1135_v5, %v10016_v49  ;;  %v10247_v20 = vadd.f32 %v1138_v47, %v10033_v45  ;;  %v10252_v11 = vld [vmem:[#allocation2 + $0x181] sm:$0xff]  ;;  %v14119_v5 = vld [vmem:[#allocation83_spill] sm:$0xff] }
 0x7e0   : > { %14104 = vst [vmem:[#allocation51_spill] sm:$0xff] %v10222_v8  ;;  %v1174_v50 = vadd.f32 %v9896_v53, %v917_v40  ;;  %v888_v12 = vmul.f32 %v9874_v42, %v14114_v9  ;;  %v2197_v39 = vadd.f32 %v2165_v27, %v2004_v32  ;;  %v2425_v35 = vmul.f32 %v10141_v37, %v14116_v38  ;;  %v14118_v63 = vld [vmem:[#allocation81_spill] sm:$0xff]  ;;  %v7097_v47 = vld [vmem:[#allocation2 + $0x98] sm:$0xff]  ;;  %v14194_v8 = vld [vmem:[#allocation298_spill] sm:$0xff] }
 0x7e1   : > { %14108 = vst [vmem:[#allocation44_spill] sm:$0xff] %v10233_v23  ;;  %v10257_v44 = vadd.f32 %v904_v52, %v10038_v41  ;;  %v1141_v49 = vmul.f32 %v9804_v43, %v14118_v63  ;;  %v1132_v45 = vmul.f32 %v9804_v43, %v14119_v5  ;;  %4640 = vperm.xlu0 %6941, %v7097_v47   ;;  %v14120_v40 = vld [vmem:[#allocation289_spill] sm:$0xff]  ;;  %v14121_v46 = vld [vmem:[#allocation555_spill] sm:$0xff]  ;;  %v14122_v41 = vld [vmem:[#allocation84_spill] sm:$0xff]  ;;  %v10272_v38 = vperm.slane %v10101_v29, 2 }
 0x7e2   : > { %14109 = vst [vmem:[#allocation53_spill] sm:$0xff] %v10236_v34  ;;  %v727_v53 = vadd.f32 %v695_v55, %v9775_v56  ;;  %v1335_v27 = vmul.f32 %v10077_v48, %v14120_v40  ;;  %v1814_v32 = vadd.f32 %v10042_v7, %v1557_v62  ;;  %v1528_v9 = vmul.f32 %v10080_v60, %v14121_v46  ;;  %v14124_v63 = vld [vmem:[#allocation316_spill] sm:$0xff]  ;;  %v10280_v56 = vpop.permute.xlu0 %3425  ;;  %v14127_v40 = vld [vmem:[#allocation582_spill] sm:$0xff] }
 0x7e3   : > { %14111 = vst [vmem:[#allocation54_spill] sm:$0xff] %v10241_v0  ;;  %v1144_v52 = vmul.f32 %v9804_v43, %v14122_v41  ;;  %v1975_v5 = vmul.f32 %v10184_v14, %v14124_v63  ;;  %v10277_v47 = vperm.slane %v10101_v29, 3  ;;  %4970 = vperm.xlu1 %6931, %v10252_v11   ;;  %v2454_v62 = vadd.f32 %v2422_v24, %v2197_v39  ;;  %v14134_v24 = vld [vmem:[#allocation343_spill] sm:$0xff]  ;;  %v14195_v34 = vld [vmem:[#allocation402_spill] sm:$0xff] }
 0x7e4   : > { %14112 = vst [vmem:[#allocation47_spill] sm:$0xff] %v10244_v31  ;;  %v920_v7 = vadd.f32 %v888_v12, %v727_v53  ;;  %v1367_v55 = vadd.f32 %v1335_v27, %v1174_v50  ;;  %v2168_v46 = vmul.f32 %v10187_v28, %v14127_v40  ;;  %v10287_v23 = vadd.f32 %v1141_v49, %v10045_v26  ;;  %v14135_v49 = vld [vmem:[#allocation82_spill] sm:$0xff]  ;;  %v14138_v27 = vld [vmem:[#allocation531_spill] sm:$0xff] }
 0x7e5   : > { %14113 = vst [vmem:[#allocation49_spill] sm:$0xff] %v10247_v20  ;;  %v1134_v63 = vmul.f32 %v9804_v43, %v14130_v36  ;;  %v1147_v20 = vmul.f32 %v9804_v43, %v14131_v16  ;;  %v14133_v12 = vmov 1   ;;  %v2615_v50 = vmul.f32 %v10272_v38, %v14134_v24  ;;  %v10320_v24 = vld [vmem:[#allocation2 + $0x1a1] sm:$0xff] }
 0x7e6   : > { %14115 = vst [vmem:[#allocation56_spill] sm:$0xff] %v10252_v11  ;;  %v10284_v41 = vpop.permute.xlu1 %4680  ;;  %v14132_v11 = vld [vmem:[#allocation265_spill] sm:$0xff]  ;;  %6932 = vset.pattern.permute.xlu2 %v14133_v12  ;;  %v1560_v39 = vadd.f32 %v1528_v9, %v1367_v55  ;;  %v2007_v53 = vadd.f32 %v1975_v5, %v1814_v32  ;;  %v2808_v26 = vmul.f32 %v10277_v47, %v9606_v59 }
 0x7e7   : > { %14117 = vst [vmem:[#allocation52_spill] sm:$0xff] %v10257_v44  ;;  %v698_v44 = vmul.f32 %v9725_v61, %v14132_v11  ;;  %5054 = vperm.xlu2 %6932, %v9652_v19   ;;  %v10303_v36 = vmul.f32 %v10141_v37, %v14135_v49  ;;  %v10306_v16 = vadd.f32 %v1132_v45, %v10051_v25  ;;  %v10313_v9 = vpop.permute.xlu2 %4830  ;;  %v14140_v32 = vld [vmem:[#allocation85_spill] sm:$0xff]  ;;  %v10329_v45 = vperm.slane %v10101_v29, 4  ;;  %v7098_v49 = vld [vmem:[#allocation2 + $0xc0] sm:$0xff] }
 0x7e8   : > { %14123 = vst [vmem:[#allocation55_spill] sm:$0xff] %v10272_v38  ;;  %v10309_v11 = vadd.f32 %v1144_v52, %v10058_v58  ;;  %v891_v40 = vmul.f32 %v9874_v42, %v14138_v27  ;;  %v10317_v59 = vmul.f32 %v10141_v37, %v14140_v32  ;;  %v1177_v19 = vadd.f32 %v9908_v17, %v920_v7  ;;  %v14145_v27 = vld [vmem:[#allocation292_spill] sm:$0xff] }
 0x7e9   : > { %14125 = vst [vmem:[#allocation57_spill] sm:$0xff] %v10277_v47  ;;  %v2200_v5 = vadd.f32 %v2168_v46, %v2007_v53  ;;  %v2647_v55 = vadd.f32 %v2615_v50, %v2454_v62  ;;  %v10323_v25 = vadd.f32 %v1134_v63, %v10065_v2  ;;  %v10326_v58 = vadd.f32 %v1147_v20, %v10072_v30  ;;  %v14146_v62 = vld [vmem:[#allocation558_spill] sm:$0xff]  ;;  %v14147_v63 = vld [vmem:[#allocation88_spill] sm:$0xff]  ;;  %v14148_v20 = vld [vmem:[#allocation89_spill] sm:$0xff] }
 0x7ea   : > { %14126 = vst [vmem:[#allocation59_spill] sm:$0xff] %v10280_v56  ;;  %v730_v52 = vadd.f32 %v698_v44, %v9786_v6  ;;  %4652 = vperm.xlu0 %6941, %v7098_v49   ;;  %v1338_v17 = vmul.f32 %v10077_v48, %v14145_v27  ;;  %v1817_v7 = vadd.f32 %v10055_v33, %v1560_v39  ;;  %v14149_v6 = vld [vmem:[#allocation106_spill] sm:$0xff]  ;;  %v10348_v32 = vpop.permute.xlu0 %3437  ;;  %v14151_v33 = vld [vmem:[#allocation319_spill] sm:$0xff]  ;;  %v14152_v49 = vld [vmem:[#allocation585_spill] sm:$0xff] }
 0x7eb   : > { %14128 = vst [vmem:[#allocation60_spill] sm:$0xff] %v10284_v41  ;;  %v1531_v46 = vmul.f32 %v10080_v60, %v14146_v62  ;;  %v2840_v2 = vadd.f32 %v2808_v26, %v2647_v55  ;;  %v10339_v30 = vmul.f32 %v10141_v37, %v14147_v63  ;;  %v10343_v50 = vmul.f32 %v9804_v43, %v14148_v20  ;;  %v14154_v63 = vld [vmem:[#allocation268_spill] sm:$0xff]  ;;  %v14161_v41 = vld [vmem:[#allocation94_spill] sm:$0xff]  ;;  %v7100_v56 = vld [vmem:[#allocation2 + $0x108] sm:$0xff] }
 0x7ec   : > { %14129 = vst [vmem:[#allocation62_spill] sm:$0xff] %v10287_v23  ;;  %v3065_v44 = vmul.f32 %v10329_v45, %v14149_v6  ;;  %v923_v53 = vadd.f32 %v891_v40, %v730_v52  ;;  %4985 = vperm.xlu1 %6931, %v10320_v24   ;;  %v1978_v39 = vmul.f32 %v10184_v14, %v14151_v33  ;;  %v10361_v52 = vperm.slane %v10101_v29, 5  ;;  %v14169_v23 = vld [vmem:[#allocation295_spill] sm:$0xff] }
 0x7ed   : > { %14136 = vst [vmem:[#allocation63_spill] sm:$0xff] %v10306_v16  ;;  %v1370_v26 = vadd.f32 %v1338_v17, %v1177_v19  ;;  %v2457_v55 = vadd.f32 %v2425_v35, %v2200_v5  ;;  %v2171_v27 = vmul.f32 %v10187_v28, %v14152_v49  ;;  %v701_v20 = vmul.f32 %v9725_v61, %v14154_v63  ;;  %v14158_v5 = vld [vmem:[#allocation611_spill] sm:$0xff]  ;;  %v14159_v49 = vld [vmem:[#allocation628_spill] sm:$0xff] }
 0x7ee   : > { %14137 = vst [vmem:[#allocation283_spill] sm:$0xff] %v10309_v11  ;;  %v10354_v62 = vpop.permute.xlu1 %4692  ;;  %v10364_v6 = vperm.slane %v10101_v29, 6  ;;  %v2010_v19 = vadd.f32 %v1978_v39, %v1817_v7  ;;  %v3097_v35 = vadd.f32 %v3065_v44, %v2840_v2  ;;  %v2811_v17 = vmul.f32 %v10277_v47, %v14158_v5  ;;  %v14165_v2 = vld [vmem:[#allocation372_spill] sm:$0xff]  ;;  %v14166_v5 = vld [vmem:[#allocation645_spill] sm:$0xff] }
 0x7ef   : > { %14139 = vst [vmem:[#allocation549_spill] sm:$0xff] %v10313_v9  ;;  %v14155_v9 = vld [vmem:[#allocation345_spill] sm:$0xff]  ;;  %v1563_v33 = vadd.f32 %v1531_v46, %v1370_v26  ;;  %5066 = vperm.xlu2 %6932, %v14159_v49   ;;  %v10380_v7 = vpop.permute.xlu2 %4845  ;;  %v3258_v44 = vmul.f32 %v10361_v52, %v14165_v2 }
 0x7f0   : > { %14141 = vst [vmem:[#allocation58_spill] sm:$0xff] %v10320_v24  ;;  %v2618_v40 = vmul.f32 %v10272_v38, %v14155_v9  ;;  %v10375_v9 = vmul.f32 %v10141_v37, %v14161_v41  ;;  %v14162_v24 = vld [vmem:[#allocation19_spill] sm:$0xff]  ;;  %v2203_v39 = vadd.f32 %v2171_v27, %v2010_v19  ;;  %v14167_v49 = vld [vmem:[#allocation109_spill] sm:$0xff]  ;;  %v14168_v41 = vld [vmem:[#allocation6_spill] sm:$0xff] }
 0x7f1   : > { %14142 = vst [vmem:[#allocation65_spill] sm:$0xff] %v10323_v25  ;;  %v14163_v25 = vld [vmem:[#allocation534_spill] sm:$0xff]  ;;  %v3068_v11 = vmul.f32 %v10329_v45, %v14167_v49  ;;  %v733_v16 = vadd.f32 %v701_v20, %v14168_v41  ;;  %v3290_v2 = vadd.f32 %v3258_v44, %v3097_v35  ;;  %v10401_v20 = vperm.slane %v10101_v29, 7 }
 0x7f2   : > { %14143 = vst [vmem:[#allocation66_spill] sm:$0xff] %v10326_v58  ;;  %v1180_v58 = vadd.f32 %v14162_v24, %v923_v53  ;;  %v894_v46 = vmul.f32 %v9874_v42, %v14163_v25  ;;  %v2650_v26 = vadd.f32 %v2618_v40, %v2457_v55  ;;  %v1341_v24 = vmul.f32 %v10077_v48, %v14169_v23  ;;  %v14170_v53 = vld [vmem:[#allocation561_spill] sm:$0xff]  ;;  %v14172_v55 = vld [vmem:[#allocation34_spill] sm:$0xff] }
 0x7f3   : > { %14144 = vst [vmem:[#allocation68_spill] sm:$0xff] %v10329_v45  ;;  %v1534_v25 = vmul.f32 %v10080_v60, %v14170_v53  ;;  %v1820_v40 = vadd.f32 %v14172_v55, %v1563_v33  ;;  %v10404_v53 = vpop.permute.xlu0 %3964  ;;  %v2460_v33 = vadd.f32 %v10303_v36, %v2203_v39  ;;  %v14180_v29 = vld [vmem:[#allocation118_spill] sm:$0xff]  ;;  %v14184_v39 = vld [vmem:[#allocation348_spill] sm:$0xff] }
 0x7f4   : > { %14150 = vst [vmem:[#allocation69_spill] sm:$0xff] %v10348_v32  ;;  %v14171_v32 = vld [vmem:[#allocation112_spill] sm:$0xff]  ;;  %v2843_v19 = vadd.f32 %v2811_v17, %v2650_v26  ;;  %v926_v23 = vadd.f32 %v894_v46, %v733_v16  ;;  %v1373_v41 = vadd.f32 %v1341_v24, %v1180_v58  ;;  %6933 = vset.pattern.permute.xlu1 %v14133_v12  ;;  %v14182_v24 = vld [vmem:[#allocation271_spill] sm:$0xff]  ;;  %v10425_v36 = vld [vmem:[%s13256_s1 + $0x10] sm:$0xff] }
 0x7f5   : > { %14153 = vst [vmem:[#allocation61_spill] sm:$0xff] %v10354_v62  ;;  %v14160_v62 = vld [vmem:[#allocation91_spill] sm:$0xff]  ;;  %v3071_v27 = vmul.f32 %v10329_v45, %v14171_v32  ;;  %v14177_v17 = vld [vmem:[#allocation588_spill] sm:$0xff]  ;;  %v10416_v16 = vmul.f32 %v10329_v45, %v14180_v29 }
 0x7f6   : > { %14156 = vst [vmem:[#allocation259_spill] sm:$0xff] %v10361_v52  ;;  %v10371_v63 = vmul.f32 %v10141_v37, %v14160_v62  ;;  %v3451_v62 = vmul.f32 %v10364_v6, %v14166_v5  ;;  %v14173_v5 = vld [vmem:[#allocation115_spill] sm:$0xff]  ;;  %v2174_v35 = vmul.f32 %v10187_v28, %v14177_v17  ;;  %v14178_v26 = vld [vmem:[#allocation632_spill] sm:$0xff]  ;;  %v10412_v55 = vpop.permute.xlu1 %4704  ;;  %v3100_v17 = vadd.f32 %v3068_v11, %v2843_v19 }
 0x7f7   : > { %14157 = vst [vmem:[#allocation64_spill] sm:$0xff] %v10364_v6  ;;  %v10398_v49 = vmul.f32 %v10329_v45, %v14173_v5  ;;  %5062 = vperm.xlu1 %6933, %v14178_v26   ;;  %v14181_v58 = vld [vmem:[#allocation136_spill] sm:$0xff]  ;;  %v704_v5 = vmul.f32 %v9725_v61, %v14182_v24  ;;  %v14185_v26 = vld [vmem:[#allocation614_spill] sm:$0xff]  ;;  %v10440_v0 = vpop.permute.xlu2 %4855 }
 0x7f8   : > { %14164 = vst [vmem:[#allocation67_spill] sm:$0xff] %v10380_v7  ;;  %v7099_v7 = vld [vmem:[#allocation2 + $0xe0] sm:$0xff]  ;;  %v3483_v44 = vadd.f32 %v3451_v62, %v3290_v2  ;;  %v3708_v46 = vmul.f32 %v10401_v20, %v14181_v58  ;;  %v2621_v62 = vmul.f32 %v10272_v38, %v14184_v39  ;;  %v2814_v29 = vmul.f32 %v10277_v47, %v14185_v26  ;;  %v14187_v58 = vld [vmem:[#allocation375_spill] sm:$0xff] }
 0x7f9   : > { %4664 = vperm.xlu0 %6941, %v7099_v7   ;;  %14174 = vst [vmem:[#allocation526_spill] sm:$0xff] %v10401_v20  ;;  %v14176_v7 = vld [vmem:[#allocation322_spill] sm:$0xff]  ;;  %v3261_v12 = vmul.f32 %v10361_v52, %v14187_v58  ;;  %v1344_v58 = vmul.f32 %v10077_v48, %v14194_v8 }
 0x7fa   : > { %14175 = vst [vmem:[#allocation71_spill] sm:$0xff] %v10404_v53  ;;  %v1981_v32 = vmul.f32 %v10184_v14, %v14176_v7  ;;  %v1566_v7 = vadd.f32 %v1534_v25, %v1373_v41  ;;  %v10435_v25 = vperm.slane %v10425_v36, 0  ;;  %v14189_v41 = vld [vmem:[#allocation17_spill] sm:$0xff]  ;;  %v2653_v11 = vadd.f32 %v2621_v62, %v2460_v33  ;;  %v14198_v33 = vld [vmem:[#allocation564_spill] sm:$0xff] }
 0x7fb   : > { %14179 = vst [vmem:[#allocation72_spill] sm:$0xff] %v10412_v55  ;;  %v14186_v55 = vld [vmem:[#allocation633_spill] sm:$0xff]  ;;  %v1183_v24 = vadd.f32 %v14189_v41, %v926_v23  ;;  %v3740_v19 = vadd.f32 %v3708_v46, %v3483_v44  ;;  %v14196_v23 = vld [vmem:[#allocation32_spill] sm:$0xff]  ;;  %v3293_v46 = vadd.f32 %v3261_v12, %v3100_v17  ;;  %v14203_v12 = vld [vmem:[#allocation139_spill] sm:$0xff] }
 0x7fc   : > { %14183 = vst [vmem:[#allocation286_spill] sm:$0xff] %v10425_v36  ;;  %v2013_v2 = vadd.f32 %v1981_v32, %v1820_v40  ;;  %5074 = vperm.xlu2 %6932, %v14186_v55   ;;  %v14190_v53 = vld [vmem:[#allocation537_spill] sm:$0xff]  ;;  %v14192_v32 = vld [vmem:[#allocation650_spill] sm:$0xff]  ;;  %v14193_v55 = vld [vmem:[#allocation7_spill] sm:$0xff]  ;;  %v3901_v22 = vmul.f32 %v10435_v25, %v14195_v34  ;;  %v1823_v41 = vadd.f32 %v14196_v23, %v1566_v7 }
 0x7fd   : > { %14188 = vst [vmem:[#allocation552_spill] sm:$0xff] %v10435_v25  ;;  %v897_v31 = vmul.f32 %v9874_v42, %v14190_v53  ;;  %v3454_v39 = vmul.f32 %v10364_v6, %v14192_v32  ;;  %v736_v26 = vadd.f32 %v704_v5, %v14193_v55  ;;  %v10451_v53 = vperm.slane %v10425_v36, 1  ;;  %v14199_v62 = vld [vmem:[#allocation325_spill] sm:$0xff]  ;;  %v14200_v32 = vld [vmem:[#allocation591_spill] sm:$0xff]  ;;  %v3985_v55 = vpop.permute.xlu0 %3984 }
 0x7fe   : > { %14191 = vst [vmem:[#allocation74_spill] sm:$0xff] %v10440_v0  ;;  %v2206_v40 = vadd.f32 %v2174_v35, %v2013_v2  ;;  %v1537_v35 = vmul.f32 %v10080_v60, %v14198_v33  ;;  %v2846_v44 = vadd.f32 %v2814_v29, %v2653_v11  ;;  %v1984_v5 = vmul.f32 %v10184_v14, %v14199_v62  ;;  %v14201_v36 = vld [vmem:[#allocation637_spill] sm:$0xff]  ;;  %v10462_v33 = vpop.permute.xlu1 %4716  ;;  %v14204_v29 = vld [vmem:[#allocation274_spill] sm:$0xff]  ;;  %v14210_v62 = vld [vmem:[#allocation24_spill] sm:$0xff] }
 0x7ff   : > { %14197 = vst [vmem:[#allocation77_spill] sm:$0xff] %v10451_v53  ;;  %v929_v2 = vadd.f32 %v897_v31, %v736_v26  ;;  %v1376_v8 = vadd.f32 %v1344_v58, %v1183_v24  ;;  %v2177_v34 = vmul.f32 %v10187_v28, %v14200_v32  ;;  %v3933_v23 = vadd.f32 %v3901_v22, %v3740_v19  ;;  %v14205_v24 = vld [vmem:[#allocation351_spill] sm:$0xff] }
 0x800   : > { %v2463_v7 = vadd.f32 %v10317_v59, %v2206_v40  ;;  %v4094_v0 = vmul.f32 %v10451_v53, %v3985_v55  ;;  %5070 = vperm.xlu1 %6933, %v14201_v36   ;;  %14202 = vst [vmem:[#allocation75_spill] sm:$0xff] %v10462_v33  ;;  %v3711_v17 = vmul.f32 %v10401_v20, %v14203_v12  ;;  %v14206_v40 = vld [vmem:[#allocation617_spill] sm:$0xff]  ;;  %v14208_v36 = vld [vmem:[#allocation638_spill] sm:$0xff]  ;;  %v14211_v55 = vld [vmem:[#allocation540_spill] sm:$0xff] }
 0x801   : > { %4676 = vperm.xlu0 %6941, %v7100_v56   ;;  %v3486_v56 = vadd.f32 %v3454_v39, %v3293_v46  ;;  %v707_v31 = vmul.f32 %v9725_v61, %v14204_v29  ;;  %v2624_v11 = vmul.f32 %v10272_v38, %v14205_v24  ;;  %v2016_v26 = vadd.f32 %v1984_v5, %v1823_v41  ;;  %v14209_v39 = vld [vmem:[#allocation142_spill] sm:$0xff]  ;;  %v10480_v24 = vpop.permute.xlu2 %4870 }
 0x802   : > { %v1569_v58 = vadd.f32 %v1537_v35, %v1376_v8  ;;  %v3103_v59 = vadd.f32 %v3071_v27, %v2846_v44  ;;  %v2817_v22 = vmul.f32 %v10277_v47, %v14206_v40  ;;  %v10472_v19 = vadd.f32 %v4094_v0, %v3933_v23  ;;  %14212 = vst [vmem:[#allocation313_spill] sm:$0xff] %v10480_v24  ;;  %v14213_v41 = vld [vmem:[#allocation378_spill] sm:$0xff]  ;;  %v14214_v0 = vld [vmem:[#allocation9_spill] sm:$0xff]  ;;  %v14215_v8 = vld [vmem:[#allocation252_spill] sm:$0xff] }
 0x803   : > { %v3714_v46 = vmul.f32 %v10401_v20, %v14209_v39  ;;  %v1186_v32 = vadd.f32 %v14210_v62, %v929_v2  ;;  %v900_v12 = vmul.f32 %v9874_v42, %v14211_v55  ;;  %v2209_v29 = vadd.f32 %v2177_v34, %v2016_v26  ;;  %v14216_v40 = vld [vmem:[#allocation15_spill] sm:$0xff]  ;;  %v14217_v2 = vld [vmem:[#allocation301_spill] sm:$0xff]  ;;  %v14221_v24 = vld [vmem:[#allocation594_spill] sm:$0xff] }
 0x804   : > { %14207 = vst [vmem:[#allocation78_spill] sm:$0xff] %v10472_v19  ;;  %5086 = vperm.xlu2 %6932, %v14208_v36   ;;  %v3264_v27 = vmul.f32 %v10361_v52, %v14213_v41  ;;  %v2656_v35 = vadd.f32 %v2624_v11, %v2463_v7  ;;  %v3743_v44 = vadd.f32 %v3711_v17, %v3486_v56  ;;  %v14218_v62 = vld [vmem:[#allocation567_spill] sm:$0xff]  ;;  %v7101_v26 = vld [vmem:[#allocation2 + $0x128] sm:$0xff]  ;;  %v14220_v41 = vld [vmem:[#allocation328_spill] sm:$0xff] }
 0x805   : > { %v3457_v5 = vmul.f32 %v10364_v6, %v14214_v0  ;;  %v681_v23 = vmul.f32 %v9725_v61, %v14215_v8  ;;  %v739_v36 = vadd.f32 %v707_v31, %v14216_v40  ;;  %v1347_v39 = vmul.f32 %v10077_v48, %v14217_v2  ;;  %v14219_v55 = vld [vmem:[#allocation405_spill] sm:$0xff]  ;;  %v3997_v2 = vpop.permute.xlu0 %3996 }
 0x806   : > { %v1540_v34 = vmul.f32 %v10080_v60, %v14218_v62  ;;  %v3904_v7 = vmul.f32 %v10435_v25, %v14219_v55  ;;  %v1826_v56 = vadd.f32 %v10135_v21, %v1569_v58  ;;  %v2849_v17 = vadd.f32 %v2817_v22, %v2656_v35  ;;  %v14222_v55 = vld [vmem:[#allocation642_spill] sm:$0xff]  ;;  %v10503_v21 = vpop.permute.xlu1 %4728  ;;  %v14224_v58 = vld [vmem:[#allocation277_spill] sm:$0xff]  ;;  %v14227_v35 = vld [vmem:[#allocation620_spill] sm:$0xff] }
 0x807   : > { %v3296_v11 = vadd.f32 %v3264_v27, %v3103_v59  ;;  %v1987_v0 = vmul.f32 %v10184_v14, %v14220_v41  ;;  %v932_v8 = vadd.f32 %v900_v12, %v739_v36  ;;  %v1379_v31 = vadd.f32 %v1347_v39, %v1186_v32  ;;  %14223 = vst [vmem:[#allocation579_spill] sm:$0xff] %v10503_v21  ;;  %v14225_v22 = vld [vmem:[#allocation354_spill] sm:$0xff]  ;;  %v14226_v12 = vld [vmem:[#allocation519_spill] sm:$0xff]  ;;  %v14229_v39 = vld [vmem:[#allocation648_spill] sm:$0xff] }
 0x808   : > { %v2466_v40 = vadd.f32 %v10339_v30, %v2209_v29  ;;  %v2180_v62 = vmul.f32 %v10187_v28, %v14221_v24  ;;  %v4097_v19 = vmul.f32 %v10451_v53, %v3997_v2  ;;  %5082 = vperm.xlu1 %6933, %v14222_v55   ;;  %v710_v59 = vmul.f32 %v9725_v61, %v14224_v58  ;;  %v14228_v36 = vld [vmem:[#allocation643_spill] sm:$0xff]  ;;  %v14230_v61 = vld [vmem:[#allocation381_spill] sm:$0xff] }
 0x809   : > { %4688 = vperm.xlu0 %6941, %v7101_v26   ;;  %v3489_v33 = vadd.f32 %v3457_v5, %v3296_v11  ;;  %v3936_v26 = vadd.f32 %v3904_v7, %v3743_v44  ;;  %v2627_v32 = vmul.f32 %v10272_v38, %v14225_v22  ;;  %v874_v30 = vmul.f32 %v9874_v42, %v14226_v12  ;;  %v14231_v41 = vld [vmem:[#allocation27_spill] sm:$0xff]  ;;  %v14236_v22 = vld [vmem:[#allocation304_spill] sm:$0xff]  ;;  %v14347_v21 = vld [vmem:[#allocation133_spill] sm:$0xff] }
 0x80a   : > { %v1572_v29 = vadd.f32 %v1540_v34, %v1379_v31  ;;  %v2019_v27 = vadd.f32 %v1987_v0, %v1826_v56  ;;  %v3106_v24 = vadd.f32 %v10398_v49, %v2849_v17  ;;  %v2820_v44 = vmul.f32 %v10277_v47, %v14227_v35  ;;  %v14232_v55 = vld [vmem:[#allocation543_spill] sm:$0xff]  ;;  %v10523_v56 = vpop.permute.xlu2 %4885  ;;  %v14234_v31 = vld [vmem:[#allocation14_spill] sm:$0xff] }
 0x80b   : > { %v10514_v5 = vadd.f32 %v4097_v19, %v3936_v26  ;;  %v713_v7 = vadd.f32 %v681_v23, %v14229_v39  ;;  %v3267_v11 = vmul.f32 %v10361_v52, %v14230_v61  ;;  %v1189_v2 = vadd.f32 %v14231_v41, %v932_v8  ;;  %14233 = vst [vmem:[#allocation70_spill] sm:$0xff] %v10523_v56  ;;  %v14235_v26 = vld [vmem:[#allocation10_spill] sm:$0xff]  ;;  %v14240_v61 = vld [vmem:[#allocation597_spill] sm:$0xff] }
 0x80c   : > { %5098 = vperm.xlu2 %6932, %v14228_v36   ;;  %v903_v34 = vmul.f32 %v9874_v42, %v14232_v55  ;;  %v2212_v49 = vadd.f32 %v2180_v62, %v2019_v27  ;;  %v2659_v17 = vadd.f32 %v2627_v32, %v2466_v40  ;;  %v3746_v0 = vadd.f32 %v3714_v46, %v3489_v33  ;;  %v7102_v8 = vld [vmem:[#allocation2 + $0x150] sm:$0xff]  ;;  %v14237_v36 = vld [vmem:[#allocation408_spill] sm:$0xff]  ;;  %v14239_v62 = vld [vmem:[#allocation331_spill] sm:$0xff] }
 0x80d   : > { %v3460_v19 = vmul.f32 %v10364_v6, %v14234_v31  ;;  %v742_v58 = vadd.f32 %v710_v59, %v14235_v26  ;;  %v1350_v23 = vmul.f32 %v10077_v48, %v14236_v22  ;;  %v906_v12 = vadd.f32 %v874_v30, %v713_v7  ;;  %v14238_v39 = vld [vmem:[#allocation570_spill] sm:$0xff]  ;;  %v4009_v7 = vpop.permute.xlu0 %4008  ;;  %v14241_v31 = vld [vmem:[#allocation647_spill] sm:$0xff]  ;;  %v14242_v26 = vld [vmem:[#allocation145_spill] sm:$0xff] }
 0x80e   : > { %v1829_v35 = vadd.f32 %v10156_v4, %v1572_v29  ;;  %v3907_v42 = vmul.f32 %v10435_v25, %v14237_v36  ;;  %v1543_v40 = vmul.f32 %v10080_v60, %v14238_v39  ;;  %v2852_v33 = vadd.f32 %v2820_v44, %v2659_v17  ;;  %v14243_v44 = vld [vmem:[#allocation357_spill] sm:$0xff] }
 0x80f   : > { %v3299_v46 = vadd.f32 %v3267_v11, %v3106_v24  ;;  %v1990_v32 = vmul.f32 %v10184_v14, %v14239_v62  ;;  %v935_v59 = vadd.f32 %v903_v34, %v742_v58  ;;  %v1382_v27 = vadd.f32 %v1350_v23, %v1189_v2  ;;  %v14244_v34 = vld [vmem:[#allocation11_spill] sm:$0xff]  ;;  %v10547_v58 = vpop.permute.xlu1 %4840  ;;  %v14247_v23 = vld [vmem:[#allocation649_spill] sm:$0xff] }
 0x810   : > { %v2183_v30 = vmul.f32 %v10187_v28, %v14240_v61  ;;  %v2469_v4 = vadd.f32 %v10371_v63, %v2212_v49  ;;  %v3939_v41 = vadd.f32 %v3907_v42, %v3746_v0  ;;  %v4100_v55 = vmul.f32 %v10451_v53, %v4009_v7  ;;  %5094 = vperm.xlu1 %6933, %v14241_v31   ;;  %v14246_v49 = vld [vmem:[#allocation623_spill] sm:$0xff]  ;;  %v14249_v42 = vld [vmem:[#allocation28_spill] sm:$0xff]  ;;  %v14254_v7 = vld [vmem:[#allocation121_spill] sm:$0xff] }
 0x811   : > { %4700 = vperm.xlu0 %6941, %v7102_v8   ;;  %v3492_v29 = vadd.f32 %v3460_v19, %v3299_v46  ;;  %v3717_v24 = vmul.f32 %v10401_v20, %v14242_v26  ;;  %v2630_v11 = vmul.f32 %v10272_v38, %v14243_v44  ;;  %v1163_v2 = vadd.f32 %v14244_v34, %v906_v12  ;;  %v14248_v8 = vld [vmem:[#allocation280_spill] sm:$0xff]  ;;  %v14250_v46 = vld [vmem:[#allocation546_spill] sm:$0xff]  ;;  %v14256_v26 = vld [vmem:[#allocation573_spill] sm:$0xff] }
 0x812   : > { %v2022_v17 = vadd.f32 %v1990_v32, %v1829_v35  ;;  %14245 = vst [vmem:[#allocation80_spill] sm:$0xff] %v10547_v58  ;;  %v1575_v22 = vadd.f32 %v1543_v40, %v1382_v27  ;;  %v3109_v63 = vadd.f32 %v10416_v16, %v2852_v33  ;;  %v2823_v0 = vmul.f32 %v10277_v47, %v14246_v49  ;;  %v10560_v62 = vpop.permute.xlu2 %4900  ;;  %v14252_v40 = vld [vmem:[#allocation384_spill] sm:$0xff]  ;;  %v14253_v27 = vld [vmem:[#allocation31_spill] sm:$0xff]  ;;  %v7103_v44 = vld [vmem:[#allocation2 + $0x170] sm:$0xff] }
 0x813   : > { %v10552_v19 = vadd.f32 %v4100_v55, %v3939_v41  ;;  %v1324_v36 = vmul.f32 %v10077_v48, %v14248_v8  ;;  %v1192_v39 = vadd.f32 %v14249_v42, %v935_v59  ;;  %v1517_v12 = vmul.f32 %v10080_v60, %v14250_v46  ;;  %14251 = vst [vmem:[#allocation73_spill] sm:$0xff] %v10560_v62  ;;  %v14255_v55 = vld [vmem:[#allocation307_spill] sm:$0xff] }
 0x814   : > { %5110 = vperm.xlu2 %6932, %v14247_v23   ;;  %v2215_v35 = vadd.f32 %v2183_v30, %v2022_v17  ;;  %v3270_v16 = vmul.f32 %v10361_v52, %v14252_v40  ;;  %v2662_v33 = vadd.f32 %v2630_v11, %v2469_v4  ;;  %v3749_v32 = vadd.f32 %v3717_v24, %v3492_v29  ;;  %v14257_v34 = vld [vmem:[#allocation411_spill] sm:$0xff]  ;;  %v14258_v11 = vld [vmem:[#allocation334_spill] sm:$0xff] }
 0x815   : > { %v3463_v61 = vmul.f32 %v10364_v6, %v14253_v27  ;;  %v3080_v41 = vmul.f32 %v10329_v45, %v14254_v7  ;;  %v1353_v59 = vmul.f32 %v10077_v48, %v14255_v55  ;;  %v1356_v31 = vadd.f32 %v1324_v36, %v1163_v2  ;;  %v4021_v2 = vpop.permute.xlu0 %4020  ;;  %v14259_v36 = vld [vmem:[#allocation600_spill] sm:$0xff]  ;;  %v14260_v55 = vld [vmem:[#allocation653_spill] sm:$0xff] }
 0x816   : > { %v1546_v30 = vmul.f32 %v10080_v60, %v14256_v26  ;;  %v3910_v17 = vmul.f32 %v10435_v25, %v14257_v34  ;;  %v1832_v4 = vadd.f32 %v10163_v54, %v1575_v22  ;;  %v2855_v29 = vadd.f32 %v2823_v0, %v2662_v33  ;;  %v14261_v54 = vld [vmem:[#allocation29_spill] sm:$0xff]  ;;  %v7107_v62 = vld [vmem:[#allocation2 + $0x99] sm:$0xff] }
 0x817   : > { %v3302_v24 = vadd.f32 %v3270_v16, %v3109_v63  ;;  %v1993_v49 = vmul.f32 %v10184_v14, %v14258_v11  ;;  %v1549_v23 = vadd.f32 %v1517_v12, %v1356_v31  ;;  %v1385_v8 = vadd.f32 %v1353_v59, %v1192_v39  ;;  %v14262_v63 = vld [vmem:[#allocation148_spill] sm:$0xff] }
 0x818   : > { %v2472_v42 = vadd.f32 %v10375_v9, %v2215_v35  ;;  %v2186_v46 = vmul.f32 %v10187_v28, %v14259_v36  ;;  %v3942_v27 = vadd.f32 %v3910_v17, %v3749_v32  ;;  %v4103_v7 = vmul.f32 %v10451_v53, %v4021_v2  ;;  %5106 = vperm.xlu1 %6933, %v14260_v55   ;;  %v14263_v39 = vld [vmem:[#allocation360_spill] sm:$0xff]  ;;  %v10590_v35 = vpop.permute.xlu1 %4850  ;;  %v14265_v32 = vld [vmem:[#allocation626_spill] sm:$0xff]  ;;  %v14269_v17 = vld [vmem:[#allocation387_spill] sm:$0xff] }
 0x819   : > { %4712 = vperm.xlu0 %6941, %v7103_v44   ;;  %v3495_v40 = vadd.f32 %v3463_v61, %v3302_v24  ;;  %v10584_v22 = vadd.f32 %v10343_v50, %v14261_v54  ;;  %v3720_v0 = vmul.f32 %v10401_v20, %v14262_v63  ;;  %v2633_v9 = vmul.f32 %v10272_v38, %v14263_v39  ;;  %v14266_v31 = vld [vmem:[#allocation8_spill] sm:$0xff]  ;;  %v14267_v50 = vld [vmem:[#allocation90_spill] sm:$0xff]  ;;  %v14270_v24 = vld [vmem:[#allocation23_spill] sm:$0xff] }
 0x81a   : > { %v1578_v12 = vadd.f32 %v1546_v30, %v1385_v8  ;;  %14264 = vst [vmem:[#allocation262_spill] sm:$0xff] %v10590_v35  ;;  %v2025_v16 = vadd.f32 %v1993_v49, %v1832_v4  ;;  %v3112_v33 = vadd.f32 %v3080_v41, %v2855_v29  ;;  %v2826_v61 = vmul.f32 %v10277_v47, %v14265_v32  ;;  %v14268_v44 = vld [vmem:[#allocation92_spill] sm:$0xff]  ;;  %v10604_v4 = vpop.permute.xlu2 %4915  ;;  %v14272_v2 = vld [vmem:[#allocation93_spill] sm:$0xff]  ;;  %v14274_v55 = vld [vmem:[#allocation310_spill] sm:$0xff] }
 0x81b   : > { %v10594_v59 = vadd.f32 %v4103_v7, %v3942_v27  ;;  %v1150_v26 = vmul.f32 %v9804_v43, %v14267_v50  ;;  %v1140_v34 = vmul.f32 %v9804_v43, %v14268_v44  ;;  %v3273_v30 = vmul.f32 %v10361_v52, %v14269_v17  ;;  %14271 = vst [vmem:[#allocation76_spill] sm:$0xff] %v10604_v4  ;;  %v14273_v27 = vld [vmem:[#allocation97_spill] sm:$0xff]  ;;  %v14275_v39 = vld [vmem:[#allocation414_spill] sm:$0xff]  ;;  %v14279_v44 = vld [vmem:[#allocation603_spill] sm:$0xff] }
 0x81c   : > { %5122 = vperm.xlu2 %6932, %v14266_v31   ;;  %v1806_v11 = vadd.f32 %v14270_v24, %v1549_v23  ;;  %v2218_v41 = vadd.f32 %v2186_v46, %v2025_v16  ;;  %v2665_v29 = vadd.f32 %v2633_v9, %v2472_v42  ;;  %v3752_v49 = vadd.f32 %v3720_v0, %v3495_v40  ;;  %v7104_v23 = vld [vmem:[#allocation2 + $0x198] sm:$0xff]  ;;  %v14276_v46 = vld [vmem:[#allocation576_spill] sm:$0xff]  ;;  %v14278_v32 = vld [vmem:[#allocation337_spill] sm:$0xff] }
 0x81d   : > { %v3466_v8 = vmul.f32 %v10364_v6, %v10122_v1  ;;  %v1153_v36 = vmul.f32 %v9804_v43, %v14272_v2  ;;  %v2443_v7 = vmul.f32 %v10141_v37, %v14273_v27  ;;  %v1967_v54 = vmul.f32 %v10184_v14, %v14274_v55  ;;  %v14277_v9 = vld [vmem:[#allocation124_spill] sm:$0xff]  ;;  %v14280_v55 = vld [vmem:[#allocation18_spill] sm:$0xff] }
 0x81e   : > { %v1835_v63 = vadd.f32 %v10216_v51, %v1578_v12  ;;  %v3913_v42 = vmul.f32 %v10435_v25, %v14275_v39  ;;  %v2160_v40 = vmul.f32 %v10187_v28, %v14276_v46  ;;  %v2858_v1 = vadd.f32 %v2826_v61, %v2665_v29  ;;  %v4033_v12 = vpop.permute.xlu0 %4032  ;;  %v14281_v61 = vld [vmem:[#allocation95_spill] sm:$0xff] }
 0x81f   : > { %v3305_v0 = vadd.f32 %v3273_v30, %v3112_v33  ;;  %v3083_v16 = vmul.f32 %v10329_v45, %v14277_v9  ;;  %v1996_v31 = vmul.f32 %v10184_v14, %v14278_v32  ;;  %v1999_v50 = vadd.f32 %v1967_v54, %v1806_v11  ;;  %v14282_v30 = vld [vmem:[#allocation151_spill] sm:$0xff] }
 0x820   : > { %v2189_v51 = vmul.f32 %v10187_v28, %v14279_v44  ;;  %v2475_v17 = vadd.f32 %v2443_v7, %v2218_v41  ;;  %v3945_v2 = vadd.f32 %v3913_v42, %v3752_v49  ;;  %v4106_v27 = vmul.f32 %v10451_v53, %v4033_v12  ;;  %5118 = vperm.xlu1 %6933, %v14280_v55   ;;  %v10633_v39 = vpop.permute.xlu1 %4865  ;;  %v14286_v42 = vld [vmem:[#allocation13_spill] sm:$0xff] }
 0x821   : > { %4724 = vperm.xlu0 %6941, %v7104_v23   ;;  %v3498_v24 = vadd.f32 %v3466_v8, %v3305_v0  ;;  %v1143_v33 = vmul.f32 %v9804_v43, %v14281_v61  ;;  %v3723_v29 = vmul.f32 %v10401_v20, %v14282_v30  ;;  %v14283_v23 = vld [vmem:[#allocation363_spill] sm:$0xff]  ;;  %v2028_v54 = vadd.f32 %v1996_v31, %v1835_v63  ;;  %v14285_v8 = vld [vmem:[#allocation630_spill] sm:$0xff]  ;;  %v14293_v55 = vld [vmem:[#allocation417_spill] sm:$0xff] }
 0x822   : > { %v2636_v11 = vmul.f32 %v10272_v38, %v14283_v23  ;;  %14284 = vst [vmem:[#allocation528_spill] sm:$0xff] %v10633_v39  ;;  %v2192_v46 = vadd.f32 %v2160_v40, %v1999_v50  ;;  %v3115_v41 = vadd.f32 %v3083_v16, %v2858_v1  ;;  %v2829_v49 = vmul.f32 %v10277_v47, %v14285_v8  ;;  %v14287_v0 = vld [vmem:[#allocation39_spill] sm:$0xff]  ;;  %v10649_v31 = vpop.permute.xlu2 %4930  ;;  %v14289_v40 = vld [vmem:[#allocation390_spill] sm:$0xff]  ;;  %v14296_v23 = vld [vmem:[#allocation340_spill] sm:$0xff] }
 0x823   : > { %v10637_v7 = vadd.f32 %v4106_v27, %v3945_v2  ;;  %v10641_v9 = vadd.f32 %v1150_v26, %v14287_v0  ;;  %v10644_v32 = vadd.f32 %v1140_v34, %v10131_v3  ;;  %v10647_v44 = vadd.f32 %v1153_v36, %v10138_v18  ;;  %14288 = vst [vmem:[#allocation79_spill] sm:$0xff] %v10649_v31  ;;  %v14290_v2 = vld [vmem:[#allocation96_spill] sm:$0xff]  ;;  %v14291_v34 = vld [vmem:[#allocation98_spill] sm:$0xff]  ;;  %v14295_v30 = vld [vmem:[#allocation127_spill] sm:$0xff] }
 0x824   : > { %5134 = vperm.xlu2 %6932, %v14286_v42   ;;  %v2221_v63 = vadd.f32 %v2189_v51, %v2028_v54  ;;  %v3276_v1 = vmul.f32 %v10361_v52, %v14289_v40  ;;  %v2668_v16 = vadd.f32 %v2636_v11, %v2475_v17  ;;  %v3755_v50 = vadd.f32 %v3723_v29, %v3498_v24  ;;  %v14292_v36 = vld [vmem:[#allocation100_spill] sm:$0xff]  ;;  %v14297_v42 = vld [vmem:[#allocation606_spill] sm:$0xff]  ;;  %v14325_v39 = vld [vmem:[#allocation157_spill] sm:$0xff] }
 0x825   : > { %v3469_v12 = vmul.f32 %v10364_v6, %v10206_v15  ;;  %v10656_v26 = vadd.f32 %v1143_v33, %v10145_v57  ;;  %v1156_v3 = vmul.f32 %v9804_v43, %v14290_v2  ;;  %v1146_v18 = vmul.f32 %v9804_v43, %v14291_v34  ;;  %v7105_v27 = vld [vmem:[#allocation2 + $0x39] sm:$0xff]  ;;  %v14301_v34 = vld [vmem:[#allocation154_spill] sm:$0xff] }
 0x826   : > { %v2446_v51 = vmul.f32 %v10141_v37, %v14292_v36  ;;  %v3916_v17 = vmul.f32 %v10435_v25, %v14293_v55  ;;  %v2449_v24 = vadd.f32 %v10229_v10, %v2192_v46  ;;  %v2861_v15 = vadd.f32 %v2829_v49, %v2668_v16  ;;  %v14294_v57 = vld [vmem:[#allocation99_spill] sm:$0xff]  ;;  %v4045_v8 = vpop.permute.xlu0 %4044  ;;  %v14298_v46 = vld [vmem:[#allocation20_spill] sm:$0xff] }
 0x827   : > { %v3308_v61 = vadd.f32 %v3276_v1, %v3115_v41  ;;  %v1159_v33 = vmul.f32 %v9804_v43, %v14294_v57  ;;  %v3086_v29 = vmul.f32 %v10329_v45, %v14295_v30  ;;  %v2610_v11 = vmul.f32 %v10272_v38, %v14296_v23  ;;  %v14299_v41 = vld [vmem:[#allocation101_spill] sm:$0xff]  ;;  %v14300_v1 = vld [vmem:[#allocation102_spill] sm:$0xff]  ;;  %v14304_v55 = vld [vmem:[#allocation635_spill] sm:$0xff] }
 0x828   : > { %v2478_v54 = vadd.f32 %v2446_v51, %v2221_v63  ;;  %v2803_v0 = vmul.f32 %v10277_v47, %v14297_v42  ;;  %v3948_v2 = vadd.f32 %v3916_v17, %v3755_v50  ;;  %v4109_v10 = vmul.f32 %v10451_v53, %v4045_v8  ;;  %5130 = vperm.xlu1 %6933, %v14298_v46   ;;  %v14302_v63 = vld [vmem:[#allocation366_spill] sm:$0xff] }
 0x829   : > { %5251 = vperm.xlu0 %6941, %v7105_v27   ;;  %v3501_v40 = vadd.f32 %v3469_v12, %v3308_v61  ;;  %v1149_v49 = vmul.f32 %v9804_v43, %v14299_v41  ;;  %v1323_v16 = vmul.f32 %v10077_v48, %v14300_v1  ;;  %v3726_v36 = vmul.f32 %v10401_v20, %v14301_v34  ;;  %v10685_v27 = vpop.permute.xlu1 %4880  ;;  %v14305_v57 = vld [vmem:[#allocation30_spill] sm:$0xff]  ;;  %v14308_v41 = vld [vmem:[#allocation393_spill] sm:$0xff]  ;;  %v14311_v34 = vld [vmem:[#allocation43_spill] sm:$0xff] }
 0x82a   : > { %v2639_v51 = vmul.f32 %v10272_v38, %v14302_v63  ;;  %14303 = vst [vmem:[#allocation81_spill] sm:$0xff] %v10685_v27  ;;  %v2642_v12 = vadd.f32 %v2610_v11, %v2449_v24  ;;  %v3118_v50 = vadd.f32 %v3086_v29, %v2861_v15  ;;  %v2832_v17 = vmul.f32 %v10277_v47, %v14304_v55  ;;  %v14306_v23 = vld [vmem:[#allocation38_spill] sm:$0xff]  ;;  %v10703_v15 = vpop.permute.xlu2 %4945  ;;  %v14313_v63 = vld [vmem:[#allocation104_spill] sm:$0xff]  ;;  %v14314_v55 = vld [vmem:[#allocation45_spill] sm:$0xff] }
 0x82b   : > { %v10689_v61 = vadd.f32 %v4109_v10, %v3948_v2  ;;  %v10693_v30 = vadd.f32 %v1156_v3, %v10148_v13  ;;  %v10696_v8 = vadd.f32 %v1146_v18, %v14306_v23  ;;  %v14307_v42 = vld [vmem:[#allocation42_spill] sm:$0xff]  ;;  %v3279_v24 = vmul.f32 %v10361_v52, %v14308_v41  ;;  %14309 = vst [vmem:[#allocation83_spill] sm:$0xff] %v10703_v15  ;;  %v14310_v10 = vld [vmem:[#allocation59_spill] sm:$0xff] }
 0x82c   : > { %5146 = vperm.xlu2 %6932, %v14305_v57   ;;  %v10699_v46 = vadd.f32 %v1159_v33, %v14307_v42  ;;  %v2835_v29 = vadd.f32 %v2803_v0, %v2642_v12  ;;  %v2671_v11 = vadd.f32 %v2639_v51, %v2478_v54  ;;  %v3758_v2 = vadd.f32 %v3726_v36, %v3501_v40  ;;  %v14312_v3 = vld [vmem:[#allocation103_spill] sm:$0xff]  ;;  %v14315_v0 = vld [vmem:[#allocation105_spill] sm:$0xff]  ;;  %v14316_v40 = vld [vmem:[#allocation420_spill] sm:$0xff] }
 0x82d   : > { %v3472_v1 = vmul.f32 %v10364_v6, %v14310_v10  ;;  %v10708_v13 = vadd.f32 %v1149_v49, %v14311_v34  ;;  %v3060_v18 = vmul.f32 %v10329_v45, %v14312_v3  ;;  %v1152_v33 = vmul.f32 %v9804_v43, %v14313_v63  ;;  %v7106_v23 = vld [vmem:[#allocation2 + $0x79] sm:$0xff]  ;;  %v14318_v41 = vld [vmem:[#allocation110_spill] sm:$0xff] }
 0x82e   : > { %v10715_v57 = vadd.f32 %v1323_v16, %v14314_v55  ;;  %v1326_v54 = vmul.f32 %v10077_v48, %v14315_v0  ;;  %v3919_v36 = vmul.f32 %v10435_v25, %v14316_v40  ;;  %v2864_v51 = vadd.f32 %v2832_v17, %v2671_v11  ;;  %v14317_v12 = vld [vmem:[#allocation107_spill] sm:$0xff]  ;;  %v14319_v34 = vld [vmem:[#allocation108_spill] sm:$0xff]  ;;  %v14320_v3 = vld [vmem:[#allocation130_spill] sm:$0xff]  ;;  %v4057_v55 = vpop.permute.xlu0 %4056 }
 0x82f   : > { %v3311_v49 = vadd.f32 %v3279_v24, %v3118_v50  ;;  %v1155_v42 = vmul.f32 %v9804_v43, %v14317_v12  ;;  %v1158_v10 = vmul.f32 %v9804_v43, %v14318_v41  ;;  %v1328_v16 = vmul.f32 %v10077_v48, %v14319_v34  ;;  %v14321_v17 = vld [vmem:[#allocation36_spill] sm:$0xff]  ;;  %v14322_v50 = vld [vmem:[#allocation50_spill] sm:$0xff]  ;;  %v14323_v11 = vld [vmem:[#allocation113_spill] sm:$0xff] }
 0x830   : > { %v3089_v63 = vmul.f32 %v10329_v45, %v14320_v3  ;;  %v3951_v27 = vadd.f32 %v3919_v36, %v3758_v2  ;;  %v4112_v40 = vmul.f32 %v10451_v53, %v4057_v55  ;;  %5142 = vperm.xlu1 %6933, %v14321_v17   ;;  %v10732_v24 = vadd.f32 %v1152_v33, %v14322_v50  ;;  %v14324_v41 = vld [vmem:[#allocation111_spill] sm:$0xff] }
 0x831   : > { %5271 = vperm.xlu0 %6941, %v7106_v23   ;;  %v3092_v23 = vadd.f32 %v3060_v18, %v2835_v29  ;;  %v3504_v0 = vadd.f32 %v3472_v1, %v3311_v49  ;;  %v1161_v12 = vmul.f32 %v9804_v43, %v14323_v11  ;;  %v1331_v34 = vmul.f32 %v10077_v48, %v14324_v41  ;;  %v10740_v35 = vpop.permute.xlu1 %4895  ;;  %v14327_v29 = vld [vmem:[#allocation369_spill] sm:$0xff]  ;;  %v14328_v18 = vld [vmem:[#allocation640_spill] sm:$0xff]  ;;  %v14331_v17 = vld [vmem:[#allocation51_spill] sm:$0xff] }
 0x832   : > { %v3729_v3 = vmul.f32 %v10401_v20, %v14325_v39  ;;  %14326 = vst [vmem:[#allocation289_spill] sm:$0xff] %v10740_v35  ;;  %v3253_v2 = vmul.f32 %v10361_v52, %v14327_v29  ;;  %v3121_v1 = vadd.f32 %v3089_v63, %v2864_v51  ;;  %v3446_v36 = vmul.f32 %v10364_v6, %v14328_v18  ;;  %v14329_v49 = vld [vmem:[#allocation37_spill] sm:$0xff]  ;;  %v14332_v39 = vld [vmem:[#allocation54_spill] sm:$0xff]  ;;  %v14333_v41 = vld [vmem:[#allocation47_spill] sm:$0xff]  ;;  %v10761_v51 = vpop.permute.xlu2 %4960 }
 0x833   : > { %v10746_v33 = vadd.f32 %v4112_v40, %v3951_v27  ;;  %v14330_v43 = vld [vmem:[#allocation53_spill] sm:$0xff]  ;;  %v10753_v50 = vadd.f32 %v1326_v54, %v14331_v17  ;;  %v10756_v11 = vadd.f32 %v1158_v10, %v14332_v39  ;;  %v10759_v35 = vadd.f32 %v1328_v16, %v14333_v41  ;;  %14334 = vst [vmem:[#allocation555_spill] sm:$0xff] %v10761_v51  ;;  %v14335_v63 = vld [vmem:[#allocation396_spill] sm:$0xff]  ;;  %v14339_v10 = vld [vmem:[#allocation114_spill] sm:$0xff] }
 0x834   : > { %5158 = vperm.xlu2 %6932, %v14329_v49   ;;  %v10750_v55 = vadd.f32 %v1155_v42, %v14330_v43  ;;  %v3282_v27 = vmul.f32 %v10361_v52, %v14335_v63  ;;  %v3285_v40 = vadd.f32 %v3253_v2, %v3092_v23  ;;  %v3761_v29 = vadd.f32 %v3729_v3, %v3504_v0  ;;  %v14336_v18 = vld [vmem:[#allocation69_spill] sm:$0xff]  ;;  %v14337_v49 = vld [vmem:[#allocation52_spill] sm:$0xff]  ;;  %v14342_v0 = vld [vmem:[#allocation423_spill] sm:$0xff] }
 0x835   : > { %v3475_v42 = vmul.f32 %v10364_v6, %v14336_v18  ;;  %v10768_v43 = vadd.f32 %v1161_v12, %v14337_v49  ;;  %v14338_v54 = vld [vmem:[#allocation49_spill] sm:$0xff]  ;;  %v1334_v16 = vmul.f32 %v10077_v48, %v14339_v10  ;;  %v14340_v39 = vld [vmem:[#allocation116_spill] sm:$0xff]  ;;  %v3922_v3 = vmul.f32 %v10435_v25, %v14342_v0  ;;  %v14343_v18 = vld [vmem:[#allocation119_spill] sm:$0xff] }
 0x836   : > { %v10771_v17 = vadd.f32 %v1331_v34, %v14338_v54  ;;  %v1325_v41 = vmul.f32 %v10077_v48, %v14340_v39  ;;  %v14341_v63 = vld [vmem:[#allocation117_spill] sm:$0xff]  ;;  %v3478_v2 = vadd.f32 %v3446_v36, %v3285_v40  ;;  %v3314_v12 = vadd.f32 %v3282_v27, %v3121_v1  ;;  %v14344_v49 = vld [vmem:[#allocation120_spill] sm:$0xff]  ;;  %v14345_v10 = vld [vmem:[#allocation122_spill] sm:$0xff]  ;;  %v4069_v56 = vpop.permute.xlu0 %4068 }
 0x837   : > { %v1337_v23 = vmul.f32 %v10077_v48, %v14341_v63  ;;  %v1327_v34 = vmul.f32 %v10077_v48, %v14343_v18  ;;  %v1340_v54 = vmul.f32 %v10077_v48, %v14344_v49  ;;  %v1330_v58 = vmul.f32 %v10077_v48, %v14345_v10  ;;  %v14346_v39 = vld [vmem:[#allocation123_spill] sm:$0xff]  ;;  %v14348_v36 = vld [vmem:[#allocation41_spill] sm:$0xff]  ;;  %v14349_v27 = vld [vmem:[#allocation62_spill] sm:$0xff] }
 0x838   : > { %v3703_v63 = vmul.f32 %v10401_v20, %v14347_v21  ;;  %v3507_v51 = vadd.f32 %v3475_v42, %v3314_v12  ;;  %v3954_v0 = vadd.f32 %v3922_v3, %v3761_v29  ;;  %v4115_v1 = vmul.f32 %v10451_v53, %v4069_v56  ;;  %5154 = vperm.xlu1 %6933, %v14348_v36   ;;  %v14350_v18 = vld [vmem:[#allocation125_spill] sm:$0xff]  ;;  %v14351_v10 = vld [vmem:[#allocation126_spill] sm:$0xff]  ;;  %v14354_v21 = vld [vmem:[#allocation63_spill] sm:$0xff] }
 0x839   : > { %5283 = vperm.xlu0 %6941, %v7107_v62   ;;  %v1343_v62 = vmul.f32 %v10077_v48, %v14346_v39  ;;  %v10794_v40 = vadd.f32 %v1334_v16, %v14349_v27  ;;  %v1333_v49 = vmul.f32 %v10077_v48, %v14350_v18  ;;  %v1346_v15 = vmul.f32 %v10077_v48, %v14351_v10  ;;  %v14352_v39 = vld [vmem:[#allocation128_spill] sm:$0xff]  ;;  %v10802_v4 = vpop.permute.xlu1 %4910  ;;  %v14356_v12 = vld [vmem:[#allocation46_spill] sm:$0xff]  ;;  %v14357_v36 = vld [vmem:[#allocation283_spill] sm:$0xff] }
 0x83a   : > { %v1336_v31 = vmul.f32 %v10077_v48, %v14352_v39  ;;  %14353 = vst [vmem:[#allocation84_spill] sm:$0xff] %v10802_v4  ;;  %v10805_v29 = vadd.f32 %v1325_v41, %v14354_v21  ;;  %v14355_v56 = vld [vmem:[#allocation160_spill] sm:$0xff]  ;;  %v3735_v3 = vadd.f32 %v3703_v63, %v3478_v2  ;;  %v10809_v16 = vadd.f32 %v4115_v1, %v3954_v0  ;;  %v14358_v18 = vld [vmem:[#allocation65_spill] sm:$0xff]  ;;  %v14359_v39 = vld [vmem:[#allocation66_spill] sm:$0xff]  ;;  %v10824_v21 = vpop.permute.xlu2 %4975 }
 0x83b   : > { %v3732_v42 = vmul.f32 %v10401_v20, %v14355_v56  ;;  %v10813_v27 = vadd.f32 %v1337_v23, %v14357_v36  ;;  %v10816_v10 = vadd.f32 %v1327_v34, %v14358_v18  ;;  %v10819_v6 = vadd.f32 %v1340_v54, %v14359_v39  ;;  %14360 = vst [vmem:[#allocation316_spill] sm:$0xff] %v10824_v21  ;;  %v14361_v63 = vld [vmem:[#allocation399_spill] sm:$0xff]  ;;  %v14367_v18 = vld [vmem:[#allocation426_spill] sm:$0xff]  ;;  %v14370_v39 = vld [vmem:[#allocation137_spill] sm:$0xff] }
 0x83c   : > { %5170 = vperm.xlu2 %6932, %v14356_v12   ;;  %v10822_v41 = vadd.f32 %v1330_v58, %v10584_v22  ;;  %v10827_v2 = vadd.f32 %v1343_v62, %v10641_v9  ;;  %v3896_v0 = vmul.f32 %v10435_v25, %v14361_v63  ;;  %v14362_v23 = vld [vmem:[#allocation71_spill] sm:$0xff]  ;;  %v10834_v34 = vadd.f32 %v1333_v49, %v10644_v32  ;;  %v14363_v22 = vld [vmem:[#allocation129_spill] sm:$0xff] }
 0x83d   : > { %v3764_v1 = vadd.f32 %v3732_v42, %v3507_v51  ;;  %v4089_v56 = vmul.f32 %v10451_v53, %v14362_v23  ;;  %v10837_v54 = vadd.f32 %v1346_v15, %v10647_v44  ;;  %v10840_v58 = vadd.f32 %v1336_v31, %v10656_v26  ;;  %v7108_v62 = vld [vmem:[#allocation2 + $0xc1] sm:$0xff]  ;;  %v14364_v12 = vld [vmem:[#allocation131_spill] sm:$0xff]  ;;  %v14365_v42 = vld [vmem:[#allocation286_spill] sm:$0xff] }
 0x83e   : > { %v1349_v9 = vmul.f32 %v10077_v48, %v14363_v22  ;;  %v1339_v51 = vmul.f32 %v10077_v48, %v14364_v12  ;;  %v10847_v36 = vperm.slane %v14365_v42, 2  ;;  %v3925_v32 = vmul.f32 %v10435_v25, %v14367_v18  ;;  %v14368_v44 = vld [vmem:[#allocation132_spill] sm:$0xff]  ;;  %v14369_v31 = vld [vmem:[#allocation134_spill] sm:$0xff]  ;;  %v14371_v23 = vld [vmem:[#allocation135_spill] sm:$0xff] }
 0x83f   : > { %v3928_v49 = vadd.f32 %v3896_v0, %v3735_v3  ;;  %v1352_v15 = vmul.f32 %v10077_v48, %v14368_v44  ;;  %v1342_v26 = vmul.f32 %v10077_v48, %v14369_v31  ;;  %v1345_v63 = vmul.f32 %v10077_v48, %v14370_v39  ;;  %v14372_v12 = vld [vmem:[#allocation138_spill] sm:$0xff]  ;;  %v14373_v0 = vld [vmem:[#allocation56_spill] sm:$0xff]  ;;  %v14375_v39 = vld [vmem:[#allocation143_spill] sm:$0xff] }
 0x840   : > { %14366 = vst [vmem:[#allocation582_spill] sm:$0xff] %v10847_v36  ;;  %v1516_v22 = vmul.f32 %v10080_v60, %v14371_v23  ;;  %v1519_v4 = vmul.f32 %v10080_v60, %v14372_v12  ;;  %v3957_v20 = vadd.f32 %v3925_v32, %v3764_v1  ;;  %5166 = vperm.xlu1 %6933, %v14373_v0   ;;  %v14374_v44 = vld [vmem:[#allocation140_spill] sm:$0xff]  ;;  %v14376_v23 = vld [vmem:[#allocation141_spill] sm:$0xff]  ;;  %v14379_v32 = vld [vmem:[#allocation163_spill] sm:$0xff] }
 0x841   : > { %5295 = vperm.xlu0 %6941, %v7108_v62   ;;  %v4081_v62 = vpop.permute.xlu0 %4080  ;;  %v4121_v21 = vadd.f32 %v4089_v56, %v3928_v49  ;;  %v10864_v18 = vadd.f32 %v1349_v9, %v10693_v30  ;;  %v1348_v31 = vmul.f32 %v10077_v48, %v14374_v44  ;;  %v1351_v25 = vmul.f32 %v10077_v48, %v14375_v39  ;;  %v10872_v45 = vpop.permute.xlu1 %4925  ;;  %v14378_v56 = vld [vmem:[#allocation144_spill] sm:$0xff]  ;;  %v14381_v39 = vld [vmem:[#allocation146_spill] sm:$0xff] }
 0x842   : > { %v4118_v3 = vmul.f32 %v10451_v53, %v4081_v62  ;;  %v1521_v52 = vmul.f32 %v10080_v60, %v14376_v23  ;;  %14377 = vst [vmem:[#allocation86_spill] sm:$0xff] %v10872_v45  ;;  %v1524_v1 = vmul.f32 %v10080_v60, %v14378_v56  ;;  %v4347_v49 = vmul.f32 %v10847_v36, %v14379_v32  ;;  %v7109_v56 = vld [vmem:[#allocation2 + $0x31] sm:$0xff]  ;;  %v7113_v53 = vld [vmem:[#allocation2 + $0x49] sm:$0xff] }
 0x843   : > { %v10879_v30 = vperm.slane %v14365_v42, 3  ;;  %v14380_v62 = vmov 2   ;;  %v1371_v12 = vadd.f32 %v1339_v51, %v10696_v8  ;;  %v1384_v0 = vadd.f32 %v1352_v15, %v10699_v46  ;;  %v10900_v51 = vpop.permute.xlu2 %5054 }
 0x844   : > { %v10881_v9 = vadd.f32 %v4118_v3, %v3957_v20  ;;  %6934 = vset.pattern.permute.xlu2 %v14380_v62  ;;  %v10887_v44 = vadd.f32 %v1342_v26, %v10708_v13  ;;  %v1354_v23 = vmul.f32 %v10077_v48, %v14381_v39  ;;  %v10892_v32 = vadd.f32 %v1345_v63, %v10732_v24  ;;  %v14383_v24 = vld [vmem:[#allocation147_spill] sm:$0xff]  ;;  %v14385_v26 = vld [vmem:[#allocation429_spill] sm:$0xff]  ;;  %v14387_v63 = vld [vmem:[#allocation152_spill] sm:$0xff] }
 0x845   : > { %5247 = vperm.xlu2 %6934, %v7109_v56   ;;  %v10895_v20 = vadd.f32 %v1516_v22, %v10715_v57  ;;  %v10898_v3 = vadd.f32 %v1519_v4, %v10753_v50  ;;  %v4379_v8 = vadd.f32 %v4347_v49, %v4121_v21  ;;  %14382 = vst [vmem:[#allocation87_spill] sm:$0xff] %v10900_v51  ;;  %v7110_v57 = vld [vmem:[#allocation2 + $0xe1] sm:$0xff]  ;;  %v14389_v49 = vld [vmem:[#allocation155_spill] sm:$0xff] }
 0x846   : > { %v10903_v46 = vadd.f32 %v1348_v31, %v10750_v55  ;;  %v10906_v13 = vadd.f32 %v1351_v25, %v10756_v11  ;;  %v10909_v48 = vadd.f32 %v1521_v52, %v10759_v35  ;;  %v1527_v15 = vmul.f32 %v10080_v60, %v14383_v24  ;;  %v14384_v50 = vld [vmem:[#allocation149_spill] sm:$0xff]  ;;  %v14386_v35 = vld [vmem:[#allocation150_spill] sm:$0xff]  ;;  %v14390_v56 = vld [vmem:[#allocation156_spill] sm:$0xff] }
 0x847   : > { %v10914_v4 = vadd.f32 %v1524_v1, %v10771_v17  ;;  %v1518_v21 = vmul.f32 %v10080_v60, %v14384_v50  ;;  %v4540_v55 = vmul.f32 %v10879_v30, %v14385_v26  ;;  %v10921_v25 = vperm.slane %v14365_v42, 4  ;;  %v14388_v17 = vld [vmem:[#allocation153_spill] sm:$0xff]  ;;  %v14392_v26 = vld [vmem:[#allocation158_spill] sm:$0xff] }
 0x848   : > { %v10924_v52 = vadd.f32 %v1354_v23, %v10768_v43  ;;  %v1530_v11 = vmul.f32 %v10080_v60, %v14386_v35  ;;  %v1520_v22 = vmul.f32 %v10080_v60, %v14387_v63  ;;  %v1533_v31 = vmul.f32 %v10080_v60, %v14388_v17  ;;  %v14391_v23 = vld [vmem:[#allocation58_spill] sm:$0xff]  ;;  %v14393_v63 = vld [vmem:[#allocation159_spill] sm:$0xff]  ;;  %v14394_v51 = vld [vmem:[#allocation161_spill] sm:$0xff] }
 0x849   : > { %5307 = vperm.xlu0 %6941, %v7110_v57   ;;  %v4609_v1 = vpop.permute.xlu0 %4608  ;;  %v1523_v39 = vmul.f32 %v10080_v60, %v14389_v49  ;;  %v1536_v24 = vmul.f32 %v10080_v60, %v14390_v56  ;;  %v4572_v57 = vadd.f32 %v4540_v55, %v4379_v8  ;;  %5178 = vperm.xlu1 %6933, %v14391_v23   ;;  %v10947_v45 = vpop.permute.xlu1 %4940  ;;  %v14396_v55 = vld [vmem:[#allocation162_spill] sm:$0xff] }
 0x84a   : > { %v4733_v43 = vmul.f32 %v10921_v25, %v4609_v1  ;;  %v10939_v50 = vadd.f32 %v1527_v15, %v10794_v40  ;;  %v1526_v35 = vmul.f32 %v10080_v60, %v14392_v26  ;;  %v1539_v17 = vmul.f32 %v10080_v60, %v14393_v63  ;;  %14395 = vst [vmem:[#allocation265_spill] sm:$0xff] %v10947_v45  ;;  %v14397_v56 = vld [vmem:[#allocation166_spill] sm:$0xff]  ;;  %v14400_v45 = vld [vmem:[#allocation165_spill] sm:$0xff] }
 0x84b   : > { %v1529_v49 = vmul.f32 %v10080_v60, %v14394_v51  ;;  %v10950_v8 = vadd.f32 %v1518_v21, %v10805_v29  ;;  %v1542_v1 = vmul.f32 %v10080_v60, %v14396_v55  ;;  %v4352_v40 = vmul.f32 %v10847_v36, %v14397_v56  ;;  %v14399_v51 = vld [vmem:[#allocation164_spill] sm:$0xff]  ;;  %v7111_v21 = vld [vmem:[#allocation2 + $0x51] sm:$0xff] }
 0x84c   : > { %v10956_v15 = vadd.f32 %v4733_v43, %v4572_v57  ;;  %v10959_v23 = vadd.f32 %v1530_v11, %v10813_v27  ;;  %v10962_v26 = vadd.f32 %v1520_v22, %v10816_v10  ;;  %v1532_v63 = vmul.f32 %v10080_v60, %v14399_v51  ;;  %v14401_v11 = vld [vmem:[#allocation78_spill] sm:$0xff]  ;;  %v10978_v22 = vpop.permute.xlu2 %5066  ;;  %v14407_v51 = vld [vmem:[#allocation432_spill] sm:$0xff] }
 0x84d   : > { %v1545_v29 = vmul.f32 %v10080_v60, %v14400_v45  ;;  %5259 = vperm.xlu2 %6934, %v7111_v21   ;;  %v10969_v55 = vadd.f32 %v1533_v31, %v10819_v6  ;;  %v10972_v57 = vadd.f32 %v1523_v39, %v10822_v41  ;;  %v10975_v27 = vadd.f32 %v1536_v24, %v10827_v2  ;;  %v14403_v6 = vld [vmem:[#allocation167_spill] sm:$0xff]  ;;  %v7112_v31 = vld [vmem:[#allocation2 + $0x109] sm:$0xff] }
 0x84e   : > { %14398 = vst [vmem:[#allocation343_spill] sm:$0xff] %v10956_v15  ;;  %v4384_v10 = vadd.f32 %v4352_v40, %v14401_v11  ;;  %v10981_v43 = vadd.f32 %v1526_v35, %v10834_v34  ;;  %v10984_v45 = vadd.f32 %v1539_v17, %v10837_v54  ;;  %v10987_v56 = vadd.f32 %v1529_v49, %v10840_v58  ;;  %v14404_v39 = vld [vmem:[#allocation170_spill] sm:$0xff]  ;;  %v14405_v40 = vld [vmem:[#allocation168_spill] sm:$0xff]  ;;  %v14408_v49 = vld [vmem:[#allocation173_spill] sm:$0xff] }
 0x84f   : > { %14402 = vst [vmem:[#allocation82_spill] sm:$0xff] %v10978_v22  ;;  %v1535_v41 = vmul.f32 %v10080_v60, %v14403_v6  ;;  %v10992_v2 = vadd.f32 %v1542_v1, %v10864_v18  ;;  %v1538_v24 = vmul.f32 %v10080_v60, %v14404_v39  ;;  %v14406_v34 = vld [vmem:[#allocation22_spill] sm:$0xff]  ;;  %v4545_v54 = vmul.f32 %v10879_v30, %v14407_v51  ;;  %v14409_v11 = vld [vmem:[#allocation171_spill] sm:$0xff]  ;;  %v14410_v6 = vld [vmem:[#allocation176_spill] sm:$0xff] }
 0x850   : > { %v1773_v35 = vmul.f32 %v14406_v34, %v14405_v40  ;;  %v11000_v17 = vadd.f32 %v1532_v63, %v1371_v12  ;;  %v11002_v58 = vadd.f32 %v1545_v29, %v1384_v0  ;;  %v1541_v21 = vmul.f32 %v10080_v60, %v14408_v49  ;;  %v14411_v39 = vld [vmem:[#allocation174_spill] sm:$0xff]  ;;  %v14412_v0 = vld [vmem:[#allocation169_spill] sm:$0xff]  ;;  %v14413_v29 = vld [vmem:[#allocation179_spill] sm:$0xff] }
 0x851   : > { %5319 = vperm.xlu0 %6941, %v7112_v31   ;;  %v1776_v18 = vmul.f32 %v14406_v34, %v14409_v11  ;;  %v4629_v1 = vpop.permute.xlu0 %4628  ;;  %v1544_v31 = vmul.f32 %v10080_v60, %v14410_v6  ;;  %v1778_v40 = vmul.f32 %v14406_v34, %v14411_v39  ;;  %v4577_v22 = vadd.f32 %v4545_v54, %v4384_v10  ;;  %v14414_v11 = vld [vmem:[#allocation177_spill] sm:$0xff]  ;;  %v11023_v39 = vpop.permute.xlu1 %4955 }
 0x852   : > { %v4738_v51 = vmul.f32 %v10921_v25, %v4629_v1  ;;  %6935 = vset.pattern.permute.xlu1 %v14380_v62  ;;  %v11015_v12 = vadd.f32 %v1535_v41, %v10887_v44  ;;  %v4355_v63 = vmul.f32 %v10847_v36, %v14412_v0  ;;  %v1547_v49 = vmul.f32 %v10080_v60, %v14413_v29  ;;  %v14416_v44 = vld [vmem:[#allocation172_spill] sm:$0xff]  ;;  %v14430_v62 = vld [vmem:[#allocation191_spill] sm:$0xff] }
 0x853   : > { %v1781_v6 = vmul.f32 %v14406_v34, %v14414_v11  ;;  %5255 = vperm.xlu1 %6935, %v7113_v53   ;;  %14415 = vst [vmem:[#allocation531_spill] sm:$0xff] %v11023_v39  ;;  %v11026_v10 = vadd.f32 %v1538_v24, %v10892_v32  ;;  %v11029_v54 = vadd.f32 %v1773_v35, %v10895_v20  ;;  %v14418_v53 = vld [vmem:[#allocation180_spill] sm:$0xff]  ;;  %v14419_v11 = vld [vmem:[#allocation182_spill] sm:$0xff]  ;;  %v14420_v20 = vld [vmem:[#allocation175_spill] sm:$0xff] }
 0x854   : > { %v4358_v41 = vmul.f32 %v10847_v36, %v14416_v44  ;;  %v11033_v1 = vadd.f32 %v4738_v51, %v4577_v22  ;;  %v11036_v60 = vadd.f32 %v1541_v21, %v10903_v46  ;;  %v11039_v0 = vadd.f32 %v1776_v18, %v10898_v3  ;;  %v7114_v24 = vld [vmem:[#allocation2 + $0x69] sm:$0xff]  ;;  %v14431_v39 = vld [vmem:[#allocation184_spill] sm:$0xff] }
 0x855   : > { %v1784_v29 = vmul.f32 %v14406_v34, %v14418_v53  ;;  %v1775_v32 = vmul.f32 %v14406_v34, %v14419_v11  ;;  %5267 = vperm.xlu2 %6934, %v7114_v24   ;;  %v11047_v35 = vmul.f32 %v10847_v36, %v14420_v20  ;;  %v11050_v22 = vadd.f32 %v1544_v31, %v10906_v13  ;;  %v14422_v18 = vld [vmem:[#allocation178_spill] sm:$0xff]  ;;  %v14423_v11 = vld [vmem:[#allocation183_spill] sm:$0xff] }
 0x856   : > { %14417 = vst [vmem:[#allocation85_spill] sm:$0xff] %v11033_v1  ;;  %v11053_v46 = vadd.f32 %v1778_v40, %v10909_v48  ;;  %v4387_v3 = vadd.f32 %v4355_v63, %v10514_v5  ;;  %v11056_v21 = vpop.permute.xlu2 %5074  ;;  %v11060_v51 = vmul.f32 %v10847_v36, %v14422_v18  ;;  %v11063_v44 = vadd.f32 %v1547_v49, %v10924_v52  ;;  %v7115_v31 = vld [vmem:[#allocation2 + $0x129] sm:$0xff]  ;;  %v14426_v20 = vld [vmem:[#allocation435_spill] sm:$0xff] }
 0x857   : > { %14421 = vst [vmem:[#allocation292_spill] sm:$0xff] %v11056_v21  ;;  %v11066_v53 = vadd.f32 %v1781_v6, %v10914_v4  ;;  %v1787_v13 = vmul.f32 %v14406_v34, %v14423_v11  ;;  %v14424_v48 = vld [vmem:[#allocation185_spill] sm:$0xff]  ;;  %v14425_v40 = vld [vmem:[#allocation186_spill] sm:$0xff]  ;;  %v11075_v24 = vperm.slane %v14365_v42, 5  ;;  %v4548_v52 = vmul.f32 %v10879_v30, %v14426_v20  ;;  %v14428_v11 = vld [vmem:[#allocation188_spill] sm:$0xff] }
 0x858   : > { %v1777_v5 = vmul.f32 %v14406_v34, %v14424_v48  ;;  %v1790_v63 = vmul.f32 %v14406_v34, %v14425_v40  ;;  %v14427_v49 = vld [vmem:[#allocation181_spill] sm:$0xff]  ;;  %v11084_v6 = vadd.f32 %v1784_v29, %v10939_v50  ;;  %v11087_v18 = vadd.f32 %v1775_v32, %v10950_v8  ;;  %v14432_v29 = vld [vmem:[#allocation192_spill] sm:$0xff] }
 0x859   : > { %5331 = vperm.xlu0 %6941, %v7115_v31   ;;  %v11081_v4 = vmul.f32 %v10847_v36, %v14427_v49  ;;  %v1780_v31 = vmul.f32 %v14406_v34, %v14428_v11  ;;  %v4641_v48 = vpop.permute.xlu0 %4640  ;;  %v14429_v40 = vld [vmem:[#allocation189_spill] sm:$0xff]  ;;  %v1783_v20 = vmul.f32 %v14406_v34, %v14430_v62  ;;  %v4580_v21 = vadd.f32 %v4548_v52, %v4387_v3  ;;  %v14433_v11 = vld [vmem:[#allocation194_spill] sm:$0xff]  ;;  %v11107_v47 = vpop.permute.xlu1 %4970  ;;  %v14435_v3 = vld [vmem:[#allocation187_spill] sm:$0xff] }
 0x85a   : > { %v1793_v42 = vmul.f32 %v14406_v34, %v14429_v40  ;;  %v4741_v49 = vmul.f32 %v10921_v25, %v4641_v48  ;;  %v11098_v50 = vmul.f32 %v10847_v36, %v14431_v39  ;;  %v11101_v8 = vadd.f32 %v1787_v13, %v10959_v23  ;;  %v7116_v40 = vld [vmem:[#allocation2 + $0x61] sm:$0xff]  ;;  %14434 = vst [vmem:[#allocation558_spill] sm:$0xff] %v11107_v47  ;;  %v14437_v48 = vld [vmem:[#allocation190_spill] sm:$0xff] }
 0x85b   : > { %v1796_v32 = vmul.f32 %v14406_v34, %v14432_v29  ;;  %v1786_v1 = vmul.f32 %v14406_v34, %v14433_v11  ;;  %5263 = vperm.xlu1 %6935, %v7116_v40   ;;  %v11110_v62 = vadd.f32 %v1777_v5, %v10962_v26  ;;  %v11114_v39 = vmul.f32 %v10847_v36, %v14435_v3  ;;  %v14438_v11 = vld [vmem:[#allocation195_spill] sm:$0xff]  ;;  %v14439_v5 = vld [vmem:[#allocation197_spill] sm:$0xff] }
 0x85c   : > { %v11117_v23 = vadd.f32 %v1790_v63, %v10969_v55  ;;  %v11119_v13 = vadd.f32 %v4741_v49, %v4580_v21  ;;  %v11122_v52 = vadd.f32 %v1780_v31, %v10972_v57  ;;  %v11126_v29 = vmul.f32 %v10847_v36, %v14437_v48  ;;  %v7117_v3 = vld [vmem:[#allocation2 + $0x91] sm:$0xff]  ;;  %v14440_v57 = vld [vmem:[#allocation193_spill] sm:$0xff] }
 0x85d   : > { %v1799_v26 = vmul.f32 %v14406_v34, %v14438_v11  ;;  %v1789_v40 = vmul.f32 %v14406_v34, %v14439_v5  ;;  %5279 = vperm.xlu2 %6934, %v7117_v3   ;;  %v11133_v55 = vadd.f32 %v1793_v42, %v10975_v27  ;;  %v11136_v21 = vadd.f32 %v1783_v20, %v10981_v43  ;;  %v14443_v5 = vld [vmem:[#allocation198_spill] sm:$0xff]  ;;  %v14444_v42 = vld [vmem:[#allocation200_spill] sm:$0xff] }
 0x85e   : > { %14436 = vst [vmem:[#allocation88_spill] sm:$0xff] %v11119_v13  ;;  %v11140_v63 = vmul.f32 %v11075_v24, %v14440_v57  ;;  %v4390_v31 = vadd.f32 %v4358_v41, %v10552_v19  ;;  %v11143_v49 = vpop.permute.xlu2 %5086  ;;  %v11146_v48 = vadd.f32 %v1796_v32, %v10984_v45  ;;  %v11149_v11 = vadd.f32 %v1786_v1, %v10987_v56  ;;  %v7118_v20 = vld [vmem:[#allocation2 + $0x151] sm:$0xff]  ;;  %v14445_v3 = vld [vmem:[#allocation196_spill] sm:$0xff] }
 0x85f   : > { %14442 = vst [vmem:[#allocation106_spill] sm:$0xff] %v11143_v49  ;;  %v1802_v27 = vmul.f32 %v14406_v34, %v14443_v5  ;;  %v1792_v43 = vmul.f32 %v14406_v34, %v14444_v42  ;;  %v11157_v57 = vmul.f32 %v11075_v24, %v14445_v3  ;;  %v14447_v19 = vld [vmem:[#allocation203_spill] sm:$0xff]  ;;  %v14448_v45 = vld [vmem:[#allocation202_spill] sm:$0xff]  ;;  %v11166_v5 = vadd.f32 %v1799_v26, %v10992_v2  ;;  %v14451_v3 = vld [vmem:[#allocation205_spill] sm:$0xff] }
 0x860   : > { %14441 = vst [vmem:[#allocation89_spill] sm:$0xff] %v11140_v63  ;;  %v1795_v41 = vmul.f32 %v14406_v34, %v14447_v19  ;;  %v1966_v32 = vmul.f32 %v10184_v14, %v14448_v45  ;;  %v14449_v56 = vld [vmem:[#allocation438_spill] sm:$0xff]  ;;  %v11169_v42 = vadd.f32 %v1789_v40, %v11000_v17  ;;  %v1969_v47 = vmul.f32 %v10184_v14, %v14451_v3  ;;  %v14452_v19 = vld [vmem:[#allocation209_spill] sm:$0xff]  ;;  %v14453_v45 = vld [vmem:[#allocation208_spill] sm:$0xff] }
 0x861   : > { %5343 = vperm.xlu0 %6941, %v7118_v20   ;;  %14446 = vst [vmem:[#allocation319_spill] sm:$0xff] %v11157_v57  ;;  %v4551_v1 = vmul.f32 %v10879_v30, %v14449_v56  ;;  %v14450_v20 = vld [vmem:[#allocation206_spill] sm:$0xff]  ;;  %v4653_v36 = vpop.permute.xlu0 %4652  ;;  %v1801_v13 = vmul.f32 %v14406_v34, %v14452_v19  ;;  %v1971_v57 = vmul.f32 %v10184_v14, %v14453_v45  ;;  %v14454_v26 = vld [vmem:[#allocation199_spill] sm:$0xff]  ;;  %v14456_v3 = vld [vmem:[#allocation201_spill] sm:$0xff] }
 0x862   : > { %v1798_v49 = vmul.f32 %v14406_v34, %v14450_v20  ;;  %v4744_v2 = vmul.f32 %v10921_v25, %v4653_v36  ;;  %v11182_v17 = vmul.f32 %v11075_v24, %v14454_v26  ;;  %v11185_v40 = vadd.f32 %v1802_v27, %v11002_v58  ;;  %v11197_v36 = vpop.permute.xlu1 %4985  ;;  %v14461_v45 = vld [vmem:[#allocation204_spill] sm:$0xff] }
 0x863   : > { %v4583_v56 = vadd.f32 %v4551_v1, %v4390_v31  ;;  %v11188_v20 = vadd.f32 %v1792_v43, %v11015_v12  ;;  %v11192_v63 = vmul.f32 %v11075_v24, %v14456_v3  ;;  %v293_v31 = vld [vmem:[%s13256_s1 + $0x18] sm:$0x7]  ;;  %v7119_v1 = vld [vmem:[#allocation2 + $0x81] sm:$0xff]  ;;  %14458 = vst [vmem:[#allocation345_spill] sm:$0xff] %v11197_v36  ;;  %v11200_v19 = vadd.f32 %v1795_v41, %v11026_v10 }
 0x864   : > { %14455 = vst [vmem:[#allocation585_spill] sm:$0xff] %v11182_v17  ;;  %5275 = vperm.xlu1 %6935, %v7119_v1   ;;  %v11203_v58 = vadd.f32 %v1966_v32, %v11029_v54  ;;  %v14459_v12 = vld [vmem:[#allocation211_spill] sm:$0xff]  ;;  %v11211_v26 = vmul.f32 %v11075_v24, %v14461_v45  ;;  %v11214_v3 = vadd.f32 %v1798_v49, %v11036_v60  ;;  %v14476_v36 = vld [vmem:[#allocation221_spill] sm:$0xff] }
 0x865   : > { %14457 = vst [vmem:[#allocation268_spill] sm:$0xff] %v11192_v63  ;;  %v1974_v27 = vmul.f32 %v10184_v14, %v14459_v12  ;;  %v11207_v43 = vadd.f32 %v4744_v2, %v4583_v56  ;;  %v11217_v1 = vadd.f32 %v1969_v47, %v11039_v0  ;;  %v14463_v10 = vld [vmem:[#allocation207_spill] sm:$0xff]  ;;  %v11224_v32 = vadd.f32 %v1801_v13, %v11050_v22  ;;  %v14467_v47 = vld [vmem:[#allocation210_spill] sm:$0xff]  ;;  %v14469_v12 = vld [vmem:[#allocation212_spill] sm:$0xff] }
 0x866   : > { %14462 = vst [vmem:[#allocation628_spill] sm:$0xff] %v11211_v26  ;;  %v11221_v41 = vmul.f32 %v11075_v24, %v14463_v10  ;;  %v7120_v54 = vld [vmem:[#allocation2 + $0xb1] sm:$0xff]  ;;  %v11227_v56 = vadd.f32 %v1971_v57, %v11053_v46  ;;  %v11229_v2 = vperm.slane %v293_v31, 0  ;;  %v4393_v60 = vadd.f32 %v11047_v35, %v10594_v59  ;;  %v11233_v49 = vpop.permute.xlu2 %5098  ;;  %v14472_v59 = vld [vmem:[#allocation217_spill] sm:$0xff] }
 0x867   : > { %14460 = vst [vmem:[#allocation611_spill] sm:$0xff] %v11207_v43  ;;  %5291 = vperm.xlu2 %6934, %v7120_v54   ;;  %v11237_v0 = vmul.f32 %v11075_v24, %v14467_v47  ;;  %v1804_v45 = vmul.f32 %v14406_v34, %v14469_v12  ;;  %v14470_v10 = vld [vmem:[#allocation214_spill] sm:$0xff]  ;;  %v14471_v13 = vld [vmem:[#allocation215_spill] sm:$0xff]  ;;  %v11246_v31 = vadd.f32 %v1974_v27, %v11066_v53  ;;  %v14475_v12 = vld [vmem:[#allocation220_spill] sm:$0xff] }
 0x868   : > { %14464 = vst [vmem:[#allocation91_spill] sm:$0xff] %v11221_v41  ;;  %v1977_v22 = vmul.f32 %v10184_v14, %v14470_v10  ;;  %v1968_v46 = vmul.f32 %v10184_v14, %v14471_v13  ;;  %v7121_v57 = vld [vmem:[#allocation2 + $0x171] sm:$0xff]  ;;  %v1980_v35 = vmul.f32 %v10184_v14, %v14472_v59  ;;  %v1983_v10 = vmul.f32 %v10184_v14, %v14475_v12  ;;  %v14478_v53 = vld [vmem:[#allocation224_spill] sm:$0xff]  ;;  %v14481_v43 = vld [vmem:[#allocation213_spill] sm:$0xff] }
 0x869   : > { %14465 = vst [vmem:[#allocation94_spill] sm:$0xff] %v11229_v2  ;;  %5355 = vperm.xlu0 %6941, %v7121_v57   ;;  %v14473_v54 = vld [vmem:[#allocation218_spill] sm:$0xff]  ;;  %v1973_v13 = vmul.f32 %v10184_v14, %v14476_v36  ;;  %v14477_v2 = vld [vmem:[#allocation223_spill] sm:$0xff]  ;;  %v1976_v27 = vmul.f32 %v10184_v14, %v14478_v53  ;;  %v1836_v12 = vadd.f32 %v1804_v45, %v11063_v44 }
 0x86a   : > { %14466 = vst [vmem:[#allocation19_spill] sm:$0xff] %v11233_v49  ;;  %v1970_v47 = vmul.f32 %v10184_v14, %v14473_v54  ;;  %v14474_v49 = vld [vmem:[#allocation441_spill] sm:$0xff]  ;;  %v1986_v57 = vmul.f32 %v10184_v14, %v14477_v2  ;;  %v14479_v59 = vld [vmem:[#allocation226_spill] sm:$0xff]  ;;  %v14480_v54 = vld [vmem:[#allocation227_spill] sm:$0xff]  ;;  %v11270_v36 = vmul.f32 %v11075_v24, %v14481_v43  ;;  %v2009_v2 = vadd.f32 %v1977_v22, %v11084_v6  ;;  %v11288_v43 = vpop.permute.xlu1 %5062 }
 0x86b   : > { %14468 = vst [vmem:[#allocation534_spill] sm:$0xff] %v11237_v0  ;;  %v4554_v34 = vmul.f32 %v10879_v30, %v14474_v49  ;;  %v4665_v0 = vpop.permute.xlu0 %4664  ;;  %v1989_v41 = vmul.f32 %v10184_v14, %v14479_v59  ;;  %v1979_v26 = vmul.f32 %v10184_v14, %v14480_v54  ;;  %v11274_v53 = vadd.f32 %v1968_v46, %v11087_v18  ;;  %v7122_v17 = vld [vmem:[#allocation2 + $0xa9] sm:$0xff]  ;;  %v14483_v59 = vld [vmem:[#allocation216_spill] sm:$0xff]  ;;  %v14486_v6 = vld [vmem:[#allocation219_spill] sm:$0xff] }
 0x86c   : > { %v4747_v63 = vmul.f32 %v10921_v25, %v4665_v0  ;;  %14482 = vst [vmem:[#allocation372_spill] sm:$0xff] %v11270_v36  ;;  %5287 = vperm.xlu1 %6935, %v7122_v17   ;;  %v11278_v15 = vmul.f32 %v11075_v24, %v14483_v59  ;;  %v11284_v44 = vadd.f32 %v1970_v47, %v11110_v62  ;;  %v7123_v22 = vld [vmem:[#allocation2 + $0xd9] sm:$0xff]  ;;  %v14490_v47 = vld [vmem:[#allocation230_spill] sm:$0xff] }
 0x86d   : > { %v4586_v49 = vadd.f32 %v4554_v34, %v4393_v60  ;;  %v11281_v60 = vadd.f32 %v1980_v35, %v11101_v8  ;;  %14485 = vst [vmem:[#allocation109_spill] sm:$0xff] %v11288_v43  ;;  %v11292_v18 = vmul.f32 %v11075_v24, %v14486_v6  ;;  %v11295_v17 = vadd.f32 %v1983_v10, %v11117_v23  ;;  %v14491_v10 = vld [vmem:[#allocation232_spill] sm:$0xff]  ;;  %v14497_v59 = vld [vmem:[#allocation239_spill] sm:$0xff]  ;;  %v7125_v36 = vld [vmem:[#allocation2 + $0xc9] sm:$0xff] }
 0x86e   : > { %14484 = vst [vmem:[#allocation645_spill] sm:$0xff] %v11278_v15  ;;  %v11298_v45 = vadd.f32 %v1973_v13, %v11122_v52  ;;  %v11301_v8 = vadd.f32 %v1986_v57, %v11133_v55  ;;  %v11304_v62 = vadd.f32 %v1976_v27, %v11136_v21  ;;  %v11310_v46 = vadd.f32 %v1979_v26, %v11149_v11  ;;  %v11314_v35 = vpop.permute.xlu2 %5110  ;;  %v14489_v52 = vld [vmem:[#allocation229_spill] sm:$0xff]  ;;  %v14493_v11 = vld [vmem:[#allocation236_spill] sm:$0xff]  ;;  %v14495_v57 = vld [vmem:[#allocation238_spill] sm:$0xff] }
 0x86f   : > { %v11286_v0 = vadd.f32 %v4747_v63, %v4586_v49  ;;  %14487 = vst [vmem:[#allocation6_spill] sm:$0xff] %v11292_v18  ;;  %5303 = vperm.xlu2 %6934, %v7123_v22   ;;  %v11307_v63 = vadd.f32 %v1989_v41, %v11146_v48  ;;  %v4396_v23 = vadd.f32 %v11060_v51, %v10637_v7  ;;  %v14492_v13 = vld [vmem:[#allocation233_spill] sm:$0xff]  ;;  %v7124_v41 = vld [vmem:[#allocation2 + $0x199] sm:$0xff]  ;;  %v14498_v22 = vld [vmem:[#allocation242_spill] sm:$0xff] }
 0x870   : > { %14488 = vst [vmem:[#allocation295_spill] sm:$0xff] %v11314_v35  ;;  %v1992_v55 = vmul.f32 %v10184_v14, %v14489_v52  ;;  %v1982_v34 = vmul.f32 %v10184_v14, %v14490_v47  ;;  %v1995_v21 = vmul.f32 %v10184_v14, %v14491_v10  ;;  %v1985_v48 = vmul.f32 %v10184_v14, %v14492_v13  ;;  %v14494_v7 = vld [vmem:[#allocation235_spill] sm:$0xff]  ;;  %v14496_v54 = vld [vmem:[#allocation444_spill] sm:$0xff]  ;;  %v14499_v47 = vld [vmem:[#allocation241_spill] sm:$0xff] }
 0x871   : > { %5367 = vperm.xlu0 %6941, %v7124_v41   ;;  %v1988_v26 = vmul.f32 %v10184_v14, %v14493_v11  ;;  %v2159_v51 = vmul.f32 %v10187_v28, %v14494_v7  ;;  %v2162_v27 = vmul.f32 %v10187_v28, %v14495_v57  ;;  %v4557_v49 = vmul.f32 %v10879_v30, %v14496_v54  ;;  %v14500_v13 = vld [vmem:[#allocation244_spill] sm:$0xff]  ;;  %v14501_v7 = vld [vmem:[#allocation245_spill] sm:$0xff]  ;;  %v14502_v57 = vld [vmem:[#allocation247_spill] sm:$0xff] }
 0x872   : > { %v1991_v6 = vmul.f32 %v10184_v14, %v14497_v59  ;;  %v1994_v52 = vmul.f32 %v10184_v14, %v14498_v22  ;;  %v2164_v10 = vmul.f32 %v10187_v28, %v14499_v47  ;;  %v2167_v41 = vmul.f32 %v10187_v28, %v14500_v13 }
 0x873   : > { %v4677_v11 = vpop.permute.xlu0 %4676  ;;  %v1997_v35 = vmul.f32 %v10184_v14, %v14501_v7  ;;  %v2170_v43 = vmul.f32 %v10187_v28, %v14502_v57  ;;  %v4589_v54 = vadd.f32 %v4557_v49, %v4396_v23  ;;  %v2024_v59 = vadd.f32 %v1992_v55, %v11166_v5  ;;  %v11358_v49 = vpop.permute.xlu1 %5070  ;;  %v14506_v55 = vld [vmem:[#allocation250_spill] sm:$0xff] }
 0x874   : > { %v4750_v18 = vmul.f32 %v10921_v25, %v4677_v11  ;;  %v2014_v22 = vadd.f32 %v1982_v34, %v11169_v42  ;;  %v2027_v15 = vadd.f32 %v1995_v21, %v11185_v40  ;;  %v2017_v47 = vadd.f32 %v1985_v48, %v11188_v20  ;;  %5299 = vperm.xlu1 %6935, %v7125_v36   ;;  %v14504_v36 = vld [vmem:[#allocation248_spill] sm:$0xff]  ;;  %v14507_v34 = vld [vmem:[#allocation251_spill] sm:$0xff]  ;;  %v14508_v21 = vld [vmem:[#allocation253_spill] sm:$0xff] }
 0x875   : > { %v11350_v13 = vadd.f32 %v1988_v26, %v11200_v19  ;;  %v2191_v14 = vadd.f32 %v2159_v51, %v11203_v58  ;;  %v11354_v7 = vadd.f32 %v2162_v27, %v11217_v1  ;;  %14503 = vst [vmem:[#allocation561_spill] sm:$0xff] %v11358_v49  ;;  %v11361_v5 = vadd.f32 %v1991_v6, %v11214_v3  ;;  %v7126_v19 = vld [vmem:[#allocation2 + $0xf9] sm:$0xff]  ;;  %v14512_v51 = vld [vmem:[#allocation257_spill] sm:$0xff]  ;;  %v7128_v49 = vld [vmem:[#allocation2 + $0xf1] sm:$0xff] }
 0x876   : > { %v11356_v23 = vadd.f32 %v4750_v18, %v4589_v54  ;;  %v11364_v42 = vadd.f32 %v1994_v52, %v11224_v32  ;;  %v11367_v40 = vadd.f32 %v2164_v10, %v11227_v56  ;;  %v11370_v20 = vadd.f32 %v2167_v41, %v11246_v31  ;;  %v11380_v32 = vpop.permute.xlu2 %5122  ;;  %v14510_v48 = vld [vmem:[#allocation255_spill] sm:$0xff]  ;;  %v14514_v10 = vld [vmem:[#allocation258_spill] sm:$0xff]  ;;  %v14515_v11 = vld [vmem:[#allocation260_spill] sm:$0xff] }
 0x877   : > { %5315 = vperm.xlu2 %6934, %v7126_v19   ;;  %v11372_v58 = vadd.f32 %v1997_v35, %v1836_v12  ;;  %v11374_v1 = vadd.f32 %v2170_v43, %v2009_v2  ;;  %v2161_v18 = vmul.f32 %v10187_v28, %v14504_v36  ;;  %v4399_v3 = vadd.f32 %v11081_v4, %v10689_v61  ;;  %v14509_v35 = vld [vmem:[#allocation254_spill] sm:$0xff]  ;;  %v7127_v43 = vld [vmem:[#allocation2 + $0x3a] sm:$0xff]  ;;  %v14516_v54 = vld [vmem:[#allocation261_spill] sm:$0xff] }
 0x878   : > { %14505 = vst [vmem:[#allocation112_spill] sm:$0xff] %v11380_v32  ;;  %v2173_v56 = vmul.f32 %v10187_v28, %v14506_v55  ;;  %v2163_v31 = vmul.f32 %v10187_v28, %v14507_v34  ;;  %v2176_v12 = vmul.f32 %v10187_v28, %v14508_v21  ;;  %v2166_v2 = vmul.f32 %v10187_v28, %v14509_v35  ;;  %v14511_v61 = vld [vmem:[#allocation256_spill] sm:$0xff]  ;;  %v14513_v6 = vld [vmem:[#allocation447_spill] sm:$0xff] }
 0x879   : > { %5894 = vperm.xlu0 %6941, %v7127_v43   ;;  %v2179_v26 = vmul.f32 %v10187_v28, %v14510_v48  ;;  %v2169_v4 = vmul.f32 %v10187_v28, %v14511_v61  ;;  %v2182_v27 = vmul.f32 %v10187_v28, %v14512_v51  ;;  %v4560_v52 = vmul.f32 %v10879_v30, %v14513_v6  ;;  %v14517_v36 = vld [vmem:[#allocation263_spill] sm:$0xff]  ;;  %v14518_v21 = vld [vmem:[#allocation264_spill] sm:$0xff]  ;;  %v14519_v43 = vld [vmem:[#allocation266_spill] sm:$0xff] }
 0x87a   : > { %v2172_v41 = vmul.f32 %v10187_v28, %v14514_v10  ;;  %v2185_v57 = vmul.f32 %v10187_v28, %v14515_v11  ;;  %v2175_v19 = vmul.f32 %v10187_v28, %v14516_v54  ;;  %v2188_v55 = vmul.f32 %v10187_v28, %v14517_v36 }
 0x87b   : > { %v4689_v34 = vpop.permute.xlu0 %4688  ;;  %v2178_v35 = vmul.f32 %v10187_v28, %v14518_v21  ;;  %v2416_v48 = vmul.f32 %v10141_v37, %v14519_v43  ;;  %v4592_v61 = vadd.f32 %v4560_v52, %v4399_v3  ;;  %v2193_v6 = vadd.f32 %v2161_v18, %v11274_v53  ;;  %v11422_v52 = vpop.permute.xlu1 %5082  ;;  %v14531_v43 = vld [vmem:[#allocation281_spill] sm:$0xff] }
 0x87c   : > { %v4753_v51 = vmul.f32 %v10921_v25, %v4689_v34  ;;  %v2205_v10 = vadd.f32 %v2173_v56, %v11281_v60  ;;  %v2195_v11 = vadd.f32 %v2163_v31, %v11284_v44  ;;  %v2208_v54 = vadd.f32 %v2176_v12, %v11295_v17  ;;  %5311 = vperm.xlu1 %6935, %v7128_v49   ;;  %v14521_v56 = vld [vmem:[#allocation267_spill] sm:$0xff]  ;;  %v14523_v31 = vld [vmem:[#allocation269_spill] sm:$0xff] }
 0x87d   : > { %v2198_v36 = vadd.f32 %v2166_v2, %v11298_v45  ;;  %v2211_v21 = vadd.f32 %v2179_v26, %v11301_v8  ;;  %v11418_v32 = vadd.f32 %v2169_v4, %v11304_v62  ;;  %14520 = vst [vmem:[#allocation34_spill] sm:$0xff] %v11422_v52  ;;  %v11425_v53 = vadd.f32 %v2182_v27, %v11307_v63  ;;  %v7129_v45 = vld [vmem:[#allocation2 + $0x121] sm:$0xff]  ;;  %v14527_v4 = vld [vmem:[#allocation275_spill] sm:$0xff] }
 0x87e   : > { %v11420_v3 = vadd.f32 %v4753_v51, %v4592_v61  ;;  %v11428_v60 = vadd.f32 %v2172_v41, %v11310_v46  ;;  %v11430_v44 = vadd.f32 %v2185_v57, %v2024_v59  ;;  %v11432_v17 = vadd.f32 %v2175_v19, %v2014_v22  ;;  %v11442_v63 = vpop.permute.xlu2 %5134  ;;  %v14522_v59 = vld [vmem:[#allocation270_spill] sm:$0xff]  ;;  %v7130_v2 = vld [vmem:[#allocation2 + $0x7a] sm:$0xff] }
 0x87f   : > { %5327 = vperm.xlu2 %6934, %v7129_v45   ;;  %v11434_v8 = vadd.f32 %v2188_v55, %v2027_v15  ;;  %v11436_v62 = vadd.f32 %v2178_v35, %v2017_v47  ;;  %v11438_v49 = vadd.f32 %v2416_v48, %v2191_v14  ;;  %v4402_v18 = vadd.f32 %v11098_v50, %v10746_v33  ;;  %v14524_v15 = vld [vmem:[#allocation272_spill] sm:$0xff]  ;;  %v14525_v14 = vld [vmem:[#allocation273_spill] sm:$0xff]  ;;  %v14528_v41 = vld [vmem:[#allocation450_spill] sm:$0xff] }
 0x880   : > { %v2181_v46 = vmul.f32 %v10187_v28, %v14521_v56  ;;  %v2184_v22 = vmul.f32 %v10187_v28, %v14522_v59  ;;  %v2419_v12 = vmul.f32 %v10141_v37, %v14523_v31  ;;  %v2421_v47 = vmul.f32 %v10141_v37, %v14524_v15  ;;  %v14526_v33 = vld [vmem:[#allocation276_spill] sm:$0xff]  ;;  %v14529_v19 = vld [vmem:[#allocation278_spill] sm:$0xff]  ;;  %v14530_v34 = vld [vmem:[#allocation279_spill] sm:$0xff] }
 0x881   : > { %5914 = vperm.xlu0 %6941, %v7130_v2   ;;  %v2187_v26 = vmul.f32 %v10187_v28, %v14525_v14  ;;  %v2190_v50 = vmul.f32 %v10187_v28, %v14526_v33  ;;  %v2424_v27 = vmul.f32 %v10141_v37, %v14527_v4  ;;  %v4563_v57 = vmul.f32 %v10879_v30, %v14528_v41  ;;  %v14532_v61 = vld [vmem:[#allocation282_spill] sm:$0xff]  ;;  %v14533_v28 = vld [vmem:[#allocation284_spill] sm:$0xff]  ;;  %v14534_v59 = vld [vmem:[#allocation285_spill] sm:$0xff] }
 0x882   : > { %v2427_v55 = vmul.f32 %v10141_v37, %v14529_v19  ;;  %v2418_v35 = vmul.f32 %v10141_v37, %v14530_v34  ;;  %v2430_v48 = vmul.f32 %v10141_v37, %v14531_v43  ;;  %v2420_v51 = vmul.f32 %v10141_v37, %v14532_v61  ;;  %v14535_v41 = vld [vmem:[#allocation287_spill] sm:$0xff] }
 0x883   : > { %v4701_v45 = vpop.permute.xlu0 %4700  ;;  %v2433_v56 = vmul.f32 %v10141_v37, %v14533_v28  ;;  %v2423_v31 = vmul.f32 %v10141_v37, %v14534_v59  ;;  %v4595_v15 = vadd.f32 %v4563_v57, %v4402_v18  ;;  %v2213_v14 = vadd.f32 %v2181_v46, %v11350_v13  ;;  %v7131_v34 = vld [vmem:[#allocation2 + $0x111] sm:$0xff]  ;;  %v11483_v57 = vpop.permute.xlu1 %5094 }
 0x884   : > { %v4756_v2 = vmul.f32 %v10921_v25, %v4701_v45  ;;  %v2216_v33 = vadd.f32 %v2184_v22, %v11361_v5  ;;  %v2451_v4 = vadd.f32 %v2419_v12, %v11354_v7  ;;  %v2436_v19 = vmul.f32 %v10141_v37, %v14535_v41  ;;  %5323 = vperm.xlu1 %6935, %v7131_v34   ;;  %v7132_v22 = vld [vmem:[#allocation2 + $0x141] sm:$0xff]  ;;  %v14548_v34 = vld [vmem:[#allocation303_spill] sm:$0xff] }
 0x885   : > { %v2219_v43 = vadd.f32 %v2187_v26, %v11364_v42  ;;  %v2453_v61 = vadd.f32 %v2421_v47, %v11367_v40  ;;  %v2456_v28 = vadd.f32 %v2424_v27, %v11370_v20  ;;  %14536 = vst [vmem:[#allocation115_spill] sm:$0xff] %v11483_v57  ;;  %v11486_v13 = vadd.f32 %v2190_v50, %v11372_v58  ;;  %v14539_v50 = vld [vmem:[#allocation291_spill] sm:$0xff] }
 0x886   : > { %v11481_v18 = vadd.f32 %v4756_v2, %v4595_v15  ;;  %v11489_v7 = vadd.f32 %v2427_v55, %v11374_v1  ;;  %v11491_v5 = vadd.f32 %v2418_v35, %v2193_v6  ;;  %v11493_v46 = vadd.f32 %v2430_v48, %v2205_v10  ;;  %v11503_v58 = vpop.permute.xlu2 %5146  ;;  %v14537_v1 = vld [vmem:[#allocation288_spill] sm:$0xff]  ;;  %v14538_v10 = vld [vmem:[#allocation290_spill] sm:$0xff]  ;;  %v14543_v35 = vld [vmem:[#allocation453_spill] sm:$0xff] }
 0x887   : > { %5339 = vperm.xlu2 %6934, %v7132_v22   ;;  %v11495_v42 = vadd.f32 %v2420_v51, %v2195_v11  ;;  %v11497_v40 = vadd.f32 %v2433_v56, %v2208_v54  ;;  %v11499_v20 = vadd.f32 %v2423_v31, %v2198_v36  ;;  %v4405_v12 = vadd.f32 %v11114_v39, %v10809_v16  ;;  %v7133_v54 = vld [vmem:[#allocation2 + $0x9a] sm:$0xff]  ;;  %v14540_v36 = vld [vmem:[#allocation293_spill] sm:$0xff]  ;;  %v14541_v55 = vld [vmem:[#allocation294_spill] sm:$0xff] }
 0x888   : > { %v11505_v47 = vadd.f32 %v2436_v19, %v2211_v21  ;;  %v2426_v6 = vmul.f32 %v10141_v37, %v14537_v1  ;;  %v2439_v26 = vmul.f32 %v10141_v37, %v14538_v10  ;;  %v2429_v11 = vmul.f32 %v10141_v37, %v14539_v50  ;;  %v14542_v39 = vld [vmem:[#allocation296_spill] sm:$0xff]  ;;  %v14544_v51 = vld [vmem:[#allocation297_spill] sm:$0xff]  ;;  %v14546_v31 = vld [vmem:[#allocation299_spill] sm:$0xff] }
 0x889   : > { %5926 = vperm.xlu0 %6941, %v7133_v54   ;;  %v2442_v27 = vmul.f32 %v10141_v37, %v14540_v36  ;;  %v2432_v16 = vmul.f32 %v10141_v37, %v14541_v55  ;;  %v2445_v21 = vmul.f32 %v10141_v37, %v14542_v39  ;;  %v4566_v48 = vmul.f32 %v10879_v30, %v14543_v35  ;;  %v14545_v56 = vld [vmem:[#allocation300_spill] sm:$0xff]  ;;  %v14547_v2 = vld [vmem:[#allocation302_spill] sm:$0xff]  ;;  %v14549_v1 = vld [vmem:[#allocation305_spill] sm:$0xff] }
 0x88a   : > { %v2435_v45 = vmul.f32 %v10141_v37, %v14544_v51  ;;  %v2438_v59 = vmul.f32 %v10141_v37, %v14545_v56  ;;  %v2609_v15 = vmul.f32 %v10272_v38, %v14546_v31  ;;  %v2612_v41 = vmul.f32 %v10272_v38, %v14547_v2  ;;  %v14550_v35 = vld [vmem:[#allocation306_spill] sm:$0xff]  ;;  %v7134_v56 = vld [vmem:[#allocation2 + $0x139] sm:$0xff] }
 0x88b   : > { %v4713_v19 = vpop.permute.xlu0 %4712  ;;  %v2441_v22 = vmul.f32 %v10141_v37, %v14548_v34  ;;  %v2614_v10 = vmul.f32 %v10272_v38, %v14549_v1  ;;  %v4598_v50 = vadd.f32 %v4566_v48, %v4405_v12  ;;  %v2458_v36 = vadd.f32 %v2426_v6, %v11418_v32  ;;  %v14552_v34 = vld [vmem:[#allocation308_spill] sm:$0xff]  ;;  %v11547_v32 = vpop.permute.xlu1 %5106  ;;  %v14561_v1 = vld [vmem:[#allocation318_spill] sm:$0xff] }
 0x88c   : > { %v4759_v54 = vmul.f32 %v10921_v25, %v4713_v19  ;;  %v2471_v55 = vadd.f32 %v2439_v26, %v11425_v53  ;;  %v2461_v39 = vadd.f32 %v2429_v11, %v11428_v60  ;;  %v2444_v51 = vmul.f32 %v10141_v37, %v14550_v35  ;;  %5335 = vperm.xlu1 %6935, %v7134_v56   ;;  %v14564_v56 = vld [vmem:[#allocation323_spill] sm:$0xff] }
 0x88d   : > { %v2474_v31 = vadd.f32 %v2442_v27, %v11430_v44  ;;  %v11541_v2 = vadd.f32 %v2432_v16, %v11432_v17  ;;  %v2617_v12 = vmul.f32 %v10272_v38, %v14552_v34  ;;  %14553 = vst [vmem:[#allocation588_spill] sm:$0xff] %v11547_v32  ;;  %v11550_v53 = vadd.f32 %v2445_v21, %v11434_v8  ;;  %v7135_v17 = vld [vmem:[#allocation2 + $0x169] sm:$0xff]  ;;  %v11672_v52 = vld [vmem:[#allocation2 + $0x32] sm:$0xff] }
 0x88e   : > { %v11545_v48 = vadd.f32 %v4759_v54, %v4598_v50  ;;  %v11553_v60 = vadd.f32 %v2435_v45, %v11436_v62  ;;  %v11555_v6 = vadd.f32 %v2438_v59, %v2213_v14  ;;  %v11558_v44 = vadd.f32 %v2609_v15, %v11438_v49  ;;  %v11568_v16 = vpop.permute.xlu2 %5158  ;;  %v14554_v14 = vld [vmem:[#allocation309_spill] sm:$0xff]  ;;  %v14555_v49 = vld [vmem:[#allocation311_spill] sm:$0xff]  ;;  %v14556_v59 = vld [vmem:[#allocation312_spill] sm:$0xff]  ;;  %14586 = vst [vmem:[#allocation136_spill] sm:$0xff] %v11672_v52 }
 0x88f   : > { %14551 = vst [vmem:[#allocation322_spill] sm:$0xff] %v11541_v2  ;;  %5351 = vperm.xlu2 %6934, %v7135_v17   ;;  %v11560_v26 = vadd.f32 %v2441_v22, %v2216_v33  ;;  %v11562_v11 = vadd.f32 %v2612_v41, %v2451_v4  ;;  %v11564_v27 = vadd.f32 %v2614_v10, %v2453_v61  ;;  %v7136_v4 = vld [vmem:[#allocation2 + $0xc2] sm:$0xff]  ;;  %v14557_v15 = vld [vmem:[#allocation314_spill] sm:$0xff] }
 0x890   : > { %v4408_v8 = vadd.f32 %v11126_v29, %v10881_v9  ;;  %v11570_v62 = vadd.f32 %v2444_v51, %v2219_v43  ;;  %v2447_v21 = vmul.f32 %v10141_v37, %v14554_v14  ;;  %v2620_v45 = vmul.f32 %v10272_v38, %v14555_v49  ;;  %v14558_v29 = vld [vmem:[#allocation315_spill] sm:$0xff]  ;;  %v14559_v41 = vld [vmem:[#allocation456_spill] sm:$0xff]  ;;  %v14560_v37 = vld [vmem:[#allocation317_spill] sm:$0xff] }
 0x891   : > { %v2611_v33 = vmul.f32 %v10272_v38, %v14556_v59  ;;  %5938 = vperm.xlu0 %6941, %v7136_v4   ;;  %v11578_v61 = vadd.f32 %v2617_v12, %v2456_v28  ;;  %v2623_v9 = vmul.f32 %v10272_v38, %v14557_v15  ;;  %v2613_v43 = vmul.f32 %v10272_v38, %v14558_v29  ;;  %v14562_v50 = vld [vmem:[#allocation320_spill] sm:$0xff]  ;;  %v14563_v28 = vld [vmem:[#allocation321_spill] sm:$0xff]  ;;  %v14566_v29 = vld [vmem:[#allocation326_spill] sm:$0xff] }
 0x892   : > { %v4569_v19 = vmul.f32 %v10879_v30, %v14559_v41  ;;  %v2626_v22 = vmul.f32 %v10272_v38, %v14560_v37  ;;  %v2616_v10 = vmul.f32 %v10272_v38, %v14561_v1  ;;  %v2629_v54 = vmul.f32 %v10272_v38, %v14562_v50  ;;  %v14565_v12 = vld [vmem:[#allocation324_spill] sm:$0xff] }
 0x893   : > { %v2619_v35 = vmul.f32 %v10272_v38, %v14563_v28  ;;  %v4725_v51 = vpop.permute.xlu0 %4724  ;;  %v2632_v34 = vmul.f32 %v10272_v38, %v14564_v56  ;;  %v2622_v17 = vmul.f32 %v10272_v38, %v14565_v12  ;;  %v2479_v59 = vadd.f32 %v2447_v21, %v11486_v13  ;;  %v7137_v37 = vld [vmem:[#allocation2 + $0x159] sm:$0xff]  ;;  %v14570_v28 = vld [vmem:[#allocation89_spill] sm:$0xff] }
 0x894   : > { %v4601_v14 = vadd.f32 %v4569_v19, %v4408_v8  ;;  %v4762_v49 = vmul.f32 %v10921_v25, %v4725_v51  ;;  %v2652_v4 = vadd.f32 %v2620_v45, %v11489_v7  ;;  %v2643_v15 = vadd.f32 %v2611_v33, %v11491_v5  ;;  %5347 = vperm.xlu1 %6935, %v7137_v37   ;;  %v7138_v8 = vld [vmem:[%s13256_s1 + $0x10] sm:$0xff]  ;;  %v11615_v7 = vpop.permute.xlu1 %5118  ;;  %v14579_v37 = vld [vmem:[#allocation339_spill] sm:$0xff] }
 0x895   : > { %v2635_v41 = vmul.f32 %v10272_v38, %v14566_v29  ;;  %v2655_v1 = vadd.f32 %v2623_v9, %v11493_v46  ;;  %v11606_v50 = vadd.f32 %v2613_v43, %v11495_v42  ;;  %v11611_v19 = vperm.slane %v7138_v8, 6  ;;  %14567 = vst [vmem:[#allocation632_spill] sm:$0xff] %v11615_v7  ;;  %v7139_v45 = vld [vmem:[#allocation2 + $0x189] sm:$0xff]  ;;  %v14569_v43 = vld [vmem:[#allocation343_spill] sm:$0xff] }
 0x896   : > { %v11613_v13 = vadd.f32 %v4762_v49, %v4601_v14  ;;  %v11618_v5 = vadd.f32 %v2626_v22, %v11497_v40  ;;  %v11621_v21 = vadd.f32 %v2616_v10, %v11499_v20  ;;  %v11624_v46 = vadd.f32 %v2629_v54, %v11505_v47  ;;  %v11636_v40 = vpop.permute.xlu2 %5170  ;;  %v14571_v22 = vld [vmem:[#allocation329_spill] sm:$0xff]  ;;  %v14573_v54 = vld [vmem:[#allocation332_spill] sm:$0xff]  ;;  %v14577_v49 = vld [vmem:[#allocation335_spill] sm:$0xff] }
 0x897   : > { %v11626_v42 = vadd.f32 %v2619_v35, %v2458_v36  ;;  %5363 = vperm.xlu2 %6934, %v7139_v45   ;;  %v11628_v33 = vadd.f32 %v2632_v34, %v2471_v55  ;;  %v11630_v9 = vadd.f32 %v2622_v17, %v2461_v39  ;;  %v5022_v51 = vadd.f32 %v14570_v28, %v14569_v43  ;;  %v14572_v36 = vld [vmem:[#allocation330_spill] sm:$0xff]  ;;  %v14574_v55 = vld [vmem:[#allocation57_spill] sm:$0xff]  ;;  %v14576_v17 = vld [vmem:[#allocation336_spill] sm:$0xff] }
 0x898   : > { %v11634_v56 = vperm.slane %v7138_v8, 7  ;;  %v11638_v20 = vadd.f32 %v2635_v41, %v2474_v31  ;;  %v2638_v47 = vmul.f32 %v10272_v38, %v14571_v22  ;;  %v2628_v10 = vmul.f32 %v10272_v38, %v14572_v36  ;;  %v7140_v39 = vld [vmem:[#allocation2 + $0xe2] sm:$0xff]  ;;  %v14578_v29 = vld [vmem:[#allocation459_spill] sm:$0xff]  ;;  %v14580_v45 = vld [vmem:[#allocation338_spill] sm:$0xff] }
 0x899   : > { %14568 = vst [vmem:[#allocation118_spill] sm:$0xff] %v11630_v9  ;;  %v2802_v35 = vmul.f32 %v14574_v55, %v14573_v54  ;;  %5950 = vperm.xlu0 %6941, %v7140_v39   ;;  %v14575_v34 = vld [vmem:[#allocation333_spill] sm:$0xff]  ;;  %v2634_v14 = vmul.f32 %v10272_v38, %v14576_v17  ;;  %v2805_v31 = vmul.f32 %v14574_v55, %v14577_v49  ;;  %v14581_v28 = vld [vmem:[#allocation342_spill] sm:$0xff] }
 0x89a   : > { %v2631_v12 = vmul.f32 %v10272_v38, %v14575_v34  ;;  %v5183_v41 = vmul.f32 %v11611_v19, %v14578_v29  ;;  %v2637_v8 = vmul.f32 %v10272_v38, %v14579_v37  ;;  %v2807_v43 = vmul.f32 %v14574_v55, %v14580_v45  ;;  %v14582_v36 = vld [vmem:[#allocation341_spill] sm:$0xff]  ;;  %v14583_v34 = vld [vmem:[#allocation344_spill] sm:$0xff]  ;;  %v14584_v49 = vld [vmem:[#allocation346_spill] sm:$0xff] }
 0x89b   : > { %v2640_v22 = vmul.f32 %v10272_v38, %v14581_v28  ;;  %v2810_v54 = vmul.f32 %v14574_v55, %v14582_v36  ;;  %v5252_v39 = vpop.permute.xlu0 %5251  ;;  %v2813_v17 = vmul.f32 %v14574_v55, %v14583_v34  ;;  %v2804_v7 = vmul.f32 %v14574_v55, %v14584_v49  ;;  %v14585_v28 = vld [vmem:[#allocation347_spill] sm:$0xff]  ;;  %v7141_v36 = vld [vmem:[#allocation2 + $0x181] sm:$0xff] }
 0x89c   : > { %v5215_v29 = vadd.f32 %v5183_v41, %v5022_v51  ;;  %v5376_v32 = vmul.f32 %v11634_v56, %v5252_v39  ;;  %v2670_v37 = vadd.f32 %v2638_v47, %v11550_v53  ;;  %v2660_v45 = vadd.f32 %v2628_v10, %v11553_v60  ;;  %5359 = vperm.xlu1 %6935, %v7141_v36   ;;  %v14587_v51 = vld [vmem:[#allocation349_spill] sm:$0xff]  ;;  %v11680_v53 = vpop.permute.xlu1 %5130 }
 0x89d   : > { %v2834_v57 = vadd.f32 %v2802_v35, %v11558_v44  ;;  %v2816_v2 = vmul.f32 %v14574_v55, %v14585_v28  ;;  %v2663_v34 = vadd.f32 %v2631_v12, %v11555_v6  ;;  %v2837_v49 = vadd.f32 %v2805_v31, %v11562_v11  ;;  %v14591_v31 = vld [vmem:[#allocation319_spill] sm:$0xff] }
 0x89e   : > { %v2806_v41 = vmul.f32 %v14574_v55, %v14587_v51  ;;  %v11678_v39 = vadd.f32 %v5376_v32, %v5215_v29  ;;  %v2666_v60 = vadd.f32 %v2634_v14, %v11560_v26  ;;  %v2669_v44 = vadd.f32 %v2637_v8, %v11570_v62  ;;  %v14590_v32 = vld [vmem:[#allocation85_spill] sm:$0xff]  ;;  %v14592_v62 = vld [vmem:[#allocation350_spill] sm:$0xff]  ;;  %v14599_v28 = vld [vmem:[#allocation359_spill] sm:$0xff] }
 0x89f   : > { %v2839_v47 = vadd.f32 %v2807_v43, %v11564_v27  ;;  %v11686_v10 = vadd.f32 %v2810_v54, %v11578_v61  ;;  %v14589_v35 = vmov 0   ;;  %v11689_v6 = vadd.f32 %v2640_v22, %v2479_v59  ;;  %v14593_v61 = vld [vmem:[#allocation352_spill] sm:$0xff]  ;;  %v14594_v8 = vld [vmem:[#allocation353_spill] sm:$0xff]  ;;  %v14596_v43 = vld [vmem:[#allocation355_spill] sm:$0xff] }
 0x8a0   : > { %14588 = vst [vmem:[#allocation271_spill] sm:$0xff] %v11678_v39  ;;  %6936 = vset.pattern.permute.xlu2 %v14589_v35  ;;  %v11691_v11 = vadd.f32 %v2813_v17, %v2652_v4  ;;  %v11693_v12 = vadd.f32 %v2804_v7, %v2643_v15  ;;  %v5027_v29 = vadd.f32 %v14591_v31, %v14590_v32  ;;  %v7142_v4 = vld [vmem:[#allocation2 + $0x10a] sm:$0xff]  ;;  %v11706_v15 = vpop.permute.xlu2 %5247  ;;  %v14601_v31 = vld [vmem:[#allocation364_spill] sm:$0xff] }
 0x8a1   : > { %5473 = vperm.xlu2 %6936, %v11672_v52   ;;  %v11698_v26 = vadd.f32 %v2816_v2, %v2655_v1  ;;  %v2819_v27 = vmul.f32 %v14574_v55, %v14592_v62  ;;  %v2809_v14 = vmul.f32 %v14574_v55, %v14593_v61  ;;  %v2822_v59 = vmul.f32 %v14574_v55, %v14594_v8  ;;  %v14597_v1 = vld [vmem:[#allocation356_spill] sm:$0xff]  ;;  %v14598_v54 = vld [vmem:[#allocation462_spill] sm:$0xff] }
 0x8a2   : > { %5962 = vperm.xlu0 %6941, %v7142_v4   ;;  %14595 = vst [vmem:[#allocation348_spill] sm:$0xff] %v11706_v15  ;;  %v11709_v7 = vadd.f32 %v2806_v41, %v11606_v50  ;;  %v2812_v2 = vmul.f32 %v14574_v55, %v14596_v43  ;;  %v2825_v22 = vmul.f32 %v14574_v55, %v14597_v1  ;;  %v14600_v51 = vld [vmem:[#allocation362_spill] sm:$0xff]  ;;  %v14602_v50 = vld [vmem:[#allocation365_spill] sm:$0xff]  ;;  %v14603_v41 = vld [vmem:[#allocation68_spill] sm:$0xff] }
 0x8a3   : > { %v5188_v17 = vmul.f32 %v11611_v19, %v14598_v54  ;;  %v2828_v36 = vmul.f32 %v14574_v55, %v14599_v28  ;;  %v2831_v32 = vmul.f32 %v14574_v55, %v14600_v51  ;;  %v2821_v62 = vmul.f32 %v14574_v55, %v14601_v31  ;;  %v5272_v8 = vpop.permute.xlu0 %5271  ;;  %v14604_v4 = vld [vmem:[#allocation367_spill] sm:$0xff]  ;;  %v14605_v1 = vld [vmem:[#allocation368_spill] sm:$0xff]  ;;  %v14606_v31 = vld [vmem:[#allocation370_spill] sm:$0xff] }
 0x8a4   : > { %v3059_v61 = vmul.f32 %v14603_v41, %v14602_v50  ;;  %v2824_v43 = vmul.f32 %v14574_v55, %v14604_v4  ;;  %v3062_v39 = vmul.f32 %v14603_v41, %v14605_v1  ;;  %v5381_v9 = vmul.f32 %v11634_v56, %v5272_v8  ;;  %v7143_v50 = vld [vmem:[#allocation2 + $0x1a1] sm:$0xff]  ;;  %v11735_v15 = vld [vmem:[#allocation2 + $0x52] sm:$0xff] }
 0x8a5   : > { %v5220_v54 = vadd.f32 %v5188_v17, %v5027_v29  ;;  %v2851_v28 = vadd.f32 %v2819_v27, %v11618_v5  ;;  %v2841_v51 = vadd.f32 %v2809_v14, %v11621_v21  ;;  %v2854_v38 = vadd.f32 %v2822_v59, %v11624_v46  ;;  %5371 = vperm.xlu1 %6935, %v7143_v50   ;;  %v14609_v17 = vld [vmem:[#allocation371_spill] sm:$0xff]  ;;  %v11745_v21 = vpop.permute.xlu1 %5142  ;;  %v14611_v59 = vld [vmem:[#allocation373_spill] sm:$0xff] }
 0x8a6   : > { %v2827_v52 = vmul.f32 %v14574_v55, %v14606_v31  ;;  %14607 = vst [vmem:[#allocation614_spill] sm:$0xff] %v11735_v15  ;;  %v11738_v4 = vadd.f32 %v2812_v2, %v11626_v42  ;;  %v2857_v29 = vadd.f32 %v2825_v22, %v11628_v33  ;;  %v3064_v8 = vmul.f32 %v14603_v41, %v14609_v17  ;;  %v14612_v33 = vld [vmem:[#allocation88_spill] sm:$0xff]  ;;  %v14613_v22 = vld [vmem:[#allocation585_spill] sm:$0xff] }
 0x8a7   : > { %v11743_v5 = vadd.f32 %v5381_v9, %v5220_v54  ;;  %v2860_v46 = vadd.f32 %v2828_v36, %v11638_v20  ;;  %v2863_v27 = vadd.f32 %v2831_v32, %v2670_v37  ;;  %v2853_v14 = vadd.f32 %v2821_v62, %v2660_v45  ;;  %v14614_v54 = vld [vmem:[#allocation376_spill] sm:$0xff]  ;;  %v14615_v37 = vld [vmem:[#allocation374_spill] sm:$0xff]  ;;  %v14616_v36 = vld [vmem:[#allocation377_spill] sm:$0xff] }
 0x8a8   : > { %14608 = vst [vmem:[#allocation633_spill] sm:$0xff] %v11738_v4  ;;  %v2830_v1 = vmul.f32 %v14574_v55, %v14611_v59  ;;  %v11750_v31 = vadd.f32 %v2824_v43, %v2663_v34  ;;  %v11752_v42 = vadd.f32 %v3059_v61, %v2834_v57  ;;  %v11754_v2 = vadd.f32 %v3062_v39, %v2837_v49  ;;  %v7144_v57 = vld [vmem:[#allocation2 + $0x12a] sm:$0xff]  ;;  %v11767_v49 = vpop.permute.xlu2 %5259  ;;  %v14618_v32 = vld [vmem:[#allocation379_spill] sm:$0xff]  ;;  %v14619_v61 = vld [vmem:[#allocation380_spill] sm:$0xff] }
 0x8a9   : > { %14610 = vst [vmem:[#allocation375_spill] sm:$0xff] %v11743_v5  ;;  %v5030_v50 = vadd.f32 %v14613_v22, %v14612_v33  ;;  %5488 = vperm.xlu2 %6936, %v11735_v15   ;;  %v11759_v9 = vadd.f32 %v2827_v52, %v2666_v60  ;;  %v2833_v20 = vmul.f32 %v14574_v55, %v14614_v54  ;;  %v14620_v60 = vld [vmem:[#allocation465_spill] sm:$0xff]  ;;  %v14621_v59 = vld [vmem:[#allocation382_spill] sm:$0xff]  ;;  %v14622_v22 = vld [vmem:[#allocation383_spill] sm:$0xff] }
 0x8aa   : > { %v3067_v45 = vmul.f32 %v14603_v41, %v14615_v37  ;;  %v3070_v34 = vmul.f32 %v14603_v41, %v14616_v36  ;;  %5974 = vperm.xlu0 %6941, %v7144_v57   ;;  %14617 = vst [vmem:[#allocation17_spill] sm:$0xff] %v11767_v49  ;;  %v3096_v39 = vadd.f32 %v3064_v8, %v2839_v47  ;;  %v14623_v37 = vld [vmem:[#allocation385_spill] sm:$0xff]  ;;  %v14625_v57 = vld [vmem:[#allocation386_spill] sm:$0xff]  ;;  %v14627_v4 = vld [vmem:[#allocation392_spill] sm:$0xff] }
 0x8ab   : > { %v3061_v62 = vmul.f32 %v14603_v41, %v14618_v32  ;;  %v3073_v52 = vmul.f32 %v14603_v41, %v14619_v61  ;;  %v5191_v43 = vmul.f32 %v11611_v19, %v14620_v60  ;;  %v11775_v17 = vadd.f32 %v2830_v1, %v2669_v44  ;;  %v5284_v8 = vpop.permute.xlu0 %5283  ;;  %v11783_v36 = vld [vmem:[#allocation2 + $0x4a] sm:$0xff]  ;;  %v14653_v49 = vld [vmem:[#allocation415_spill] sm:$0xff] }
 0x8ac   : > { %v3063_v33 = vmul.f32 %v14603_v41, %v14621_v59  ;;  %v3076_v54 = vmul.f32 %v14603_v41, %v14622_v22  ;;  %v3066_v47 = vmul.f32 %v14603_v41, %v14623_v37  ;;  %14624 = vst [vmem:[#allocation537_spill] sm:$0xff] %v11783_v36  ;;  %v3079_v32 = vmul.f32 %v14603_v41, %v14625_v57  ;;  %v14626_v61 = vld [vmem:[#allocation389_spill] sm:$0xff] }
 0x8ad   : > { %v3082_v60 = vmul.f32 %v14603_v41, %v14626_v61  ;;  %v5223_v44 = vadd.f32 %v5191_v43, %v5030_v50  ;;  %v5384_v1 = vmul.f32 %v11634_v56, %v5284_v8  ;;  %v2865_v59 = vadd.f32 %v2833_v20, %v11689_v6  ;;  %6937 = vset.pattern.permute.xlu1 %v14589_v35  ;;  %v11796_v55 = vld [vmem:[#allocation2 + $0x6a] sm:$0xff]  ;;  %v14629_v50 = vld [vmem:[#allocation395_spill] sm:$0xff] }
 0x8ae   : > { %v3099_v5 = vadd.f32 %v3067_v45, %v11686_v10  ;;  %v3102_v22 = vadd.f32 %v3070_v34, %v11691_v11  ;;  %v3085_v37 = vmul.f32 %v14603_v41, %v14627_v4  ;;  %14628 = vst [vmem:[#allocation650_spill] sm:$0xff] %v11796_v55  ;;  %v3093_v57 = vadd.f32 %v3061_v62, %v11693_v12  ;;  %v11805_v10 = vpop.permute.xlu1 %5154  ;;  %v11807_v6 = vld [vmem:[#allocation2 + $0x16a] sm:$0xff] }
 0x8af   : > { %v3105_v61 = vadd.f32 %v3073_v52, %v11698_v26  ;;  %v3088_v43 = vmul.f32 %v14603_v41, %v14629_v50  ;;  %v11802_v8 = vadd.f32 %v5384_v1, %v5223_v44  ;;  %5483 = vperm.xlu1 %6937, %v11783_v36   ;;  %14631 = vst [vmem:[#allocation298_spill] sm:$0xff] %v11805_v10  ;;  %v14632_v20 = vld [vmem:[#allocation397_spill] sm:$0xff]  ;;  %v14633_v26 = vld [vmem:[#allocation388_spill] sm:$0xff]  ;;  %v14635_v52 = vld [vmem:[#allocation611_spill] sm:$0xff] }
 0x8b0   : > { %v3095_v11 = vadd.f32 %v3063_v33, %v11709_v7  ;;  %v3108_v35 = vadd.f32 %v3076_v54, %v2851_v28  ;;  %v3098_v4 = vadd.f32 %v3066_v47, %v2841_v51  ;;  %v3078_v12 = vmul.f32 %v14603_v41, %v14632_v20  ;;  %v14636_v44 = vld [vmem:[#allocation268_spill] sm:$0xff]  ;;  %v14638_v51 = vld [vmem:[#allocation398_spill] sm:$0xff]  ;;  %v14639_v33 = vld [vmem:[#allocation259_spill] sm:$0xff] }
 0x8b1   : > { %14630 = vst [vmem:[#allocation7_spill] sm:$0xff] %v11802_v8  ;;  %v11812_v45 = vadd.f32 %v3079_v32, %v2854_v38  ;;  %v11816_v34 = vmul.f32 %v14603_v41, %v14633_v26  ;;  %v11818_v62 = vadd.f32 %v3082_v60, %v2857_v29  ;;  %v5033_v1 = vadd.f32 %v14636_v44, %v14635_v52  ;;  %v14637_v7 = vld [vmem:[#allocation400_spill] sm:$0xff]  ;;  %v14640_v54 = vld [vmem:[#allocation401_spill] sm:$0xff]  ;;  %v11832_v29 = vpop.permute.xlu2 %5267  ;;  %v14642_v60 = vld [vmem:[#allocation403_spill] sm:$0xff] }
 0x8b2   : > { %5498 = vperm.xlu2 %6936, %v11796_v55   ;;  %v11823_v50 = vadd.f32 %v3085_v37, %v2860_v46  ;;  %v3081_v28 = vmul.f32 %v14603_v41, %v14637_v7  ;;  %v3252_v38 = vmul.f32 %v14639_v33, %v14638_v51  ;;  %v3255_v47 = vmul.f32 %v14639_v33, %v14640_v54  ;;  %v14643_v26 = vld [vmem:[#allocation404_spill] sm:$0xff]  ;;  %v14645_v7 = vld [vmem:[#allocation406_spill] sm:$0xff]  ;;  %v14646_v8 = vld [vmem:[#allocation409_spill] sm:$0xff] }
 0x8b3   : > { %14634 = vst [vmem:[#allocation402_spill] sm:$0xff] %v11816_v34  ;;  %5994 = vperm.xlu0 %6941, %v11807_v6   ;;  %v3120_v32 = vadd.f32 %v3088_v43, %v2863_v27  ;;  %v3084_v20 = vmul.f32 %v14603_v41, %v14642_v60  ;;  %v3257_v46 = vmul.f32 %v14639_v33, %v14643_v26  ;;  %v14644_v37 = vld [vmem:[#allocation468_spill] sm:$0xff]  ;;  %v14647_v34 = vld [vmem:[#allocation407_spill] sm:$0xff]  ;;  %v5296_v27 = vpop.permute.xlu0 %5295  ;;  %v14649_v60 = vld [vmem:[#allocation410_spill] sm:$0xff] }
 0x8b4   : > { %14641 = vst [vmem:[#allocation32_spill] sm:$0xff] %v11832_v29  ;;  %v5194_v52 = vmul.f32 %v11611_v19, %v14644_v37  ;;  %v3110_v44 = vadd.f32 %v3078_v12, %v2853_v14  ;;  %v3087_v51 = vmul.f32 %v14603_v41, %v14645_v7  ;;  %v3090_v54 = vmul.f32 %v14603_v41, %v14646_v8  ;;  %v11846_v43 = vld [vmem:[#allocation2 + $0x62] sm:$0xff]  ;;  %v11858_v10 = vld [vmem:[#allocation2 + $0x92] sm:$0xff] }
 0x8b5   : > { %v3260_v55 = vmul.f32 %v14639_v33, %v14647_v34  ;;  %14648 = vst [vmem:[#allocation564_spill] sm:$0xff] %v11846_v43  ;;  %v3263_v29 = vmul.f32 %v14639_v33, %v14649_v60  ;;  %v14650_v26 = vld [vmem:[#allocation412_spill] sm:$0xff]  ;;  %v5387_v14 = vmul.f32 %v11634_v56, %v5296_v27  ;;  %v3113_v12 = vadd.f32 %v3081_v28, %v11750_v31  ;;  %v14651_v41 = vld [vmem:[#allocation413_spill] sm:$0xff] }
 0x8b6   : > { %v3254_v36 = vmul.f32 %v14639_v33, %v14650_v26  ;;  %v5226_v37 = vadd.f32 %v5194_v52, %v5033_v1  ;;  %v3284_v7 = vadd.f32 %v3252_v38, %v11752_v42  ;;  %v3287_v8 = vadd.f32 %v3255_v47, %v11754_v2  ;;  %14652 = vst [vmem:[#allocation325_spill] sm:$0xff] %v11858_v10  ;;  %v11866_v31 = vpop.permute.xlu1 %5166  ;;  %v14655_v28 = vld [vmem:[#allocation416_spill] sm:$0xff]  ;;  %v14656_v38 = vld [vmem:[#allocation418_spill] sm:$0xff]  ;;  %v14660_v27 = vld [vmem:[#allocation425_spill] sm:$0xff] }
 0x8b7   : > { %v3266_v34 = vmul.f32 %v14639_v33, %v14651_v41  ;;  %v3116_v15 = vadd.f32 %v3084_v20, %v11759_v9  ;;  %v3289_v60 = vadd.f32 %v3257_v46, %v3096_v39  ;;  %v3256_v26 = vmul.f32 %v14639_v33, %v14653_v49  ;;  %5493 = vperm.xlu1 %6937, %v11846_v43   ;;  %v14657_v20 = vld [vmem:[#allocation628_spill] sm:$0xff] }
 0x8b8   : > { %v11863_v1 = vadd.f32 %v5387_v14, %v5226_v37  ;;  %v3119_v42 = vadd.f32 %v3087_v51, %v11775_v17  ;;  %v3292_v2 = vadd.f32 %v3260_v55, %v3099_v5  ;;  %v3269_v41 = vmul.f32 %v14639_v33, %v14655_v28  ;;  %v14658_v55 = vld [vmem:[#allocation419_spill] sm:$0xff]  ;;  %v14659_v17 = vld [vmem:[#allocation422_spill] sm:$0xff] }
 0x8b9   : > { %v3259_v47 = vmul.f32 %v14639_v33, %v14656_v38  ;;  %v11873_v9 = vadd.f32 %v3090_v54, %v2865_v59  ;;  %v11875_v39 = vadd.f32 %v3263_v29, %v3102_v22  ;;  %v11877_v49 = vadd.f32 %v3254_v36, %v3093_v57  ;;  %v7145_v22 = vld [vmem:[#allocation2 + $0x172] sm:$0xff]  ;;  %v11890_v36 = vpop.permute.xlu2 %5279  ;;  %v14666_v38 = vld [vmem:[#allocation433_spill] sm:$0xff] }
 0x8ba   : > { %14654 = vst [vmem:[#allocation591_spill] sm:$0xff] %v11863_v1  ;;  %v5036_v46 = vadd.f32 %v14657_v20, %v11286_v0  ;;  %5513 = vperm.xlu2 %6936, %v11858_v10   ;;  %v11882_v52 = vadd.f32 %v3266_v34, %v3105_v61  ;;  %v3272_v5 = vmul.f32 %v14639_v33, %v14658_v55  ;;  %v14662_v0 = vld [vmem:[#allocation428_spill] sm:$0xff]  ;;  %v14663_v61 = vld [vmem:[#allocation430_spill] sm:$0xff]  ;;  %v14664_v37 = vld [vmem:[#allocation471_spill] sm:$0xff] }
 0x8bb   : > { %v3275_v51 = vmul.f32 %v14639_v33, %v14659_v17  ;;  %v3278_v59 = vmul.f32 %v14639_v33, %v14660_v27  ;;  %5998 = vperm.xlu0 %6941, %v7145_v22   ;;  %14661 = vst [vmem:[#allocation637_spill] sm:$0xff] %v11890_v36  ;;  %v11892_v57 = vadd.f32 %v3256_v26, %v3095_v11  ;;  %v14667_v55 = vld [vmem:[#allocation431_spill] sm:$0xff]  ;;  %v14668_v17 = vld [vmem:[#allocation64_spill] sm:$0xff]  ;;  %v5308_v11 = vpop.permute.xlu0 %5307  ;;  %v14671_v1 = vld [vmem:[#allocation434_spill] sm:$0xff] }
 0x8bc   : > { %v3281_v29 = vmul.f32 %v14639_v33, %v14662_v0  ;;  %v3271_v54 = vmul.f32 %v14639_v33, %v14663_v61  ;;  %v5197_v14 = vmul.f32 %v11611_v19, %v14664_v37  ;;  %v3301_v34 = vadd.f32 %v3269_v41, %v3108_v35  ;;  %v11906_v26 = vld [vmem:[#allocation2 + $0x82] sm:$0xff] }
 0x8bd   : > { %v11900_v28 = vadd.f32 %v3259_v47, %v3098_v4  ;;  %v3274_v20 = vmul.f32 %v14639_v33, %v14666_v38  ;;  %v3445_v27 = vmul.f32 %v14668_v17, %v14667_v55  ;;  %14669 = vst [vmem:[#allocation274_spill] sm:$0xff] %v11906_v26  ;;  %v14670_v22 = vld [vmem:[#allocation436_spill] sm:$0xff]  ;;  %v3448_v61 = vmul.f32 %v14668_v17, %v14671_v1  ;;  %v14672_v37 = vld [vmem:[#allocation437_spill] sm:$0xff]  ;;  %v11920_v55 = vld [vmem:[#allocation2 + $0xb2] sm:$0xff] }
 0x8be   : > { %v3277_v0 = vmul.f32 %v14639_v33, %v14670_v22  ;;  %v5229_v10 = vadd.f32 %v5197_v14, %v5036_v46  ;;  %v5390_v35 = vmul.f32 %v11634_v56, %v5308_v11  ;;  %v3304_v4 = vadd.f32 %v3272_v5, %v11812_v45  ;;  %14673 = vst [vmem:[#allocation351_spill] sm:$0xff] %v11920_v55  ;;  %v14674_v1 = vld [vmem:[#allocation449_spill] sm:$0xff]  ;;  %v11931_v45 = vpop.permute.xlu1 %5178  ;;  %v14677_v5 = vld [vmem:[#allocation439_spill] sm:$0xff]  ;;  %v14717_v36 = vld [vmem:[#allocation76_spill] sm:$0xff] }
 0x8bf   : > { %14665 = vst [vmem:[#allocation139_spill] sm:$0xff] %v11900_v28  ;;  %v3307_v41 = vadd.f32 %v3275_v51, %v11818_v62  ;;  %v11916_v47 = vadd.f32 %v3278_v59, %v11823_v50  ;;  %v3450_v38 = vmul.f32 %v14668_v17, %v14672_v37  ;;  %v11922_v28 = vadd.f32 %v3281_v29, %v3120_v32  ;;  %v14678_v32 = vld [vmem:[#allocation440_spill] sm:$0xff] }
 0x8c0   : > { %v11924_v22 = vadd.f32 %v3271_v54, %v3110_v44  ;;  %v3462_v46 = vmul.f32 %v14668_v17, %v14674_v1  ;;  %v11928_v14 = vadd.f32 %v5390_v35, %v5229_v10  ;;  %5508 = vperm.xlu1 %6937, %v11906_v26   ;;  %14676 = vst [vmem:[#allocation638_spill] sm:$0xff] %v11931_v45  ;;  %v14679_v10 = vld [vmem:[#allocation482_spill] sm:$0xff]  ;;  %v14681_v35 = vld [vmem:[#allocation91_spill] sm:$0xff] }
 0x8c1   : > { %v11933_v62 = vadd.f32 %v3274_v20, %v3113_v12  ;;  %v11935_v50 = vadd.f32 %v3445_v27, %v3284_v7  ;;  %v3280_v51 = vmul.f32 %v14639_v33, %v14677_v5  ;;  %v3453_v44 = vmul.f32 %v14668_v17, %v14678_v32  ;;  %v14680_v54 = vld [vmem:[#allocation526_spill] sm:$0xff]  ;;  %v14683_v27 = vld [vmem:[#allocation443_spill] sm:$0xff] }
 0x8c2   : > { %14675 = vst [vmem:[#allocation617_spill] sm:$0xff] %v11928_v14  ;;  %v11941_v59 = vadd.f32 %v3277_v0, %v3116_v15  ;;  %v11943_v29 = vadd.f32 %v3448_v61, %v3287_v8  ;;  %v3719_v11 = vmul.f32 %v14680_v54, %v14679_v10  ;;  %v5039_v37 = vadd.f32 %v14681_v35, %v11356_v23  ;;  %v14682_v7 = vld [vmem:[#allocation442_spill] sm:$0xff]  ;;  %v14684_v15 = vld [vmem:[#allocation445_spill] sm:$0xff]  ;;  %v7146_v0 = vld [vmem:[#allocation2 + $0x19a] sm:$0xff]  ;;  %v11958_v61 = vpop.permute.xlu2 %5291 }
 0x8c3   : > { %5528 = vperm.xlu2 %6936, %v11920_v55   ;;  %v11950_v12 = vadd.f32 %v3450_v38, %v3289_v60  ;;  %v3283_v20 = vmul.f32 %v14639_v33, %v14682_v7  ;;  %v3456_v1 = vmul.f32 %v14668_v17, %v14683_v27  ;;  %v3447_v8 = vmul.f32 %v14668_v17, %v14684_v15  ;;  %v14686_v5 = vld [vmem:[#allocation446_spill] sm:$0xff]  ;;  %v14688_v38 = vld [vmem:[#allocation516_spill] sm:$0xff] }
 0x8c4   : > { %6010 = vperm.xlu0 %6941, %v7146_v0   ;;  %14685 = vst [vmem:[#allocation142_spill] sm:$0xff] %v11958_v61  ;;  %v3459_v23 = vmul.f32 %v14668_v17, %v14686_v5  ;;  %v3494_v32 = vadd.f32 %v3462_v46, %v3301_v34  ;;  %v14687_v10 = vld [vmem:[#allocation474_spill] sm:$0xff]  ;;  %v14689_v35 = vld [vmem:[#allocation552_spill] sm:$0xff]  ;;  %v11966_v14 = vadd.f32 %v3280_v51, %v3119_v42  ;;  %v5320_v61 = vpop.permute.xlu0 %5319  ;;  %v14693_v46 = vld [vmem:[#allocation547_spill] sm:$0xff] }
 0x8c5   : > { %v5200_v60 = vmul.f32 %v11611_v19, %v14687_v10  ;;  %v3912_v7 = vmul.f32 %v14689_v35, %v14688_v38  ;;  %v11968_v27 = vadd.f32 %v3453_v44, %v3292_v2  ;;  %v14690_v33 = vld [vmem:[#allocation448_spill] sm:$0xff]  ;;  %v11974_v26 = vld [vmem:[#allocation2 + $0xaa] sm:$0xff]  ;;  %v5393_v38 = vmul.f32 %v11634_v56, %v5320_v61  ;;  %v14695_v51 = vld [vmem:[#allocation455_spill] sm:$0xff] }
 0x8c6   : > { %v3449_v15 = vmul.f32 %v14668_v17, %v14690_v33  ;;  %v14691_v0 = vld [vmem:[#allocation452_spill] sm:$0xff]  ;;  %14692 = vst [vmem:[#allocation24_spill] sm:$0xff] %v11974_v26  ;;  %v3751_v34 = vadd.f32 %v3719_v11, %v3494_v32  ;;  %v14694_v5 = vld [vmem:[#allocation77_spill] sm:$0xff]  ;;  %v11980_v42 = vadd.f32 %v3283_v20, %v11873_v9  ;;  %v11983_v2 = vadd.f32 %v3456_v1, %v11875_v39  ;;  %v14698_v61 = vld [vmem:[#allocation582_spill] sm:$0xff] }
 0x8c7   : > { %v3465_v55 = vmul.f32 %v14668_v17, %v14691_v0  ;;  %v4105_v10 = vmul.f32 %v14694_v5, %v14693_v46  ;;  %v5232_v45 = vadd.f32 %v5200_v60, %v5039_v37  ;;  %v11986_v33 = vadd.f32 %v3447_v8, %v11877_v49  ;;  %v11990_v0 = vld [vmem:[#allocation2 + $0xda] sm:$0xff]  ;;  %v14702_v1 = vld [vmem:[#allocation458_spill] sm:$0xff] }
 0x8c8   : > { %v3468_v44 = vmul.f32 %v14668_v17, %v14695_v51  ;;  %14696 = vst [vmem:[#allocation540_spill] sm:$0xff] %v11990_v0  ;;  %v11993_v11 = vadd.f32 %v3459_v23, %v11882_v52  ;;  %v3944_v37 = vadd.f32 %v3912_v7, %v3751_v34  ;;  %v14697_v32 = vld [vmem:[#allocation580_spill] sm:$0xff]  ;;  %5523 = vperm.xlu1 %6937, %v11974_v26   ;;  %v14700_v49 = vld [vmem:[#allocation451_spill] sm:$0xff]  ;;  %v14703_v52 = vld [vmem:[#allocation485_spill] sm:$0xff]  ;;  %v12011_v7 = vpop.permute.xlu1 %5255 }
 0x8c9   : > { %v4363_v60 = vmul.f32 %v14698_v61, %v14697_v32  ;;  %v11997_v9 = vadd.f32 %v5393_v38, %v5232_v45  ;;  %v12001_v39 = vadd.f32 %v3449_v15, %v11892_v57  ;;  %v12005_v20 = vmul.f32 %v14668_v17, %v14700_v49  ;;  %14704 = vst [vmem:[#allocation252_spill] sm:$0xff] %v12011_v7  ;;  %v14705_v46 = vld [vmem:[#allocation612_spill] sm:$0xff]  ;;  %v14706_v57 = vld [vmem:[#allocation534_spill] sm:$0xff]  ;;  %v14707_v32 = vld [vmem:[#allocation461_spill] sm:$0xff] }
 0x8ca   : > { %v3471_v8 = vmul.f32 %v14668_v17, %v14702_v1  ;;  %v3722_v23 = vmul.f32 %v14680_v54, %v14703_v52  ;;  %v3497_v34 = vadd.f32 %v3465_v55, %v3304_v4  ;;  %v4137_v45 = vadd.f32 %v4105_v10, %v3944_v37  ;;  %v14708_v1 = vld [vmem:[#allocation463_spill] sm:$0xff]  ;;  %v14709_v52 = vld [vmem:[#allocation518_spill] sm:$0xff]  ;;  %v12024_v4 = vpop.permute.xlu2 %5303  ;;  %v14711_v55 = vld [vmem:[#allocation464_spill] sm:$0xff] }
 0x8cb   : > { %14699 = vst [vmem:[#allocation378_spill] sm:$0xff] %v11997_v9  ;;  %v4556_v38 = vmul.f32 %v10879_v30, %v14705_v46  ;;  %v5042_v15 = vadd.f32 %v14706_v57, %v11420_v3  ;;  %5543 = vperm.xlu2 %6936, %v11990_v0   ;;  %v3500_v51 = vadd.f32 %v3468_v44, %v3307_v41  ;;  %v14712_v37 = vld [vmem:[#allocation477_spill] sm:$0xff]  ;;  %v14713_v57 = vld [vmem:[#allocation12_spill] sm:$0xff] }
 0x8cc   : > { %14701 = vst [vmem:[#allocation9_spill] sm:$0xff] %v12005_v20  ;;  %v3474_v49 = vmul.f32 %v14668_v17, %v14707_v32  ;;  %v3464_v9 = vmul.f32 %v14668_v17, %v14708_v1  ;;  %v3915_v26 = vmul.f32 %v14689_v35, %v14709_v52  ;;  %v3702_v10 = vmul.f32 %v14680_v54, %v14711_v55  ;;  %v14714_v32 = vld [vmem:[#allocation466_spill] sm:$0xff]  ;;  %v5332_v7 = vpop.permute.xlu0 %5331 }
 0x8cd   : > { %14710 = vst [vmem:[#allocation15_spill] sm:$0xff] %v12024_v4  ;;  %v5203_v3 = vmul.f32 %v11611_v19, %v14712_v37  ;;  %v4395_v46 = vadd.f32 %v4363_v60, %v4137_v45  ;;  %v4749_v41 = vmul.f32 %v10921_v25, %v14713_v57  ;;  %v12033_v44 = vadd.f32 %v3471_v8, %v11916_v47  ;;  %v14715_v52 = vld [vmem:[#allocation550_spill] sm:$0xff] }
 0x8ce   : > { %v3467_v1 = vmul.f32 %v14668_v17, %v14714_v32  ;;  %v3754_v0 = vadd.f32 %v3722_v23, %v3497_v34  ;;  %v4108_v4 = vmul.f32 %v14694_v5, %v14715_v52  ;;  %v12039_v20 = vld [vmem:[#allocation2 + $0xca] sm:$0xff]  ;;  %v5006_v60 = vmul.f32 %v11075_v24, %v14717_v36  ;;  %v14718_v34 = vld [vmem:[#allocation583_spill] sm:$0xff]  ;;  %v14720_v36 = vld [vmem:[#allocation112_spill] sm:$0xff] }
 0x8cf   : > { %14716 = vst [vmem:[#allocation301_spill] sm:$0xff] %v12039_v20  ;;  %v4588_v55 = vadd.f32 %v4556_v38, %v4395_v46  ;;  %v5235_v45 = vadd.f32 %v5203_v3, %v5042_v15  ;;  %v5396_v37 = vmul.f32 %v11634_v56, %v5332_v7  ;;  %v12045_v47 = vadd.f32 %v3474_v49, %v11922_v28  ;;  %v12052_v32 = vld [vmem:[#allocation2 + $0xfa] sm:$0xff] }
 0x8d0   : > { %v12048_v8 = vadd.f32 %v3464_v9, %v11924_v22  ;;  %v3947_v23 = vadd.f32 %v3915_v26, %v3754_v0  ;;  %v4366_v57 = vmul.f32 %v14698_v61, %v14718_v34  ;;  %14719 = vst [vmem:[#allocation567_spill] sm:$0xff] %v12052_v32  ;;  %v12055_v38 = vadd.f32 %v3702_v10, %v11935_v50  ;;  %v14722_v26 = vld [vmem:[#allocation488_spill] sm:$0xff]  ;;  %v14723_v9 = vld [vmem:[#allocation615_spill] sm:$0xff]  ;;  %v12069_v50 = vpop.permute.xlu1 %5263  ;;  %v14725_v10 = vld [vmem:[#allocation469_spill] sm:$0xff] }
 0x8d1   : > { %v4781_v46 = vadd.f32 %v4749_v41, %v4588_v55  ;;  %v5199_v15 = vmul.f32 %v11611_v19, %v14720_v36  ;;  %v12059_v7 = vadd.f32 %v5396_v37, %v5235_v45  ;;  %5538 = vperm.xlu1 %6937, %v12039_v20   ;;  %v12063_v28 = vadd.f32 %v3467_v1, %v11933_v62  ;;  %v14726_v41 = vld [vmem:[#allocation467_spill] sm:$0xff]  ;;  %v14727_v45 = vld [vmem:[#allocation372_spill] sm:$0xff]  ;;  %v14729_v37 = vld [vmem:[#allocation470_spill] sm:$0xff] }
 0x8d2   : > { %v3725_v22 = vmul.f32 %v14680_v54, %v14722_v26  ;;  %v4140_v0 = vadd.f32 %v4108_v4, %v3947_v23  ;;  %v4559_v49 = vmul.f32 %v10879_v30, %v14723_v9  ;;  %14724 = vst [vmem:[#allocation328_spill] sm:$0xff] %v12069_v50  ;;  %v3470_v3 = vmul.f32 %v14668_v17, %v14725_v10  ;;  %v14728_v1 = vld [vmem:[#allocation472_spill] sm:$0xff]  ;;  %v14730_v34 = vld [vmem:[#allocation521_spill] sm:$0xff]  ;;  %v5316_v9 = vpop.permute.xlu2 %5315 }
 0x8d3   : > { %14721 = vst [vmem:[#allocation405_spill] sm:$0xff] %v12059_v7  ;;  %v3705_v52 = vmul.f32 %v14680_v54, %v14726_v41  ;;  %v5038_v55 = vadd.f32 %v5006_v60, %v4781_v46  ;;  %v5045_v62 = vadd.f32 %v14727_v45, %v11481_v18  ;;  %5558 = vperm.xlu2 %6936, %v12052_v32   ;;  %v14731_v10 = vld [vmem:[#allocation480_spill] sm:$0xff]  ;;  %v14732_v60 = vld [vmem:[#allocation25_spill] sm:$0xff] }
 0x8d4   : > { %v3473_v4 = vmul.f32 %v14668_v17, %v14728_v1  ;;  %v3707_v23 = vmul.f32 %v14680_v54, %v14729_v37  ;;  %v3918_v36 = vmul.f32 %v14689_v35, %v14730_v34  ;;  %v4398_v26 = vadd.f32 %v4366_v57, %v4140_v0  ;;  %v14733_v7 = vld [vmem:[#allocation473_spill] sm:$0xff]  ;;  %v5344_v34 = vpop.permute.xlu0 %5343  ;;  %v12093_v57 = vld [vmem:[#allocation2 + $0xf2] sm:$0xff] }
 0x8d5   : > { %v5206_v41 = vmul.f32 %v11611_v19, %v14731_v10  ;;  %v4752_v46 = vmul.f32 %v10921_v25, %v14732_v60  ;;  %v5231_v18 = vadd.f32 %v5199_v15, %v5038_v55  ;;  %v5392_v45 = vmul.f32 %v11634_v56, %v5316_v9  ;;  %v14734_v20 = vld [vmem:[#allocation553_spill] sm:$0xff]  ;;  %v14735_v0 = vld [vmem:[#allocation79_spill] sm:$0xff] }
 0x8d6   : > { %v3710_v1 = vmul.f32 %v14680_v54, %v14733_v7  ;;  %v3757_v32 = vadd.f32 %v3725_v22, %v3500_v51  ;;  %v4111_v37 = vmul.f32 %v14694_v5, %v14734_v20  ;;  %v4591_v50 = vadd.f32 %v4559_v49, %v4398_v26  ;;  %v14736_v20 = vld [vmem:[#allocation586_spill] sm:$0xff]  ;;  %v12108_v49 = vld [vmem:[#allocation2 + $0x122] sm:$0xff] }
 0x8d7   : > { %v5009_v10 = vmul.f32 %v11075_v24, %v14735_v0  ;;  %v5238_v43 = vadd.f32 %v5206_v41, %v5045_v62  ;;  %v5399_v60 = vmul.f32 %v11634_v56, %v5344_v34  ;;  %v12098_v15 = vadd.f32 %v5392_v45, %v5231_v18  ;;  %v14743_v45 = vld [vmem:[#allocation478_spill] sm:$0xff]  ;;  %v14744_v34 = vld [vmem:[#allocation523_spill] sm:$0xff] }
 0x8d8   : > { %v12101_v55 = vadd.f32 %v3470_v3, %v11941_v59  ;;  %v12104_v51 = vadd.f32 %v3705_v52, %v11943_v29  ;;  %v3950_v7 = vadd.f32 %v3918_v36, %v3757_v32  ;;  %v4369_v22 = vmul.f32 %v14698_v61, %v14736_v20  ;;  %v14738_v29 = vld [vmem:[#allocation491_spill] sm:$0xff]  ;;  %v14739_v52 = vld [vmem:[#allocation618_spill] sm:$0xff] }
 0x8d9   : > { %v12111_v26 = vadd.f32 %v3707_v23, %v11950_v12  ;;  %v4784_v62 = vadd.f32 %v4752_v46, %v4591_v50  ;;  %v5202_v9 = vmul.f32 %v11611_v19, %v11442_v63  ;;  %v12115_v41 = vadd.f32 %v5399_v60, %v5238_v43  ;;  %5553 = vperm.xlu1 %6937, %v12093_v57   ;;  %v12125_v12 = vpop.permute.xlu1 %5275  ;;  %v14740_v50 = vld [vmem:[#allocation475_spill] sm:$0xff]  ;;  %v14741_v46 = vld [vmem:[#allocation645_spill] sm:$0xff] }
 0x8da   : > { %v12119_v59 = vadd.f32 %v3473_v4, %v11966_v14  ;;  %v3728_v32 = vmul.f32 %v14680_v54, %v14738_v29  ;;  %v4143_v3 = vadd.f32 %v4111_v37, %v3950_v7  ;;  %v4562_v36 = vmul.f32 %v10879_v30, %v14739_v52  ;;  %v14742_v4 = vld [vmem:[#allocation476_spill] sm:$0xff]  ;;  %v5328_v7 = vpop.permute.xlu2 %5327  ;;  %v14745_v20 = vld [vmem:[#allocation483_spill] sm:$0xff]  ;;  %v14747_v52 = vld [vmem:[#allocation494_spill] sm:$0xff] }
 0x8db   : > { %14737 = vst [vmem:[#allocation594_spill] sm:$0xff] %v12115_v41  ;;  %v3476_v23 = vmul.f32 %v14668_v17, %v14740_v50  ;;  %v12130_v63 = vadd.f32 %v3710_v1, %v11968_v27  ;;  %v5041_v43 = vadd.f32 %v5009_v10, %v4784_v62  ;;  %v5048_v14 = vadd.f32 %v14741_v46, %v11545_v48  ;;  %v14746_v1 = vld [vmem:[#allocation33_spill] sm:$0xff]  ;;  %v14748_v46 = vld [vmem:[#allocation556_spill] sm:$0xff] }
 0x8dc   : > { %5573 = vperm.xlu2 %6936, %v12108_v49   ;;  %v3713_v18 = vmul.f32 %v14680_v54, %v14742_v4  ;;  %v3704_v37 = vmul.f32 %v14680_v54, %v14743_v45  ;;  %v3921_v0 = vmul.f32 %v14689_v35, %v14744_v34  ;;  %v4401_v60 = vadd.f32 %v4369_v22, %v4143_v3  ;;  %v5356_v22 = vpop.permute.xlu0 %5355  ;;  %v12151_v3 = vld [vmem:[#allocation2 + $0x112] sm:$0xff] }
 0x8dd   : > { %v5209_v27 = vmul.f32 %v11611_v19, %v14745_v20  ;;  %v4755_v10 = vmul.f32 %v10921_v25, %v14746_v1  ;;  %v5234_v48 = vadd.f32 %v5202_v9, %v5041_v43  ;;  %v5395_v62 = vmul.f32 %v11634_v56, %v5328_v7  ;;  %14749 = vst [vmem:[#allocation642_spill] sm:$0xff] %v12151_v3  ;;  %v14750_v34 = vld [vmem:[#allocation83_spill] sm:$0xff]  ;;  %v14751_v1 = vld [vmem:[#allocation589_spill] sm:$0xff] }
 0x8de   : > { %v3760_v29 = vadd.f32 %v3728_v32, %v12033_v44  ;;  %v3731_v50 = vmul.f32 %v14680_v54, %v14747_v52  ;;  %v4114_v4 = vmul.f32 %v14694_v5, %v14748_v46  ;;  %v4594_v45 = vadd.f32 %v4562_v36, %v4401_v60  ;;  %v12166_v60 = vld [vmem:[#allocation2 + $0x142] sm:$0xff]  ;;  %v14759_v46 = vld [vmem:[#allocation6_spill] sm:$0xff] }
 0x8df   : > { %v5012_v20 = vmul.f32 %v11075_v24, %v14750_v34  ;;  %v5241_v41 = vadd.f32 %v5209_v27, %v5048_v14  ;;  %v5402_v9 = vmul.f32 %v11634_v56, %v5356_v22  ;;  %v12156_v43 = vadd.f32 %v5395_v62, %v5234_v48  ;;  %14752 = vst [vmem:[#allocation277_spill] sm:$0xff] %v12166_v60  ;;  %v14756_v62 = vld [vmem:[#allocation621_spill] sm:$0xff]  ;;  %v14760_v22 = vld [vmem:[#allocation496_spill] sm:$0xff] }
 0x8e0   : > { %v12159_v44 = vadd.f32 %v3476_v23, %v11980_v42  ;;  %v12162_v32 = vadd.f32 %v3713_v18, %v11983_v2  ;;  %v3953_v7 = vadd.f32 %v3921_v0, %v3760_v29  ;;  %v4372_v36 = vmul.f32 %v14698_v61, %v14751_v1  ;;  %v14754_v42 = vld [vmem:[#allocation479_spill] sm:$0xff]  ;;  %v14755_v23 = vld [vmem:[#allocation481_spill] sm:$0xff] }
 0x8e1   : > { %v12169_v52 = vadd.f32 %v3704_v37, %v11986_v33  ;;  %v4787_v14 = vadd.f32 %v4755_v10, %v4594_v45  ;;  %v5205_v27 = vmul.f32 %v11611_v19, %v11503_v58  ;;  %v12173_v48 = vadd.f32 %v5402_v9, %v5241_v41  ;;  %5568 = vperm.xlu1 %6937, %v12151_v3   ;;  %v12182_v33 = vpop.permute.xlu1 %5287  ;;  %v14758_v37 = vld [vmem:[#allocation486_spill] sm:$0xff] }
 0x8e2   : > { %v3716_v2 = vmul.f32 %v14680_v54, %v14754_v42  ;;  %v3706_v18 = vmul.f32 %v14680_v54, %v14755_v23  ;;  %v4146_v0 = vadd.f32 %v4114_v4, %v3953_v7  ;;  %v4565_v29 = vmul.f32 %v10879_v30, %v14756_v62  ;;  %14757 = vst [vmem:[#allocation519_spill] sm:$0xff] %v12182_v33  ;;  %v14761_v4 = vld [vmem:[#allocation498_spill] sm:$0xff]  ;;  %v14762_v7 = vld [vmem:[#allocation525_spill] sm:$0xff]  ;;  %v5340_v23 = vpop.permute.xlu2 %5339  ;;  %v14763_v62 = vld [vmem:[#allocation499_spill] sm:$0xff] }
 0x8e3   : > { %14753 = vst [vmem:[#allocation354_spill] sm:$0xff] %v12173_v48  ;;  %v5212_v10 = vmul.f32 %v11611_v19, %v14758_v37  ;;  %v3763_v58 = vadd.f32 %v3731_v50, %v12045_v47  ;;  %v5044_v41 = vadd.f32 %v5012_v20, %v4787_v14  ;;  %v5051_v45 = vadd.f32 %v14759_v46, %v11613_v13  ;;  %v14764_v50 = vld [vmem:[#allocation40_spill] sm:$0xff]  ;;  %v14765_v37 = vld [vmem:[#allocation502_spill] sm:$0xff]  ;;  %v14767_v48 = vld [vmem:[#allocation559_spill] sm:$0xff] }
 0x8e4   : > { %5588 = vperm.xlu2 %6936, %v12166_v60   ;;  %v3721_v34 = vmul.f32 %v14680_v54, %v14760_v22  ;;  %v3895_v9 = vmul.f32 %v14689_v35, %v14761_v4  ;;  %v3924_v1 = vmul.f32 %v14689_v35, %v14762_v7  ;;  %v4404_v42 = vadd.f32 %v4372_v36, %v4146_v0  ;;  %v14766_v22 = vld [vmem:[#allocation501_spill] sm:$0xff]  ;;  %v5368_v0 = vpop.permute.xlu0 %5367  ;;  %v12207_v60 = vld [vmem:[#allocation2 + $0x13a] sm:$0xff] }
 0x8e5   : > { %v3724_v47 = vmul.f32 %v14680_v54, %v14763_v62  ;;  %v4758_v20 = vmul.f32 %v10921_v25, %v14764_v50  ;;  %v5237_v13 = vadd.f32 %v5205_v27, %v5044_v41  ;;  %v5398_v14 = vmul.f32 %v11634_v56, %v5340_v23  ;;  %v14768_v62 = vld [vmem:[#allocation555_spill] sm:$0xff] }
 0x8e6   : > { %v3727_v46 = vmul.f32 %v14680_v54, %v14765_v37  ;;  %v3898_v4 = vmul.f32 %v14689_v35, %v14766_v22  ;;  %v4117_v7 = vmul.f32 %v14694_v5, %v14767_v48  ;;  %v4597_v36 = vadd.f32 %v4565_v29, %v4404_v42  ;;  %v14769_v42 = vld [vmem:[#allocation592_spill] sm:$0xff] }
 0x8e7   : > { %v5015_v3 = vmul.f32 %v11075_v24, %v14768_v62  ;;  %v5244_v50 = vadd.f32 %v5212_v10, %v5051_v45  ;;  %v5405_v27 = vmul.f32 %v11634_v56, %v5368_v0  ;;  %v12212_v41 = vadd.f32 %v5398_v14, %v5237_v13 }
 0x8e8   : > { %v12215_v23 = vadd.f32 %v3716_v2, %v11993_v11  ;;  %v12218_v37 = vadd.f32 %v3706_v18, %v12001_v39  ;;  %v3753_v48 = vadd.f32 %v3721_v34, %v12048_v8  ;;  %v3956_v29 = vadd.f32 %v3924_v1, %v3763_v58  ;;  %v14771_v8 = vld [vmem:[#allocation527_spill] sm:$0xff]  ;;  %v14772_v1 = vld [vmem:[#allocation624_spill] sm:$0xff] }
 0x8e9   : > { %v4375_v22 = vmul.f32 %v14698_v61, %v14769_v42  ;;  %v4790_v33 = vadd.f32 %v4758_v20, %v4597_v36  ;;  %v5208_v10 = vmul.f32 %v11611_v19, %v11568_v16  ;;  %v12225_v45 = vadd.f32 %v5405_v27, %v5244_v50  ;;  %5583 = vperm.xlu1 %6937, %v12207_v60   ;;  %v12235_v58 = vpop.permute.xlu1 %5299  ;;  %v14777_v36 = vld [vmem:[#allocation44_spill] sm:$0xff]  ;;  %v14779_v27 = vld [vmem:[#allocation529_spill] sm:$0xff] }
 0x8ea   : > { %v3756_v11 = vadd.f32 %v3724_v47, %v12063_v28  ;;  %v3927_v2 = vadd.f32 %v3895_v9, %v12055_v38  ;;  %v12231_v39 = vadd.f32 %v3898_v4, %v12104_v51  ;;  %v3914_v18 = vmul.f32 %v14689_v35, %v14771_v8  ;;  %v14773_v28 = vld [vmem:[#allocation505_spill] sm:$0xff]  ;;  %v14774_v51 = vld [vmem:[#allocation504_spill] sm:$0xff]  ;;  %v14775_v47 = vld [vmem:[#allocation507_spill] sm:$0xff] }
 0x8eb   : > { %14770 = vst [vmem:[#allocation620_spill] sm:$0xff] %v12225_v45  ;;  %v12238_v34 = vadd.f32 %v3727_v46, %v12101_v55  ;;  %v4149_v16 = vadd.f32 %v4117_v7, %v3956_v29  ;;  %v4568_v20 = vmul.f32 %v10879_v30, %v14772_v1  ;;  %v5047_v13 = vadd.f32 %v5015_v3, %v4790_v33  ;;  %v14776_v4 = vld [vmem:[#allocation560_spill] sm:$0xff]  ;;  %v5352_v46 = vpop.permute.xlu2 %5351  ;;  %v14780_v42 = vld [vmem:[#allocation593_spill] sm:$0xff]  ;;  %v14814_v45 = vld [vmem:[#allocation82_spill] sm:$0xff] }
 0x8ec   : > { %5603 = vperm.xlu2 %6936, %v11807_v6   ;;  %v3730_v38 = vmul.f32 %v14680_v54, %v14773_v28  ;;  %v3900_v9 = vmul.f32 %v14689_v35, %v14774_v51  ;;  %v3903_v14 = vmul.f32 %v14689_v35, %v14775_v47  ;;  %v4107_v55 = vmul.f32 %v14694_v5, %v14776_v4  ;;  %v14778_v33 = vld [vmem:[#allocation508_spill] sm:$0xff]  ;;  %v14781_v28 = vld [vmem:[#allocation510_spill] sm:$0xff] }
 0x8ed   : > { %v4407_v7 = vadd.f32 %v4375_v22, %v4149_v16  ;;  %v4761_v0 = vmul.f32 %v10921_v25, %v14777_v36  ;;  %v5240_v3 = vadd.f32 %v5208_v10, %v5047_v13  ;;  %v5401_v6 = vmul.f32 %v11634_v56, %v5352_v46  ;;  %v12260_v1 = vld [vmem:[#allocation2 + $0x15a] sm:$0xff]  ;;  %v14784_v46 = vld [vmem:[#allocation625_spill] sm:$0xff] }
 0x8ee   : > { %v3733_v62 = vmul.f32 %v14680_v54, %v14778_v33  ;;  %v3946_v50 = vadd.f32 %v3914_v18, %v3753_v48  ;;  %v4088_v29 = vmul.f32 %v14694_v5, %v14779_v27  ;;  %v4365_v8 = vmul.f32 %v14698_v61, %v14780_v42  ;;  %v14782_v51 = vld [vmem:[#allocation316_spill] sm:$0xff]  ;;  %v14783_v18 = vld [vmem:[#allocation562_spill] sm:$0xff] }
 0x8ef   : > { %v3906_v22 = vmul.f32 %v14689_v35, %v14781_v28  ;;  %v4600_v16 = vadd.f32 %v4568_v20, %v4407_v7  ;;  %v5018_v10 = vmul.f32 %v11075_v24, %v14782_v51  ;;  %v12266_v13 = vadd.f32 %v5401_v6, %v5240_v3  ;;  %v12275_v33 = vld [vmem:[#allocation2 + $0x18a] sm:$0xff] }
 0x8f0   : > { %v12269_v47 = vadd.f32 %v3900_v9, %v12111_v26  ;;  %v4139_v48 = vadd.f32 %v4107_v55, %v3946_v50  ;;  %v4346_v4 = vmul.f32 %v14698_v61, %v14783_v18  ;;  %v4558_v36 = vmul.f32 %v10879_v30, %v14784_v46  ;;  %v14785_v9 = vld [vmem:[#allocation530_spill] sm:$0xff]  ;;  %v14786_v50 = vld [vmem:[#allocation595_spill] sm:$0xff] }
 0x8f1   : > { %v12278_v27 = vadd.f32 %v3730_v38, %v12119_v59  ;;  %v12281_v20 = vadd.f32 %v3903_v14, %v12130_v63  ;;  %v4793_v7 = vadd.f32 %v4761_v0, %v4600_v16  ;;  %v5211_v26 = vmul.f32 %v11611_v19, %v11636_v40  ;;  %5598 = vperm.xlu1 %6937, %v12260_v1   ;;  %v12290_v28 = vpop.permute.xlu1 %5311  ;;  %v14787_v38 = vld [vmem:[#allocation60_spill] sm:$0xff]  ;;  %v14788_v0 = vld [vmem:[#allocation511_spill] sm:$0xff] }
 0x8f2   : > { %v3917_v55 = vmul.f32 %v14689_v35, %v14785_v9  ;;  %v4120_v3 = vadd.f32 %v4088_v29, %v3927_v2  ;;  %v4397_v6 = vadd.f32 %v4365_v8, %v4139_v48  ;;  %v4539_v42 = vmul.f32 %v10879_v30, %v14786_v50  ;;  %v14789_v29 = vld [vmem:[#allocation563_spill] sm:$0xff]  ;;  %v14793_v50 = vld [vmem:[#allocation596_spill] sm:$0xff] }
 0x8f3   : > { %v12293_v59 = vadd.f32 %v3733_v62, %v12159_v44  ;;  %v12296_v63 = vadd.f32 %v3906_v22, %v12162_v32  ;;  %v4751_v40 = vmul.f32 %v10921_v25, %v14787_v38  ;;  %v5050_v14 = vadd.f32 %v5018_v10, %v4793_v7  ;;  %v5364_v48 = vpop.permute.xlu2 %5363  ;;  %v14790_v44 = vld [vmem:[#allocation627_spill] sm:$0xff]  ;;  %v14791_v32 = vld [vmem:[#allocation86_spill] sm:$0xff]  ;;  %v14792_v7 = vld [vmem:[#allocation532_spill] sm:$0xff] }
 0x8f4   : > { %5618 = vperm.xlu2 %6936, %v12275_v33   ;;  %v3897_v2 = vmul.f32 %v14689_v35, %v14788_v0  ;;  %v4110_v8 = vmul.f32 %v14694_v5, %v14789_v29  ;;  %v4378_v16 = vadd.f32 %v4346_v4, %v4120_v3  ;;  %v4590_v51 = vadd.f32 %v4558_v36, %v4397_v6  ;;  %v12314_v4 = vld [vmem:[#allocation2 + $0x182] sm:$0xff] }
 0x8f5   : > { %v4732_v62 = vmul.f32 %v10921_v25, %v14790_v44  ;;  %v5008_v22 = vmul.f32 %v11075_v24, %v14791_v32  ;;  %v5243_v18 = vadd.f32 %v5211_v26, %v5050_v14  ;;  %v5404_v10 = vmul.f32 %v11634_v56, %v5364_v48  ;;  %v14794_v3 = vld [vmem:[#allocation549_spill] sm:$0xff] }
 0x8f6   : > { %v3949_v46 = vadd.f32 %v3917_v55, %v3756_v11  ;;  %v4091_v9 = vmul.f32 %v14694_v5, %v14792_v7  ;;  %v4368_v38 = vmul.f32 %v14698_v61, %v14793_v50  ;;  %v4571_v0 = vadd.f32 %v4539_v42, %v4378_v16  ;;  %v14795_v14 = vld [vmem:[#allocation533_spill] sm:$0xff]  ;;  %v14798_v7 = vld [vmem:[#allocation87_spill] sm:$0xff] }
 0x8f7   : > { %v4783_v36 = vadd.f32 %v4751_v40, %v4590_v51  ;;  %v4989_v6 = vmul.f32 %v11075_v24, %v14794_v3  ;;  %v5201_v29 = vmul.f32 %v11611_v19, %v11680_v53  ;;  %v12320_v26 = vadd.f32 %v5404_v10, %v5243_v18  ;;  %v14796_v48 = vld [vmem:[#allocation565_spill] sm:$0xff] }
 0x8f8   : > { %v3920_v11 = vmul.f32 %v14689_v35, %v14795_v14  ;;  %v4142_v55 = vadd.f32 %v4110_v8, %v3949_v46  ;;  %v4349_v44 = vmul.f32 %v14698_v61, %v14796_v48  ;;  %v14797_v32 = vld [vmem:[#allocation629_spill] sm:$0xff]  ;;  %v12329_v40 = vadd.f32 %v3897_v2, %v12169_v52  ;;  %v14799_v8 = vld [vmem:[#allocation598_spill] sm:$0xff]  ;;  %v14801_v2 = vld [vmem:[#allocation348_spill] sm:$0xff] }
 0x8f9   : > { %v4561_v42 = vmul.f32 %v10879_v30, %v14797_v32  ;;  %v4764_v16 = vadd.f32 %v4732_v62, %v4571_v0  ;;  %v5040_v51 = vadd.f32 %v5008_v22, %v4783_v36  ;;  %v5182_v53 = vmul.f32 %v11611_v19, %v14798_v7  ;;  %5613 = vperm.xlu1 %6937, %v12314_v4   ;;  %v14800_v50 = vld [vmem:[#allocation61_spill] sm:$0xff]  ;;  %v5324_v14 = vpop.permute.xlu1 %5323  ;;  %v14804_v32 = vld [vmem:[#allocation136_spill] sm:$0xff]  ;;  %v14805_v7 = vld [vmem:[#allocation631_spill] sm:$0xff] }
 0x8fa   : > { %v4123_v18 = vadd.f32 %v4091_v9, %v12231_v39  ;;  %v4400_v10 = vadd.f32 %v4368_v38, %v4142_v55  ;;  %v4542_v46 = vmul.f32 %v10879_v30, %v14799_v8  ;;  %v4754_v3 = vmul.f32 %v10921_v25, %v14800_v50  ;;  %v14803_v39 = vld [vmem:[#allocation566_spill] sm:$0xff] }
 0x8fb   : > { %v5021_v48 = vadd.f32 %v4989_v6, %v4764_v16  ;;  %v5233_v52 = vadd.f32 %v5201_v29, %v5040_v51  ;;  %v5375_v62 = vmul.f32 %v11634_v56, %v14801_v2  ;;  %v5394_v22 = vmul.f32 %v11634_v56, %v5324_v14  ;;  %v14806_v29 = vld [vmem:[#allocation265_spill] sm:$0xff]  ;;  %v5474_v50 = vpop.permute.xlu2 %5473  ;;  %v14807_v14 = vld [vmem:[#allocation535_spill] sm:$0xff] }
 0x8fc   : > { %v14802_v0 = vmov 1   ;;  %v3952_v36 = vadd.f32 %v3920_v11, %v12238_v34  ;;  %v4113_v9 = vmul.f32 %v14694_v5, %v14803_v39  ;;  %v4381_v38 = vadd.f32 %v4349_v44, %v4123_v18  ;;  %v14808_v11 = vld [vmem:[#allocation599_spill] sm:$0xff]  ;;  %v12357_v18 = vld [vmem:[#allocation2 + $0x1a2] sm:$0xff] }
 0x8fd   : > { %6939 = vset.pattern.permute.xlu2 %v14802_v0  ;;  %v4593_v55 = vadd.f32 %v4561_v42, %v4400_v10  ;;  %v4735_v6 = vmul.f32 %v10921_v25, %v14805_v7  ;;  %v5011_v16 = vmul.f32 %v11075_v24, %v14806_v29  ;;  %v5214_v51 = vadd.f32 %v5182_v53, %v5021_v48  ;;  %v14809_v10 = vld [vmem:[#allocation67_spill] sm:$0xff]  ;;  %v14810_v48 = vld [vmem:[#allocation94_spill] sm:$0xff] }
 0x8fe   : > { %5697 = vperm.xlu2 %6939, %v14804_v32   ;;  %v12351_v8 = vadd.f32 %v5394_v22, %v5233_v52  ;;  %v4093_v34 = vmul.f32 %v14694_v5, %v14807_v14  ;;  %v4371_v2 = vmul.f32 %v14698_v61, %v14808_v11  ;;  %v4574_v44 = vadd.f32 %v4542_v46, %v4381_v38  ;;  %v14811_v22 = vld [vmem:[#allocation536_spill] sm:$0xff]  ;;  %v14813_v46 = vld [vmem:[#allocation634_spill] sm:$0xff] }
 0x8ff   : > { %v4786_v42 = vadd.f32 %v4754_v3, %v4593_v55  ;;  %v4992_v39 = vmul.f32 %v11075_v24, %v14809_v10  ;;  %v5204_v32 = vmul.f32 %v11611_v19, %v11745_v21  ;;  %v5407_v53 = vadd.f32 %v5375_v62, %v5214_v51  ;;  %v14812_v14 = vld [vmem:[#allocation568_spill] sm:$0xff] }
 0x900   : > { %v5632_v52 = vmul.f32 %v14810_v48, %v5474_v50  ;;  %v3923_v7 = vmul.f32 %v14689_v35, %v14811_v22  ;;  %v4145_v29 = vadd.f32 %v4113_v9, %v3952_v36  ;;  %v4351_v11 = vmul.f32 %v14698_v61, %v14812_v14  ;;  %v14815_v50 = vld [vmem:[#allocation601_spill] sm:$0xff]  ;;  %v14816_v9 = vld [vmem:[#allocation72_spill] sm:$0xff] }
 0x901   : > { %v4564_v3 = vmul.f32 %v10879_v30, %v14813_v46  ;;  %v4767_v38 = vadd.f32 %v4735_v6, %v4574_v44  ;;  %v5043_v55 = vadd.f32 %v5011_v16, %v4786_v42  ;;  %v5185_v10 = vmul.f32 %v11611_v19, %v14814_v45  ;;  %5628 = vperm.xlu1 %6937, %v12357_v18   ;;  %v5336_v14 = vpop.permute.xlu1 %5335  ;;  %v14817_v16 = vld [vmem:[#allocation17_spill] sm:$0xff] }
 0x902   : > { %v12373_v21 = vadd.f32 %v5632_v52, %v5407_v53  ;;  %v4125_v62 = vadd.f32 %v4093_v34, %v12269_v47  ;;  %v4403_v51 = vadd.f32 %v4371_v2, %v4145_v29  ;;  %v4544_v36 = vmul.f32 %v10879_v30, %v14815_v50  ;;  %v14818_v53 = vld [vmem:[#allocation569_spill] sm:$0xff]  ;;  %v14819_v52 = vld [vmem:[#allocation614_spill] sm:$0xff]  ;;  %v14820_v29 = vld [vmem:[#allocation636_spill] sm:$0xff] }
 0x903   : > { %v4757_v22 = vmul.f32 %v10921_v25, %v14816_v9  ;;  %v5024_v46 = vadd.f32 %v4992_v39, %v4767_v38  ;;  %v5236_v6 = vadd.f32 %v5204_v32, %v5043_v55  ;;  %v5378_v44 = vmul.f32 %v11634_v56, %v14817_v16  ;;  %v14821_v9 = vld [vmem:[#allocation531_spill] sm:$0xff]  ;;  %v5489_v55 = vpop.permute.xlu2 %5488 }
 0x904   : > { %v5397_v45 = vmul.f32 %v11634_v56, %v5336_v14  ;;  %v3955_v42 = vadd.f32 %v3923_v7, %v12278_v27  ;;  %v4116_v47 = vmul.f32 %v14694_v5, %v14818_v53  ;;  %v4383_v34 = vadd.f32 %v4351_v11, %v4125_v62  ;;  %v14823_v14 = vld [vmem:[#allocation538_spill] sm:$0xff] }
 0x905   : > { %v4596_v2 = vadd.f32 %v4564_v3, %v4403_v51  ;;  %v4737_v50 = vmul.f32 %v10921_v25, %v14820_v29  ;;  %v5014_v39 = vmul.f32 %v11075_v24, %v14821_v9  ;;  %v5217_v32 = vadd.f32 %v5185_v10, %v5024_v46  ;;  %v14824_v7 = vld [vmem:[#allocation602_spill] sm:$0xff]  ;;  %v14827_v46 = vld [vmem:[#allocation539_spill] sm:$0xff] }
 0x906   : > { %5709 = vperm.xlu2 %6939, %v14819_v52   ;;  %v12391_v38 = vadd.f32 %v5397_v45, %v5236_v6  ;;  %v4096_v27 = vmul.f32 %v14694_v5, %v14823_v14  ;;  %v4374_v16 = vmul.f32 %v14698_v61, %v14824_v7  ;;  %v4576_v11 = vadd.f32 %v4544_v36, %v4383_v34  ;;  %v14825_v62 = vld [vmem:[#allocation74_spill] sm:$0xff]  ;;  %v14828_v9 = vld [vmem:[#allocation571_spill] sm:$0xff] }
 0x907   : > { %v4789_v3 = vadd.f32 %v4757_v22, %v4596_v2  ;;  %v4994_v51 = vmul.f32 %v11075_v24, %v14825_v62  ;;  %v14826_v53 = vld [vmem:[#allocation298_spill] sm:$0xff]  ;;  %v5410_v29 = vadd.f32 %v5378_v44, %v5217_v32  ;;  %v5635_v10 = vmul.f32 %v14810_v48, %v5489_v55  ;;  %v14830_v2 = vld [vmem:[#allocation292_spill] sm:$0xff] }
 0x908   : > { %14822 = vst [vmem:[#allocation643_spill] sm:$0xff] %v12391_v38  ;;  %v5207_v52 = vmul.f32 %v11611_v19, %v14826_v53  ;;  %v3926_v6 = vmul.f32 %v14689_v35, %v14827_v46  ;;  %v4148_v45 = vadd.f32 %v4116_v47, %v3955_v42  ;;  %v4354_v14 = vmul.f32 %v14698_v61, %v14828_v9  ;;  %v14829_v38 = vld [vmem:[#allocation639_spill] sm:$0xff]  ;;  %v14831_v62 = vld [vmem:[#allocation604_spill] sm:$0xff]  ;;  %v14833_v46 = vld [vmem:[#allocation537_spill] sm:$0xff] }
 0x909   : > { %v4567_v36 = vmul.f32 %v10879_v30, %v14829_v38  ;;  %v4769_v22 = vadd.f32 %v4737_v50, %v4576_v11  ;;  %v5046_v34 = vadd.f32 %v5014_v39, %v4789_v3  ;;  %v5187_v7 = vmul.f32 %v11611_v19, %v14830_v2  ;;  %6940 = vset.pattern.permute.xlu1 %v14802_v0  ;;  %v14832_v47 = vld [vmem:[#allocation75_spill] sm:$0xff]  ;;  %v5348_v50 = vpop.permute.xlu1 %5347  ;;  %v14834_v11 = vld [vmem:[#allocation32_spill] sm:$0xff]  ;;  %v14837_v9 = vld [vmem:[#allocation641_spill] sm:$0xff] }
 0x90a   : > { %v12411_v44 = vadd.f32 %v5635_v10, %v5410_v29  ;;  %v4128_v32 = vadd.f32 %v4096_v27, %v12281_v20  ;;  %v4406_v55 = vadd.f32 %v4374_v16, %v4148_v45  ;;  %v4547_v42 = vmul.f32 %v10879_v30, %v14831_v62  ;;  %5705 = vperm.xlu1 %6940, %v14833_v46   ;;  %v14835_v20 = vld [vmem:[#allocation572_spill] sm:$0xff]  ;;  %v14836_v45 = vld [vmem:[#allocation650_spill] sm:$0xff] }
 0x90b   : > { %v4760_v53 = vmul.f32 %v10921_v25, %v14832_v47  ;;  %v5026_v39 = vadd.f32 %v4994_v51, %v4769_v22  ;;  %v5239_v38 = vadd.f32 %v5207_v52, %v5046_v34  ;;  %v5380_v3 = vmul.f32 %v11634_v56, %v14834_v11  ;;  %v14838_v62 = vld [vmem:[#allocation558_spill] sm:$0xff]  ;;  %v14839_v47 = vld [vmem:[#allocation541_spill] sm:$0xff] }
 0x90c   : > { %v5400_v0 = vmul.f32 %v11634_v56, %v5348_v50  ;;  %v3958_v29 = vadd.f32 %v3926_v6, %v12293_v59  ;;  %v4119_v27 = vmul.f32 %v14694_v5, %v14835_v20  ;;  %v4386_v16 = vadd.f32 %v4354_v14, %v4128_v32  ;;  %v5499_v34 = vpop.permute.xlu2 %5498  ;;  %v14840_v6 = vld [vmem:[#allocation605_spill] sm:$0xff]  ;;  %v14843_v20 = vld [vmem:[#allocation574_spill] sm:$0xff] }
 0x90d   : > { %v4599_v10 = vadd.f32 %v4567_v36, %v4406_v55  ;;  %v4740_v2 = vmul.f32 %v10921_v25, %v14837_v9  ;;  %v5017_v51 = vmul.f32 %v11075_v24, %v14838_v62  ;;  %v5219_v52 = vadd.f32 %v5187_v7, %v5026_v39  ;;  %v14841_v32 = vld [vmem:[#allocation313_spill] sm:$0xff]  ;;  %v14844_v9 = vld [vmem:[#allocation644_spill] sm:$0xff] }
 0x90e   : > { %5717 = vperm.xlu2 %6939, %v14836_v45   ;;  %v12430_v22 = vadd.f32 %v5400_v0, %v5239_v38  ;;  %v4099_v59 = vmul.f32 %v14694_v5, %v14839_v47  ;;  %v4377_v46 = vmul.f32 %v14698_v61, %v14840_v6  ;;  %v4579_v14 = vadd.f32 %v4547_v42, %v4386_v16  ;;  %v14842_v39 = vld [vmem:[#allocation513_spill] sm:$0xff]  ;;  %v14848_v6 = vld [vmem:[#allocation564_spill] sm:$0xff] }
 0x90f   : > { %v4792_v36 = vadd.f32 %v4760_v53, %v4599_v10  ;;  %v4997_v55 = vmul.f32 %v11075_v24, %v14841_v32  ;;  %v5210_v50 = vmul.f32 %v11611_v19, %v11866_v31  ;;  %v5412_v11 = vadd.f32 %v5380_v3, %v5219_v52  ;;  %v14845_v10 = vld [vmem:[#allocation106_spill] sm:$0xff]  ;;  %v14846_v52 = vld [vmem:[#allocation607_spill] sm:$0xff] }
 0x910   : > { %v5637_v7 = vmul.f32 %v14810_v48, %v5499_v34  ;;  %v3909_v38 = vmul.f32 %v14689_v35, %v14842_v39  ;;  %v4151_v0 = vadd.f32 %v4119_v27, %v3958_v29  ;;  %v4357_v45 = vmul.f32 %v14698_v61, %v14843_v20  ;;  %v14847_v29 = vld [vmem:[#allocation579_spill] sm:$0xff]  ;;  %v14852_v20 = vld [vmem:[#allocation646_spill] sm:$0xff] }
 0x911   : > { %v4570_v42 = vmul.f32 %v10879_v30, %v14844_v9  ;;  %v4772_v53 = vadd.f32 %v4740_v2, %v4579_v14  ;;  %v5049_v16 = vadd.f32 %v5017_v51, %v4792_v36  ;;  %v5190_v62 = vmul.f32 %v11611_v19, %v14845_v10  ;;  %v5360_v32 = vpop.permute.xlu1 %5359  ;;  %v14849_v51 = vld [vmem:[#allocation637_spill] sm:$0xff] }
 0x912   : > { %v12449_v47 = vadd.f32 %v5637_v7, %v5412_v11  ;;  %v4131_v31 = vadd.f32 %v4099_v59, %v12296_v63  ;;  %v4409_v3 = vadd.f32 %v4377_v46, %v4151_v0  ;;  %v4550_v34 = vmul.f32 %v10879_v30, %v14846_v52  ;;  %5713 = vperm.xlu1 %6940, %v14848_v6   ;;  %v14850_v63 = vld [vmem:[#allocation542_spill] sm:$0xff]  ;;  %v14851_v0 = vld [vmem:[#allocation325_spill] sm:$0xff]  ;;  %v14855_v52 = vld [vmem:[#allocation544_spill] sm:$0xff] }
 0x913   : > { %v4763_v27 = vmul.f32 %v10921_v25, %v14847_v29  ;;  %v5029_v39 = vadd.f32 %v4997_v55, %v4772_v53  ;;  %v5242_v2 = vadd.f32 %v5210_v50, %v5049_v16  ;;  %v5383_v14 = vmul.f32 %v11634_v56, %v14849_v51  ;;  %v14853_v10 = vld [vmem:[#allocation345_spill] sm:$0xff]  ;;  %v14858_v6 = vld [vmem:[#allocation638_spill] sm:$0xff] }
 0x914   : > { %v5403_v36 = vmul.f32 %v11634_v56, %v5360_v32  ;;  %v3941_v11 = vadd.f32 %v3909_v38, %v12215_v23  ;;  %v4090_v59 = vmul.f32 %v14694_v5, %v14850_v63  ;;  %v4389_v46 = vadd.f32 %v4357_v45, %v4131_v31  ;;  %v5514_v16 = vpop.permute.xlu2 %5513  ;;  %v14856_v38 = vld [vmem:[#allocation575_spill] sm:$0xff]  ;;  %v14857_v31 = vld [vmem:[#allocation70_spill] sm:$0xff]  ;;  %v14860_v63 = vld [vmem:[#allocation577_spill] sm:$0xff] }
 0x915   : > { %v4602_v7 = vadd.f32 %v4570_v42, %v4409_v3  ;;  %v4743_v9 = vmul.f32 %v10921_v25, %v14852_v20  ;;  %v5020_v55 = vmul.f32 %v11075_v24, %v14853_v10  ;;  %v5222_v50 = vadd.f32 %v5190_v62, %v5029_v39  ;;  %v14859_v39 = vld [vmem:[#allocation514_spill] sm:$0xff]  ;;  %v14861_v20 = vld [vmem:[#allocation608_spill] sm:$0xff] }
 0x916   : > { %5729 = vperm.xlu2 %6939, %v14851_v0   ;;  %v12468_v53 = vadd.f32 %v5403_v36, %v5242_v2  ;;  %v4102_v23 = vmul.f32 %v14694_v5, %v14855_v52  ;;  %v4348_v29 = vmul.f32 %v14698_v61, %v14856_v38  ;;  %v4582_v45 = vadd.f32 %v4550_v34, %v4389_v46 }
 0x917   : > { %v4795_v42 = vadd.f32 %v4763_v27, %v4602_v7  ;;  %v5000_v3 = vmul.f32 %v11075_v24, %v14857_v31  ;;  %v5213_v32 = vmul.f32 %v11611_v19, %v14858_v6  ;;  %v5415_v51 = vadd.f32 %v5383_v14, %v5222_v50  ;;  %v14862_v7 = vld [vmem:[#allocation19_spill] sm:$0xff] }
 0x918   : > { %14854 = vst [vmem:[#allocation648_spill] sm:$0xff] %v12468_v53  ;;  %v5640_v62 = vmul.f32 %v14810_v48, %v5514_v16  ;;  %v3899_v2 = vmul.f32 %v14689_v35, %v14859_v39  ;;  %v4122_v36 = vadd.f32 %v4090_v59, %v12329_v40  ;;  %v4360_v0 = vmul.f32 %v14698_v61, %v14860_v63  ;;  %v14864_v16 = vld [vmem:[#allocation609_spill] sm:$0xff]  ;;  %v14865_v31 = vld [vmem:[#allocation651_spill] sm:$0xff]  ;;  %v14866_v59 = vld [vmem:[#allocation274_spill] sm:$0xff] }
 0x919   : > { %v4541_v34 = vmul.f32 %v10879_v30, %v14861_v20  ;;  %v4775_v27 = vadd.f32 %v4743_v9, %v4582_v45  ;;  %v5052_v46 = vadd.f32 %v5020_v55, %v4795_v42  ;;  %v5193_v10 = vmul.f32 %v11611_v19, %v14862_v7  ;;  %v5372_v6 = vpop.permute.xlu1 %5371  ;;  %v14867_v9 = vld [vmem:[#allocation142_spill] sm:$0xff]  ;;  %v14868_v42 = vld [vmem:[#allocation545_spill] sm:$0xff]  ;;  %v14871_v20 = vld [vmem:[#allocation484_spill] sm:$0xff] }
 0x91a   : > { %v12488_v52 = vadd.f32 %v5640_v62, %v5415_v51  ;;  %v4134_v14 = vadd.f32 %v4102_v23, %v3941_v11  ;;  %v4380_v50 = vadd.f32 %v4348_v29, %v4122_v36  ;;  %v4553_v38 = vmul.f32 %v10879_v30, %v14864_v16  ;;  %5725 = vperm.xlu1 %6940, %v14866_v59   ;;  %v14869_v51 = vld [vmem:[#allocation652_spill] sm:$0xff]  ;;  %v14870_v36 = vld [vmem:[#allocation351_spill] sm:$0xff]  ;;  %v14874_v59 = vld [vmem:[#allocation578_spill] sm:$0xff] }
 0x91b   : > { %v4734_v40 = vmul.f32 %v10921_v25, %v14865_v31  ;;  %v5032_v39 = vadd.f32 %v5000_v3, %v4775_v27  ;;  %v5245_v63 = vadd.f32 %v5213_v32, %v5052_v46  ;;  %v5386_v55 = vmul.f32 %v11634_v56, %v14867_v9  ;;  %v14872_v3 = vld [vmem:[#allocation80_spill] sm:$0xff]  ;;  %v14876_v9 = vld [vmem:[#allocation109_spill] sm:$0xff] }
 0x91c   : > { %14863 = vst [vmem:[#allocation381_spill] sm:$0xff] %v12488_v52  ;;  %v5406_v45 = vmul.f32 %v11634_v56, %v5372_v6  ;;  %v4092_v11 = vmul.f32 %v14694_v5, %v14868_v42  ;;  %v4392_v23 = vadd.f32 %v4360_v0, %v4134_v14  ;;  %v4573_v29 = vadd.f32 %v4541_v34, %v4380_v50  ;;  %v14875_v50 = vld [vmem:[#allocation73_spill] sm:$0xff] }
 0x91d   : > { %v4746_v62 = vmul.f32 %v10921_v25, %v14869_v51  ;;  %v3709_v7 = vmul.f32 %v14680_v54, %v14871_v20  ;;  %v4991_v32 = vmul.f32 %v11075_v24, %v14872_v3  ;;  %v5225_v27 = vadd.f32 %v5193_v10, %v5032_v39  ;;  %v5529_v16 = vpop.permute.xlu2 %5528  ;;  %v14877_v10 = vld [vmem:[#allocation139_spill] sm:$0xff]  ;;  %v14878_v39 = vld [vmem:[#allocation9_spill] sm:$0xff]  ;;  %v14879_v20 = vld [vmem:[#allocation610_spill] sm:$0xff] }
 0x91e   : > { %5741 = vperm.xlu2 %6939, %v14870_v36   ;;  %v12507_v46 = vadd.f32 %v5406_v45, %v5245_v63  ;;  %v3931_v31 = vadd.f32 %v3899_v2, %v12218_v37  ;;  %v4350_v0 = vmul.f32 %v14698_v61, %v14874_v59  ;;  %v4585_v34 = vadd.f32 %v4553_v38, %v4392_v23  ;;  %v14880_v38 = vld [vmem:[#allocation295_spill] sm:$0xff]  ;;  %v14881_v23 = vld [vmem:[#allocation252_spill] sm:$0xff] }
 0x91f   : > { %v4766_v14 = vadd.f32 %v4734_v40, %v4573_v29  ;;  %v5003_v6 = vmul.f32 %v11075_v24, %v14875_v50  ;;  %v5184_v42 = vmul.f32 %v11611_v19, %v14876_v9  ;;  %v5418_v51 = vadd.f32 %v5386_v55, %v5225_v27  ;;  %v14883_v55 = vld [vmem:[#allocation358_spill] sm:$0xff]  ;;  %v14884_v27 = vld [vmem:[#allocation57_spill] sm:$0xff] }
 0x920   : > { %14873 = vst [vmem:[#allocation27_spill] sm:$0xff] %v12507_v46  ;;  %v5643_v36 = vmul.f32 %v14810_v48, %v5529_v16  ;;  %v3484_v63 = vadd.f32 %v14878_v39, %v14877_v10  ;;  %v4124_v45 = vadd.f32 %v4092_v11, %v3931_v31  ;;  %v4543_v37 = vmul.f32 %v10879_v30, %v14879_v20  ;;  %v14885_v50 = vld [vmem:[#allocation517_spill] sm:$0xff]  ;;  %v14886_v31 = vld [vmem:[#allocation16_spill] sm:$0xff]  ;;  %v14888_v39 = vld [vmem:[#allocation15_spill] sm:$0xff] }
 0x921   : > { %v4778_v2 = vadd.f32 %v4746_v62, %v4585_v34  ;;  %v5023_v3 = vadd.f32 %v4991_v32, %v4766_v14  ;;  %v5196_v40 = vmul.f32 %v11611_v19, %v14880_v38  ;;  %v5377_v29 = vmul.f32 %v11634_v56, %v14881_v23  ;;  %v14887_v62 = vld [vmem:[#allocation24_spill] sm:$0xff]  ;;  %v14896_v46 = vld [vmem:[#allocation581_spill] sm:$0xff] }
 0x922   : > { %v12525_v59 = vadd.f32 %v5643_v36, %v5418_v51  ;;  %v2815_v16 = vmul.f32 %v14884_v27, %v14883_v55  ;;  %v3902_v9 = vmul.f32 %v14689_v35, %v14885_v50  ;;  %v4382_v11 = vadd.f32 %v4350_v0, %v4124_v45  ;;  %5737 = vperm.xlu1 %6940, %v14887_v62   ;;  %v5484_v51 = vpop.permute.xlu1 %5483  ;;  %v14889_v36 = vld [vmem:[#allocation548_spill] sm:$0xff]  ;;  %v14890_v55 = vld [vmem:[#allocation262_spill] sm:$0xff] }
 0x923   : > { %v4736_v10 = vmul.f32 %v10921_v25, %v14886_v31  ;;  %v3741_v32 = vadd.f32 %v3709_v7, %v3484_v63  ;;  %v5035_v34 = vadd.f32 %v5003_v6, %v4778_v2  ;;  %v5216_v14 = vadd.f32 %v5184_v42, %v5023_v3  ;;  %v14891_v45 = vld [vmem:[#allocation540_spill] sm:$0xff]  ;;  %v14892_v31 = vld [vmem:[#allocation633_spill] sm:$0xff]  ;;  %v14893_v62 = vld [vmem:[#allocation402_spill] sm:$0xff] }
 0x924   : > { %14882 = vst [vmem:[#allocation543_spill] sm:$0xff] %v12525_v59  ;;  %v5389_v20 = vmul.f32 %v11634_v56, %v14888_v39  ;;  %v4095_v38 = vmul.f32 %v14694_v5, %v14889_v36  ;;  %v4575_v23 = vadd.f32 %v4543_v37, %v4382_v11  ;;  %v4993_v50 = vmul.f32 %v11075_v24, %v14890_v55  ;;  %v14894_v6 = vld [vmem:[#allocation421_spill] sm:$0xff]  ;;  %v14895_v42 = vld [vmem:[#allocation259_spill] sm:$0xff] }
 0x925   : > { %v5634_v0 = vmul.f32 %v14810_v48, %v5484_v51  ;;  %v3101_v7 = vadd.f32 %v14893_v62, %v14892_v31  ;;  %v3262_v63 = vmul.f32 %v14895_v42, %v14894_v6  ;;  %v5228_v2 = vadd.f32 %v5196_v40, %v5035_v34  ;;  %v5544_v39 = vpop.permute.xlu2 %5543  ;;  %v14897_v36 = vld [vmem:[#allocation561_spill] sm:$0xff]  ;;  %v14898_v51 = vld [vmem:[#allocation454_spill] sm:$0xff]  ;;  %v14902_v34 = vld [vmem:[#allocation68_spill] sm:$0xff] }
 0x926   : > { %5753 = vperm.xlu2 %6939, %v14891_v45   ;;  %v5409_v3 = vadd.f32 %v5377_v29, %v5216_v14  ;;  %v3934_v59 = vadd.f32 %v3902_v9, %v3741_v32  ;;  %v4353_v37 = vmul.f32 %v14698_v61, %v14896_v46  ;;  %v4768_v11 = vadd.f32 %v4736_v10, %v4575_v23  ;;  %v14899_v40 = vld [vmem:[#allocation613_spill] sm:$0xff]  ;;  %v14900_v32 = vld [vmem:[#allocation328_spill] sm:$0xff]  ;;  %v14901_v10 = vld [vmem:[#allocation391_spill] sm:$0xff] }
 0x927   : > { %v5186_v55 = vmul.f32 %v11611_v19, %v14897_v36  ;;  %v3455_v45 = vmul.f32 %v14668_v17, %v14898_v51  ;;  %v5421_v52 = vadd.f32 %v5389_v20, %v5228_v2  ;;  %v5646_v31 = vmul.f32 %v14810_v48, %v5544_v39  ;;  %v14903_v6 = vld [vmem:[#allocation487_spill] sm:$0xff]  ;;  %v14909_v51 = vld [vmem:[#allocation118_spill] sm:$0xff] }
 0x928   : > { %v12552_v53 = vadd.f32 %v5634_v0, %v5409_v3  ;;  %v4127_v62 = vadd.f32 %v4095_v38, %v3934_v59  ;;  %v4546_v29 = vmul.f32 %v10879_v30, %v14899_v40  ;;  %v5025_v9 = vadd.f32 %v4993_v50, %v4768_v11  ;;  %v14905_v0 = vld [vmem:[#allocation327_spill] sm:$0xff]  ;;  %v14907_v38 = vld [vmem:[#allocation21_spill] sm:$0xff] }
 0x929   : > { %v5379_v46 = vmul.f32 %v11634_v56, %v14900_v32  ;;  %v3072_v14 = vmul.f32 %v14902_v34, %v14901_v10  ;;  %v3294_v23 = vadd.f32 %v3262_v63, %v3101_v7  ;;  %v3712_v36 = vmul.f32 %v14680_v54, %v14903_v6  ;;  %v14906_v2 = vld [vmem:[#allocation55_spill] sm:$0xff]  ;;  %v14908_v11 = vld [vmem:[#allocation301_spill] sm:$0xff]  ;;  %v14910_v32 = vld [vmem:[#allocation424_spill] sm:$0xff] }
 0x92a   : > { %v12563_v20 = vadd.f32 %v5646_v31, %v5421_v52  ;;  %v2625_v3 = vmul.f32 %v14906_v2, %v14905_v0  ;;  %v4385_v59 = vadd.f32 %v4353_v37, %v4127_v62  ;;  %v4739_v39 = vmul.f32 %v10921_v25, %v14907_v38  ;;  %5749 = vperm.xlu1 %6940, %v14908_v11   ;;  %v14911_v10 = vld [vmem:[#allocation520_spill] sm:$0xff]  ;;  %v5494_v31 = vpop.permute.xlu1 %5493  ;;  %v14914_v2 = vld [vmem:[#allocation457_spill] sm:$0xff]  ;;  %v14915_v11 = vld [vmem:[#allocation551_spill] sm:$0xff] }
 0x92b   : > { %v5218_v50 = vadd.f32 %v5186_v55, %v5025_v9  ;;  %v2847_v40 = vadd.f32 %v2815_v16, %v14909_v51  ;;  %v3265_v7 = vmul.f32 %v14895_v42, %v14910_v32  ;;  %v3487_v63 = vadd.f32 %v3455_v45, %v3294_v23  ;;  %v14913_v55 = vld [vmem:[#allocation567_spill] sm:$0xff]  ;;  %v14916_v32 = vld [vmem:[#allocation34_spill] sm:$0xff] }
 0x92c   : > { %14904 = vst [vmem:[#allocation14_spill] sm:$0xff] %v12563_v20  ;;  %v3905_v52 = vmul.f32 %v14689_v35, %v14911_v10  ;;  %v4578_v6 = vadd.f32 %v4546_v29, %v4385_v59  ;;  %v14912_v20 = vld [vmem:[#allocation528_spill] sm:$0xff]  ;;  %v5636_v0 = vmul.f32 %v14810_v48, %v5494_v31  ;;  %v3458_v16 = vmul.f32 %v14668_v17, %v14914_v2  ;;  %v14921_v2 = vld [vmem:[#allocation394_spill] sm:$0xff] }
 0x92d   : > { %v4996_v37 = vmul.f32 %v11075_v24, %v14912_v20  ;;  %v5411_v62 = vadd.f32 %v5379_v46, %v5218_v50  ;;  %v3104_v9 = vadd.f32 %v3072_v14, %v2847_v40  ;;  %v3744_v38 = vadd.f32 %v3712_v36, %v3487_v63  ;;  %v5559_v23 = vpop.permute.xlu2 %5558  ;;  %v14917_v20 = vld [vmem:[#allocation361_spill] sm:$0xff]  ;;  %v14918_v10 = vld [vmem:[#allocation584_spill] sm:$0xff]  ;;  %v14919_v63 = vld [vmem:[#allocation490_spill] sm:$0xff] }
 0x92e   : > { %5765 = vperm.xlu2 %6939, %v14913_v55   ;;  %v4098_v45 = vmul.f32 %v14694_v5, %v14915_v11  ;;  %v4771_v51 = vadd.f32 %v4739_v39, %v4578_v6  ;;  %v5189_v29 = vmul.f32 %v11611_v19, %v14916_v32  ;;  %v5649_v46 = vmul.f32 %v14810_v48, %v5559_v23  ;;  %v14923_v11 = vld [vmem:[#allocation522_spill] sm:$0xff] }
 0x92f   : > { %v12585_v59 = vadd.f32 %v5636_v0, %v5411_v62  ;;  %v2818_v50 = vmul.f32 %v14884_v27, %v14917_v20  ;;  %v3297_v14 = vadd.f32 %v3265_v7, %v3104_v9  ;;  %v3937_v40 = vadd.f32 %v3905_v52, %v3744_v38  ;;  %v14920_v62 = vld [vmem:[#allocation322_spill] sm:$0xff]  ;;  %v14922_v52 = vld [vmem:[#allocation616_spill] sm:$0xff] }
 0x930   : > { %v4356_v36 = vmul.f32 %v14698_v61, %v14918_v10  ;;  %v3715_v31 = vmul.f32 %v14680_v54, %v14919_v63  ;;  %v5028_v55 = vadd.f32 %v4996_v37, %v4771_v51  ;;  %v5382_v39 = vmul.f32 %v11634_v56, %v12125_v12  ;;  %v14924_v51 = vld [vmem:[#allocation427_spill] sm:$0xff]  ;;  %v14926_v20 = vld [vmem:[#allocation554_spill] sm:$0xff] }
 0x931   : > { %v12597_v6 = vadd.f32 %v5649_v46, %v12098_v15  ;;  %v2657_v0 = vadd.f32 %v2625_v3, %v14920_v62  ;;  %v3075_v27 = vmul.f32 %v14902_v34, %v14921_v2  ;;  %v4130_v7 = vadd.f32 %v4098_v45, %v3937_v40  ;;  %v14925_v3 = vld [vmem:[#allocation26_spill] sm:$0xff]  ;;  %v14929_v62 = vld [vmem:[#allocation587_spill] sm:$0xff] }
 0x932   : > { %v4549_v9 = vmul.f32 %v10879_v30, %v14922_v52  ;;  %v3490_v38 = vadd.f32 %v3458_v16, %v3297_v14  ;;  %v3908_v23 = vmul.f32 %v14689_v35, %v14923_v11  ;;  %v5221_v37 = vadd.f32 %v5189_v29, %v5028_v55  ;;  %5761 = vperm.xlu1 %6940, %v12093_v57   ;;  %v5509_v34 = vpop.permute.xlu1 %5508  ;;  %v14927_v57 = vld [vmem:[#allocation460_spill] sm:$0xff]  ;;  %v14931_v52 = vld [vmem:[#allocation115_spill] sm:$0xff] }
 0x933   : > { %v2850_v12 = vadd.f32 %v2818_v50, %v2657_v0  ;;  %v3268_v15 = vmul.f32 %v14895_v42, %v14924_v51  ;;  %v4388_v32 = vadd.f32 %v4356_v36, %v4130_v7  ;;  %v4742_v46 = vmul.f32 %v10921_v25, %v14925_v3  ;;  %v14928_v42 = vld [vmem:[#allocation81_spill] sm:$0xff]  ;;  %v14933_v51 = vld [vmem:[#allocation519_spill] sm:$0xff] }
 0x934   : > { %v3747_v45 = vadd.f32 %v3715_v31, %v3490_v38  ;;  %v4101_v40 = vmul.f32 %v14694_v5, %v14926_v20  ;;  %v5414_v16 = vadd.f32 %v5382_v39, %v5221_v37  ;;  %v5639_v14 = vmul.f32 %v14810_v48, %v5509_v34  ;;  %v14930_v7 = vld [vmem:[#allocation493_spill] sm:$0xff]  ;;  %v14932_v38 = vld [vmem:[#allocation619_spill] sm:$0xff] }
 0x935   : > { %v3107_v29 = vadd.f32 %v3075_v27, %v2850_v12  ;;  %v3461_v50 = vmul.f32 %v14668_v17, %v14927_v57  ;;  %v4581_v10 = vadd.f32 %v4549_v9, %v4388_v32  ;;  %v4999_v36 = vmul.f32 %v11075_v24, %v14928_v42  ;;  %v14938_v57 = vld [vmem:[#allocation289_spill] sm:$0xff] }
 0x936   : > { %5777 = vperm.xlu2 %6939, %v12108_v49   ;;  %v5574_v63 = vpop.permute.xlu2 %5573  ;;  %v3940_v55 = vadd.f32 %v3908_v23, %v3747_v45  ;;  %v4359_v31 = vmul.f32 %v14698_v61, %v14929_v62  ;;  %v12621_v0 = vadd.f32 %v5639_v14, %v5414_v16  ;;  %v3718_v49 = vmul.f32 %v14680_v54, %v14930_v7  ;;  %v14936_v45 = vld [vmem:[#allocation642_spill] sm:$0xff]  ;;  %v14937_v14 = vld [vmem:[#allocation557_spill] sm:$0xff] }
 0x937   : > { %v5652_v39 = vmul.f32 %v14810_v48, %v5574_v63  ;;  %v3300_v2 = vadd.f32 %v3268_v15, %v3107_v29  ;;  %v4774_v27 = vadd.f32 %v4742_v46, %v4581_v10  ;;  %v5192_v17 = vmul.f32 %v11611_v19, %v14931_v52  ;;  %v14934_v15 = vld [vmem:[#allocation524_spill] sm:$0xff]  ;;  %v14935_v46 = vld [vmem:[#allocation35_spill] sm:$0xff]  ;;  %v14939_v42 = vld [vmem:[#allocation277_spill] sm:$0xff] }
 0x938   : > { %v4133_v9 = vadd.f32 %v4101_v40, %v3940_v55  ;;  %v4552_v11 = vmul.f32 %v10879_v30, %v14932_v38  ;;  %v5385_v32 = vmul.f32 %v11634_v56, %v14933_v51  ;;  %v3911_v3 = vmul.f32 %v14689_v35, %v14934_v15  ;;  %v14940_v55 = vld [vmem:[#allocation590_spill] sm:$0xff]  ;;  %v14944_v15 = vld [vmem:[#allocation84_spill] sm:$0xff] }
 0x939   : > { %v12631_v23 = vadd.f32 %v5652_v39, %v12156_v43  ;;  %v3493_v37 = vadd.f32 %v3461_v50, %v3300_v2  ;;  %v5031_v12 = vadd.f32 %v4999_v36, %v4774_v27  ;;  %v4745_v34 = vmul.f32 %v10921_v25, %v14935_v46  ;;  %v14941_v39 = vld [vmem:[#allocation588_spill] sm:$0xff]  ;;  %v14942_v27 = vld [vmem:[#allocation622_spill] sm:$0xff] }
 0x93a   : > { %v4391_v54 = vadd.f32 %v4359_v31, %v4133_v9  ;;  %5773 = vperm.xlu1 %6940, %v14936_v45   ;;  %v5524_v16 = vpop.permute.xlu1 %5523  ;;  %v4104_v43 = vmul.f32 %v14694_v5, %v14937_v14  ;;  %v5002_v50 = vmul.f32 %v11075_v24, %v14938_v57  ;;  %v4362_v62 = vmul.f32 %v14698_v61, %v14940_v55  ;;  %v7147_v46 = vld [vmem:[#allocation2 + $0x16a] sm:$0xff] }
 0x93b   : > { %v3750_v20 = vadd.f32 %v3718_v49, %v3493_v37  ;;  %v5224_v40 = vadd.f32 %v5192_v17, %v5031_v12  ;;  %v5642_v10 = vmul.f32 %v14810_v48, %v5524_v16  ;;  %v5195_v2 = vmul.f32 %v11611_v19, %v14941_v39  ;;  %v14947_v39 = vld [vmem:[#allocation643_spill] sm:$0xff] }
 0x93c   : > { %v4584_v29 = vadd.f32 %v4552_v11, %v4391_v54  ;;  %v4555_v52 = vmul.f32 %v10879_v30, %v14942_v27  ;;  %v5388_v9 = vmul.f32 %v11634_v56, %v12235_v58  ;;  %v14943_v11 = vld [vmem:[#allocation48_spill] sm:$0xff] }
 0x93d   : > { %v5417_v35 = vadd.f32 %v5385_v32, %v5224_v40  ;;  %v3943_v63 = vadd.f32 %v3911_v3, %v3750_v20  ;;  %v4748_v37 = vmul.f32 %v10921_v25, %v14943_v11  ;;  %v5005_v3 = vmul.f32 %v11075_v24, %v14944_v15  ;;  %v7154_v15 = vld [vmem:[#allocation2 + $0x92] sm:$0xff] }
 0x93e   : > { %5789 = vperm.xlu2 %6939, %v14939_v42   ;;  %v5589_v36 = vpop.permute.xlu2 %5588  ;;  %v4777_v31 = vadd.f32 %v4745_v34, %v4584_v29  ;;  %v14945_v34 = vld [vmem:[#allocation632_spill] sm:$0xff]  ;;  %v5391_v40 = vmul.f32 %v11634_v56, %v12290_v28  ;;  %v12691_v28 = vld [vmem:[%s13256_s1 + $0x18] sm:$0x7] }
 0x93f   : > { %v12650_v7 = vadd.f32 %v5642_v10, %v5417_v35  ;;  %v5655_v5 = vmul.f32 %v14810_v48, %v5589_v36  ;;  %v4136_v49 = vadd.f32 %v4104_v43, %v3943_v63  ;;  %v5198_v45 = vmul.f32 %v11611_v19, %v14945_v34  ;;  %v7149_v42 = vld [vmem:[#allocation2 + $0x32] sm:$0xff] }
 0x940   : > { %v5034_v17 = vadd.f32 %v5002_v50, %v4777_v31  ;;  %v7150_v31 = vld [vmem:[#allocation2 + $0x52] sm:$0xff] }
 0x941   : > { %v12658_v38 = vadd.f32 %v5655_v5, %v12212_v41  ;;  %v4394_v61 = vadd.f32 %v4362_v62, %v4136_v49 }
 0x942   : > { %v5227_v12 = vadd.f32 %v5195_v2, %v5034_v17  ;;  %5785 = vperm.xlu1 %6940, %v12207_v60   ;;  %v7152_v17 = vld [vmem:[#allocation2 + $0x6a] sm:$0xff] }
 0x943   : > { %v5539_v51 = vpop.permute.xlu1 %5538  ;;  %v4587_v32 = vadd.f32 %v4555_v52, %v4394_v61 }
 0x944   : > { %v5420_v30 = vadd.f32 %v5388_v9, %v5227_v12  ;;  %v5645_v54 = vmul.f32 %v14810_v48, %v5539_v51  ;;  %v7153_v12 = vld [vmem:[#allocation2 + $0x62] sm:$0xff] }
 0x945   : > { %v4780_v41 = vadd.f32 %v4748_v37, %v4587_v32 }
 0x946   : > { %5801 = vperm.xlu2 %6939, %v7147_v46   ;;  %v5604_v58 = vpop.permute.xlu2 %5603  ;;  %v12668_v20 = vadd.f32 %v5645_v54, %v5420_v30  ;;  %v14949_v46 = vld [vmem:[#allocation381_spill] sm:$0xff] }
 0x947   : > { %v5658_v25 = vmul.f32 %v14810_v48, %v5604_v58  ;;  %v5037_v60 = vadd.f32 %v5005_v3, %v4780_v41  ;;  %v14948_v3 = vld [vmem:[#allocation648_spill] sm:$0xff] }
 0x949   : > { %v12674_v24 = vadd.f32 %v5658_v25, %v12266_v13  ;;  %v5230_v16 = vadd.f32 %v5198_v45, %v5037_v60  ;;  %v7156_v25 = vld [vmem:[#allocation2 + $0xb2] sm:$0xff] }
 0x94a   : > { %5797 = vperm.xlu1 %6940, %v12260_v1   ;;  %v14946_v1 = vmov 2   ;;  %v14950_v60 = vld [vmem:[#allocation27_spill] sm:$0xff] }
 0x94b   : > { %v5554_v14 = vpop.permute.xlu1 %5553  ;;  %v5423_v43 = vadd.f32 %v5391_v40, %v5230_v16 }
 0x94c   : > { %v5648_v29 = vmul.f32 %v14810_v48, %v5554_v14 }
 0x94e   : > { %5813 = vperm.xlu2 %6939, %v12275_v33   ;;  %v5619_v19 = vpop.permute.xlu2 %5618  ;;  %v12679_v57 = vadd.f32 %v5648_v29, %v5423_v43  ;;  %v12694_v33 = vperm.slane %v12691_v28, 1  ;;  %v14951_v43 = vld [vmem:[#allocation543_spill] sm:$0xff] }
 0x94f   : > { %v5661_v50 = vmul.f32 %v14810_v48, %v5619_v19  ;;  %v7157_v19 = vld [vmem:[#allocation2 + $0xaa] sm:$0xff] }
 0x951   : > { %v12683_v10 = vadd.f32 %v5661_v50, %v12320_v26 }
 0x952   : > { %5809 = vperm.xlu1 %6940, %v12314_v4   ;;  %v12699_v4 = vpop.permute.xlu0 %5894 }
 0x953   : > { %v5569_v56 = vpop.permute.xlu1 %5568 }
 0x954   : > { %v5651_v13 = vmul.f32 %v14810_v48, %v5569_v56 }
 0x956   : > { %6942 = vset.pattern.permute.xlu2 %v14946_v1  ;;  %v12697_v26 = vadd.f32 %v5651_v13, %v12351_v8  ;;  %v7158_v13 = vld [vmem:[#allocation2 + $0xda] sm:$0xff] }
 0x957   : > { %5890 = vperm.xlu2 %6942, %v7149_v42  }
 0x958   : > { %v5698_v35 = vpop.permute.xlu2 %5697 }
 0x959   : > { %v5825_v36 = vmul.f32 %v12694_v33, %v5698_v35 }
 0x95a   : > { %5821 = vperm.xlu1 %6940, %v12357_v18   ;;  %v12711_v49 = vpop.permute.xlu0 %5914 }
 0x95b   : > { %v12703_v63 = vadd.f32 %v5825_v36, %v12373_v21  ;;  %v5584_v55 = vpop.permute.xlu1 %5583  ;;  %v7151_v21 = vld [vmem:[#allocation2 + $0x4a] sm:$0xff] }
 0x95c   : > { %v5654_v62 = vmul.f32 %v14810_v48, %v5584_v55  ;;  %v14952_v55 = vld [vmem:[#allocation14_spill] sm:$0xff] }
 0x95e   : > { %v12708_v2 = vadd.f32 %v5654_v62, %v14947_v39 }
 0x95f   : > { %5902 = vperm.xlu2 %6942, %v7150_v31   ;;  %v7159_v31 = vld [vmem:[#allocation2 + $0xca] sm:$0xff] }
 0x960   : > { %v5710_v8 = vpop.permute.xlu2 %5709 }
 0x961   : > { %v5828_v5 = vmul.f32 %v12694_v33, %v5710_v8 }
 0x962   : > { %6943 = vset.pattern.permute.xlu1 %v14946_v1 }
 0x963   : > { %v12714_v27 = vadd.f32 %v5828_v5, %v12411_v44  ;;  %5898 = vperm.xlu1 %6943, %v7151_v21   ;;  %v5599_v18 = vpop.permute.xlu1 %5598  ;;  %v12725_v44 = vpop.permute.xlu0 %5926  ;;  %v7160_v5 = vld [vmem:[#allocation2 + $0xfa] sm:$0xff]  ;;  %v14953_v21 = vld [vmem:[#allocation222_spill] sm:$0xff] }
 0x964   : > { %v5657_v52 = vmul.f32 %v14810_v48, %v5599_v18  ;;  %v5633_v18 = vmul.f32 %v14810_v48, %v14953_v21 }
 0x966   : > { %v12719_v9 = vadd.f32 %v5657_v52, %v12430_v22  ;;  %v12759_v52 = vperm.slane %v12691_v28, 2 }
 0x967   : > { %5910 = vperm.xlu2 %6942, %v7152_v17  }
 0x968   : > { %v5718_v61 = vpop.permute.xlu2 %5717 }
 0x969   : > { %v5830_v11 = vmul.f32 %v12694_v33, %v5718_v61 }
 0x96b   : > { %v12723_v37 = vadd.f32 %v5830_v11, %v12449_v47  ;;  %5906 = vperm.xlu1 %6943, %v7153_v12   ;;  %v5614_v51 = vpop.permute.xlu1 %5613  ;;  %v7155_v47 = vld [vmem:[#allocation2 + $0x82] sm:$0xff]  ;;  %v12736_v45 = vpop.permute.xlu0 %5938  ;;  %v14954_v11 = vld [vmem:[#allocation271_spill] sm:$0xff] }
 0x96c   : > { %v5660_v32 = vmul.f32 %v14810_v48, %v5614_v51  ;;  %v5665_v12 = vadd.f32 %v5633_v18, %v14954_v11 }
 0x96e   : > { %v12729_v30 = vadd.f32 %v5660_v32, %v14948_v3 }
 0x96f   : > { %5922 = vperm.xlu2 %6942, %v7154_v15   ;;  %v14955_v15 = vld [vmem:[#allocation225_spill] sm:$0xff] }
 0x970   : > { %v5730_v22 = vpop.permute.xlu2 %5729  ;;  %v5638_v3 = vmul.f32 %v14810_v48, %v14955_v15 }
 0x971   : > { %v5833_v54 = vmul.f32 %v12694_v33, %v5730_v22  ;;  %v14956_v22 = vld [vmem:[#allocation489_spill] sm:$0xff] }
 0x972   : > { %v5826_v28 = vmul.f32 %v12694_v33, %v14956_v22 }
 0x973   : > { %v12733_v58 = vadd.f32 %v5833_v54, %v14949_v46  ;;  %5918 = vperm.xlu1 %6943, %v7155_v47   ;;  %v5629_v41 = vpop.permute.xlu1 %5628  ;;  %v12746_v42 = vpop.permute.xlu0 %5950  ;;  %v6019_v54 = vmul.f32 %v12759_v52, %v12699_v4  ;;  %v14957_v46 = vld [vmem:[#allocation375_spill] sm:$0xff]  ;;  %v6024_v4 = vmul.f32 %v12759_v52, %v12711_v49 }
 0x974   : > { %v5663_v34 = vmul.f32 %v14810_v48, %v5629_v41  ;;  %v5670_v47 = vadd.f32 %v5638_v3, %v14957_v46  ;;  %v5858_v41 = vadd.f32 %v5826_v28, %v5665_v12  ;;  %v14967_v12 = vld [vmem:[#allocation591_spill] sm:$0xff]  ;;  %v14969_v3 = vld [vmem:[#allocation246_spill] sm:$0xff] }
 0x975   : > { %v5659_v22 = vmul.f32 %v14810_v48, %v14969_v3  ;;  %v14970_v28 = vld [vmem:[#allocation495_spill] sm:$0xff] }
 0x976   : > { %v12739_v40 = vadd.f32 %v5663_v34, %v14950_v60  ;;  %v7162_v60 = vld [vmem:[#allocation2 + $0x122] sm:$0xff] }
 0x977   : > { %5934 = vperm.xlu2 %6942, %v7156_v25  }
 0x978   : > { %v5742_v16 = vpop.permute.xlu2 %5741 }
 0x979   : > { %v5836_v14 = vmul.f32 %v12694_v33, %v5742_v16 }
 0x97b   : > { %v12743_v29 = vadd.f32 %v5836_v14, %v14951_v43  ;;  %5930 = vperm.xlu1 %6943, %v7157_v19   ;;  %v12766_v51 = vpop.permute.xlu0 %5962  ;;  %v14959_v14 = vld [vmem:[#allocation492_spill] sm:$0xff]  ;;  %v6051_v19 = vadd.f32 %v6019_v54, %v5858_v41  ;;  %v5834_v54 = vmul.f32 %v12694_v33, %v14970_v28 }
 0x97c   : > { %v5706_v50 = vpop.permute.xlu1 %5705  ;;  %v5831_v43 = vmul.f32 %v12694_v33, %v14959_v14 }
 0x97d   : > { %v5827_v56 = vmul.f32 %v12694_v33, %v5706_v50 }
 0x97e   : > { %v5863_v18 = vadd.f32 %v5831_v43, %v5670_v47  ;;  %v14971_v47 = vld [vmem:[#allocation249_spill] sm:$0xff]  ;;  %v14974_v43 = vld [vmem:[#allocation503_spill] sm:$0xff] }
 0x97f   : > { %5946 = vperm.xlu2 %6942, %v7158_v13   ;;  %v12749_v35 = vadd.f32 %v5827_v56, %v12552_v53  ;;  %v14960_v56 = vld [vmem:[#allocation231_spill] sm:$0xff]  ;;  %v5662_v41 = vmul.f32 %v14810_v48, %v14971_v47 }
 0x980   : > { %v5754_v1 = vpop.permute.xlu2 %5753  ;;  %v5644_v13 = vmul.f32 %v14810_v48, %v14960_v56  ;;  %v6056_v46 = vadd.f32 %v6024_v4, %v5863_v18  ;;  %v14975_v4 = vld [vmem:[#allocation617_spill] sm:$0xff]  ;;  %v7164_v18 = vld [vmem:[#allocation2 + $0x152] sm:$0xff] }
 0x981   : > { %v5839_v36 = vmul.f32 %v12694_v33, %v5754_v1 }
 0x982   : > { %v6120_v28 = vrot.slane %v6056_v46, 4 }
 0x983   : > { %v12753_v62 = vadd.f32 %v5839_v36, %v14952_v55  ;;  %5942 = vperm.xlu1 %6943, %v7159_v31   ;;  %v14962_v55 = vld [vmem:[#allocation234_spill] sm:$0xff] }
 0x984   : > { %v5714_v39 = vpop.permute.xlu1 %5713  ;;  %v5647_v31 = vmul.f32 %v14810_v48, %v14962_v55 }
 0x985   : > { %v5829_v8 = vmul.f32 %v12694_v33, %v5714_v39  ;;  %v14963_v39 = vld [vmem:[#allocation237_spill] sm:$0xff] }
 0x986   : > { %v5679_v56 = vadd.f32 %v5647_v31, %v14975_v4 }
 0x987   : > { %5958 = vperm.xlu2 %6942, %v7160_v5   ;;  %v12762_v17 = vadd.f32 %v5829_v8, %v12585_v59  ;;  %v7161_v59 = vld [vmem:[#allocation2 + $0xf2] sm:$0xff]  ;;  %v5650_v8 = vmul.f32 %v14810_v48, %v14963_v39 }
 0x988   : > { %v5766_v53 = vpop.permute.xlu2 %5765  ;;  %v14964_v5 = vld [vmem:[#allocation7_spill] sm:$0xff] }
 0x989   : > { %v5842_v61 = vmul.f32 %v12694_v33, %v5766_v53  ;;  %v14965_v53 = vld [vmem:[#allocation240_spill] sm:$0xff] }
 0x98a   : > { %v5653_v49 = vmul.f32 %v14810_v48, %v14965_v53  ;;  %v14977_v53 = vld [vmem:[#allocation405_spill] sm:$0xff] }
 0x98b   : > { %v12769_v32 = vadd.f32 %v5842_v61, %v12597_v6  ;;  %5954 = vperm.xlu1 %6943, %v7161_v59   ;;  %v14958_v6 = vld [vmem:[#allocation228_spill] sm:$0xff]  ;;  %v14966_v61 = vld [vmem:[#allocation243_spill] sm:$0xff]  ;;  %v6115_v59 = vrot.slane %v6051_v19, 4 }
 0x98c   : > { %v5726_v34 = vpop.permute.xlu1 %5725  ;;  %v5641_v16 = vmul.f32 %v14810_v48, %v14958_v6  ;;  %v5656_v11 = vmul.f32 %v14810_v48, %v14966_v61  ;;  %v7163_v6 = vld [vmem:[#allocation2 + $0x112] sm:$0xff]  ;;  %v5685_v61 = vadd.f32 %v5653_v49, %v14977_v53 }
 0x98d   : > { %v5832_v25 = vmul.f32 %v12694_v33, %v5726_v34  ;;  %v14972_v34 = vld [vmem:[#allocation497_spill] sm:$0xff]  ;;  %v6200_v3 = vsel %vm6178_vm2, %v6115_v59, -inf }
 0x98e   : > { %v5673_v21 = vadd.f32 %v5641_v16, %v14964_v5  ;;  %v14973_v16 = vld [vmem:[#allocation500_spill] sm:$0xff]  ;;  %v6030_v5 = vmul.f32 %v12759_v52, %v12736_v45 }
 0x98f   : > { %5970 = vperm.xlu2 %6942, %v7162_v60   ;;  %v12788_v1 = vadd.f32 %v5832_v25, %v12621_v0  ;;  %v5676_v0 = vadd.f32 %v5644_v13, %v14967_v12  ;;  %v5837_v25 = vmul.f32 %v12694_v33, %v14972_v34  ;;  %v6027_v60 = vmul.f32 %v12759_v52, %v12725_v44  ;;  %v14980_v34 = vld [vmem:[#allocation509_spill] sm:$0xff] }
 0x990   : > { %v5778_v50 = vpop.permute.xlu2 %5777  ;;  %v5840_v14 = vmul.f32 %v12694_v33, %v14973_v16  ;;  %v5866_v13 = vadd.f32 %v5834_v54, %v5673_v21  ;;  %v6193_v12 = vsel %vm6178_vm2, %v6051_v19, -inf  ;;  %v14979_v54 = vld [vmem:[#allocation506_spill] sm:$0xff]  ;;  %v5849_v49 = vmul.f32 %v12694_v33, %v14980_v34  ;;  %v14981_v19 = vld [vmem:[#allocation512_spill] sm:$0xff]  ;;  %v14983_v16 = vld [vmem:[#allocation515_spill] sm:$0xff] }
 0x991   : > { %14961 = vst [vmem:[#allocation10_spill] sm:$0xff] %v12788_v1  ;;  %v5845_v36 = vmul.f32 %v12694_v33, %v5778_v50  ;;  %v5843_v50 = vmul.f32 %v12694_v33, %v14974_v43  ;;  %v5869_v39 = vadd.f32 %v5837_v25, %v5676_v0  ;;  %v5846_v47 = vmul.f32 %v12694_v33, %v14979_v54 }
 0x992   : > { %v6059_v21 = vadd.f32 %v6027_v60, %v5866_v13  ;;  %v5852_v59 = vmul.f32 %v12694_v33, %v14981_v19  ;;  %v5872_v25 = vadd.f32 %v5840_v14, %v5679_v56  ;;  %v6263_v60 = vsel %vm6178_vm2, %v6056_v46, -inf  ;;  %v7165_v46 = vld [vmem:[#allocation2 + $0x13a] sm:$0xff] }
 0x993   : > { %v12802_v15 = vadd.f32 %v5845_v36, %v12631_v23  ;;  %v5975_v23 = vpop.permute.xlu0 %5974  ;;  %5966 = vperm.xlu1 %6943, %v7163_v6   ;;  %v14976_v36 = vld [vmem:[#allocation378_spill] sm:$0xff]  ;;  %v6062_v6 = vadd.f32 %v6030_v5, %v5869_v39  ;;  %v5855_v43 = vmul.f32 %v12694_v33, %v14983_v16  ;;  %v6194_v4 = vrot.slane %v6193_v12, 4 }
 0x994   : > { %v5738_v48 = vpop.permute.xlu1 %5737  ;;  %v5682_v55 = vadd.f32 %v5650_v8, %v14976_v36  ;;  %v6033_v8 = vmul.f32 %v12759_v52, %v12746_v42  ;;  %v6036_v42 = vmul.f32 %v12759_v52, %v12766_v51  ;;  %v6201_v13 = vrot.slane %v6200_v3, 4  ;;  %v14984_v39 = vld [vmem:[#allocation594_spill] sm:$0xff] }
 0x995   : > { %14968 = vst [vmem:[#allocation304_spill] sm:$0xff] %v12802_v15  ;;  %v5835_v44 = vmul.f32 %v12694_v33, %v5738_v48  ;;  %v6270_v36 = vsel %vm6178_vm2, %v6120_v28, -inf  ;;  %v5878_v56 = vadd.f32 %v5846_v47, %v5685_v61  ;;  %v5688_v5 = vadd.f32 %v5656_v11, %v14984_v39  ;;  %v14985_v51 = vld [vmem:[#allocation354_spill] sm:$0xff]  ;;  %v7166_v28 = vld [vmem:[#allocation2 + $0x15a] sm:$0xff] }
 0x996   : > { %v5875_v48 = vadd.f32 %v5843_v50, %v5682_v55  ;;  %v6065_v14 = vadd.f32 %v6033_v8, %v5872_v25  ;;  %v6123_v53 = vrot.slane %v6059_v21, 4  ;;  %v6126_v34 = vrot.slane %v6062_v6, 4 }
 0x997   : > { %5986 = vperm.xlu2 %6942, %v7164_v18   ;;  %v12829_v0 = vadd.f32 %v5835_v44, %v12650_v7  ;;  %v6305_v44 = vsel %vm6178_vm2, %v6059_v21, -inf  ;;  %v5691_v18 = vadd.f32 %v5659_v22, %v14985_v51  ;;  %v6195_v61 = vmax.f32 %v6193_v12, %v6194_v4 }
 0x998   : > { %v5790_v31 = vpop.permute.xlu2 %5789  ;;  %v6068_v19 = vadd.f32 %v6036_v42, %v5875_v48  ;;  %v6202_v8 = vmax.f32 %v6200_v3, %v6201_v13  ;;  %v6271_v47 = vrot.slane %v6270_v36, 4  ;;  %v6306_v25 = vrot.slane %v6305_v44, 4 }
 0x999   : > { %14978 = vst [vmem:[#allocation408_spill] sm:$0xff] %v12829_v0  ;;  %v5848_v45 = vmul.f32 %v12694_v33, %v5790_v31  ;;  %v6129_v16 = vrot.slane %v6065_v14, 4  ;;  %v6039_v22 = vmul.f32 %v12759_v52, %v5975_v23  ;;  %v6312_v48 = vsel %vm6178_vm2, %v6123_v53, -inf }
 0x99a   : > { %v12862_v39 = vadd.f32 %v5849_v49, %v5688_v5  ;;  %v6347_v12 = vsel %vm6178_vm2, %v6062_v6, -inf  ;;  %v6354_v3 = vsel %vm6178_vm2, %v6126_v34, -inf  ;;  %v6132_v4 = vrot.slane %v6068_v19, 4  ;;  %v7167_v49 = vld [vmem:[#allocation2 + $0x142] sm:$0xff] }
 0x99b   : > { %v12842_v7 = vadd.f32 %v5848_v45, %v12658_v38  ;;  %5978 = vperm.xlu1 %6943, %v7165_v46   ;;  %v6264_v38 = vrot.slane %v6263_v60, 4  ;;  %v14986_v45 = vld [vmem:[#allocation620_spill] sm:$0xff]  ;;  %v12851_v50 = vpop.permute.xlu0 %5994  ;;  %v12860_v46 = vadd.f32 %v5852_v59, %v5691_v18  ;;  %v6196_v23 = vrot.slane %v6195_v61, 2 }
 0x99c   : > { %v5750_v31 = vpop.permute.xlu1 %5749  ;;  %v5694_v54 = vadd.f32 %v5662_v41, %v14986_v45  ;;  %14988 = vst [vmem:[#allocation597_spill] sm:$0xff] %v12862_v39  ;;  %v6307_v51 = vmax.f32 %v6305_v44, %v6306_v25  ;;  %v6071_v59 = vadd.f32 %v6039_v22, %v5878_v56  ;;  %v6313_v6 = vrot.slane %v6312_v48, 4 }
 0x99d   : > { %14982 = vst [vmem:[#allocation570_spill] sm:$0xff] %v12842_v7  ;;  %v5838_v55 = vmul.f32 %v12694_v33, %v5750_v31  ;;  %v6265_v42 = vmax.f32 %v6263_v60, %v6264_v38  ;;  %v6389_v31 = vsel %vm6178_vm2, %v6065_v14, -inf  ;;  %v6203_v60 = vrot.slane %v6202_v8, 2  ;;  %v7168_v14 = vld [vmem:[#allocation2 + $0x18a] sm:$0xff] }
 0x99e   : > { %v6396_v38 = vsel %vm6178_vm2, %v6129_v16, -inf  ;;  %v12871_v18 = vadd.f32 %v5855_v43, %v5694_v54  ;;  %v6348_v5 = vrot.slane %v6347_v12, 4  ;;  %v6355_v53 = vrot.slane %v6354_v3, 4 }
 0x99f   : > { %5990 = vperm.xlu2 %6942, %v7166_v28   ;;  %v12856_v21 = vadd.f32 %v5838_v55, %v12668_v20  ;;  %v6272_v20 = vmax.f32 %v6270_v36, %v6271_v47  ;;  %v6431_v45 = vsel %vm6178_vm2, %v6068_v19, -inf  ;;  %v6266_v34 = vrot.slane %v6265_v42, 2 }
 0x9a0   : > { %v5802_v11 = vpop.permute.xlu2 %5801  ;;  %v6390_v55 = vrot.slane %v6389_v31, 4  ;;  %v6438_v36 = vsel %vm6178_vm2, %v6132_v4, -inf  ;;  %v6197_v28 = vmax.f32 %v6195_v61, %v6196_v23  ;;  %v6308_v43 = vrot.slane %v6307_v51, 2 }
 0x9a1   : > { %14987 = vst [vmem:[#allocation331_spill] sm:$0xff] %v12856_v21  ;;  %v5851_v41 = vmul.f32 %v12694_v33, %v5802_v11  ;;  %v6273_v56 = vrot.slane %v6272_v20, 2  ;;  %v6397_v54 = vrot.slane %v6396_v38, 4  ;;  %v6432_v25 = vrot.slane %v6431_v45, 4 }
 0x9a2   : > { %v6473_v11 = vsel %vm6178_vm2, %v6071_v59, -inf  ;;  %v6349_v4 = vmax.f32 %v6347_v12, %v6348_v5  ;;  %v6204_v7 = vmax.f32 %v6202_v8, %v6203_v60  ;;  %v6391_v61 = vmax.f32 %v6389_v31, %v6390_v55 }
 0x9a3   : > { %v12867_v13 = vadd.f32 %v5851_v41, %v12674_v24  ;;  %5982 = vperm.xlu1 %6943, %v7167_v49   ;;  %v5999_v16 = vpop.permute.xlu0 %5998  ;;  %v6314_v41 = vmax.f32 %v6312_v48, %v6313_v6  ;;  %v6356_v49 = vmax.f32 %v6354_v3, %v6355_v53  ;;  %v6274_v21 = vmax.f32 %v6272_v20, %v6273_v56 }
 0x9a4   : > { %v5762_v24 = vpop.permute.xlu1 %5761  ;;  %v6309_v39 = vmax.f32 %v6307_v51, %v6308_v43  ;;  %v6474_v0 = vrot.slane %v6473_v11, 4  ;;  %v6045_v15 = vmul.f32 %v12759_v52, %v5999_v16  ;;  %v6198_v1 = vrot.slane %v6197_v28, 1 }
 0x9a5   : > { %v5841_v44 = vmul.f32 %v12694_v33, %v5762_v24  ;;  %v6439_v24 = vrot.slane %v6438_v36, 4  ;;  %v6315_v48 = vrot.slane %v6314_v41, 2  ;;  %v6350_v12 = vrot.slane %v6349_v4, 2 }
 0x9a6   : > { %v6357_v3 = vrot.slane %v6356_v49, 2  ;;  %v6205_v31 = vrot.slane %v6204_v7, 1  ;;  %v6275_v51 = vrot.slane %v6274_v21, 1  ;;  %v6310_v6 = vrot.slane %v6309_v39, 1 }
 0x9a7   : > { %6006 = vperm.xlu2 %6942, %v7168_v14   ;;  %v12878_v19 = vadd.f32 %v5841_v44, %v12679_v57  ;;  %v6267_v14 = vmax.f32 %v6265_v42, %v6266_v34  ;;  %v6398_v57 = vmax.f32 %v6396_v38, %v6397_v54  ;;  %v6433_v44 = vmax.f32 %v6431_v45, %v6432_v25 }
 0x9a8   : > { %v5814_v47 = vpop.permute.xlu2 %5813  ;;  %v6440_v8 = vmax.f32 %v6438_v36, %v6439_v24  ;;  %v6475_v5 = vmax.f32 %v6473_v11, %v6474_v0  ;;  %v6077_v53 = vadd.f32 %v6045_v15, %v12860_v46  ;;  %v6316_v36 = vmax.f32 %v6314_v41, %v6315_v48 }
 0x9a9   : > { %14989 = vst [vmem:[#allocation647_spill] sm:$0xff] %v12878_v19  ;;  %v5854_v22 = vmul.f32 %v12694_v33, %v5814_v47  ;;  %v6135_v19 = vrot.slane %v6071_v59, 4  ;;  %v7169_v47 = vld [vmem:[#allocation2 + $0x182] sm:$0xff]  ;;  %v6268_v60 = vrot.slane %v6267_v14, 1  ;;  %v6399_v38 = vrot.slane %v6398_v57, 2 }
 0x9aa   : > { %v6434_v45 = vrot.slane %v6433_v44, 2  ;;  %v6351_v56 = vmax.f32 %v6349_v4, %v6350_v12  ;;  %v6358_v43 = vmax.f32 %v6356_v49, %v6357_v3  ;;  %v6441_v54 = vrot.slane %v6440_v8, 2 }
 0x9ab   : > { %v12882_v23 = vadd.f32 %v5854_v22, %v12683_v10  ;;  %6002 = vperm.xlu1 %6943, %v7169_v47   ;;  %v6392_v10 = vrot.slane %v6391_v61, 2  ;;  %v6480_v59 = vsel %vm6178_vm2, %v6135_v19, -inf  ;;  %v12891_v25 = vmax.f32 %v6197_v28, %v6198_v1  ;;  %v6011_v49 = vpop.permute.xlu0 %6010  ;;  %v7170_v47 = vld [vmem:[#allocation2 + $0x1a2] sm:$0xff] }
 0x9ac   : > { %v5774_v42 = vpop.permute.xlu1 %5773  ;;  %v12893_v16 = vmax.f32 %v6204_v7, %v6205_v31  ;;  %v12895_v22 = vmax.f32 %v6267_v14, %v6268_v60  ;;  %v6476_v15 = vrot.slane %v6475_v5, 2  ;;  %v6481_v46 = vrot.slane %v6480_v59, 4 }
 0x9ad   : > { %v5844_v20 = vmul.f32 %v12694_v33, %v5774_v42  ;;  %v6393_v0 = vmax.f32 %v6391_v61, %v6392_v10  ;;  %v6141_v11 = vrot.slane %v6077_v53, 4  ;;  %v6557_v19 = vsel %vm6178_vm2, %v6077_v53, -inf }
 0x9ae   : > { %v12898_v24 = vmax.f32 %v6274_v21, %v6275_v51  ;;  %v6400_v41 = vmax.f32 %v6398_v57, %v6399_v38  ;;  %v6435_v4 = vmax.f32 %v6433_v44, %v6434_v45  ;;  %v6317_v1 = vrot.slane %v6316_v36, 1 }
 0x9af   : > { %v12889_v34 = vadd.f32 %v5844_v20, %v12697_v26  ;;  %v12900_v26 = vmax.f32 %v6309_v39, %v6310_v6  ;;  %v6352_v7 = vrot.slane %v6351_v56, 1  ;;  %v6359_v28 = vrot.slane %v6358_v43, 1 }
 0x9b0   : > { %v6442_v14 = vmax.f32 %v6440_v8, %v6441_v54  ;;  %v6394_v61 = vrot.slane %v6393_v0, 1  ;;  %v6044_v12 = vmul.f32 %v12759_v52, %v12851_v50  ;;  %v6558_v3 = vrot.slane %v6557_v19, 4 }
 0x9b1   : > { %v5891_v55 = vpop.permute.xlu2 %5890  ;;  %v6477_v42 = vmax.f32 %v6475_v5, %v6476_v15  ;;  %v6482_v39 = vmax.f32 %v6480_v59, %v6481_v46  ;;  %v6564_v57 = vsel %vm6178_vm2, %v6141_v11, -inf  ;;  %v6048_v44 = vmul.f32 %v12759_v52, %v6011_v49 }
 0x9b2   : > { %v6401_v31 = vrot.slane %v6400_v41, 1  ;;  %v6436_v60 = vrot.slane %v6435_v4, 1  ;;  %v6018_v8 = vmul.f32 %v12759_v52, %v5891_v55  ;;  %v12911_v51 = vmax.f32 %v6316_v36, %v6317_v1 }
 0x9b3   : > { %6014 = vperm.xlu1 %6943, %v7170_v47   ;;  %v6443_v50 = vrot.slane %v6442_v14, 1  ;;  %v6076_v6 = vadd.f32 %v6044_v12, %v12867_v13  ;;  %v12915_v53 = vmax.f32 %v6351_v56, %v6352_v7  ;;  %v12917_v38 = vmax.f32 %v6358_v43, %v6359_v28 }
 0x9b4   : > { %v5786_v48 = vpop.permute.xlu1 %5785  ;;  %v6559_v45 = vmax.f32 %v6557_v19, %v6558_v3  ;;  %v6565_v59 = vrot.slane %v6564_v57, 4  ;;  %v6478_v54 = vrot.slane %v6477_v42, 1  ;;  %v6483_v15 = vrot.slane %v6482_v39, 2 }
 0x9b5   : > { %v5847_v21 = vmul.f32 %v12694_v33, %v5786_v48  ;;  %v12921_v46 = vmax.f32 %v6393_v0, %v6394_v61  ;;  %v12923_v36 = vmax.f32 %v6400_v41, %v6401_v31  ;;  %v12925_v11 = vmax.f32 %v6435_v4, %v6436_v60 }
 0x9b6   : > { %v6050_v13 = vadd.f32 %v6018_v8, %v12703_v63  ;;  %v12928_v56 = vmax.f32 %v6442_v14, %v6443_v50  ;;  %v6140_v43 = vrot.slane %v6076_v6, 4  ;;  %v6560_v1 = vrot.slane %v6559_v45, 2 }
 0x9b7   : > { %v12908_v10 = vadd.f32 %v5847_v21, %v12708_v2  ;;  %v6080_v2 = vadd.f32 %v6048_v44, %v12871_v18  ;;  %v6566_v7 = vmax.f32 %v6564_v57, %v6565_v59  ;;  %v12932_v0 = vmax.f32 %v6477_v42, %v6478_v54 }
 0x9b8   : > { %v12934_v41 = vmax.f32 %v6482_v39, %v6483_v15  ;;  %v6543_v63 = vsel %vm6178_vm2, %v6076_v6, -inf  ;;  %v6114_v14 = vrot.slane %v6050_v13, 4  ;;  %v6550_v21 = vsel %vm6178_vm2, %v6140_v43, -inf }
 0x9b9   : > { %v5903_v20 = vpop.permute.xlu2 %5902  ;;  %14990 = vst [vmem:[#allocation145_spill] sm:$0xff] %v12932_v0  ;;  %v6144_v4 = vrot.slane %v6080_v2, 4  ;;  %v6599_v3 = vsel %vm6178_vm2, %v6080_v2, -inf  ;;  %v12944_v39 = vmax.f32 %v6559_v45, %v6560_v1  ;;  %v6567_v44 = vrot.slane %v6566_v7, 2 }
 0x9ba   : > { %v6021_v5 = vmul.f32 %v12759_v52, %v5903_v20  ;;  %v6179_v31 = vsel %vm6178_vm2, %v6050_v13, -inf  ;;  %v6544_v20 = vrot.slane %v6543_v63, 4  ;;  %v6600_v6 = vrot.slane %v6599_v3, 4 }
 0x9bb   : > { %v6606_v8 = vsel %vm6178_vm2, %v6144_v4, -inf  ;;  %v6186_v59 = vsel %vm6178_vm2, %v6114_v14, -inf  ;;  %v6180_v15 = vrot.slane %v6179_v31, 4 }
 0x9bc   : > { %v6053_v55 = vadd.f32 %v6021_v5, %v12714_v27  ;;  %v5798_v49 = vpop.permute.xlu1 %5797  ;;  %v6551_v5 = vrot.slane %v6550_v21, 4  ;;  %v6545_v1 = vmax.f32 %v6543_v63, %v6544_v20  ;;  %v6601_v0 = vmax.f32 %v6599_v3, %v6600_v6 }
 0x9bd   : > { %v5850_v18 = vmul.f32 %v12694_v33, %v5798_v49  ;;  %v6607_v49 = vrot.slane %v6606_v8, 4 }
 0x9be   : > { %v6117_v19 = vrot.slane %v6053_v55, 4  ;;  %v6221_v47 = vsel %vm6178_vm2, %v6053_v55, -inf }
 0x9bf   : > { %v6222_v27 = vrot.slane %v6221_v47, 4  ;;  %v12939_v48 = vadd.f32 %v5850_v18, %v12719_v9  ;;  %v6187_v18 = vrot.slane %v6186_v59, 4 }
 0x9c0   : > { %v6228_v28 = vsel %vm6178_vm2, %v6117_v19, -inf }
 0x9c1   : > { %v6223_v61 = vmax.f32 %v6221_v47, %v6222_v27  ;;  %v5911_v12 = vpop.permute.xlu2 %5910  ;;  %v6229_v57 = vrot.slane %v6228_v28, 4 }
 0x9c2   : > { %v6023_v42 = vmul.f32 %v12759_v52, %v5911_v12 }
 0x9c3   : > { %v6224_v60 = vrot.slane %v6223_v61, 2  ;;  %v6230_v9 = vmax.f32 %v6228_v28, %v6229_v57  ;;  %v6552_v57 = vmax.f32 %v6550_v21, %v6551_v5  ;;  %v6546_v21 = vrot.slane %v6545_v1, 2 }
 0x9c4   : > { %v6055_v50 = vadd.f32 %v6023_v42, %v12723_v37  ;;  %v5810_v55 = vpop.permute.xlu1 %5809  ;;  %v6181_v42 = vmax.f32 %v6179_v31, %v6180_v15 }
 0x9c5   : > { %v6225_v54 = vmax.f32 %v6223_v61, %v6224_v60  ;;  %v6231_v2 = vrot.slane %v6230_v9, 2  ;;  %v5853_v19 = vmul.f32 %v12694_v33, %v5810_v55  ;;  %v6553_v31 = vrot.slane %v6552_v57, 2 }
 0x9c6   : > { %v6119_v45 = vrot.slane %v6055_v50, 4  ;;  %v6249_v43 = vsel %vm6178_vm2, %v6055_v50, -inf  ;;  %v6182_v5 = vrot.slane %v6181_v42, 2 }
 0x9c7   : > { %v6226_v13 = vrot.slane %v6225_v54, 1  ;;  %v6250_v47 = vrot.slane %v6249_v43, 4  ;;  %v6232_v27 = vmax.f32 %v6230_v9, %v6231_v2  ;;  %v12954_v28 = vadd.f32 %v5853_v19, %v12729_v30 }
 0x9c8   : > { %v6256_v37 = vsel %vm6178_vm2, %v6119_v45, -inf  ;;  %v6608_v9 = vmax.f32 %v6606_v8, %v6607_v49  ;;  %v6188_v2 = vmax.f32 %v6186_v59, %v6187_v18  ;;  %v6485_v30 = vrot.slane %v12934_v41, 1 }
 0x9c9   : > { %v6227_v4 = vmax.f32 %v6225_v54, %v6226_v13  ;;  %v6251_v14 = vmax.f32 %v6249_v43, %v6250_v47  ;;  %v6257_v61 = vrot.slane %v6256_v37, 4  ;;  %v5923_v12 = vpop.permute.xlu2 %5922  ;;  %v6233_v60 = vrot.slane %v6232_v27, 1 }
 0x9ca   : > { %v6026_v50 = vmul.f32 %v12759_v52, %v5923_v12  ;;  %v6568_v43 = vmax.f32 %v6566_v7, %v6567_v44  ;;  %v6562_v59 = vrot.slane %v12944_v39, 1  ;;  %v6609_v49 = vrot.slane %v6608_v9, 2 }
 0x9cb   : > { %v6633_v55 = vmax.f32 %v12891_v25, %v6227_v4  ;;  %v6252_v63 = vrot.slane %v6251_v14, 2  ;;  %v6258_v20 = vmax.f32 %v6256_v37, %v6257_v61  ;;  %v6234_v45 = vmax.f32 %v6232_v27, %v6233_v60 }
 0x9cc   : > { %v6058_v54 = vadd.f32 %v6026_v50, %v12733_v58  ;;  %v5822_v3 = vpop.permute.xlu1 %5821  ;;  %v6602_v58 = vrot.slane %v6601_v0, 2  ;;  %v6189_v18 = vrot.slane %v6188_v2, 2  ;;  %v6183_v60 = vmax.f32 %v6181_v42, %v6182_v5 }
 0x9cd   : > { %v6253_v13 = vmax.f32 %v6251_v14, %v6252_v63  ;;  %v6259_v19 = vrot.slane %v6258_v20, 2  ;;  %v6636_v15 = vmax.f32 %v12893_v16, %v6234_v45  ;;  %v5856_v47 = vmul.f32 %v12694_v33, %v5822_v3 }
 0x9ce   : > { %v6291_v8 = vsel %vm6178_vm2, %v6058_v54, -inf  ;;  %v6122_v37 = vrot.slane %v6058_v54, 4  ;;  %v6569_v16 = vrot.slane %v6568_v43, 1  ;;  %v6547_v14 = vmax.f32 %v6545_v1, %v6546_v21 }
 0x9cf   : > { %v6254_v6 = vrot.slane %v6253_v13, 1  ;;  %v6260_v25 = vmax.f32 %v6258_v20, %v6259_v19  ;;  %v12965_v27 = vadd.f32 %v5856_v47, %v12739_v40  ;;  %v6292_v61 = vrot.slane %v6291_v8, 4 }
 0x9d0   : > { %v6554_v33 = vmax.f32 %v6552_v57, %v6553_v31  ;;  %v12971_v20 = vmax.f32 %v12934_v41, %v6485_v30  ;;  %v12974_v45 = vmax.f32 %v12944_v39, %v6562_v59  ;;  %v12976_v40 = vmax.f32 %v6601_v0, %v6602_v58 }
 0x9d1   : > { %v6255_v7 = vmax.f32 %v6253_v13, %v6254_v6  ;;  %v6261_v44 = vrot.slane %v6260_v25, 1  ;;  %v5935_v4 = vpop.permute.xlu2 %5934  ;;  %v12979_v13 = vmax.f32 %v6608_v9, %v6609_v49  ;;  %v6190_v1 = vmax.f32 %v6188_v2, %v6189_v18 }
 0x9d2   : > { %v6029_v12 = vmul.f32 %v12759_v52, %v5935_v4  ;;  %v6298_v57 = vsel %vm6178_vm2, %v6122_v37, -inf  ;;  %v6548_v42 = vrot.slane %v6547_v14, 1  ;;  %v12985_v30 = vmax.f32 %v6568_v43, %v6569_v16 }
 0x9d3   : > { %v6262_v50 = vmax.f32 %v6260_v25, %v6261_v44  ;;  %v12968_v63 = vmax.f32 %v6633_v55, %v6255_v7  ;;  %v6293_v55 = vmax.f32 %v6291_v8, %v6292_v61  ;;  %v6555_v39 = vrot.slane %v6554_v33, 1 }
 0x9d4   : > { %v6061_v54 = vadd.f32 %v6029_v12, %v12743_v29  ;;  %v6184_v31 = vrot.slane %v6183_v60, 1  ;;  %v6299_v9 = vrot.slane %v6298_v57, 4  ;;  %v6191_v6 = vrot.slane %v6190_v1, 1 }
 0x9d5   : > { %v12981_v19 = vmax.f32 %v6636_v15, %v6262_v50  ;;  %v5899_v5 = vpop.permute.xlu1 %5898  ;;  %v12991_v59 = vmax.f32 %v6547_v14, %v6548_v42  ;;  %v6294_v43 = vrot.slane %v6293_v55, 2  ;;  %v12995_v18 = vmax.f32 %v6554_v33, %v6555_v39 }
 0x9d6   : > { %v6125_v21 = vrot.slane %v6061_v54, 4  ;;  %v6333_v41 = vsel %vm6178_vm2, %v6061_v54, -inf  ;;  %v6020_v15 = vmul.f32 %v12759_v52, %v5899_v5  ;;  %v12997_v7 = vmax.f32 %v6183_v60, %v6184_v31 }
 0x9d7   : > { %v6334_v0 = vrot.slane %v6333_v41, 4  ;;  %v6300_v4 = vmax.f32 %v6298_v57, %v6299_v9  ;;  %v13001_v50 = vmax.f32 %v6190_v1, %v6191_v6 }
 0x9d8   : > { %v6340_v2 = vsel %vm6178_vm2, %v6125_v21, -inf  ;;  %v6052_v58 = vadd.f32 %v6020_v15, %v12749_v35  ;;  %v6295_v35 = vmax.f32 %v6293_v55, %v6294_v43 }
 0x9d9   : > { %v6335_v25 = vmax.f32 %v6333_v41, %v6334_v0  ;;  %v6341_v47 = vrot.slane %v6340_v2, 4  ;;  %v5947_v8 = vpop.permute.xlu2 %5946  ;;  %v6301_v5 = vrot.slane %v6300_v4, 2 }
 0x9da   : > { %v6032_v49 = vmul.f32 %v12759_v52, %v5947_v8  ;;  %v6116_v16 = vrot.slane %v6052_v58, 4  ;;  %v6207_v61 = vsel %vm6178_vm2, %v6052_v58, -inf }
 0x9db   : > { %v6336_v44 = vrot.slane %v6335_v25, 2  ;;  %v6342_v37 = vmax.f32 %v6340_v2, %v6341_v47  ;;  %v6208_v42 = vrot.slane %v6207_v61, 4 }
 0x9dc   : > { %v6064_v12 = vadd.f32 %v6032_v49, %v12753_v62  ;;  %v6214_v21 = vsel %vm6178_vm2, %v6116_v16, -inf }
 0x9dd   : > { %v6337_v14 = vmax.f32 %v6335_v25, %v6336_v44  ;;  %v6343_v54 = vrot.slane %v6342_v37, 2  ;;  %v6209_v31 = vmax.f32 %v6207_v61, %v6208_v42  ;;  %v6215_v57 = vrot.slane %v6214_v21, 4  ;;  %v5907_v0 = vpop.permute.xlu1 %5906 }
 0x9de   : > { %v6128_v33 = vrot.slane %v6064_v12, 4  ;;  %v6375_v60 = vsel %vm6178_vm2, %v6064_v12, -inf  ;;  %v6022_v1 = vmul.f32 %v12759_v52, %v5907_v0  ;;  %v6302_v61 = vmax.f32 %v6300_v4, %v6301_v5 }
 0x9df   : > { %v6338_v41 = vrot.slane %v6337_v14, 1  ;;  %v6344_v39 = vmax.f32 %v6342_v37, %v6343_v54  ;;  %v6376_v9 = vrot.slane %v6375_v60, 4  ;;  %v6210_v55 = vrot.slane %v6209_v31, 2 }
 0x9e0   : > { %v6382_v62 = vsel %vm6178_vm2, %v6128_v33, -inf  ;;  %v6216_v6 = vmax.f32 %v6214_v21, %v6215_v57  ;;  %v6054_v43 = vadd.f32 %v6022_v1, %v12762_v17  ;;  %v6303_v1 = vrot.slane %v6302_v61, 1 }
 0x9e1   : > { %v13007_v2 = vmax.f32 %v6337_v14, %v6338_v41  ;;  %v6345_v15 = vrot.slane %v6344_v39, 1  ;;  %v5959_v25 = vpop.permute.xlu2 %5958  ;;  %v6377_v47 = vmax.f32 %v6375_v60, %v6376_v9  ;;  %v6383_v8 = vrot.slane %v6382_v62, 4 }
 0x9e2   : > { %v6035_v58 = vmul.f32 %v12759_v52, %v5959_v25  ;;  %v6211_v37 = vmax.f32 %v6209_v31, %v6210_v55  ;;  %v6217_v16 = vrot.slane %v6216_v6, 2  ;;  %v6118_v14 = vrot.slane %v6054_v43, 4 }
 0x9e3   : > { %v13011_v49 = vmax.f32 %v6344_v39, %v6345_v15  ;;  %v6384_v12 = vmax.f32 %v6382_v62, %v6383_v8  ;;  %v6235_v54 = vsel %vm6178_vm2, %v6054_v43, -inf  ;;  %v6378_v60 = vrot.slane %v6377_v47, 2 }
 0x9e4   : > { %v6212_v21 = vrot.slane %v6211_v37, 1  ;;  %v6218_v33 = vmax.f32 %v6216_v6, %v6217_v16  ;;  %v6236_v17 = vrot.slane %v6235_v54, 4  ;;  %v6242_v39 = vsel %vm6178_vm2, %v6118_v14, -inf }
 0x9e5   : > { %v6385_v41 = vrot.slane %v6384_v12, 2  ;;  %v6067_v57 = vadd.f32 %v6035_v58, %v12769_v32  ;;  %v6243_v4 = vrot.slane %v6242_v39, 4  ;;  %v5919_v5 = vpop.permute.xlu1 %5918  ;;  %v6296_v62 = vrot.slane %v6295_v35, 1 }
 0x9e6   : > { %v6213_v0 = vmax.f32 %v6211_v37, %v6212_v21  ;;  %v6219_v31 = vrot.slane %v6218_v33, 1  ;;  %v6237_v9 = vmax.f32 %v6235_v54, %v6236_v17  ;;  %v6379_v3 = vmax.f32 %v6377_v47, %v6378_v60 }
 0x9e7   : > { %v6131_v15 = vrot.slane %v6067_v57, 4  ;;  %v6417_v55 = vsel %vm6178_vm2, %v6067_v57, -inf  ;;  %v6244_v43 = vmax.f32 %v6242_v39, %v6243_v4  ;;  %v6386_v14 = vmax.f32 %v6384_v12, %v6385_v41 }
 0x9e8   : > { %v6220_v25 = vmax.f32 %v6218_v33, %v6219_v31  ;;  %v6627_v6 = vmax.f32 %v12997_v7, %v6213_v0  ;;  %v6238_v8 = vrot.slane %v6237_v9, 2  ;;  %v6418_v29 = vrot.slane %v6417_v55, 4  ;;  %v14991_v0 = vld [vmem:[#allocation10_spill] sm:$0xff] }
 0x9e9   : > { %v5971_v16 = vpop.permute.xlu2 %5970  ;;  %v6424_v32 = vsel %vm6178_vm2, %v6131_v15, -inf  ;;  %v6245_v54 = vrot.slane %v6244_v43, 2  ;;  %v13024_v17 = vmax.f32 %v6295_v35, %v6296_v62  ;;  %v6025_v33 = vmul.f32 %v12759_v52, %v5919_v5 }
 0x9ea   : > { %v6630_v58 = vmax.f32 %v13001_v50, %v6220_v25  ;;  %v6239_v37 = vmax.f32 %v6237_v9, %v6238_v8  ;;  %v6425_v21 = vrot.slane %v6424_v32, 4  ;;  %v6419_v42 = vmax.f32 %v6417_v55, %v6418_v29  ;;  %v14992_v50 = vld [vmem:[#allocation304_spill] sm:$0xff] }
 0x9eb   : > { %v6038_v7 = vmul.f32 %v12759_v52, %v5971_v16  ;;  %v13028_v57 = vmax.f32 %v6302_v61, %v6303_v1  ;;  %v6246_v47 = vmax.f32 %v6244_v43, %v6245_v54  ;;  %v6380_v60 = vrot.slane %v6379_v3, 1 }
 0x9ec   : > { %v6240_v39 = vrot.slane %v6239_v37, 1  ;;  %v6426_v12 = vmax.f32 %v6424_v32, %v6425_v21  ;;  %v6420_v41 = vrot.slane %v6419_v42, 2  ;;  %v6057_v31 = vadd.f32 %v6025_v33, %v14991_v0 }
 0x9ed   : > { %v6070_v9 = vadd.f32 %v6038_v7, %v14992_v50  ;;  %v6387_v4 = vrot.slane %v6386_v14, 1  ;;  %v6247_v35 = vrot.slane %v6246_v47, 1  ;;  %v5931_v29 = vpop.permute.xlu1 %5930  ;;  %v13036_v33 = vmax.f32 %v6379_v3, %v6380_v60 }
 0x9ee   : > { %v6241_v15 = vmax.f32 %v6239_v37, %v6240_v39  ;;  %v6427_v62 = vrot.slane %v6426_v12, 2  ;;  %v6421_v5 = vmax.f32 %v6419_v42, %v6420_v41  ;;  %v6121_v55 = vrot.slane %v6057_v31, 4  ;;  %v13041_v42 = vld [vmem:[%s13257_s2] ss:$0 sm:$0xff] }
 0x9ef   : > { %v6277_v61 = vsel %vm6178_vm2, %v6057_v31, -inf  ;;  %v6134_v1 = vrot.slane %v6070_v9, 4  ;;  %v6248_v25 = vmax.f32 %v6246_v47, %v6247_v35  ;;  %v6459_v21 = vsel %vm6178_vm2, %v6070_v9, -inf }
 0x9f0   : > { %v6628_v8 = vmax.f32 %v6627_v6, %v6241_v15  ;;  %v6428_v43 = vmax.f32 %v6426_v12, %v6427_v62  ;;  %v6278_v16 = vrot.slane %v6277_v61, 4  ;;  %v6422_v32 = vrot.slane %v6421_v5, 1 }
 0x9f1   : > { %v6284_v54 = vsel %vm6178_vm2, %v6121_v55, -inf  ;;  %v6466_v37 = vsel %vm6178_vm2, %v6134_v1, -inf  ;;  %v6631_v39 = vmax.f32 %v6630_v58, %v6248_v25  ;;  %v5987_v47 = vpop.permute.xlu2 %5986  ;;  %v13044_v12 = vmax.f32 %v6386_v14, %v6387_v4  ;;  %v14993_v25 = vld [vmem:[#allocation408_spill] sm:$0xff] }
 0x9f2   : > { %v6629_v7 = vmax.f32 %v6628_v8, %v12895_v22  ;;  %v6279_v6 = vmax.f32 %v6277_v61, %v6278_v16  ;;  %v6285_v41 = vrot.slane %v6284_v54, 4  ;;  %v6460_v0 = vrot.slane %v6459_v21, 4 }
 0x9f3   : > { %v6467_v31 = vrot.slane %v6466_v37, 4  ;;  %v6632_v50 = vmax.f32 %v6631_v39, %v12898_v24  ;;  %v13047_v9 = vmax.f32 %v6421_v5, %v6422_v32  ;;  %v6429_v3 = vrot.slane %v6428_v43, 1 }
 0x9f4   : > { %v6280_v60 = vrot.slane %v6279_v6, 2  ;;  %v6286_v15 = vmax.f32 %v6284_v54, %v6285_v41  ;;  %v6461_v35 = vmax.f32 %v6459_v21, %v6460_v0  ;;  %v6028_v55 = vmul.f32 %v12759_v52, %v5931_v29  ;;  %v14994_v21 = vld [vmem:[#allocation597_spill] sm:$0xff] }
 0x9f5   : > { %v6468_v62 = vmax.f32 %v6466_v37, %v6467_v31  ;;  %v6679_v22 = vadd.f32 %v13041_v42, %v6629_v7  ;;  %v6680_v58 = vadd.f32 %v13041_v42, %v6632_v50  ;;  %v6042_v4 = vmul.f32 %v12759_v52, %v5987_v47  ;;  %v5943_v61 = vpop.permute.xlu1 %5942 }
 0x9f6   : > { %v6281_v14 = vmax.f32 %v6279_v6, %v6280_v60  ;;  %v6287_v1 = vrot.slane %v6286_v15, 2  ;;  %v6462_v24 = vrot.slane %v6461_v35, 2  ;;  %v6060_v8 = vadd.f32 %v6028_v55, %v14993_v25 }
 0x9f7   : > { %v6469_v5 = vrot.slane %v6468_v62, 2  ;;  %v6711_v16 = vrot.slane %v6680_v58, 7  ;;  %v13054_v32 = vmax.f32 %v6428_v43, %v6429_v3  ;;  %v6074_v29 = vadd.f32 %v6042_v4, %v14994_v21 }
 0x9f8   : > { %v6282_v54 = vrot.slane %v6281_v14, 1  ;;  %v6288_v37 = vmax.f32 %v6286_v15, %v6287_v1  ;;  %v6463_v7 = vmax.f32 %v6461_v35, %v6462_v24  ;;  %v6124_v6 = vrot.slane %v6060_v8, 4 }
 0x9f9   : > { %v13057_v39 = vmax.f32 %v6468_v62, %v6469_v5  ;;  %v6713_v47 = vsel %vm6712_vm3, %v6711_v16, %v6679_v22  ;;  %v6319_v0 = vsel %vm6178_vm2, %v6060_v8, -inf  ;;  %v6138_v31 = vrot.slane %v6074_v29, 4  ;;  %v5991_v58 = vpop.permute.xlu2 %5990 }
 0x9fa   : > { %v6283_v41 = vmax.f32 %v6281_v14, %v6282_v54  ;;  %v6289_v50 = vrot.slane %v6288_v37, 1  ;;  %v6464_v60 = vrot.slane %v6463_v7, 1  ;;  %v6320_v55 = vrot.slane %v6319_v0, 4  ;;  %v14995_v54 = vld [vmem:[#allocation331_spill] sm:$0xff] }
 0x9fb   : > { %v6031_v43 = vmul.f32 %v12759_v52, %v5943_v61  ;;  %v6326_v15 = vsel %vm6178_vm2, %v6124_v6, -inf  ;;  %v6515_v35 = vsel %vm6178_vm2, %v6074_v29, -inf  ;;  %v6522_v62 = vsel %vm6178_vm2, %v6138_v31, -inf }
 0x9fc   : > { %v6635_v3 = vmax.f32 %v12968_v63, %v6283_v41  ;;  %v6290_v22 = vmax.f32 %v6288_v37, %v6289_v50  ;;  %v13066_v4 = vmax.f32 %v6463_v7, %v6464_v60  ;;  %v6321_v1 = vmax.f32 %v6319_v0, %v6320_v55 }
 0x9fd   : > { %v6327_v5 = vrot.slane %v6326_v15, 4  ;;  %v6516_v25 = vrot.slane %v6515_v35, 4  ;;  %v6523_v61 = vrot.slane %v6522_v62, 4  ;;  %v5955_v8 = vpop.permute.xlu1 %5954  ;;  %v6063_v21 = vadd.f32 %v6031_v43, %v14995_v54 }
 0x9fe   : > { %v6681_v24 = vadd.f32 %v13041_v42, %v6635_v3  ;;  %v6638_v63 = vmax.f32 %v12981_v19, %v6290_v22  ;;  %v6322_v16 = vrot.slane %v6321_v1, 2  ;;  %v6043_v29 = vmul.f32 %v12759_v52, %v5991_v58 }
 0x9ff   : > { %v6328_v37 = vmax.f32 %v6326_v15, %v6327_v5  ;;  %v6517_v7 = vmax.f32 %v6515_v35, %v6516_v25  ;;  %v6524_v41 = vmax.f32 %v6522_v62, %v6523_v61  ;;  %v6127_v50 = vrot.slane %v6063_v21, 4 }
 0xa00   : > { %v6714_v6 = vrot.slane %v6681_v24, 6  ;;  %v6682_v31 = vadd.f32 %v13041_v42, %v6638_v63  ;;  %v6323_v0 = vmax.f32 %v6321_v1, %v6322_v16  ;;  %v6361_v60 = vsel %vm6178_vm2, %v6063_v21, -inf }
 0xa01   : > { %v6329_v3 = vrot.slane %v6328_v37, 2  ;;  %v6518_v44 = vrot.slane %v6517_v7, 2  ;;  %v6525_v19 = vrot.slane %v6524_v41, 2  ;;  %v6362_v43 = vrot.slane %v6361_v60, 4 }
 0xa02   : > { %v6716_v55 = vsel %vm6715_vm4, %v6714_v6, %v6713_v47  ;;  %v6717_v22 = vrot.slane %v6682_v31, 5  ;;  %v6324_v14 = vrot.slane %v6323_v0, 1  ;;  %v6368_v58 = vsel %vm6178_vm2, %v6127_v50, -inf }
 0xa03   : > { %v6330_v24 = vmax.f32 %v6328_v37, %v6329_v3  ;;  %v6519_v15 = vmax.f32 %v6517_v7, %v6518_v44  ;;  %v6526_v35 = vmax.f32 %v6524_v41, %v6525_v19  ;;  %v6369_v62 = vrot.slane %v6368_v58, 4 }
 0xa04   : > { %v13078_v5 = vsel %vm6718_vm5, %v6717_v22, %v6716_v55  ;;  %v6325_v1 = vmax.f32 %v6323_v0, %v6324_v14  ;;  %v6363_v25 = vmax.f32 %v6361_v60, %v6362_v43  ;;  %v6075_v61 = vadd.f32 %v6043_v29, %v12939_v48  ;;  %v6007_v55 = vpop.permute.xlu2 %6006 }
 0xa05   : > { %v6331_v47 = vrot.slane %v6330_v24, 1  ;;  %v6520_v63 = vrot.slane %v6519_v15, 1  ;;  %v6527_v16 = vrot.slane %v6526_v35, 1  ;;  %v6370_v54 = vmax.f32 %v6368_v58, %v6369_v62  ;;  %v13081_v21 = vpop.permute.xlu1 %5966 }
 0xa06   : > { %v6639_v6 = vmax.f32 %v13024_v17, %v6325_v1  ;;  %v6364_v31 = vrot.slane %v6363_v25, 2  ;;  %v6139_v37 = vrot.slane %v6075_v61, 4  ;;  %v6529_v44 = vsel %vm6178_vm2, %v6075_v61, -inf }
 0xa07   : > { %v6332_v7 = vmax.f32 %v6330_v24, %v6331_v47  ;;  %v13085_v41 = vmax.f32 %v6519_v15, %v6520_v63  ;;  %v13087_v50 = vmax.f32 %v6526_v35, %v6527_v16  ;;  %v6371_v14 = vrot.slane %v6370_v54, 2 }
 0xa08   : > { %v6640_v48 = vmax.f32 %v6639_v6, %v12915_v53  ;;  %v6365_v29 = vmax.f32 %v6363_v25, %v6364_v31  ;;  %v6530_v0 = vrot.slane %v6529_v44, 4  ;;  %v6536_v60 = vsel %vm6178_vm2, %v6139_v37, -inf }
 0xa09   : > { %v6642_v3 = vmax.f32 %v13028_v57, %v6332_v7  ;;  %v6663_v17 = vmax.f32 %v13085_v41, %v12991_v59  ;;  %v6666_v19 = vmax.f32 %v13087_v50, %v12995_v18  ;;  %v6372_v22 = vmax.f32 %v6370_v54, %v6371_v14 }
 0xa0a   : > { %v6641_v43 = vmax.f32 %v6640_v48, %v13036_v33  ;;  %v6366_v58 = vrot.slane %v6365_v29, 1  ;;  %v6531_v24 = vmax.f32 %v6529_v44, %v6530_v0  ;;  %v6537_v15 = vrot.slane %v6536_v60, 4  ;;  %v14996_v33 = vld [vmem:[#allocation647_spill] sm:$0xff] }
 0xa0b   : > { %v6643_v53 = vmax.f32 %v6642_v3, %v12917_v38  ;;  %v6373_v35 = vrot.slane %v6372_v22, 1  ;;  %v6034_v62 = vmul.f32 %v12759_v52, %v5955_v8  ;;  %v6047_v1 = vmul.f32 %v12759_v52, %v6007_v55 }
 0xa0c   : > { %v13101_v57 = vadd.f32 %v13041_v42, %v6641_v43  ;;  %v6367_v25 = vmax.f32 %v6365_v29, %v6366_v58  ;;  %v6532_v61 = vrot.slane %v6531_v24, 2  ;;  %v6538_v47 = vmax.f32 %v6536_v60, %v6537_v15 }
 0xa0d   : > { %v6644_v63 = vmax.f32 %v6643_v53, %v13044_v12  ;;  %v6374_v16 = vmax.f32 %v6372_v22, %v6373_v35  ;;  %v6066_v54 = vadd.f32 %v6034_v62, %v14996_v33  ;;  %v6079_v6 = vadd.f32 %v6047_v1, %v12882_v23  ;;  %v5979_v31 = vpop.permute.xlu1 %5978 }
 0xa0e   : > { %v14997_v38 = vrot.slane %v13057_v39, 1  ;;  %v14998_v37 = vmax.f32 %v12900_v26, %v13007_v2  ;;  %v6533_v7 = vmax.f32 %v6531_v24, %v6532_v61  ;;  %v6539_v14 = vrot.slane %v6538_v47, 2 }
 0xa0f   : > { %v13115_v48 = vadd.f32 %v13041_v42, %v6644_v63  ;;  %v14999_v12 = vmax.f32 %v12911_v51, %v13011_v49  ;;  %v6130_v23 = vrot.slane %v6066_v54, 4  ;;  %v6403_v0 = vsel %vm6178_vm2, %v6066_v54, -inf }
 0xa10   : > { %v13109_v8 = vmax.f32 %v13057_v39, %v14997_v38  ;;  %v6646_v44 = vmax.f32 %v14998_v37, %v6367_v25  ;;  %v6534_v39 = vrot.slane %v6533_v7, 1  ;;  %v6540_v55 = vmax.f32 %v6538_v47, %v6539_v14 }
 0xa11   : > { %v6649_v29 = vmax.f32 %v14999_v12, %v6374_v16  ;;  %v6404_v3 = vrot.slane %v6403_v0, 4  ;;  %v6720_v26 = vrot.slane %v13101_v57, 4  ;;  %v6410_v22 = vsel %vm6178_vm2, %v6130_v23, -inf }
 0xa12   : > { %v6647_v60 = vmax.f32 %v6646_v44, %v12921_v46  ;;  %v6143_v43 = vrot.slane %v6079_v6, 4  ;;  %v6723_v58 = vrot.slane %v13115_v48, 3  ;;  %v13126_v24 = vmax.f32 %v6533_v7, %v6534_v39 }
 0xa13   : > { %v6650_v2 = vmax.f32 %v6649_v29, %v12923_v36  ;;  %v6541_v51 = vrot.slane %v6540_v55, 1  ;;  %v6405_v49 = vmax.f32 %v6403_v0, %v6404_v3  ;;  %v6411_v46 = vrot.slane %v6410_v22, 4  ;;  %v15000_v0 = vld [vmem:[#allocation570_spill] sm:$0xff] }
 0xa14   : > { %v13129_v15 = vadd.f32 %v13041_v42, %v6647_v60  ;;  %v6585_v53 = vsel %vm6178_vm2, %v6079_v6, -inf  ;;  %v6592_v35 = vsel %vm6178_vm2, %v6143_v43, -inf  ;;  %v6669_v1 = vmax.f32 %v13126_v24, %v12974_v45 }
 0xa15   : > { %v13134_v62 = vadd.f32 %v13041_v42, %v6650_v2  ;;  %v6542_v36 = vmax.f32 %v6540_v55, %v6541_v51  ;;  %v6406_v25 = vrot.slane %v6405_v49, 2  ;;  %v6412_v61 = vmax.f32 %v6410_v22, %v6411_v46  ;;  %v5983_v33 = vpop.permute.xlu1 %5982 }
 0xa16   : > { %v6586_v47 = vrot.slane %v6585_v53, 4  ;;  %v6593_v63 = vrot.slane %v6592_v35, 4  ;;  %v6037_v16 = vmul.f32 %v12759_v52, %v13081_v21  ;;  %v6040_v38 = vmul.f32 %v12759_v52, %v5979_v31 }
 0xa17   : > { %v6672_v54 = vmax.f32 %v6542_v36, %v12985_v30  ;;  %v6407_v6 = vmax.f32 %v6405_v49, %v6406_v25  ;;  %v6041_v37 = vmul.f32 %v12759_v52, %v5983_v33  ;;  %v6413_v44 = vrot.slane %v6412_v61, 2 }
 0xa18   : > { %v6587_v7 = vmax.f32 %v6585_v53, %v6586_v47  ;;  %v6594_v14 = vmax.f32 %v6592_v35, %v6593_v63  ;;  %v6069_v45 = vadd.f32 %v6037_v16, %v12889_v34  ;;  %v6726_v12 = vrot.slane %v13129_v15, 2 }
 0xa19   : > { %v6408_v29 = vrot.slane %v6407_v6, 1  ;;  %v6072_v23 = vadd.f32 %v6040_v38, %v12908_v10  ;;  %v6073_v21 = vadd.f32 %v6041_v37, %v15000_v0  ;;  %v6414_v60 = vmax.f32 %v6412_v61, %v6413_v44 }
 0xa1a   : > { %v6588_v39 = vrot.slane %v6587_v7, 2  ;;  %v6595_v30 = vrot.slane %v6594_v14, 2  ;;  %v6133_v55 = vrot.slane %v6069_v45, 4  ;;  %v6445_v31 = vsel %vm6178_vm2, %v6069_v45, -inf }
 0xa1b   : > { %v6409_v3 = vmax.f32 %v6407_v6, %v6408_v29  ;;  %v6136_v2 = vrot.slane %v6072_v23, 4  ;;  %v6487_v22 = vsel %vm6178_vm2, %v6072_v23, -inf  ;;  %v6415_v43 = vrot.slane %v6414_v60, 1 }
 0xa1c   : > { %v6589_v34 = vmax.f32 %v6587_v7, %v6588_v39  ;;  %v6596_v24 = vmax.f32 %v6594_v14, %v6595_v30  ;;  %v6446_v51 = vrot.slane %v6445_v31, 4  ;;  %v6452_v10 = vsel %vm6178_vm2, %v6133_v55, -inf }
 0xa1d   : > { %v6651_v49 = vmax.f32 %v6409_v3, %v12925_v11  ;;  %v6488_v46 = vrot.slane %v6487_v22, 4  ;;  %v6494_v53 = vsel %vm6178_vm2, %v6136_v2, -inf  ;;  %v6416_v35 = vmax.f32 %v6414_v60, %v6415_v43  ;;  %v6003_v6 = vpop.permute.xlu1 %6002 }
 0xa1e   : > { %v6590_v36 = vrot.slane %v6589_v34, 1  ;;  %v6597_v25 = vrot.slane %v6596_v24, 1  ;;  %v6447_v61 = vmax.f32 %v6445_v31, %v6446_v51  ;;  %v6453_v47 = vrot.slane %v6452_v10, 4 }
 0xa1f   : > { %v6652_v63 = vmax.f32 %v6651_v49, %v13066_v4  ;;  %v6489_v16 = vmax.f32 %v6487_v22, %v6488_v46  ;;  %v6495_v33 = vrot.slane %v6494_v53, 4  ;;  %v6654_v38 = vmax.f32 %v6416_v35, %v12928_v56 }
 0xa20   : > { %v6591_v37 = vmax.f32 %v6589_v34, %v6590_v36  ;;  %v6598_v44 = vmax.f32 %v6596_v24, %v6597_v25  ;;  %v6448_v11 = vrot.slane %v6447_v61, 2  ;;  %v6454_v7 = vmax.f32 %v6452_v10, %v6453_v47 }
 0xa21   : > { %v6490_v14 = vrot.slane %v6489_v16, 2  ;;  %v6496_v45 = vmax.f32 %v6494_v53, %v6495_v33  ;;  %v6137_v29 = vrot.slane %v6073_v21, 4  ;;  %v6655_v39 = vmax.f32 %v6654_v38, %v13109_v8  ;;  %v15001_v38 = vld [vmem:[#allocation145_spill] sm:$0xff] }
 0xa22   : > { %v13154_v23 = vmax.f32 %v6669_v1, %v6591_v37  ;;  %v13156_v0 = vmax.f32 %v6672_v54, %v6598_v44  ;;  %v6449_v60 = vmax.f32 %v6447_v61, %v6448_v11  ;;  %v6455_v4 = vrot.slane %v6454_v7, 2 }
 0xa23   : > { %v6491_v30 = vmax.f32 %v6489_v16, %v6490_v14  ;;  %v6497_v55 = vrot.slane %v6496_v45, 2  ;;  %v6501_v3 = vsel %vm6178_vm2, %v6073_v21, -inf  ;;  %v6508_v2 = vsel %vm6178_vm2, %v6137_v29, -inf }
 0xa24   : > { %v6450_v56 = vrot.slane %v6449_v60, 1  ;;  %v6502_v31 = vrot.slane %v6501_v3, 4  ;;  %v6046_v22 = vmul.f32 %v12759_v52, %v6003_v6  ;;  %v6456_v43 = vmax.f32 %v6454_v7, %v6455_v4 }
 0xa25   : > { %v6492_v34 = vrot.slane %v6491_v30, 1  ;;  %v6498_v1 = vmax.f32 %v6496_v45, %v6497_v55  ;;  %v6509_v24 = vrot.slane %v6508_v2, 4  ;;  %v6722_v8 = vsel %vm6721_vm6, %v6720_v26, %v13078_v5 }
 0xa26   : > { %v6451_v54 = vmax.f32 %v6449_v60, %v6450_v56  ;;  %v6503_v51 = vmax.f32 %v6501_v3, %v6502_v31  ;;  %v6078_v49 = vadd.f32 %v6046_v22, %v12954_v28  ;;  %v6457_v21 = vrot.slane %v6456_v43, 1  ;;  %v6015_v28 = vpop.permute.xlu1 %6014 }
 0xa27   : > { %v6493_v10 = vmax.f32 %v6491_v30, %v6492_v34  ;;  %v6499_v46 = vrot.slane %v6498_v1, 1  ;;  %v6510_v53 = vmax.f32 %v6508_v2, %v6509_v24  ;;  %v6725_v2 = vsel %vm6724_vm7, %v6723_v58, %v6722_v8 }
 0xa28   : > { %v6657_v35 = vmax.f32 %v13047_v9, %v6451_v54  ;;  %v6504_v36 = vrot.slane %v6503_v51, 2  ;;  %v6142_v25 = vrot.slane %v6078_v49, 4  ;;  %v6571_v61 = vsel %vm6178_vm2, %v6078_v49, -inf }
 0xa29   : > { %v6458_v47 = vmax.f32 %v6456_v43, %v6457_v21  ;;  %v6500_v16 = vmax.f32 %v6498_v1, %v6499_v46  ;;  %v6653_v33 = vmax.f32 %v6652_v63, %v6493_v10  ;;  %v6511_v6 = vrot.slane %v6510_v53, 2 }
 0xa2a   : > { %v6658_v57 = vmax.f32 %v6657_v35, %v15001_v38  ;;  %v6505_v37 = vmax.f32 %v6503_v51, %v6504_v36  ;;  %v6572_v5 = vrot.slane %v6571_v61, 4  ;;  %v6578_v26 = vsel %vm6178_vm2, %v6142_v25, -inf }
 0xa2b   : > { %v6660_v44 = vmax.f32 %v13054_v32, %v6458_v47  ;;  %v6656_v11 = vmax.f32 %v6655_v39, %v6500_v16  ;;  %v6687_v9 = vadd.f32 %v13041_v42, %v6653_v33  ;;  %v6512_v7 = vmax.f32 %v6510_v53, %v6511_v6 }
 0xa2c   : > { %v6506_v14 = vrot.slane %v6505_v37, 1  ;;  %v6573_v45 = vmax.f32 %v6571_v61, %v6572_v5  ;;  %v6579_v29 = vrot.slane %v6578_v26, 4  ;;  %v6049_v63 = vmul.f32 %v12759_v52, %v6015_v28 }
 0xa2d   : > { %v6688_v60 = vadd.f32 %v13041_v42, %v6656_v11  ;;  %v6661_v4 = vmax.f32 %v6660_v44, %v12971_v20  ;;  %v6513_v30 = vrot.slane %v6512_v7, 1  ;;  %v6729_v21 = vrot.slane %v13134_v62, 1 }
 0xa2e   : > { %v6507_v55 = vmax.f32 %v6505_v37, %v6506_v14  ;;  %v6574_v3 = vrot.slane %v6573_v45, 2  ;;  %v6580_v32 = vmax.f32 %v6578_v26, %v6579_v29  ;;  %v6081_v39 = vadd.f32 %v6049_v63, %v12965_v27 }
 0xa2f   : > { %v6732_v56 = vrot.slane %v6688_v60, 7  ;;  %v6514_v31 = vmax.f32 %v6512_v7, %v6513_v30  ;;  %v6728_v27 = vsel %vm6727_vm8, %v6726_v12, %v6725_v2  ;;  %v15002_v15 = vrot.slane %v12976_v40, 1 }
 0xa30   : > { %v6659_v52 = vmax.f32 %v6658_v57, %v6507_v55  ;;  %v6575_v22 = vmax.f32 %v6573_v45, %v6574_v3  ;;  %v6581_v43 = vrot.slane %v6580_v32, 2  ;;  %v6145_v20 = vrot.slane %v6081_v39, 4 }
 0xa31   : > { %v6733_v34 = vsel %vm6712_vm3, %v6732_v56, %v6687_v9  ;;  %v6662_v1 = vmax.f32 %v6661_v4, %v6514_v31  ;;  %v6613_v24 = vsel %vm6178_vm2, %v6081_v39, -inf  ;;  %v6605_v12 = vmax.f32 %v12976_v40, %v15002_v15 }
 0xa32   : > { %v6689_v48 = vadd.f32 %v13041_v42, %v6659_v52  ;;  %v6576_v54 = vrot.slane %v6575_v22, 1  ;;  %v6582_v58 = vmax.f32 %v6580_v32, %v6581_v43  ;;  %v6614_v51 = vrot.slane %v6613_v24, 4 }
 0xa33   : > { %v6690_v49 = vadd.f32 %v13041_v42, %v6662_v1  ;;  %v6620_v8 = vsel %vm6178_vm2, %v6145_v20, -inf  ;;  %v6731_v61 = vsel %vm6730_vm9, %v6729_v21, %v6728_v27  ;;  %v15003_v28 = vrot.slane %v12979_v13, 1 }
 0xa34   : > { %v6734_v10 = vrot.slane %v6689_v48, 6  ;;  %v6577_v46 = vmax.f32 %v6575_v22, %v6576_v54  ;;  %v6583_v53 = vrot.slane %v6582_v58, 1  ;;  %v6615_v35 = vmax.f32 %v6613_v24, %v6614_v51  ;;  %6748 = vst [vmem:[%s13200_s27] sm:$0xff] %v6731_v61 }
 0xa35   : > { %v6736_v36 = vrot.slane %v6690_v49, 5  ;;  %v6621_v25 = vrot.slane %v6620_v8, 4  ;;  %v6612_v38 = vmax.f32 %v12979_v13, %v15003_v28 }
 0xa36   : > { %v6735_v47 = vsel %vm6715_vm4, %v6734_v10, %v6733_v34  ;;  %v6584_v16 = vmax.f32 %v6582_v58, %v6583_v53  ;;  %v6664_v62 = vmax.f32 %v6663_v17, %v6577_v46  ;;  %v6616_v33 = vrot.slane %v6615_v35, 2 }
 0xa37   : > { %v6737_v6 = vsel %vm6718_vm5, %v6736_v36, %v6735_v47  ;;  %v6622_v40 = vmax.f32 %v6620_v8, %v6621_v25 }
 0xa38   : > { %v6665_v57 = vmax.f32 %v6664_v62, %v6605_v12  ;;  %v6667_v37 = vmax.f32 %v6666_v19, %v6584_v16  ;;  %v6617_v59 = vmax.f32 %v6615_v35, %v6616_v33 }
 0xa39   : > { %v6623_v41 = vrot.slane %v6622_v40, 2 }
 0xa3a   : > { %v6668_v17 = vmax.f32 %v6667_v37, %v6612_v38  ;;  %v6691_v5 = vadd.f32 %v13041_v42, %v6665_v57  ;;  %v6618_v26 = vrot.slane %v6617_v59, 1 }
 0xa3b   : > { %v6624_v44 = vmax.f32 %v6622_v40, %v6623_v41 }
 0xa3c   : > { %v6692_v11 = vadd.f32 %v13041_v42, %v6668_v17  ;;  %v6738_v9 = vrot.slane %v6691_v5, 4  ;;  %v6619_v7 = vmax.f32 %v6617_v59, %v6618_v26 }
 0xa3d   : > { %v6625_v14 = vrot.slane %v6624_v44, 1 }
 0xa3e   : > { %v6740_v13 = vrot.slane %v6692_v11, 3  ;;  %v6671_v45 = vmax.f32 %v13154_v23, %v6619_v7  ;;  %v6739_v18 = vsel %vm6721_vm6, %v6738_v9, %v6737_v6 }
 0xa3f   : > { %v6626_v50 = vmax.f32 %v6624_v44, %v6625_v14 }
 0xa40   : > { %v6693_v19 = vadd.f32 %v13041_v42, %v6671_v45  ;;  %v6741_v29 = vsel %vm6724_vm7, %v6740_v13, %v6739_v18 }
 0xa41   : > { %v6674_v63 = vmax.f32 %v13156_v0, %v6626_v50 }
 0xa42   : > { %v6742_v60 = vrot.slane %v6693_v19, 2 }
 0xa43   : > { %v6694_v23 = vadd.f32 %v13041_v42, %v6674_v63 }
 0xa44   : > { %v6743_v4 = vsel %vm6727_vm8, %v6742_v60, %v6741_v29 }
 0xa45   : > { %v6744_v30 = vrot.slane %v6694_v23, 1 }
 0xa47   : > { %v6745_v55 = vsel %vm6730_vm9, %v6744_v30, %v6743_v4 }
 0xa48   : > { %6749 = vst [vmem:[%s13200_s27 + $0x8] sm:$0xff] %v6745_v55 }
 0xa49   : > { %7198 = shalt.err (!%p7195_p3)
}
 0xa4a   : > { %s7239_s20 = smov 128   ;;  %s7240_s24 = smov 8  }
 0xa4b   : > { %6842 = dma.vmem_to_hbm [thread:$0]  (%p7299_p5), %s6764_s16, 256, %s6766_s5, %s6751_s6, %s7239_s20, %s7239_s20, %s7240_s24  }
 0xa4c PF: > { %p6848_p4 = scmp.ge.s32.totalorder %s7233_s15, 2  ;;  %s6780_s25 = sand.u32 1, %s7221_s12  }
 0xa4d   : > { %s6781_s26 = scalar_lea.sflag [#allocation4], %s6780_s25 }
 0xa4e   : > { %p6845_p7 = pnand %p6848_p4, %p7303_p6 }
 0xa50   : > { %p6846_p8 = pneg %p6845_p7 }
 0xa52   : > { %7216 = dma.done.wait (%p6846_p8), %s6781_s26, 256  }
 0xa53   : > { %7218 = vsyncadd (%p6846_p8), %s6781_s26, 4294967040  ;;  %p13_p9 = scmp.ge.s32.totalorder %s7286_s18, 4   ;;  %s15004_s12 = smov %s7225_s13 }
 0xa54   : > { %s15005_s13 = smov %s7229_s14  ;;  %s15006_s14 = smov %s7297_s21 }
 0xa55   : > { %s15007_s15 = smov %s7286_s18  ;;  %15 = sbr.rel (!%p13_p9) target bundleno = 3 (0x3), region = 69 }
 0xa5a   :  { %6787 = vsyncpa [#allocation4], 1 }
 0xa5b   :  { %6789 = vsyncpa [#allocation4 + $0x1], 1 }

</bundles_post_ra>
